<compile_context>
chip_gen: v5e
topology: v5e:2x2
jax: 0.10.0
libtpu: 0.0.40
codegen_flags: <defaults>
</compile_context>

<pallas_src>
import functools
import math

import jax
import jax.numpy as jnp
import numpy as np
from jax.experimental import pallas as pl
from jax.experimental.pallas import tpu as pltpu

EPS = 1e-5
LANE = 128


# --------------------------------------------------------------------------
# helpers
# --------------------------------------------------------------------------
def _round_up(x, m):
    return (x + m - 1) // m * m


def _nbytes(shape, dtype):
    return int(math.prod(shape)) * jnp.dtype(dtype).itemsize


def _fold_bn(bn, cout_padded):
    scale = bn['gamma'] / jnp.sqrt(bn['var'] + EPS)
    bias = bn['beta'] - bn['mean'] * scale
    pad = cout_padded - scale.shape[0]
    scale = jnp.pad(scale, (0, pad)).reshape(1, cout_padded).astype(jnp.float32)
    bias = jnp.pad(bias, (0, pad)).reshape(1, cout_padded).astype(jnp.float32)
    return scale, bias


# --------------------------------------------------------------------------
# Fused BasicBlock kernel
# --------------------------------------------------------------------------
def _basic_block_kernel(x_ref, w1_ref, s1_ref, b1_ref, w2_ref, s2_ref, b2_ref,
                        *rest, stride, has_ds, ho, wo, wo_p, rc1):
    if has_ds:
        wd_ref, sd_ref, bd_ref, out_ref, o1_ref = rest
    else:
        out_ref, o1_ref = rest

    cip = x_ref.shape[-1]
    cop = out_ref.shape[-1]
    cdt = o1_ref.dtype                       # MXU operand / scratch dtype (bf16 or f32)

    s1 = s1_ref[0]
    b1 = b1_ref[0]
    s2 = s2_ref[0]
    b2 = b2_ref[0]

    # ---- zero only the 1-px border of the conv1 scratch (conv2's halo) ----
    ws = o1_ref.shape[1]                     # = wo_p + 2
    zrow = jnp.zeros((1, ws, cop), cdt)
    o1_ref[0:1, :, :] = zrow
    o1_ref[ho + 1:ho + 2, :, :] = zrow
    o1_ref[:, 0:1, :] = jnp.zeros((ho + 2, 1, cop), cdt)
    o1_ref[:, wo + 1:ws, :] = jnp.zeros((ho + 2, ws - (wo + 1), cop), cdt)

    # exact row chunking (handles remainders; no divisibility requirement)
    chunks = []
    r = 0
    while r < ho:
        rc = min(rc1, ho - r)
        chunks.append((r, rc))
        r += rc

    # ------------------ conv1 (3x3, stride s) + BN + ReLU ------------------
    for (r0, rc) in chunks:
        acc = jnp.zeros((rc * wo_p, cop), jnp.float32)
        if stride == 1:
            # x_ref: (1, Hi+2, wo_p+2, Cip); cast the chunk slab once
            xin = x_ref[0, r0:r0 + rc + 2, :, :].astype(cdt)
            for kx in range(3):
                xs = xin[:, kx:kx + wo_p, :]          # W shift hoisted over ky
                for ky in range(3):
                    lhs = xs[ky:ky + rc].reshape(rc * wo_p, cip)
                    acc = acc + jnp.dot(lhs, w1_ref[ky, kx],
                                        preferred_element_type=jnp.float32)
        else:
            # x_ref: (1, 2, 2, ho+1, wo_p+1, Cip) phase-decomposed ->
            # every tap is a unit-stride static slice.
            for ky in range(3):
                a, ia = ky % 2, ky // 2
                for kx in range(3):
                    pb, jb = kx % 2, kx // 2
                    patch = x_ref[0, a, pb, r0 + ia:r0 + ia + rc,
                                  jb:jb + wo_p, :]
                    lhs = patch.reshape(rc * wo_p, cip).astype(cdt)
                    acc = acc + jnp.dot(lhs, w1_ref[ky, kx],
                                        preferred_element_type=jnp.float32)
        o1 = jnp.maximum(acc * s1 + b1, 0.0).reshape(rc, wo_p, cop)
        o1_ref[1 + r0:1 + r0 + rc, 1:1 + wo, :] = o1[:, :wo, :].astype(cdt)

    # ---------- conv2 (3x3, stride 1) + BN + identity add + ReLU ----------
    for (r0, rc) in chunks:
        acc = jnp.zeros((rc * wo_p, cop), jnp.float32)
        yin = o1_ref[r0:r0 + rc + 2, :, :]            # already in cdt (bf16)
        for kx in range(3):
            ys = yin[:, kx:kx + wo_p, :]
            for ky in range(3):
                lhs = ys[ky:ky + rc].reshape(rc * wo_p, cop)
                acc = acc + jnp.dot(lhs, w2_ref[ky, kx],
                                    preferred_element_type=jnp.float32)
        out = acc * s2 + b2

        if has_ds:
            if stride == 1:
                xid = x_ref[0, 1 + r0:1 + r0 + rc, 1:1 + wo_p, :]
            else:
                xid = x_ref[0, 1, 1, r0:r0 + rc, 0:wo_p, :]
            lhs = xid.reshape(rc * wo_p, cip).astype(cdt)
            idn = jnp.dot(lhs, wd_ref[...], preferred_element_type=jnp.float32)
            out = out + (idn * sd_ref[0] + bd_ref[0])
        else:
            # stride==1 and Cin==Cout here; padded lanes of x are zero.
            xid = x_ref[0, 1 + r0:1 + r0 + rc, 1:1 + wo_p, :]
            out = out + xid.reshape(rc * wo_p, cop).astype(jnp.float32)

        out = jnp.maximum(out, 0.0).reshape(rc, wo_p, cop)[:, :wo, :]
        out_ref[0, r0:r0 + rc, :, :] = out.astype(out_ref.dtype)


# --------------------------------------------------------------------------
# BasicBlock forward (wrapper)
# --------------------------------------------------------------------------
def basic_block(x_nchw, params, *, stride=1, mxu_dtype=jnp.bfloat16):
    assert stride in (1, 2)
    # NOTE: in a full network keep activations NHWC and transpose once at the
    # model boundary, not per block.
    x = jnp.transpose(x_nchw, (0, 2, 3, 1))           # NCHW -> NHWC
    n, hi, wi, cin = x.shape
    planes = params['w1'].shape[-1]
    cip = _round_up(cin, LANE)
    cop = _round_up(planes, LANE)
    has_ds = params['wd'] is not None
    if not has_ds:
        assert stride == 1 and cin == planes, "BasicBlock identity path shape mismatch"

    ho = (hi - 1) // stride + 1
    wo = (wi - 1) // stride + 1
    wo_p = _round_up(wo, 8)                           # sublane-aligned matmul M dim

    wdt = jnp.float32 if mxu_dtype is None else mxu_dtype

    # --- single HBM pad pass: 1-px H/W halo, extra W cols for Wo alignment,
    #     channel pad to the 128-lane width.  stride=2 additionally lays the
    #     input out as (2,2) even/odd phase planes (unit-stride taps in-kernel).
    if stride == 1:
        wt = wo_p + 2
        x_in = jnp.pad(x, ((0, 0), (1, 1), (1, wt - wi - 1), (0, cip - cin)))
        x_spec = pl.BlockSpec((1, hi + 2, wt, cip), lambda b: (b, 0, 0, 0))
    else:
        hp2, wp2 = 2 * (ho + 1), 2 * (wo_p + 1)
        xpad = jnp.pad(x, ((0, 0), (1, hp2 - hi - 1),
                           (1, wp2 - wi - 1), (0, cip - cin)))
        x_in = xpad.reshape(n, ho + 1, 2, wo_p + 1, 2, cip).transpose(0, 2, 4, 1, 3, 5)
        x_spec = pl.BlockSpec((1, 2, 2, ho + 1, wo_p + 1, cip),
                              lambda b: (b, 0, 0, 0, 0, 0))

    # weights: pad + pre-cast to the MXU operand dtype ONCE here
    w1 = jnp.pad(params['w1'],
                 ((0, 0), (0, 0), (0, cip - cin), (0, cop - planes))).astype(wdt)
    w2 = jnp.pad(params['w2'],
                 ((0, 0), (0, 0), (0, cop - planes), (0, cop - planes))).astype(wdt)
    s1, b1 = _fold_bn(params['bn1'], cop)
    s2, b2 = _fold_bn(params['bn2'], cop)

    args = [x_in, w1, s1, b1, w2, s2, b2]
    in_specs = [
        x_spec,
        pl.BlockSpec((3, 3, cip, cop), lambda b: (0, 0, 0, 0)),
        pl.BlockSpec((1, cop), lambda b: (0, 0)),
        pl.BlockSpec((1, cop), lambda b: (0, 0)),
        pl.BlockSpec((3, 3, cop, cop), lambda b: (0, 0, 0, 0)),
        pl.BlockSpec((1, cop), lambda b: (0, 0)),
        pl.BlockSpec((1, cop), lambda b: (0, 0)),
    ]
    wd = None
    if has_ds:
        wd = jnp.pad(params['wd'], ((0, cip - cin), (0, cop - planes))).astype(wdt)
        sd, bd = _fold_bn(params['bnd'], cop)
        args += [wd, sd, bd]
        in_specs += [pl.BlockSpec((cip, cop), lambda b: (0, 0)),
                     pl.BlockSpec((1, cop), lambda b: (0, 0)),
                     pl.BlockSpec((1, cop), lambda b: (0, 0))]

    out_struct = jax.ShapeDtypeStruct((n, ho, wo, cop), x.dtype)
    out_spec = pl.BlockSpec((1, ho, wo, cop), lambda b: (b, 0, 0, 0))
    scratch = pltpu.VMEM((ho + 2, wo_p + 2, cop), wdt)   # padded conv1 output

    # row-chunk size so the f32 accumulator stays ~64 KiB (vreg-resident)
    rc1 = max(1, min(ho, (64 * 1024) // (wo_p * cop * 4)))

    # cost estimate + generation-aware VMEM budget
    flops = 2 * n * ho * wo * 9 * (cip * cop + cop * cop)
    if has_ds:
        flops += 2 * n * ho * wo * cip * cop
    bytes_acc = (sum(_nbytes(a.shape, a.dtype) for a in args)
                 + _nbytes(out_struct.shape, out_struct.dtype))

    itemsize = jnp.dtype(wdt).itemsize
    step_bytes = (2 * _nbytes(x_in.shape[1:], x_in.dtype)          # double-buffered input
                  + 2 * _nbytes(out_struct.shape[1:], out_struct.dtype)
                  + 2 * (w1.size + w2.size + (wd.size if has_ds else 0)) * itemsize
                  + (ho + 2) * (wo_p + 2) * cop * itemsize         # scratch
                  + 2 * 1024 * 1024)                               # headroom
    try:
        vmem_cap = int(pltpu.get_tpu_info().vmem_capacity_bytes)
    except Exception:
        vmem_cap = 64 * 2 ** 20                                    # v7x-safe fallback
    vmem_limit = int(min(max(step_bytes, 16 * 2 ** 20), int(vmem_cap * 0.85)))

    kern = functools.partial(_basic_block_kernel, stride=stride, has_ds=has_ds,
                             ho=ho, wo=wo, wo_p=wo_p, rc1=rc1)
    out = pl.pallas_call(
        kern,
        out_shape=out_struct,
        grid=(n,),
        in_specs=in_specs,
        out_specs=out_spec,
        scratch_shapes=[scratch],
        compiler_params=pltpu.CompilerParams(
            dimension_semantics=("parallel",),
            vmem_limit_bytes=vmem_limit),
        cost_estimate=pl.CostEstimate(flops=int(flops), transcendentals=0,
                                      bytes_accessed=int(bytes_acc)),
    )(*args)

    out = out[..., :planes]                            # drop channel padding
    return jnp.transpose(out, (0, 3, 1, 2))            # NHWC -> NCHW


# --------------------------------------------------------------------------
# Pure-JAX reference
# --------------------------------------------------------------------------
def ref_basic_block(x_nchw, params, *, stride=1):
    dn = ('NHWC', 'HWIO', 'NHWC')

    def conv(inp, w, s, pad):
        return jax.lax.conv_general_dilated(inp, w, (s, s), pad,
                                            dimension_numbers=dn)

    def fold(bn):
        scale = bn['gamma'] / jnp.sqrt(bn['var'] + EPS)
        return scale, bn['beta'] - bn['mean'] * scale

    x = jnp.transpose(x_nchw, (0, 2, 3, 1))
    s1, b1 = fold(params['bn1'])
    out = jnp.maximum(conv(x, params['w1'], stride, ((1, 1), (1, 1))) * s1 + b1, 0.0)

    if params['wd'] is not None:
        sd, bd = fold(params['bnd'])
        wd = params['wd'].reshape(1, 1, *params['wd'].shape)
        identity = conv(x, wd, stride, ((0, 0), (0, 0))) * sd + bd
    else:
        identity = x

    s2, b2 = fold(params['bn2'])
    out = conv(out, params['w2'], 1, ((1, 1), (1, 1))) * s2 + b2
    out = jnp.maximum(out + identity, 0.0)
    return jnp.transpose(out, (0, 3, 1, 2))


# --------------------------------------------------------------------------
# Deterministic parameter init (mirrors BasicBlock.__init__ shapes)
# --------------------------------------------------------------------------
def init_params(key, inplanes, planes, stride):
    ks = jax.random.split(key, 6)

    def w_init(k, shape):
        fan_in = int(np.prod(shape[:-1]))
        return jax.random.normal(k, shape, jnp.float32) / np.sqrt(fan_in)

    def bn_init(k):
        k1, k2, k3, k4 = jax.random.split(k, 4)
        return dict(
            gamma=jax.random.uniform(k1, (planes,), jnp.float32, 0.5, 1.5),
            beta=jax.random.normal(k2, (planes,), jnp.float32) * 0.1,
            mean=jax.random.normal(k3, (planes,), jnp.float32) * 0.1,
            var=jax.random.uniform(k4, (planes,), jnp.float32, 0.5, 1.5),
        )

    params = dict(
        w1=w_init(ks[0], (3, 3, inplanes, planes)),
        bn1=bn_init(ks[1]),
        w2=w_init(ks[2], (3, 3, planes, planes)),
        bn2=bn_init(ks[3]),
    )
    if stride != 1 or inplanes != planes:
        params['wd'] = w_init(ks[4], (inplanes, planes))
        params['bnd'] = bn_init(ks[5])
    else:
        params['wd'] = None
        params['bnd'] = None
    return params


# --------------------------------------------------------------------------
if __name__ == "__main__":
    key = jax.random.PRNGKey(0)
    N, inplanes, planes = 2, 4, 8
    H = W = 16
    stride = 1                        # inplanes != planes -> downsample exercised

    kx_, kp = jax.random.split(key)
    x = jax.random.normal(kx_, (N, inplanes, H, W), jnp.float32)
    params = init_params(kp, inplanes, planes, stride)

    ref = ref_basic_block(x, params, stride=stride)

    # f32 MXU-operand path: tight numerical check
    out_f32 = jax.block_until_ready(basic_block(x, params, stride=stride,
                                                mxu_dtype=None))
    np.testing.assert_allclose(np.asarray(out_f32), np.asarray(ref),
                               rtol=2e-2, atol=2e-2)

    # bf16 MXU-operand path (the default, perf build)
    out_bf16 = jax.block_until_ready(basic_block(x, params, stride=stride))
    np.testing.assert_allclose(np.asarray(out_bf16), np.asarray(ref),
                               rtol=1e-1, atol=1e-1)

    print("KERNEL_OK")
</pallas_src>

<mosaic_0001>
module attributes {stable_mosaic.version = 11 : i64} {
  func.func @_basic_block_kernel(%arg0: i32, %arg1: memref<1x18x18x128xf32, #tpu.memory_space<vmem>>, %arg2: memref<3x3x128x128xf32, #tpu.memory_space<vmem>>, %arg3: memref<1x128xf32, #tpu.memory_space<vmem>>, %arg4: memref<1x128xf32, #tpu.memory_space<vmem>>, %arg5: memref<3x3x128x128xf32, #tpu.memory_space<vmem>>, %arg6: memref<1x128xf32, #tpu.memory_space<vmem>>, %arg7: memref<1x128xf32, #tpu.memory_space<vmem>>, %arg8: memref<128x128xf32, #tpu.memory_space<vmem>>, %arg9: memref<1x128xf32, #tpu.memory_space<vmem>>, %arg10: memref<1x128xf32, #tpu.memory_space<vmem>>, %arg11: memref<1x16x16x128xf32, #tpu.memory_space<vmem>>, %arg12: memref<18x18x128xf32, #tpu.memory_space<vmem>>) attributes {dimension_semantics = [#tpu.dimension_semantics<parallel>], iteration_bounds = array<i64: 2>, scalar_prefetch = 0 : i64, scratch_operands = 1 : i64, tpu.core_type = #tpu.core_type<tc>, window_params = [{transform_indices = @transform_0, window_bounds = array<i64: 1, 18, 18, 128>}, {pipeline_mode = #tpu.pipeline_mode<synchronous>, transform_indices = @transform_1, window_bounds = array<i64: 3, 3, 128, 128>}, {pipeline_mode = #tpu.pipeline_mode<synchronous>, transform_indices = @transform_2, window_bounds = array<i64: 1, 128>}, {pipeline_mode = #tpu.pipeline_mode<synchronous>, transform_indices = @transform_3, window_bounds = array<i64: 1, 128>}, {pipeline_mode = #tpu.pipeline_mode<synchronous>, transform_indices = @transform_4, window_bounds = array<i64: 3, 3, 128, 128>}, {pipeline_mode = #tpu.pipeline_mode<synchronous>, transform_indices = @transform_5, window_bounds = array<i64: 1, 128>}, {pipeline_mode = #tpu.pipeline_mode<synchronous>, transform_indices = @transform_6, window_bounds = array<i64: 1, 128>}, {pipeline_mode = #tpu.pipeline_mode<synchronous>, transform_indices = @transform_7, window_bounds = array<i64: 128, 128>}, {pipeline_mode = #tpu.pipeline_mode<synchronous>, transform_indices = @transform_8, window_bounds = array<i64: 1, 128>}, {pipeline_mode = #tpu.pipeline_mode<synchronous>, transform_indices = @transform_9, window_bounds = array<i64: 1, 128>}, {transform_indices = @transform_10, window_bounds = array<i64: 1, 16, 16, 128>}]} {
    %c0 = arith.constant 0 : index
    %c0_0 = arith.constant 0 : index
    %0 = vector.load %arg3[%c0, %c0_0] : memref<1x128xf32, #tpu.memory_space<vmem>>, vector<1x128xf32>
    %1 = vector.shape_cast %0 : vector<1x128xf32> to vector<128xf32>
    %c0_1 = arith.constant 0 : index
    %c0_2 = arith.constant 0 : index
    %2 = vector.load %arg4[%c0_1, %c0_2] : memref<1x128xf32, #tpu.memory_space<vmem>>, vector<1x128xf32>
    %3 = vector.shape_cast %2 : vector<1x128xf32> to vector<128xf32>
    %c0_3 = arith.constant 0 : index
    %c0_4 = arith.constant 0 : index
    %4 = vector.load %arg6[%c0_3, %c0_4] : memref<1x128xf32, #tpu.memory_space<vmem>>, vector<1x128xf32>
    %5 = vector.shape_cast %4 : vector<1x128xf32> to vector<128xf32>
    %c0_5 = arith.constant 0 : index
    %c0_6 = arith.constant 0 : index
    %6 = vector.load %arg7[%c0_5, %c0_6] : memref<1x128xf32, #tpu.memory_space<vmem>>, vector<1x128xf32>
    %7 = vector.shape_cast %6 : vector<1x128xf32> to vector<128xf32>
    %cst = arith.constant 0.000000e+00 : f32
    %8 = vector.broadcast %cst : f32 to vector<1x18x128xf32>
    %c0_7 = arith.constant 0 : index
    %c0_8 = arith.constant 0 : index
    %c0_9 = arith.constant 0 : index
    %9 = vector.load %arg12[%c0_7, %c0_8, %c0_9] : memref<18x18x128xf32, #tpu.memory_space<vmem>>, vector<1x18x128xf32>
    tpu.vector_store %arg12[%c0_7, %c0_8, %c0_9], %8 {strides = array<i32>} : memref<18x18x128xf32, #tpu.memory_space<vmem>>, vector<1x18x128xf32>,
    %c17 = arith.constant 17 : index
    %c0_10 = arith.constant 0 : index
    %c0_11 = arith.constant 0 : index
    %10 = vector.load %arg12[%c17, %c0_10, %c0_11] : memref<18x18x128xf32, #tpu.memory_space<vmem>>, vector<1x18x128xf32>
    tpu.vector_store %arg12[%c17, %c0_10, %c0_11], %8 {strides = array<i32>} : memref<18x18x128xf32, #tpu.memory_space<vmem>>, vector<1x18x128xf32>,
    %cst_12 = arith.constant 0.000000e+00 : f32
    %11 = vector.broadcast %cst_12 : f32 to vector<18x1x128xf32>
    %c0_13 = arith.constant 0 : index
    %c0_14 = arith.constant 0 : index
    %c0_15 = arith.constant 0 : index
    %12 = vector.load %arg12[%c0_13, %c0_14, %c0_15] : memref<18x18x128xf32, #tpu.memory_space<vmem>>, vector<18x1x128xf32>
    tpu.vector_store %arg12[%c0_13, %c0_14, %c0_15], %11 {strides = array<i32>} : memref<18x18x128xf32, #tpu.memory_space<vmem>>, vector<18x1x128xf32>,
    %cst_16 = arith.constant 0.000000e+00 : f32
    %13 = vector.broadcast %cst_16 : f32 to vector<18x1x128xf32>
    %c0_17 = arith.constant 0 : index
    %c17_18 = arith.constant 17 : index
    %c0_19 = arith.constant 0 : index
    %14 = vector.load %arg12[%c0_17, %c17_18, %c0_19] : memref<18x18x128xf32, #tpu.memory_space<vmem>>, vector<18x1x128xf32>
    tpu.vector_store %arg12[%c0_17, %c17_18, %c0_19], %13 {strides = array<i32>} : memref<18x18x128xf32, #tpu.memory_space<vmem>>, vector<18x1x128xf32>,
    %cst_20 = arith.constant 0.000000e+00 : f32
    %15 = vector.broadcast %cst_20 : f32 to vector<128x128xf32>
    %c0_21 = arith.constant 0 : index
    %c0_22 = arith.constant 0 : index
    %c0_23 = arith.constant 0 : index
    %c0_24 = arith.constant 0 : index
    %16 = vector.load %arg1[%c0_21, %c0_22, %c0_23, %c0_24] : memref<1x18x18x128xf32, #tpu.memory_space<vmem>>, vector<1x10x18x128xf32>
    %17 = vector.shape_cast %16 : vector<1x10x18x128xf32> to vector<10x18x128xf32>
    %18 = vector.extract_strided_slice %17 {offsets = [0, 0, 0], sizes = [10, 16, 128], strides = [1, 1, 1]} : vector<10x18x128xf32> to vector<10x16x128xf32>
    %19 = vector.extract_strided_slice %18 {offsets = [0, 0, 0], sizes = [8, 16, 128], strides = [1, 1, 1]} : vector<10x16x128xf32> to vector<8x16x128xf32>
    %20 = vector.shape_cast %19 : vector<8x16x128xf32> to vector<128x128xf32>
    %c0_25 = arith.constant 0 : index
    %c0_26 = arith.constant 0 : index
    %c0_27 = arith.constant 0 : index
    %c0_28 = arith.constant 0 : index
    %21 = vector.load %arg2[%c0_25, %c0_26, %c0_27, %c0_28] : memref<3x3x128x128xf32, #tpu.memory_space<vmem>>, vector<1x1x128x128xf32>
    %22 = vector.shape_cast %21 : vector<1x1x128x128xf32> to vector<128x128xf32>
    %cst_29 = arith.constant dense<0.000000e+00> : vector<128x128xf32>
    %23 = tpu.matmul %20, %22, %cst_29 {dimension_numbers = #tpu.dot_dimension_numbers<[1], [0], [0], [1], [0, 0, 1, 1], [], []>} : vector<128x128xf32>, vector<128x128xf32>, vector<128x128xf32> -> vector<128x128xf32>
    %24 = arith.addf %15, %23 : vector<128x128xf32>
    %25 = vector.extract_strided_slice %18 {offsets = [1, 0, 0], sizes = [8, 16, 128], strides = [1, 1, 1]} : vector<10x16x128xf32> to vector<8x16x128xf32>
    %26 = vector.shape_cast %25 : vector<8x16x128xf32> to vector<128x128xf32>
    %c1 = arith.constant 1 : index
    %c0_30 = arith.constant 0 : index
    %c0_31 = arith.constant 0 : index
    %c0_32 = arith.constant 0 : index
    %27 = vector.load %arg2[%c1, %c0_30, %c0_31, %c0_32] : memref<3x3x128x128xf32, #tpu.memory_space<vmem>>, vector<1x1x128x128xf32>
    %28 = vector.shape_cast %27 : vector<1x1x128x128xf32> to vector<128x128xf32>
    %cst_33 = arith.constant dense<0.000000e+00> : vector<128x128xf32>
    %29 = tpu.matmul %26, %28, %cst_33 {dimension_numbers = #tpu.dot_dimension_numbers<[1], [0], [0], [1], [0, 0, 1, 1], [], []>} : vector<128x128xf32>, vector<128x128xf32>, vector<128x128xf32> -> vector<128x128xf32>
    %30 = arith.addf %24, %29 : vector<128x128xf32>
    %31 = vector.extract_strided_slice %18 {offsets = [2, 0, 0], sizes = [8, 16, 128], strides = [1, 1, 1]} : vector<10x16x128xf32> to vector<8x16x128xf32>
    %32 = vector.shape_cast %31 : vector<8x16x128xf32> to vector<128x128xf32>
    %c2 = arith.constant 2 : index
    %c0_34 = arith.constant 0 : index
    %c0_35 = arith.constant 0 : index
    %c0_36 = arith.constant 0 : index
    %33 = vector.load %arg2[%c2, %c0_34, %c0_35, %c0_36] : memref<3x3x128x128xf32, #tpu.memory_space<vmem>>, vector<1x1x128x128xf32>
    %34 = vector.shape_cast %33 : vector<1x1x128x128xf32> to vector<128x128xf32>
    %cst_37 = arith.constant dense<0.000000e+00> : vector<128x128xf32>
    %35 = tpu.matmul %32, %34, %cst_37 {dimension_numbers = #tpu.dot_dimension_numbers<[1], [0], [0], [1], [0, 0, 1, 1], [], []>} : vector<128x128xf32>, vector<128x128xf32>, vector<128x128xf32> -> vector<128x128xf32>
    %36 = arith.addf %30, %35 : vector<128x128xf32>
    %37 = vector.extract_strided_slice %17 {offsets = [0, 1, 0], sizes = [10, 16, 128], strides = [1, 1, 1]} : vector<10x18x128xf32> to vector<10x16x128xf32>
    %38 = vector.extract_strided_slice %37 {offsets = [0, 0, 0], sizes = [8, 16, 128], strides = [1, 1, 1]} : vector<10x16x128xf32> to vector<8x16x128xf32>
    %39 = vector.shape_cast %38 : vector<8x16x128xf32> to vector<128x128xf32>
    %c0_38 = arith.constant 0 : index
    %c1_39 = arith.constant 1 : index
    %c0_40 = arith.constant 0 : index
    %c0_41 = arith.constant 0 : index
    %40 = vector.load %arg2[%c0_38, %c1_39, %c0_40, %c0_41] : memref<3x3x128x128xf32, #tpu.memory_space<vmem>>, vector<1x1x128x128xf32>
    %41 = vector.shape_cast %40 : vector<1x1x128x128xf32> to vector<128x128xf32>
    %cst_42 = arith.constant dense<0.000000e+00> : vector<128x128xf32>
    %42 = tpu.matmul %39, %41, %cst_42 {dimension_numbers = #tpu.dot_dimension_numbers<[1], [0], [0], [1], [0, 0, 1, 1], [], []>} : vector<128x128xf32>, vector<128x128xf32>, vector<128x128xf32> -> vector<128x128xf32>
    %43 = arith.addf %36, %42 : vector<128x128xf32>
    %44 = vector.extract_strided_slice %37 {offsets = [1, 0, 0], sizes = [8, 16, 128], strides = [1, 1, 1]} : vector<10x16x128xf32> to vector<8x16x128xf32>
    %45 = vector.shape_cast %44 : vector<8x16x128xf32> to vector<128x128xf32>
    %c1_43 = arith.constant 1 : index
    %c1_44 = arith.constant 1 : index
    %c0_45 = arith.constant 0 : index
    %c0_46 = arith.constant 0 : index
    %46 = vector.load %arg2[%c1_43, %c1_44, %c0_45, %c0_46] : memref<3x3x128x128xf32, #tpu.memory_space<vmem>>, vector<1x1x128x128xf32>
    %47 = vector.shape_cast %46 : vector<1x1x128x128xf32> to vector<128x128xf32>
    %cst_47 = arith.constant dense<0.000000e+00> : vector<128x128xf32>
    %48 = tpu.matmul %45, %47, %cst_47 {dimension_numbers = #tpu.dot_dimension_numbers<[1], [0], [0], [1], [0, 0, 1, 1], [], []>} : vector<128x128xf32>, vector<128x128xf32>, vector<128x128xf32> -> vector<128x128xf32>
    %49 = arith.addf %43, %48 : vector<128x128xf32>
    %50 = vector.extract_strided_slice %37 {offsets = [2, 0, 0], sizes = [8, 16, 128], strides = [1, 1, 1]} : vector<10x16x128xf32> to vector<8x16x128xf32>
    %51 = vector.shape_cast %50 : vector<8x16x128xf32> to vector<128x128xf32>
    %c2_48 = arith.constant 2 : index
    %c1_49 = arith.constant 1 : index
    %c0_50 = arith.constant 0 : index
    %c0_51 = arith.constant 0 : index
    %52 = vector.load %arg2[%c2_48, %c1_49, %c0_50, %c0_51] : memref<3x3x128x128xf32, #tpu.memory_space<vmem>>, vector<1x1x128x128xf32>
    %53 = vector.shape_cast %52 : vector<1x1x128x128xf32> to vector<128x128xf32>
    %cst_52 = arith.constant dense<0.000000e+00> : vector<128x128xf32>
    %54 = tpu.matmul %51, %53, %cst_52 {dimension_numbers = #tpu.dot_dimension_numbers<[1], [0], [0], [1], [0, 0, 1, 1], [], []>} : vector<128x128xf32>, vector<128x128xf32>, vector<128x128xf32> -> vector<128x128xf32>
    %55 = arith.addf %49, %54 : vector<128x128xf32>
    %56 = vector.extract_strided_slice %17 {offsets = [0, 2, 0], sizes = [10, 16, 128], strides = [1, 1, 1]} : vector<10x18x128xf32> to vector<10x16x128xf32>
    %57 = vector.extract_strided_slice %56 {offsets = [0, 0, 0], sizes = [8, 16, 128], strides = [1, 1, 1]} : vector<10x16x128xf32> to vector<8x16x128xf32>
    %58 = vector.shape_cast %57 : vector<8x16x128xf32> to vector<128x128xf32>
    %c0_53 = arith.constant 0 : index
    %c2_54 = arith.constant 2 : index
    %c0_55 = arith.constant 0 : index
    %c0_56 = arith.constant 0 : index
    %59 = vector.load %arg2[%c0_53, %c2_54, %c0_55, %c0_56] : memref<3x3x128x128xf32, #tpu.memory_space<vmem>>, vector<1x1x128x128xf32>
    %60 = vector.shape_cast %59 : vector<1x1x128x128xf32> to vector<128x128xf32>
    %cst_57 = arith.constant dense<0.000000e+00> : vector<128x128xf32>
    %61 = tpu.matmul %58, %60, %cst_57 {dimension_numbers = #tpu.dot_dimension_numbers<[1], [0], [0], [1], [0, 0, 1, 1], [], []>} : vector<128x128xf32>, vector<128x128xf32>, vector<128x128xf32> -> vector<128x128xf32>
    %62 = arith.addf %55, %61 : vector<128x128xf32>
    %63 = vector.extract_strided_slice %56 {offsets = [1, 0, 0], sizes = [8, 16, 128], strides = [1, 1, 1]} : vector<10x16x128xf32> to vector<8x16x128xf32>
    %64 = vector.shape_cast %63 : vector<8x16x128xf32> to vector<128x128xf32>
    %c1_58 = arith.constant 1 : index
    %c2_59 = arith.constant 2 : index
    %c0_60 = arith.constant 0 : index
    %c0_61 = arith.constant 0 : index
    %65 = vector.load %arg2[%c1_58, %c2_59, %c0_60, %c0_61] : memref<3x3x128x128xf32, #tpu.memory_space<vmem>>, vector<1x1x128x128xf32>
    %66 = vector.shape_cast %65 : vector<1x1x128x128xf32> to vector<128x128xf32>
    %cst_62 = arith.constant dense<0.000000e+00> : vector<128x128xf32>
    %67 = tpu.matmul %64, %66, %cst_62 {dimension_numbers = #tpu.dot_dimension_numbers<[1], [0], [0], [1], [0, 0, 1, 1], [], []>} : vector<128x128xf32>, vector<128x128xf32>, vector<128x128xf32> -> vector<128x128xf32>
    %68 = arith.addf %62, %67 : vector<128x128xf32>
    %69 = vector.extract_strided_slice %56 {offsets = [2, 0, 0], sizes = [8, 16, 128], strides = [1, 1, 1]} : vector<10x16x128xf32> to vector<8x16x128xf32>
    %70 = vector.shape_cast %69 : vector<8x16x128xf32> to vector<128x128xf32>
    %c2_63 = arith.constant 2 : index
    %c2_64 = arith.constant 2 : index
    %c0_65 = arith.constant 0 : index
    %c0_66 = arith.constant 0 : index
    %71 = vector.load %arg2[%c2_63, %c2_64, %c0_65, %c0_66] : memref<3x3x128x128xf32, #tpu.memory_space<vmem>>, vector<1x1x128x128xf32>
    %72 = vector.shape_cast %71 : vector<1x1x128x128xf32> to vector<128x128xf32>
    %cst_67 = arith.constant dense<0.000000e+00> : vector<128x128xf32>
    %73 = tpu.matmul %70, %72, %cst_67 {dimension_numbers = #tpu.dot_dimension_numbers<[1], [0], [0], [1], [0, 0, 1, 1], [], []>} : vector<128x128xf32>, vector<128x128xf32>, vector<128x128xf32> -> vector<128x128xf32>
    %74 = arith.addf %68, %73 : vector<128x128xf32>
    %75 = vector.shape_cast %1 : vector<128xf32> to vector<1x128xf32>
    %76 = vector.broadcast %75 : vector<1x128xf32> to vector<128x128xf32>
    %77 = arith.mulf %74, %76 : vector<128x128xf32>
    %78 = vector.shape_cast %3 : vector<128xf32> to vector<1x128xf32>
    %79 = vector.broadcast %78 : vector<1x128xf32> to vector<128x128xf32>
    %80 = arith.addf %77, %79 : vector<128x128xf32>
    %cst_68 = arith.constant 0.000000e+00 : f32
    %81 = vector.broadcast %cst_68 : f32 to vector<128x128xf32>
    %82 = arith.maximumf %80, %81 : vector<128x128xf32>
    %83 = vector.shape_cast %82 : vector<128x128xf32> to vector<8x16x128xf32>
    %c1_69 = arith.constant 1 : index
    %c1_70 = arith.constant 1 : index
    %c0_71 = arith.constant 0 : index
    %84 = vector.load %arg12[%c1_69, %c1_70, %c0_71] : memref<18x18x128xf32, #tpu.memory_space<vmem>>, vector<8x16x128xf32>
    tpu.vector_store %arg12[%c1_69, %c1_70, %c0_71], %83 {strides = array<i32>} : memref<18x18x128xf32, #tpu.memory_space<vmem>>, vector<8x16x128xf32>,
    %cst_72 = arith.constant 0.000000e+00 : f32
    %85 = vector.broadcast %cst_72 : f32 to vector<128x128xf32>
    %c0_73 = arith.constant 0 : index
    %c8 = arith.constant 8 : index
    %c0_74 = arith.constant 0 : index
    %c0_75 = arith.constant 0 : index
    %86 = vector.load %arg1[%c0_73, %c8, %c0_74, %c0_75] : memref<1x18x18x128xf32, #tpu.memory_space<vmem>>, vector<1x10x18x128xf32>
    %87 = vector.shape_cast %86 : vector<1x10x18x128xf32> to vector<10x18x128xf32>
    %88 = vector.extract_strided_slice %87 {offsets = [0, 0, 0], sizes = [10, 16, 128], strides = [1, 1, 1]} : vector<10x18x128xf32> to vector<10x16x128xf32>
    %89 = vector.extract_strided_slice %88 {offsets = [0, 0, 0], sizes = [8, 16, 128], strides = [1, 1, 1]} : vector<10x16x128xf32> to vector<8x16x128xf32>
    %90 = vector.shape_cast %89 : vector<8x16x128xf32> to vector<128x128xf32>
    %c0_76 = arith.constant 0 : index
    %c0_77 = arith.constant 0 : index
    %c0_78 = arith.constant 0 : index
    %c0_79 = arith.constant 0 : index
    %91 = vector.load %arg2[%c0_76, %c0_77, %c0_78, %c0_79] : memref<3x3x128x128xf32, #tpu.memory_space<vmem>>, vector<1x1x128x128xf32>
    %92 = vector.shape_cast %91 : vector<1x1x128x128xf32> to vector<128x128xf32>
    %cst_80 = arith.constant dense<0.000000e+00> : vector<128x128xf32>
    %93 = tpu.matmul %90, %92, %cst_80 {dimension_numbers = #tpu.dot_dimension_numbers<[1], [0], [0], [1], [0, 0, 1, 1], [], []>} : vector<128x128xf32>, vector<128x128xf32>, vector<128x128xf32> -> vector<128x128xf32>
    %94 = arith.addf %85, %93 : vector<128x128xf32>
    %95 = vector.extract_strided_slice %88 {offsets = [1, 0, 0], sizes = [8, 16, 128], strides = [1, 1, 1]} : vector<10x16x128xf32> to vector<8x16x128xf32>
    %96 = vector.shape_cast %95 : vector<8x16x128xf32> to vector<128x128xf32>
    %c1_81 = arith.constant 1 : index
    %c0_82 = arith.constant 0 : index
    %c0_83 = arith.constant 0 : index
    %c0_84 = arith.constant 0 : index
    %97 = vector.load %arg2[%c1_81, %c0_82, %c0_83, %c0_84] : memref<3x3x128x128xf32, #tpu.memory_space<vmem>>, vector<1x1x128x128xf32>
    %98 = vector.shape_cast %97 : vector<1x1x128x128xf32> to vector<128x128xf32>
    %cst_85 = arith.constant dense<0.000000e+00> : vector<128x128xf32>
    %99 = tpu.matmul %96, %98, %cst_85 {dimension_numbers = #tpu.dot_dimension_numbers<[1], [0], [0], [1], [0, 0, 1, 1], [], []>} : vector<128x128xf32>, vector<128x128xf32>, vector<128x128xf32> -> vector<128x128xf32>
    %100 = arith.addf %94, %99 : vector<128x128xf32>
    %101 = vector.extract_strided_slice %88 {offsets = [2, 0, 0], sizes = [8, 16, 128], strides = [1, 1, 1]} : vector<10x16x128xf32> to vector<8x16x128xf32>
    %102 = vector.shape_cast %101 : vector<8x16x128xf32> to vector<128x128xf32>
    %c2_86 = arith.constant 2 : index
    %c0_87 = arith.constant 0 : index
    %c0_88 = arith.constant 0 : index
    %c0_89 = arith.constant 0 : index
    %103 = vector.load %arg2[%c2_86, %c0_87, %c0_88, %c0_89] : memref<3x3x128x128xf32, #tpu.memory_space<vmem>>, vector<1x1x128x128xf32>
    %104 = vector.shape_cast %103 : vector<1x1x128x128xf32> to vector<128x128xf32>
    %cst_90 = arith.constant dense<0.000000e+00> : vector<128x128xf32>
    %105 = tpu.matmul %102, %104, %cst_90 {dimension_numbers = #tpu.dot_dimension_numbers<[1], [0], [0], [1], [0, 0, 1, 1], [], []>} : vector<128x128xf32>, vector<128x128xf32>, vector<128x128xf32> -> vector<128x128xf32>
    %106 = arith.addf %100, %105 : vector<128x128xf32>
    %107 = vector.extract_strided_slice %87 {offsets = [0, 1, 0], sizes = [10, 16, 128], strides = [1, 1, 1]} : vector<10x18x128xf32> to vector<10x16x128xf32>
    %108 = vector.extract_strided_slice %107 {offsets = [0, 0, 0], sizes = [8, 16, 128], strides = [1, 1, 1]} : vector<10x16x128xf32> to vector<8x16x128xf32>
    %109 = vector.shape_cast %108 : vector<8x16x128xf32> to vector<128x128xf32>
    %c0_91 = arith.constant 0 : index
    %c1_92 = arith.constant 1 : index
    %c0_93 = arith.constant 0 : index
    %c0_94 = arith.constant 0 : index
    %110 = vector.load %arg2[%c0_91, %c1_92, %c0_93, %c0_94] : memref<3x3x128x128xf32, #tpu.memory_space<vmem>>, vector<1x1x128x128xf32>
    %111 = vector.shape_cast %110 : vector<1x1x128x128xf32> to vector<128x128xf32>
    %cst_95 = arith.constant dense<0.000000e+00> : vector<128x128xf32>
    %112 = tpu.matmul %109, %111, %cst_95 {dimension_numbers = #tpu.dot_dimension_numbers<[1], [0], [0], [1], [0, 0, 1, 1], [], []>} : vector<128x128xf32>, vector<128x128xf32>, vector<128x128xf32> -> vector<128x128xf32>
    %113 = arith.addf %106, %112 : vector<128x128xf32>
    %114 = vector.extract_strided_slice %107 {offsets = [1, 0, 0], sizes = [8, 16, 128], strides = [1, 1, 1]} : vector<10x16x128xf32> to vector<8x16x128xf32>
    %115 = vector.shape_cast %114 : vector<8x16x128xf32> to vector<128x128xf32>
    %c1_96 = arith.constant 1 : index
    %c1_97 = arith.constant 1 : index
    %c0_98 = arith.constant 0 : index
    %c0_99 = arith.constant 0 : index
    %116 = vector.load %arg2[%c1_96, %c1_97, %c0_98, %c0_99] : memref<3x3x128x128xf32, #tpu.memory_space<vmem>>, vector<1x1x128x128xf32>
    %117 = vector.shape_cast %116 : vector<1x1x128x128xf32> to vector<128x128xf32>
    %cst_100 = arith.constant dense<0.000000e+00> : vector<128x128xf32>
    %118 = tpu.matmul %115, %117, %cst_100 {dimension_numbers = #tpu.dot_dimension_numbers<[1], [0], [0], [1], [0, 0, 1, 1], [], []>} : vector<128x128xf32>, vector<128x128xf32>, vector<128x128xf32> -> vector<128x128xf32>
    %119 = arith.addf %113, %118 : vector<128x128xf32>
    %120 = vector.extract_strided_slice %107 {offsets = [2, 0, 0], sizes = [8, 16, 128], strides = [1, 1, 1]} : vector<10x16x128xf32> to vector<8x16x128xf32>
    %121 = vector.shape_cast %120 : vector<8x16x128xf32> to vector<128x128xf32>
    %c2_101 = arith.constant 2 : index
    %c1_102 = arith.constant 1 : index
    %c0_103 = arith.constant 0 : index
    %c0_104 = arith.constant 0 : index
    %122 = vector.load %arg2[%c2_101, %c1_102, %c0_103, %c0_104] : memref<3x3x128x128xf32, #tpu.memory_space<vmem>>, vector<1x1x128x128xf32>
    %123 = vector.shape_cast %122 : vector<1x1x128x128xf32> to vector<128x128xf32>
    %cst_105 = arith.constant dense<0.000000e+00> : vector<128x128xf32>
    %124 = tpu.matmul %121, %123, %cst_105 {dimension_numbers = #tpu.dot_dimension_numbers<[1], [0], [0], [1], [0, 0, 1, 1], [], []>} : vector<128x128xf32>, vector<128x128xf32>, vector<128x128xf32> -> vector<128x128xf32>
    %125 = arith.addf %119, %124 : vector<128x128xf32>
    %126 = vector.extract_strided_slice %87 {offsets = [0, 2, 0], sizes = [10, 16, 128], strides = [1, 1, 1]} : vector<10x18x128xf32> to vector<10x16x128xf32>
    %127 = vector.extract_strided_slice %126 {offsets = [0, 0, 0], sizes = [8, 16, 128], strides = [1, 1, 1]} : vector<10x16x128xf32> to vector<8x16x128xf32>
    %128 = vector.shape_cast %127 : vector<8x16x128xf32> to vector<128x128xf32>
    %c0_106 = arith.constant 0 : index
    %c2_107 = arith.constant 2 : index
    %c0_108 = arith.constant 0 : index
    %c0_109 = arith.constant 0 : index
    %129 = vector.load %arg2[%c0_106, %c2_107, %c0_108, %c0_109] : memref<3x3x128x128xf32, #tpu.memory_space<vmem>>, vector<1x1x128x128xf32>
    %130 = vector.shape_cast %129 : vector<1x1x128x128xf32> to vector<128x128xf32>
    %cst_110 = arith.constant dense<0.000000e+00> : vector<128x128xf32>
    %131 = tpu.matmul %128, %130, %cst_110 {dimension_numbers = #tpu.dot_dimension_numbers<[1], [0], [0], [1], [0, 0, 1, 1], [], []>} : vector<128x128xf32>, vector<128x128xf32>, vector<128x128xf32> -> vector<128x128xf32>
    %132 = arith.addf %125, %131 : vector<128x128xf32>
    %133 = vector.extract_strided_slice %126 {offsets = [1, 0, 0], sizes = [8, 16, 128], strides = [1, 1, 1]} : vector<10x16x128xf32> to vector<8x16x128xf32>
    %134 = vector.shape_cast %133 : vector<8x16x128xf32> to vector<128x128xf32>
    %c1_111 = arith.constant 1 : index
    %c2_112 = arith.constant 2 : index
    %c0_113 = arith.constant 0 : index
    %c0_114 = arith.constant 0 : index
    %135 = vector.load %arg2[%c1_111, %c2_112, %c0_113, %c0_114] : memref<3x3x128x128xf32, #tpu.memory_space<vmem>>, vector<1x1x128x128xf32>
    %136 = vector.shape_cast %135 : vector<1x1x128x128xf32> to vector<128x128xf32>
    %cst_115 = arith.constant dense<0.000000e+00> : vector<128x128xf32>
    %137 = tpu.matmul %134, %136, %cst_115 {dimension_numbers = #tpu.dot_dimension_numbers<[1], [0], [0], [1], [0, 0, 1, 1], [], []>} : vector<128x128xf32>, vector<128x128xf32>, vector<128x128xf32> -> vector<128x128xf32>
    %138 = arith.addf %132, %137 : vector<128x128xf32>
    %139 = vector.extract_strided_slice %126 {offsets = [2, 0, 0], sizes = [8, 16, 128], strides = [1, 1, 1]} : vector<10x16x128xf32> to vector<8x16x128xf32>
    %140 = vector.shape_cast %139 : vector<8x16x128xf32> to vector<128x128xf32>
    %c2_116 = arith.constant 2 : index
    %c2_117 = arith.constant 2 : index
    %c0_118 = arith.constant 0 : index
    %c0_119 = arith.constant 0 : index
    %141 = vector.load %arg2[%c2_116, %c2_117, %c0_118, %c0_119] : memref<3x3x128x128xf32, #tpu.memory_space<vmem>>, vector<1x1x128x128xf32>
    %142 = vector.shape_cast %141 : vector<1x1x128x128xf32> to vector<128x128xf32>
    %cst_120 = arith.constant dense<0.000000e+00> : vector<128x128xf32>
    %143 = tpu.matmul %140, %142, %cst_120 {dimension_numbers = #tpu.dot_dimension_numbers<[1], [0], [0], [1], [0, 0, 1, 1], [], []>} : vector<128x128xf32>, vector<128x128xf32>, vector<128x128xf32> -> vector<128x128xf32>
    %144 = arith.addf %138, %143 : vector<128x128xf32>
    %145 = vector.shape_cast %1 : vector<128xf32> to vector<1x128xf32>
    %146 = vector.broadcast %145 : vector<1x128xf32> to vector<128x128xf32>
    %147 = arith.mulf %144, %146 : vector<128x128xf32>
    %148 = vector.shape_cast %3 : vector<128xf32> to vector<1x128xf32>
    %149 = vector.broadcast %148 : vector<1x128xf32> to vector<128x128xf32>
    %150 = arith.addf %147, %149 : vector<128x128xf32>
    %cst_121 = arith.constant 0.000000e+00 : f32
    %151 = vector.broadcast %cst_121 : f32 to vector<128x128xf32>
    %152 = arith.maximumf %150, %151 : vector<128x128xf32>
    %153 = vector.shape_cast %152 : vector<128x128xf32> to vector<8x16x128xf32>
    %c9 = arith.constant 9 : index
    %c1_122 = arith.constant 1 : index
    %c0_123 = arith.constant 0 : index
    %154 = vector.load %arg12[%c9, %c1_122, %c0_123] : memref<18x18x128xf32, #tpu.memory_space<vmem>>, vector<8x16x128xf32>
    tpu.vector_store %arg12[%c9, %c1_122, %c0_123], %153 {strides = array<i32>} : memref<18x18x128xf32, #tpu.memory_space<vmem>>, vector<8x16x128xf32>,
    %cst_124 = arith.constant 0.000000e+00 : f32
    %155 = vector.broadcast %cst_124 : f32 to vector<128x128xf32>
    %c0_125 = arith.constant 0 : index
    %c0_126 = arith.constant 0 : index
    %c0_127 = arith.constant 0 : index
    %156 = vector.load %arg12[%c0_125, %c0_126, %c0_127] : memref<18x18x128xf32, #tpu.memory_space<vmem>>, vector<10x18x128xf32>
    %157 = vector.extract_strided_slice %156 {offsets = [0, 0, 0], sizes = [10, 16, 128], strides = [1, 1, 1]} : vector<10x18x128xf32> to vector<10x16x128xf32>
    %158 = vector.extract_strided_slice %157 {offsets = [0, 0, 0], sizes = [8, 16, 128], strides = [1, 1, 1]} : vector<10x16x128xf32> to vector<8x16x128xf32>
    %159 = vector.shape_cast %158 : vector<8x16x128xf32> to vector<128x128xf32>
    %c0_128 = arith.constant 0 : index
    %c0_129 = arith.constant 0 : index
    %c0_130 = arith.constant 0 : index
    %c0_131 = arith.constant 0 : index
    %160 = vector.load %arg5[%c0_128, %c0_129, %c0_130, %c0_131] : memref<3x3x128x128xf32, #tpu.memory_space<vmem>>, vector<1x1x128x128xf32>
    %161 = vector.shape_cast %160 : vector<1x1x128x128xf32> to vector<128x128xf32>
    %cst_132 = arith.constant dense<0.000000e+00> : vector<128x128xf32>
    %162 = tpu.matmul %159, %161, %cst_132 {dimension_numbers = #tpu.dot_dimension_numbers<[1], [0], [0], [1], [0, 0, 1, 1], [], []>} : vector<128x128xf32>, vector<128x128xf32>, vector<128x128xf32> -> vector<128x128xf32>
    %163 = arith.addf %155, %162 : vector<128x128xf32>
    %164 = vector.extract_strided_slice %157 {offsets = [1, 0, 0], sizes = [8, 16, 128], strides = [1, 1, 1]} : vector<10x16x128xf32> to vector<8x16x128xf32>
    %165 = vector.shape_cast %164 : vector<8x16x128xf32> to vector<128x128xf32>
    %c1_133 = arith.constant 1 : index
    %c0_134 = arith.constant 0 : index
    %c0_135 = arith.constant 0 : index
    %c0_136 = arith.constant 0 : index
    %166 = vector.load %arg5[%c1_133, %c0_134, %c0_135, %c0_136] : memref<3x3x128x128xf32, #tpu.memory_space<vmem>>, vector<1x1x128x128xf32>
    %167 = vector.shape_cast %166 : vector<1x1x128x128xf32> to vector<128x128xf32>
    %cst_137 = arith.constant dense<0.000000e+00> : vector<128x128xf32>
    %168 = tpu.matmul %165, %167, %cst_137 {dimension_numbers = #tpu.dot_dimension_numbers<[1], [0], [0], [1], [0, 0, 1, 1], [], []>} : vector<128x128xf32>, vector<128x128xf32>, vector<128x128xf32> -> vector<128x128xf32>
    %169 = arith.addf %163, %168 : vector<128x128xf32>
    %170 = vector.extract_strided_slice %157 {offsets = [2, 0, 0], sizes = [8, 16, 128], strides = [1, 1, 1]} : vector<10x16x128xf32> to vector<8x16x128xf32>
    %171 = vector.shape_cast %170 : vector<8x16x128xf32> to vector<128x128xf32>
    %c2_138 = arith.constant 2 : index
    %c0_139 = arith.constant 0 : index
    %c0_140 = arith.constant 0 : index
    %c0_141 = arith.constant 0 : index
    %172 = vector.load %arg5[%c2_138, %c0_139, %c0_140, %c0_141] : memref<3x3x128x128xf32, #tpu.memory_space<vmem>>, vector<1x1x128x128xf32>
    %173 = vector.shape_cast %172 : vector<1x1x128x128xf32> to vector<128x128xf32>
    %cst_142 = arith.constant dense<0.000000e+00> : vector<128x128xf32>
    %174 = tpu.matmul %171, %173, %cst_142 {dimension_numbers = #tpu.dot_dimension_numbers<[1], [0], [0], [1], [0, 0, 1, 1], [], []>} : vector<128x128xf32>, vector<128x128xf32>, vector<128x128xf32> -> vector<128x128xf32>
    %175 = arith.addf %169, %174 : vector<128x128xf32>
    %176 = vector.extract_strided_slice %156 {offsets = [0, 1, 0], sizes = [10, 16, 128], strides = [1, 1, 1]} : vector<10x18x128xf32> to vector<10x16x128xf32>
    %177 = vector.extract_strided_slice %176 {offsets = [0, 0, 0], sizes = [8, 16, 128], strides = [1, 1, 1]} : vector<10x16x128xf32> to vector<8x16x128xf32>
    %178 = vector.shape_cast %177 : vector<8x16x128xf32> to vector<128x128xf32>
    %c0_143 = arith.constant 0 : index
    %c1_144 = arith.constant 1 : index
    %c0_145 = arith.constant 0 : index
    %c0_146 = arith.constant 0 : index
    %179 = vector.load %arg5[%c0_143, %c1_144, %c0_145, %c0_146] : memref<3x3x128x128xf32, #tpu.memory_space<vmem>>, vector<1x1x128x128xf32>
    %180 = vector.shape_cast %179 : vector<1x1x128x128xf32> to vector<128x128xf32>
    %cst_147 = arith.constant dense<0.000000e+00> : vector<128x128xf32>
    %181 = tpu.matmul %178, %180, %cst_147 {dimension_numbers = #tpu.dot_dimension_numbers<[1], [0], [0], [1], [0, 0, 1, 1], [], []>} : vector<128x128xf32>, vector<128x128xf32>, vector<128x128xf32> -> vector<128x128xf32>
    %182 = arith.addf %175, %181 : vector<128x128xf32>
    %183 = vector.extract_strided_slice %176 {offsets = [1, 0, 0], sizes = [8, 16, 128], strides = [1, 1, 1]} : vector<10x16x128xf32> to vector<8x16x128xf32>
    %184 = vector.shape_cast %183 : vector<8x16x128xf32> to vector<128x128xf32>
    %c1_148 = arith.constant 1 : index
    %c1_149 = arith.constant 1 : index
    %c0_150 = arith.constant 0 : index
    %c0_151 = arith.constant 0 : index
    %185 = vector.load %arg5[%c1_148, %c1_149, %c0_150, %c0_151] : memref<3x3x128x128xf32, #tpu.memory_space<vmem>>, vector<1x1x128x128xf32>
    %186 = vector.shape_cast %185 : vector<1x1x128x128xf32> to vector<128x128xf32>
    %cst_152 = arith.constant dense<0.000000e+00> : vector<128x128xf32>
    %187 = tpu.matmul %184, %186, %cst_152 {dimension_numbers = #tpu.dot_dimension_numbers<[1], [0], [0], [1], [0, 0, 1, 1], [], []>} : vector<128x128xf32>, vector<128x128xf32>, vector<128x128xf32> -> vector<128x128xf32>
    %188 = arith.addf %182, %187 : vector<128x128xf32>
    %189 = vector.extract_strided_slice %176 {offsets = [2, 0, 0], sizes = [8, 16, 128], strides = [1, 1, 1]} : vector<10x16x128xf32> to vector<8x16x128xf32>
    %190 = vector.shape_cast %189 : vector<8x16x128xf32> to vector<128x128xf32>
    %c2_153 = arith.constant 2 : index
    %c1_154 = arith.constant 1 : index
    %c0_155 = arith.constant 0 : index
    %c0_156 = arith.constant 0 : index
    %191 = vector.load %arg5[%c2_153, %c1_154, %c0_155, %c0_156] : memref<3x3x128x128xf32, #tpu.memory_space<vmem>>, vector<1x1x128x128xf32>
    %192 = vector.shape_cast %191 : vector<1x1x128x128xf32> to vector<128x128xf32>
    %cst_157 = arith.constant dense<0.000000e+00> : vector<128x128xf32>
    %193 = tpu.matmul %190, %192, %cst_157 {dimension_numbers = #tpu.dot_dimension_numbers<[1], [0], [0], [1], [0, 0, 1, 1], [], []>} : vector<128x128xf32>, vector<128x128xf32>, vector<128x128xf32> -> vector<128x128xf32>
    %194 = arith.addf %188, %193 : vector<128x128xf32>
    %195 = vector.extract_strided_slice %156 {offsets = [0, 2, 0], sizes = [10, 16, 128], strides = [1, 1, 1]} : vector<10x18x128xf32> to vector<10x16x128xf32>
    %196 = vector.extract_strided_slice %195 {offsets = [0, 0, 0], sizes = [8, 16, 128], strides = [1, 1, 1]} : vector<10x16x128xf32> to vector<8x16x128xf32>
    %197 = vector.shape_cast %196 : vector<8x16x128xf32> to vector<128x128xf32>
    %c0_158 = arith.constant 0 : index
    %c2_159 = arith.constant 2 : index
    %c0_160 = arith.constant 0 : index
    %c0_161 = arith.constant 0 : index
    %198 = vector.load %arg5[%c0_158, %c2_159, %c0_160, %c0_161] : memref<3x3x128x128xf32, #tpu.memory_space<vmem>>, vector<1x1x128x128xf32>
    %199 = vector.shape_cast %198 : vector<1x1x128x128xf32> to vector<128x128xf32>
    %cst_162 = arith.constant dense<0.000000e+00> : vector<128x128xf32>
    %200 = tpu.matmul %197, %199, %cst_162 {dimension_numbers = #tpu.dot_dimension_numbers<[1], [0], [0], [1], [0, 0, 1, 1], [], []>} : vector<128x128xf32>, vector<128x128xf32>, vector<128x128xf32> -> vector<128x128xf32>
    %201 = arith.addf %194, %200 : vector<128x128xf32>
    %202 = vector.extract_strided_slice %195 {offsets = [1, 0, 0], sizes = [8, 16, 128], strides = [1, 1, 1]} : vector<10x16x128xf32> to vector<8x16x128xf32>
    %203 = vector.shape_cast %202 : vector<8x16x128xf32> to vector<128x128xf32>
    %c1_163 = arith.constant 1 : index
    %c2_164 = arith.constant 2 : index
    %c0_165 = arith.constant 0 : index
    %c0_166 = arith.constant 0 : index
    %204 = vector.load %arg5[%c1_163, %c2_164, %c0_165, %c0_166] : memref<3x3x128x128xf32, #tpu.memory_space<vmem>>, vector<1x1x128x128xf32>
    %205 = vector.shape_cast %204 : vector<1x1x128x128xf32> to vector<128x128xf32>
    %cst_167 = arith.constant dense<0.000000e+00> : vector<128x128xf32>
    %206 = tpu.matmul %203, %205, %cst_167 {dimension_numbers = #tpu.dot_dimension_numbers<[1], [0], [0], [1], [0, 0, 1, 1], [], []>} : vector<128x128xf32>, vector<128x128xf32>, vector<128x128xf32> -> vector<128x128xf32>
    %207 = arith.addf %201, %206 : vector<128x128xf32>
    %208 = vector.extract_strided_slice %195 {offsets = [2, 0, 0], sizes = [8, 16, 128], strides = [1, 1, 1]} : vector<10x16x128xf32> to vector<8x16x128xf32>
    %209 = vector.shape_cast %208 : vector<8x16x128xf32> to vector<128x128xf32>
    %c2_168 = arith.constant 2 : index
    %c2_169 = arith.constant 2 : index
    %c0_170 = arith.constant 0 : index
    %c0_171 = arith.constant 0 : index
    %210 = vector.load %arg5[%c2_168, %c2_169, %c0_170, %c0_171] : memref<3x3x128x128xf32, #tpu.memory_space<vmem>>, vector<1x1x128x128xf32>
    %211 = vector.shape_cast %210 : vector<1x1x128x128xf32> to vector<128x128xf32>
    %cst_172 = arith.constant dense<0.000000e+00> : vector<128x128xf32>
    %212 = tpu.matmul %209, %211, %cst_172 {dimension_numbers = #tpu.dot_dimension_numbers<[1], [0], [0], [1], [0, 0, 1, 1], [], []>} : vector<128x128xf32>, vector<128x128xf32>, vector<128x128xf32> -> vector<128x128xf32>
    %213 = arith.addf %207, %212 : vector<128x128xf32>
    %214 = vector.shape_cast %5 : vector<128xf32> to vector<1x128xf32>
    %215 = vector.broadcast %214 : vector<1x128xf32> to vector<128x128xf32>
    %216 = arith.mulf %213, %215 : vector<128x128xf32>
    %217 = vector.shape_cast %7 : vector<128xf32> to vector<1x128xf32>
    %218 = vector.broadcast %217 : vector<1x128xf32> to vector<128x128xf32>
    %219 = arith.addf %216, %218 : vector<128x128xf32>
    %c0_173 = arith.constant 0 : index
    %c1_174 = arith.constant 1 : index
    %c1_175 = arith.constant 1 : index
    %c0_176 = arith.constant 0 : index
    %220 = vector.load %arg1[%c0_173, %c1_174, %c1_175, %c0_176] : memref<1x18x18x128xf32, #tpu.memory_space<vmem>>, vector<1x8x16x128xf32>
    %221 = vector.shape_cast %220 : vector<1x8x16x128xf32> to vector<8x16x128xf32>
    %222 = vector.shape_cast %221 : vector<8x16x128xf32> to vector<128x128xf32>
    %c0_177 = arith.constant 0 : index
    %c0_178 = arith.constant 0 : index
    %223 = vector.load %arg8[%c0_177, %c0_178] : memref<128x128xf32, #tpu.memory_space<vmem>>, vector<128x128xf32>
    %cst_179 = arith.constant dense<0.000000e+00> : vector<128x128xf32>
    %224 = tpu.matmul %222, %223, %cst_179 {dimension_numbers = #tpu.dot_dimension_numbers<[1], [0], [0], [1], [0, 0, 1, 1], [], []>} : vector<128x128xf32>, vector<128x128xf32>, vector<128x128xf32> -> vector<128x128xf32>
    %c0_180 = arith.constant 0 : index
    %c0_181 = arith.constant 0 : index
    %225 = vector.load %arg9[%c0_180, %c0_181] : memref<1x128xf32, #tpu.memory_space<vmem>>, vector<1x128xf32>
    %226 = vector.shape_cast %225 : vector<1x128xf32> to vector<128xf32>
    %227 = vector.shape_cast %226 : vector<128xf32> to vector<1x128xf32>
    %228 = vector.broadcast %227 : vector<1x128xf32> to vector<128x128xf32>
    %229 = arith.mulf %224, %228 : vector<128x128xf32>
    %c0_182 = arith.constant 0 : index
    %c0_183 = arith.constant 0 : index
    %230 = vector.load %arg10[%c0_182, %c0_183] : memref<1x128xf32, #tpu.memory_space<vmem>>, vector<1x128xf32>
    %231 = vector.shape_cast %230 : vector<1x128xf32> to vector<128xf32>
    %232 = vector.shape_cast %231 : vector<128xf32> to vector<1x128xf32>
    %233 = vector.broadcast %232 : vector<1x128xf32> to vector<128x128xf32>
    %234 = arith.addf %229, %233 : vector<128x128xf32>
    %235 = arith.addf %219, %234 : vector<128x128xf32>
    %cst_184 = arith.constant 0.000000e+00 : f32
    %236 = vector.broadcast %cst_184 : f32 to vector<128x128xf32>
    %237 = arith.maximumf %235, %236 : vector<128x128xf32>
    %238 = vector.shape_cast %237 : vector<128x128xf32> to vector<8x16x128xf32>
    %c0_185 = arith.constant 0 : index
    %c0_186 = arith.constant 0 : index
    %c0_187 = arith.constant 0 : index
    %c0_188 = arith.constant 0 : index
    %239 = vector.load %arg11[%c0_185, %c0_186, %c0_187, %c0_188] : memref<1x16x16x128xf32, #tpu.memory_space<vmem>>, vector<1x8x16x128xf32>
    %240 = vector.shape_cast %239 : vector<1x8x16x128xf32> to vector<8x16x128xf32>
    %241 = vector.shape_cast %238 : vector<8x16x128xf32> to vector<1x8x16x128xf32>
    tpu.vector_store %arg11[%c0_185, %c0_186, %c0_187, %c0_188], %241 {strides = array<i32>} : memref<1x16x16x128xf32, #tpu.memory_space<vmem>>, vector<1x8x16x128xf32>,
    %cst_189 = arith.constant 0.000000e+00 : f32
    %242 = vector.broadcast %cst_189 : f32 to vector<128x128xf32>
    %c8_190 = arith.constant 8 : index
    %c0_191 = arith.constant 0 : index
    %c0_192 = arith.constant 0 : index
    %243 = vector.load %arg12[%c8_190, %c0_191, %c0_192] : memref<18x18x128xf32, #tpu.memory_space<vmem>>, vector<10x18x128xf32>
    %244 = vector.extract_strided_slice %243 {offsets = [0, 0, 0], sizes = [10, 16, 128], strides = [1, 1, 1]} : vector<10x18x128xf32> to vector<10x16x128xf32>
    %245 = vector.extract_strided_slice %244 {offsets = [0, 0, 0], sizes = [8, 16, 128], strides = [1, 1, 1]} : vector<10x16x128xf32> to vector<8x16x128xf32>
    %246 = vector.shape_cast %245 : vector<8x16x128xf32> to vector<128x128xf32>
    %c0_193 = arith.constant 0 : index
    %c0_194 = arith.constant 0 : index
    %c0_195 = arith.constant 0 : index
    %c0_196 = arith.constant 0 : index
    %247 = vector.load %arg5[%c0_193, %c0_194, %c0_195, %c0_196] : memref<3x3x128x128xf32, #tpu.memory_space<vmem>>, vector<1x1x128x128xf32>
    %248 = vector.shape_cast %247 : vector<1x1x128x128xf32> to vector<128x128xf32>
    %cst_197 = arith.constant dense<0.000000e+00> : vector<128x128xf32>
    %249 = tpu.matmul %246, %248, %cst_197 {dimension_numbers = #tpu.dot_dimension_numbers<[1], [0], [0], [1], [0, 0, 1, 1], [], []>} : vector<128x128xf32>, vector<128x128xf32>, vector<128x128xf32> -> vector<128x128xf32>
    %250 = arith.addf %242, %249 : vector<128x128xf32>
    %251 = vector.extract_strided_slice %244 {offsets = [1, 0, 0], sizes = [8, 16, 128], strides = [1, 1, 1]} : vector<10x16x128xf32> to vector<8x16x128xf32>
    %252 = vector.shape_cast %251 : vector<8x16x128xf32> to vector<128x128xf32>
    %c1_198 = arith.constant 1 : index
    %c0_199 = arith.constant 0 : index
    %c0_200 = arith.constant 0 : index
    %c0_201 = arith.constant 0 : index
    %253 = vector.load %arg5[%c1_198, %c0_199, %c0_200, %c0_201] : memref<3x3x128x128xf32, #tpu.memory_space<vmem>>, vector<1x1x128x128xf32>
    %254 = vector.shape_cast %253 : vector<1x1x128x128xf32> to vector<128x128xf32>
    %cst_202 = arith.constant dense<0.000000e+00> : vector<128x128xf32>
    %255 = tpu.matmul %252, %254, %cst_202 {dimension_numbers = #tpu.dot_dimension_numbers<[1], [0], [0], [1], [0, 0, 1, 1], [], []>} : vector<128x128xf32>, vector<128x128xf32>, vector<128x128xf32> -> vector<128x128xf32>
    %256 = arith.addf %250, %255 : vector<128x128xf32>
    %257 = vector.extract_strided_slice %244 {offsets = [2, 0, 0], sizes = [8, 16, 128], strides = [1, 1, 1]} : vector<10x16x128xf32> to vector<8x16x128xf32>
    %258 = vector.shape_cast %257 : vector<8x16x128xf32> to vector<128x128xf32>
    %c2_203 = arith.constant 2 : index
    %c0_204 = arith.constant 0 : index
    %c0_205 = arith.constant 0 : index
    %c0_206 = arith.constant 0 : index
    %259 = vector.load %arg5[%c2_203, %c0_204, %c0_205, %c0_206] : memref<3x3x128x128xf32, #tpu.memory_space<vmem>>, vector<1x1x128x128xf32>
    %260 = vector.shape_cast %259 : vector<1x1x128x128xf32> to vector<128x128xf32>
    %cst_207 = arith.constant dense<0.000000e+00> : vector<128x128xf32>
    %261 = tpu.matmul %258, %260, %cst_207 {dimension_numbers = #tpu.dot_dimension_numbers<[1], [0], [0], [1], [0, 0, 1, 1], [], []>} : vector<128x128xf32>, vector<128x128xf32>, vector<128x128xf32> -> vector<128x128xf32>
    %262 = arith.addf %256, %261 : vector<128x128xf32>
    %263 = vector.extract_strided_slice %243 {offsets = [0, 1, 0], sizes = [10, 16, 128], strides = [1, 1, 1]} : vector<10x18x128xf32> to vector<10x16x128xf32>
    %264 = vector.extract_strided_slice %263 {offsets = [0, 0, 0], sizes = [8, 16, 128], strides = [1, 1, 1]} : vector<10x16x128xf32> to vector<8x16x128xf32>
    %265 = vector.shape_cast %264 : vector<8x16x128xf32> to vector<128x128xf32>
    %c0_208 = arith.constant 0 : index
    %c1_209 = arith.constant 1 : index
    %c0_210 = arith.constant 0 : index
    %c0_211 = arith.constant 0 : index
    %266 = vector.load %arg5[%c0_208, %c1_209, %c0_210, %c0_211] : memref<3x3x128x128xf32, #tpu.memory_space<vmem>>, vector<1x1x128x128xf32>
    %267 = vector.shape_cast %266 : vector<1x1x128x128xf32> to vector<128x128xf32>
    %cst_212 = arith.constant dense<0.000000e+00> : vector<128x128xf32>
    %268 = tpu.matmul %265, %267, %cst_212 {dimension_numbers = #tpu.dot_dimension_numbers<[1], [0], [0], [1], [0, 0, 1, 1], [], []>} : vector<128x128xf32>, vector<128x128xf32>, vector<128x128xf32> -> vector<128x128xf32>
    %269 = arith.addf %262, %268 : vector<128x128xf32>
    %270 = vector.extract_strided_slice %263 {offsets = [1, 0, 0], sizes = [8, 16, 128], strides = [1, 1, 1]} : vector<10x16x128xf32> to vector<8x16x128xf32>
    %271 = vector.shape_cast %270 : vector<8x16x128xf32> to vector<128x128xf32>
    %c1_213 = arith.constant 1 : index
    %c1_214 = arith.constant 1 : index
    %c0_215 = arith.constant 0 : index
    %c0_216 = arith.constant 0 : index
    %272 = vector.load %arg5[%c1_213, %c1_214, %c0_215, %c0_216] : memref<3x3x128x128xf32, #tpu.memory_space<vmem>>, vector<1x1x128x128xf32>
    %273 = vector.shape_cast %272 : vector<1x1x128x128xf32> to vector<128x128xf32>
    %cst_217 = arith.constant dense<0.000000e+00> : vector<128x128xf32>
    %274 = tpu.matmul %271, %273, %cst_217 {dimension_numbers = #tpu.dot_dimension_numbers<[1], [0], [0], [1], [0, 0, 1, 1], [], []>} : vector<128x128xf32>, vector<128x128xf32>, vector<128x128xf32> -> vector<128x128xf32>
    %275 = arith.addf %269, %274 : vector<128x128xf32>
    %276 = vector.extract_strided_slice %263 {offsets = [2, 0, 0], sizes = [8, 16, 128], strides = [1, 1, 1]} : vector<10x16x128xf32> to vector<8x16x128xf32>
    %277 = vector.shape_cast %276 : vector<8x16x128xf32> to vector<128x128xf32>
    %c2_218 = arith.constant 2 : index
    %c1_219 = arith.constant 1 : index
    %c0_220 = arith.constant 0 : index
    %c0_221 = arith.constant 0 : index
    %278 = vector.load %arg5[%c2_218, %c1_219, %c0_220, %c0_221] : memref<3x3x128x128xf32, #tpu.memory_space<vmem>>, vector<1x1x128x128xf32>
    %279 = vector.shape_cast %278 : vector<1x1x128x128xf32> to vector<128x128xf32>
    %cst_222 = arith.constant dense<0.000000e+00> : vector<128x128xf32>
    %280 = tpu.matmul %277, %279, %cst_222 {dimension_numbers = #tpu.dot_dimension_numbers<[1], [0], [0], [1], [0, 0, 1, 1], [], []>} : vector<128x128xf32>, vector<128x128xf32>, vector<128x128xf32> -> vector<128x128xf32>
    %281 = arith.addf %275, %280 : vector<128x128xf32>
    %282 = vector.extract_strided_slice %243 {offsets = [0, 2, 0], sizes = [10, 16, 128], strides = [1, 1, 1]} : vector<10x18x128xf32> to vector<10x16x128xf32>
    %283 = vector.extract_strided_slice %282 {offsets = [0, 0, 0], sizes = [8, 16, 128], strides = [1, 1, 1]} : vector<10x16x128xf32> to vector<8x16x128xf32>
    %284 = vector.shape_cast %283 : vector<8x16x128xf32> to vector<128x128xf32>
    %c0_223 = arith.constant 0 : index
    %c2_224 = arith.constant 2 : index
    %c0_225 = arith.constant 0 : index
    %c0_226 = arith.constant 0 : index
    %285 = vector.load %arg5[%c0_223, %c2_224, %c0_225, %c0_226] : memref<3x3x128x128xf32, #tpu.memory_space<vmem>>, vector<1x1x128x128xf32>
    %286 = vector.shape_cast %285 : vector<1x1x128x128xf32> to vector<128x128xf32>
    %cst_227 = arith.constant dense<0.000000e+00> : vector<128x128xf32>
    %287 = tpu.matmul %284, %286, %cst_227 {dimension_numbers = #tpu.dot_dimension_numbers<[1], [0], [0], [1], [0, 0, 1, 1], [], []>} : vector<128x128xf32>, vector<128x128xf32>, vector<128x128xf32> -> vector<128x128xf32>
    %288 = arith.addf %281, %287 : vector<128x128xf32>
    %289 = vector.extract_strided_slice %282 {offsets = [1, 0, 0], sizes = [8, 16, 128], strides = [1, 1, 1]} : vector<10x16x128xf32> to vector<8x16x128xf32>
    %290 = vector.shape_cast %289 : vector<8x16x128xf32> to vector<128x128xf32>
    %c1_228 = arith.constant 1 : index
    %c2_229 = arith.constant 2 : index
    %c0_230 = arith.constant 0 : index
    %c0_231 = arith.constant 0 : index
    %291 = vector.load %arg5[%c1_228, %c2_229, %c0_230, %c0_231] : memref<3x3x128x128xf32, #tpu.memory_space<vmem>>, vector<1x1x128x128xf32>
    %292 = vector.shape_cast %291 : vector<1x1x128x128xf32> to vector<128x128xf32>
    %cst_232 = arith.constant dense<0.000000e+00> : vector<128x128xf32>
    %293 = tpu.matmul %290, %292, %cst_232 {dimension_numbers = #tpu.dot_dimension_numbers<[1], [0], [0], [1], [0, 0, 1, 1], [], []>} : vector<128x128xf32>, vector<128x128xf32>, vector<128x128xf32> -> vector<128x128xf32>
    %294 = arith.addf %288, %293 : vector<128x128xf32>
    %295 = vector.extract_strided_slice %282 {offsets = [2, 0, 0], sizes = [8, 16, 128], strides = [1, 1, 1]} : vector<10x16x128xf32> to vector<8x16x128xf32>
    %296 = vector.shape_cast %295 : vector<8x16x128xf32> to vector<128x128xf32>
    %c2_233 = arith.constant 2 : index
    %c2_234 = arith.constant 2 : index
    %c0_235 = arith.constant 0 : index
    %c0_236 = arith.constant 0 : index
    %297 = vector.load %arg5[%c2_233, %c2_234, %c0_235, %c0_236] : memref<3x3x128x128xf32, #tpu.memory_space<vmem>>, vector<1x1x128x128xf32>
    %298 = vector.shape_cast %297 : vector<1x1x128x128xf32> to vector<128x128xf32>
    %cst_237 = arith.constant dense<0.000000e+00> : vector<128x128xf32>
    %299 = tpu.matmul %296, %298, %cst_237 {dimension_numbers = #tpu.dot_dimension_numbers<[1], [0], [0], [1], [0, 0, 1, 1], [], []>} : vector<128x128xf32>, vector<128x128xf32>, vector<128x128xf32> -> vector<128x128xf32>
    %300 = arith.addf %294, %299 : vector<128x128xf32>
    %301 = vector.shape_cast %5 : vector<128xf32> to vector<1x128xf32>
    %302 = vector.broadcast %301 : vector<1x128xf32> to vector<128x128xf32>
    %303 = arith.mulf %300, %302 : vector<128x128xf32>
    %304 = vector.shape_cast %7 : vector<128xf32> to vector<1x128xf32>
    %305 = vector.broadcast %304 : vector<1x128xf32> to vector<128x128xf32>
    %306 = arith.addf %303, %305 : vector<128x128xf32>
    %c0_238 = arith.constant 0 : index
    %c9_239 = arith.constant 9 : index
    %c1_240 = arith.constant 1 : index
    %c0_241 = arith.constant 0 : index
    %307 = vector.load %arg1[%c0_238, %c9_239, %c1_240, %c0_241] : memref<1x18x18x128xf32, #tpu.memory_space<vmem>>, vector<1x8x16x128xf32>
    %308 = vector.shape_cast %307 : vector<1x8x16x128xf32> to vector<8x16x128xf32>
    %309 = vector.shape_cast %308 : vector<8x16x128xf32> to vector<128x128xf32>
    %c0_242 = arith.constant 0 : index
    %c0_243 = arith.constant 0 : index
    %310 = vector.load %arg8[%c0_242, %c0_243] : memref<128x128xf32, #tpu.memory_space<vmem>>, vector<128x128xf32>
    %cst_244 = arith.constant dense<0.000000e+00> : vector<128x128xf32>
    %311 = tpu.matmul %309, %310, %cst_244 {dimension_numbers = #tpu.dot_dimension_numbers<[1], [0], [0], [1], [0, 0, 1, 1], [], []>} : vector<128x128xf32>, vector<128x128xf32>, vector<128x128xf32> -> vector<128x128xf32>
    %c0_245 = arith.constant 0 : index
    %c0_246 = arith.constant 0 : index
    %312 = vector.load %arg9[%c0_245, %c0_246] : memref<1x128xf32, #tpu.memory_space<vmem>>, vector<1x128xf32>
    %313 = vector.shape_cast %312 : vector<1x128xf32> to vector<128xf32>
    %314 = vector.shape_cast %313 : vector<128xf32> to vector<1x128xf32>
    %315 = vector.broadcast %314 : vector<1x128xf32> to vector<128x128xf32>
    %316 = arith.mulf %311, %315 : vector<128x128xf32>
    %c0_247 = arith.constant 0 : index
    %c0_248 = arith.constant 0 : index
    %317 = vector.load %arg10[%c0_247, %c0_248] : memref<1x128xf32, #tpu.memory_space<vmem>>, vector<1x128xf32>
    %318 = vector.shape_cast %317 : vector<1x128xf32> to vector<128xf32>
    %319 = vector.shape_cast %318 : vector<128xf32> to vector<1x128xf32>
    %320 = vector.broadcast %319 : vector<1x128xf32> to vector<128x128xf32>
    %321 = arith.addf %316, %320 : vector<128x128xf32>
    %322 = arith.addf %306, %321 : vector<128x128xf32>
    %cst_249 = arith.constant 0.000000e+00 : f32
    %323 = vector.broadcast %cst_249 : f32 to vector<128x128xf32>
    %324 = arith.maximumf %322, %323 : vector<128x128xf32>
    %325 = vector.shape_cast %324 : vector<128x128xf32> to vector<8x16x128xf32>
    %c0_250 = arith.constant 0 : index
    %c8_251 = arith.constant 8 : index
    %c0_252 = arith.constant 0 : index
    %c0_253 = arith.constant 0 : index
    %326 = vector.load %arg11[%c0_250, %c8_251, %c0_252, %c0_253] : memref<1x16x16x128xf32, #tpu.memory_space<vmem>>, vector<1x8x16x128xf32>
    %327 = vector.shape_cast %326 : vector<1x8x16x128xf32> to vector<8x16x128xf32>
    %328 = vector.shape_cast %325 : vector<8x16x128xf32> to vector<1x8x16x128xf32>
    tpu.vector_store %arg11[%c0_250, %c8_251, %c0_252, %c0_253], %328 {strides = array<i32>} : memref<1x16x16x128xf32, #tpu.memory_space<vmem>>, vector<1x8x16x128xf32>,
    return
  }
  func.func @transform_0(%arg0: i32) -> (i32, i32, i32, i32) {
    %c0_i32 = arith.constant 0 : i32
    %c0_i32_0 = arith.constant 0 : i32
    %c0_i32_1 = arith.constant 0 : i32
    %c0_i32_2 = arith.constant 0 : i32
    return %arg0, %c0_i32, %c0_i32_0, %c0_i32_1 : i32, i32, i32, i32
  }
  func.func @transform_1(%arg0: i32) -> (i32, i32, i32, i32) {
    %c0_i32 = arith.constant 0 : i32
    %c0_i32_0 = arith.constant 0 : i32
    %c0_i32_1 = arith.constant 0 : i32
    %c0_i32_2 = arith.constant 0 : i32
    %c0_i32_3 = arith.constant 0 : i32
    return %c0_i32, %c0_i32_0, %c0_i32_1, %c0_i32_2 : i32, i32, i32, i32
  }
  func.func @transform_2(%arg0: i32) -> (i32, i32) {
    %c0_i32 = arith.constant 0 : i32
    %c0_i32_0 = arith.constant 0 : i32
    %c0_i32_1 = arith.constant 0 : i32
    return %c0_i32, %c0_i32_0 : i32, i32
  }
  func.func @transform_3(%arg0: i32) -> (i32, i32) {
    %c0_i32 = arith.constant 0 : i32
    %c0_i32_0 = arith.constant 0 : i32
    %c0_i32_1 = arith.constant 0 : i32
    return %c0_i32, %c0_i32_0 : i32, i32
  }
  func.func @transform_4(%arg0: i32) -> (i32, i32, i32, i32) {
    %c0_i32 = arith.constant 0 : i32
    %c0_i32_0 = arith.constant 0 : i32
    %c0_i32_1 = arith.constant 0 : i32
    %c0_i32_2 = arith.constant 0 : i32
    %c0_i32_3 = arith.constant 0 : i32
    return %c0_i32, %c0_i32_0, %c0_i32_1, %c0_i32_2 : i32, i32, i32, i32
  }
  func.func @transform_5(%arg0: i32) -> (i32, i32) {
    %c0_i32 = arith.constant 0 : i32
    %c0_i32_0 = arith.constant 0 : i32
    %c0_i32_1 = arith.constant 0 : i32
    return %c0_i32, %c0_i32_0 : i32, i32
  }
  func.func @transform_6(%arg0: i32) -> (i32, i32) {
    %c0_i32 = arith.constant 0 : i32
    %c0_i32_0 = arith.constant 0 : i32
    %c0_i32_1 = arith.constant 0 : i32
    return %c0_i32, %c0_i32_0 : i32, i32
  }
  func.func @transform_7(%arg0: i32) -> (i32, i32) {
    %c0_i32 = arith.constant 0 : i32
    %c0_i32_0 = arith.constant 0 : i32
    %c0_i32_1 = arith.constant 0 : i32
    return %c0_i32, %c0_i32_0 : i32, i32
  }
  func.func @transform_8(%arg0: i32) -> (i32, i32) {
    %c0_i32 = arith.constant 0 : i32
    %c0_i32_0 = arith.constant 0 : i32
    %c0_i32_1 = arith.constant 0 : i32
    return %c0_i32, %c0_i32_0 : i32, i32
  }
  func.func @transform_9(%arg0: i32) -> (i32, i32) {
    %c0_i32 = arith.constant 0 : i32
    %c0_i32_0 = arith.constant 0 : i32
    %c0_i32_1 = arith.constant 0 : i32
    return %c0_i32, %c0_i32_0 : i32, i32
  }
  func.func @transform_10(%arg0: i32) -> (i32, i32, i32, i32) {
    %c0_i32 = arith.constant 0 : i32
    %c0_i32_0 = arith.constant 0 : i32
    %c0_i32_1 = arith.constant 0 : i32
    %c0_i32_2 = arith.constant 0 : i32
    return %arg0, %c0_i32, %c0_i32_0, %c0_i32_1 : i32, i32, i32, i32
  }
}

</mosaic_0001>

<bundles_post_ra>
// kernel: tpu_custom_call.1
= control target key start
LH: loop header
LB: loop body
LE: loop exit
PB: predicated region body
PF: predicated region fallthrough
CT: control target
= control target key end

     0   :  { %15 = vsyncpa [#allocation4], 0  ;;  %s9261_s0 = inlined_call_operand.vmem [shape: f32[2,18,18,128], index: 0, kind: input, shape index: {}]   ;;  %s9262_s1 = inlined_call_operand.vmem [shape: f32[3,3,128,128], index: 1, kind: input, shape index: {}]   ;;  %s9263_s2 = inlined_call_operand.vmem [shape: f32[1,128], index: 2, kind: input, shape index: {}]   ;;  %s9264_s3 = inlined_call_operand.vmem [shape: f32[1,128], index: 3, kind: input, shape index: {}]   ;;  %s9265_s4 = inlined_call_operand.hbm [shape: f32[3,3,128,128], index: 4, kind: input, shape index: {}]   ;;  %s9266_s5 = inlined_call_operand.vmem [shape: f32[1,128], index: 5, kind: input, shape index: {}]   ;;  %s9267_s6 = inlined_call_operand.vmem [shape: f32[1,128], index: 6, kind: input, shape index: {}]   ;;  %s9268_s7 = inlined_call_operand.vmem [shape: f32[128,128], index: 7, kind: input, shape index: {}]   ;;  %s9269_s8 = inlined_call_operand.vmem [shape: f32[1,128], index: 8, kind: input, shape index: {}]   ;;  %s9270_s9 = inlined_call_operand.vmem [shape: f32[1,128], index: 9, kind: input, shape index: {}]   ;;  %s9271_s10 = inlined_call_operand.hbm [shape: f32[2,16,16,128], index: 10, kind: output, shape index: {}]  }
   0x1   :  { %16 = vsyncpa [#allocation5], 0 }
   0x2   :  { %18 = vsyncpa [#allocation5 + $0x1], 0  ;;  %s5930_s13 = smov 0   ;;  %s5932_s14 = smov 0  }
   0x3   :  { %s5934_s15 = smov 0   ;;  %s5936_s16 = smov 0  }
   0x4 LB: > { %s5951_s17 = sadd.s32 4294967295, %s5867_s16   ;;  %s5275_s18 = sadd.s32 4294967294, %s5867_s16   ;;  %s5867_s16 = sphi %s5936_s16, %s9307_s16   ;;  %s5863_s15 = sphi %s5934_s15, %s9306_s15   ;;  %s5859_s14 = sphi %s5932_s14, %s9305_s14   ;;  %s5855_s13 = sphi %s5930_s13, %s9304_s13  }
   0x5   : > { %s5955_s19 = sadd.s32 1, %s5867_s16   ;;  %s246_s20 = sadd.s32 1, %s5863_s15 }
   0x6   : > { %s243_s21 = ssub.s32 %s5867_s16, %s5955_s19  ;;  %p256_p0 = scmp.ne.s32.totalorder %s5863_s15, %s5859_s14 }
   0x7   : > { %p244_p1 = scmp.eq.s32.totalorder %s243_s21, 0  ;;  %p257_p2 = scmp.eq.s32.totalorder %s5951_s17, 1 }
   0x8   : > { %p262_p3 = scmp.ne.s32.totalorder %s5859_s14, %s5855_s13  ;;  %p263_p4 = scmp.eq.s32.totalorder %s5275_s18, 1 }
   0x9   : > { %s5966_s22 = scalar_select %p244_p1, %s5863_s15, %s246_s20  }
   0xa   : > { %p5968_p5 = por %p257_p2, %p256_p0  ;;  %p5972_p6 = por %p263_p4, %p262_p3 }
   0xb   : > { %p5276_p7 = scmp.ge.s32.totalorder %s5867_s16, 1  ;;  %p270_p8 = scmp.lt.s32.totalorder %s5867_s16, 3 }
   0xc   : > { %p5670_p9 = scmp.eq.s32.totalorder %s5951_s17, 0  ;;  %s290_s27 = sshll.u32 %s9265_s4, 4  ;;  %s291_s27 = int_to_ptr.hbm [resolvable:$true] %s290_s27 }
   0xd   : > { %p271_p10 = pnand %p5276_p7, %p270_p8  ;;  %s5869_s28 = smov [#allocation3]  }
   0xe   : > { %s292_s29 = sshll.u32 %s5869_s28, 4  ;;  %s5870_s30 = smov 128   ;;  %s293_s29 = int_to_ptr.vmem [resolvable:$true] %s292_s29 }
   0xf   : > { %p5662_p11 = pneg %p271_p10  ;;  %s5871_s11 = smov 8  }
  0x10   : > { %331 = sbr.rel (%p271_p10) target bundleno = 1413 (0x585), region = 60 }
  0x11   : > { %p5663_p12 = pnand %p5670_p9, %p5662_p11 }
  0x13   : > { %5665 = dma.hbm_to_vmem [thread:$0]  (!%p5663_p12), %s291_s27, 18432, %s293_s29, [#allocation4], %s5870_s30, %s5870_s30, %s5871_s11  }
  0x15   : > { %5846 = dma.done.wait (%p5670_p9), [#allocation4], 18432  }
  0x16   : > { %5848 = vsyncadd (%p5670_p9), [#allocation4], 4294948864  ;;  %v5991_v0 = vld [vmem:[%s9262_s1 + $0x1f8] sm:$0xff]  ;;  %v5999_v2 = vld [vmem:[%s9262_s1 + $0x1f0] sm:$0xff]  ;;  %p370_p13 = scmp.lt.s32.totalorder %s5951_s17, 1  ;;  %vm737_vm0 = vcmask 1046528  }
  0x17   : > { %v467_v1 = vld [vmem:[%s9262_s1 + $0x78] sm:$0xff]  ;;  %485 = vmatpush.msra.mxu0 %v5991_v0  ;;  %5623 = vmatpush.msra.mxu2 %v5991_v0  ;;  %v466_v3 = vld [vmem:[%s9262_s1 + $0x70] sm:$0xff]  ;;  %v6009_v4 = vld [vmem:[%s9262_s1 + $0x1e8] sm:$0xff]  ;;  %vm1108_vm1 = vcmask 1045504   ;;  %s367_s18 = sand.u32 1, %s5859_s14  }
  0x18   : > { %550 = vmatpush.msra.mxu1 %v467_v1  ;;  %5639 = vmatpush.msra.mxu3 %v467_v1  ;;  %v465_v5 = vld [vmem:[%s9262_s1 + $0x68] sm:$0xff]  ;;  %v6019_v6 = vld [vmem:[%s9262_s1 + $0x1e0] sm:$0xff]  ;;  %v6029_v8 = vld [vmem:[%s9262_s1 + $0x1d8] sm:$0xff]  ;;  %s371_s12 = scalar_select %p370_p13, %s5951_s17, 1 }
  0x19   : > { %486 = vmatpush.msra.mxu0 %v5999_v2  ;;  %5624 = vmatpush.msra.mxu2 %v5999_v2  ;;  %v464_v7 = vld [vmem:[%s9262_s1 + $0x60] sm:$0xff]  ;;  %v463_v9 = vld [vmem:[%s9262_s1 + $0x58] sm:$0xff]  ;;  %v6039_v10 = vld [vmem:[%s9262_s1 + $0x1d0] sm:$0xff]  ;;  %s5281_s25 = sshll.u32 %s367_s18, 8 }
  0x1a   : > { %551 = vmatpush.msra.mxu1 %v466_v3  ;;  %5640 = vmatpush.msra.mxu3 %v466_v3  ;;  %v462_v11 = vld [vmem:[%s9262_s1 + $0x50] sm:$0xff]  ;;  %v6049_v12 = vld [vmem:[%s9262_s1 + $0x1c8] sm:$0xff]  ;;  %v6059_v14 = vld [vmem:[%s9262_s1 + $0x1c0] sm:$0xff]  ;;  %s5655_s30 = smul.u32 432, %s371_s12  ;;  %s5622_s12 = sshll.u32 %s5951_s17, 8 }
  0x1b   : > { %487 = vmatpush.msra.mxu0 %v6009_v4  ;;  %5625 = vmatpush.msra.mxu2 %v6009_v4  ;;  %v461_v13 = vld [vmem:[%s9262_s1 + $0x48] sm:$0xff]  ;;  %v460_v15 = vld [vmem:[%s9262_s1 + $0x40] sm:$0xff]  ;;  %v6069_v16 = vld [vmem:[%s9262_s1 + $0x1b8] sm:$0xff]  ;;  %s5197_s28 = scalar_lea.hbm %s9271_s10, %s5622_s12  ;;  %s5186_s17 = scalar_lea.sflag [#allocation5], %s367_s18 }
  0x1c   : > { %552 = vmatpush.msra.mxu1 %v465_v5  ;;  %5641 = vmatpush.msra.mxu3 %v465_v5  ;;  %v459_v17 = vld [vmem:[%s9262_s1 + $0x38] sm:$0xff]  ;;  %v6080_v18 = vld [vmem:[%s9262_s1 + $0x1b0] sm:$0xff]  ;;  %v6090_v20 = vld [vmem:[%s9262_s1 + $0x1a8] sm:$0xff]  ;;  %s6141_s11 = scalar_lea.vmem %s9261_s0, %s5655_s30  ;;  %s8633_s30 = scalar_lea.vmem [#allocation6], %s5281_s25 }
  0x1d   : > { %488 = vmatpush.msra.mxu0 %v6019_v6  ;;  %5626 = vmatpush.msra.mxu2 %v6019_v6  ;;  %v458_v19 = vld [vmem:[%s9262_s1 + $0x30] sm:$0xff]  ;;  %v457_v21 = vld [vmem:[%s9262_s1 + $0x28] sm:$0xff]  ;;  %v6101_v22 = vld [vmem:[%s9262_s1 + $0x1a0] sm:$0xff]  ;;  %s5198_s29 = sshll.u32 %s8633_s30, 4  ;;  %s5200_s20 = sshll.u32 %s5197_s28, 4  ;;  %s5199_s29 = int_to_ptr.vmem [resolvable:$true] %s5198_s29  ;;  %s5201_s20 = int_to_ptr.hbm [resolvable:$true] %s5200_s20 }
  0x1e   : > { %553 = vmatpush.msra.mxu1 %v464_v7  ;;  %5642 = vmatpush.msra.mxu3 %v464_v7  ;;  %v456_v23 = vld [vmem:[%s9262_s1 + $0x20] sm:$0xff]  ;;  %v6109_v24 = vld [vmem:[%s9262_s1 + $0x198] sm:$0xff]  ;;  %v6121_v26 = vld [vmem:[%s9262_s1 + $0x190] sm:$0xff]  ;;  %s5815_s21 = sshra.s32 %s5201_s20, 4  ;;  %s5816_s21 = int_to_ptr.hbm [resolvable:$true] %s5815_s21 }
  0x1f   : > { %489 = vmatpush.msra.mxu0 %v6029_v8  ;;  %5627 = vmatpush.msra.mxu2 %v6029_v8  ;;  %v455_v25 = vld [vmem:[%s9262_s1 + $0x18] sm:$0xff]  ;;  %v454_v27 = vld [vmem:[%s9262_s1 + $0x10] sm:$0xff]  ;;  %v6131_v28 = vld [vmem:[%s9262_s1 + $0x188] sm:$0xff]  ;;  %s5817_s25 = scalar_lea.hbm %s5816_s21, 256  ;;  %p5822_p3 = scmp.lt.s32.totalorder %s5816_s21, %s9271_s10 }
  0x20   : > { %554 = vmatpush.msra.mxu1 %v463_v9  ;;  %5643 = vmatpush.msra.mxu3 %v463_v9  ;;  %v453_v29 = vld [vmem:[%s9262_s1 + $0x8] sm:$0xff]  ;;  %v6146_v30 = vld [vmem:[%s9262_s1 + $0x180] sm:$0xff]  ;;  %v6154_v32 = vld [vmem:[%s6141_s11 + $0x18] sm:$0xff]  ;;  %p5818_p0 = scmp.ne.s32.totalorder %s5816_s21, %s5817_s25 }
  0x21   : > { %490 = vmatpush.msra.mxu0 %v6039_v10  ;;  %5628 = vmatpush.msra.mxu2 %v6039_v10  ;;  %v452_v31 = vld [vmem:[%s9262_s1] sm:$0xff]  ;;  %v6157_v33 = vld [vmem:[%s6141_s11 + $0x78] sm:$0xff]  ;;  %v6190_v40 = vld [vmem:[%s9262_s1 + $0x370] sm:$0xff] }
  0x22   : > { %555 = vmatpush.msra.mxu1 %v462_v11  ;;  %5644 = vmatpush.msra.mxu3 %v462_v11  ;;  %v6162_v34 = vld [vmem:[%s6141_s11] sm:$0xff]  ;;  %v6170_v36 = vld [vmem:[%s9262_s1 + $0x378] sm:$0xff]  ;;  %v5329_v41 = vld [vmem:[%s9262_s1 + $0xf0] sm:$0xff]  ;;  %p5819_p1 = pnand %p5818_p0, %p5968_p5 }
  0x23   : > { %491 = vmatpush.msra.mxu0 %v6049_v12  ;;  %5629 = vmatpush.msra.mxu2 %v6049_v12  ;;  %v6165_v35 = vld [vmem:[%s6141_s11 + $0x60] sm:$0xff]  ;;  %v5330_v37 = vld [vmem:[%s9262_s1 + $0xf8] sm:$0xff]  ;;  %v5345_v42 = vld [vmem:[%s9262_s1 + $0x270] sm:$0xff] }
  0x24   : > { %556 = vmatpush.msra.mxu1 %v461_v13  ;;  %5645 = vmatpush.msra.mxu3 %v461_v13  ;;  %v6180_v38 = vld [vmem:[%s9262_s1 + $0x278] sm:$0xff]  ;;  %v5361_v43 = vld [vmem:[%s9262_s1 + $0x3f0] sm:$0xff]  ;;  %v5312_v44 = vld [vmem:[%s9262_s1 + $0x368] sm:$0xff]  ;;  %p5820_p2 = pneg %p5819_p1 }
  0x25   : > { %492 = vmatpush.msra.mxu0 %v6059_v14  ;;  %5630 = vmatpush.msra.mxu2 %v6059_v14  ;;  %v5362_v39 = vld [vmem:[%s9262_s1 + $0x3f8] sm:$0xff]  ;;  %v5328_v45 = vld [vmem:[%s9262_s1 + $0xe8] sm:$0xff]  ;;  %v6217_v48 = vld [vmem:[%s6141_s11 + $0x20] sm:$0xff] }
  0x26   : > { %557 = vmatpush.msra.mxu1 %v460_v15  ;;  %5646 = vmatpush.msra.mxu3 %v460_v15  ;;  %v5344_v46 = vld [vmem:[%s9262_s1 + $0x268] sm:$0xff]  ;;  %v6220_v49 = vld [vmem:[%s6141_s11 + $0x80] sm:$0xff]  ;;  %v5310_v56 = vld [vmem:[%s9262_s1 + $0x358] sm:$0xff] }
  0x27   : > { %493 = vmatpush.msra.mxu0 %v6069_v16  ;;  %5631 = vmatpush.msra.mxu2 %v6069_v16  ;;  %v5360_v47 = vld [vmem:[%s9262_s1 + $0x3e8] sm:$0xff]  ;;  %v5311_v52 = vld [vmem:[%s9262_s1 + $0x360] sm:$0xff]  ;;  %v5326_v57 = vld [vmem:[%s9262_s1 + $0xd8] sm:$0xff] }
  0x28   : > { %558 = vmatpush.msra.mxu1 %v459_v17  ;;  %5647 = vmatpush.msra.mxu3 %v459_v17  ;;  %v6223_v50 = vld [vmem:[%s6141_s11 + $0x8] sm:$0xff]  ;;  %v5327_v53 = vld [vmem:[%s9262_s1 + $0xe0] sm:$0xff]  ;;  %v5342_v58 = vld [vmem:[%s9262_s1 + $0x258] sm:$0xff] }
  0x29   : > { %494 = vmatpush.msra.mxu0 %v6080_v18  ;;  %5632 = vmatpush.msra.mxu2 %v6080_v18  ;;  %v6226_v51 = vld [vmem:[%s6141_s11 + $0x68] sm:$0xff]  ;;  %v5343_v54 = vld [vmem:[%s9262_s1 + $0x260] sm:$0xff]  ;;  %v5358_v59 = vld [vmem:[%s9262_s1 + $0x3d8] sm:$0xff] }
  0x2a   : > { %559 = vmatpush.msra.mxu1 %v458_v19  ;;  %5648 = vmatpush.msra.mxu3 %v458_v19  ;;  %v5359_v55 = vld [vmem:[%s9262_s1 + $0x3e0] sm:$0xff]  ;;  %v5309_v60 = vld [vmem:[%s9262_s1 + $0x350] sm:$0xff]  ;;  %v5308_v5 = vld [vmem:[%s9262_s1 + $0x348] sm:$0xff] }
  0x2b   : > { %495 = vmatpush.msra.mxu0 %v6090_v20  ;;  %5633 = vmatpush.msra.mxu2 %v6090_v20  ;;  %v5325_v61 = vld [vmem:[%s9262_s1 + $0xd0] sm:$0xff]  ;;  %v5324_v7 = vld [vmem:[%s9262_s1 + $0xc8] sm:$0xff]  ;;  %v5307_v13 = vld [vmem:[%s9262_s1 + $0x340] sm:$0xff] }
  0x2c   : > { %560 = vmatpush.msra.mxu1 %v457_v21  ;;  %5649 = vmatpush.msra.mxu3 %v457_v21  ;;  %v5341_v62 = vld [vmem:[%s9262_s1 + $0x250] sm:$0xff]  ;;  %v5340_v9 = vld [vmem:[%s9262_s1 + $0x248] sm:$0xff]  ;;  %v5323_v15 = vld [vmem:[%s9262_s1 + $0xc0] sm:$0xff] }
  0x2d   : > { %496 = vmatpush.msra.mxu0 %v6101_v22  ;;  %5634 = vmatpush.msra.mxu2 %v6101_v22  ;;  %v5357_v63 = vld [vmem:[%s9262_s1 + $0x3d0] sm:$0xff]  ;;  %v5356_v11 = vld [vmem:[%s9262_s1 + $0x3c8] sm:$0xff]  ;;  %v5339_v17 = vld [vmem:[%s9262_s1 + $0x240] sm:$0xff] }
  0x2e   : > { %561 = vmatpush.msra.mxu1 %v456_v23  ;;  %5650 = vmatpush.msra.mxu3 %v456_v23  ;;  %v6269_v1 = vld [vmem:[%s6141_s11 + $0x30] sm:$0xff]  ;;  %v5355_v19 = vld [vmem:[%s9262_s1 + $0x3c0] sm:$0xff]  ;;  %v5306_v21 = vld [vmem:[%s9262_s1 + $0x338] sm:$0xff] }
  0x2f   : > { %497 = vmatpush.msra.mxu0 %v6109_v24  ;;  %5635 = vmatpush.msra.mxu2 %v6109_v24  ;;  %v6272_v3 = vld [vmem:[%s6141_s11 + $0x90] sm:$0xff]  ;;  %v5322_v23 = vld [vmem:[%s9262_s1 + $0xb8] sm:$0xff] }
  0x30   : > { %562 = vmatpush.msra.mxu1 %v455_v25  ;;  %5651 = vmatpush.msra.mxu3 %v455_v25  ;;  %v5338_v25 = vld [vmem:[%s9262_s1 + $0x238] sm:$0xff] }
  0x31   : > { %498 = vmatpush.msra.mxu0 %v6121_v26  ;;  %5636 = vmatpush.msra.mxu2 %v6121_v26 }
  0x32   : > { %563 = vmatpush.msra.mxu1 %v454_v27  ;;  %5652 = vmatpush.msra.mxu3 %v454_v27  ;;  %v5354_v27 = vld [vmem:[%s9262_s1 + $0x3b8] sm:$0xff] }
  0x33   : > { %499 = vmatpush.msra.mxu0 %v6131_v28  ;;  %5637 = vmatpush.msra.mxu2 %v6131_v28 }
  0x34   : > { %564 = vmatpush.msra.mxu1 %v453_v29  ;;  %5653 = vmatpush.msra.mxu3 %v453_v29  ;;  %v6315_v29 = vld [vmem:[%s6141_s11 + $0x38] sm:$0xff] }
  0x35   : > { %500 = vmatpush.msra.mxu0 %v6146_v30  ;;  %5638 = vmatpush.msra.mxu2 %v6146_v30 }
  0x36   : > { %565 = vmatpush.msra.mxu1 %v452_v31  ;;  %5654 = vmatpush.msra.mxu3 %v452_v31  ;;  %v6318_v31 = vld [vmem:[%s6141_s11 + $0x98] sm:$0xff] }
  0x37   : > { %501 = vmatmul.f32.vlgmr.msra.gmra.mxu0 %v6154_v32  ;;  %525 = vmatmul.f32.vlgmr.msra.gmra.mxu2 %v6157_v33 }
  0x38   : > { %566 = vmatmul.f32.vlgmr.msra.gmra.mxu1 %v6162_v34  ;;  %590 = vmatmul.f32.vlgmr.msra.gmra.mxu3 %v6165_v35 }
  0x39   : > { %632 = vmatpush.msrb.mxu2 %v6170_v36  ;;  %811 = vmatpush.msrb.mxu3 %v5330_v37  ;;  %v5305_v37 = vld [vmem:[%s9262_s1 + $0x330] sm:$0xff] }
  0x3a   : > { %919 = vmatpush.msrb.mxu0 %v6180_v38  ;;  %1027 = vmatpush.msrb.mxu1 %v5362_v39  ;;  %v5321_v39 = vld [vmem:[%s9262_s1 + $0xb0] sm:$0xff] }
  0x3b   : > { %633 = vmatpush.msrb.mxu2 %v6190_v40  ;;  %812 = vmatpush.msrb.mxu3 %v5329_v41  ;;  %v5337_v41 = vld [vmem:[%s9262_s1 + $0x230] sm:$0xff] }
  0x3c   : > { %920 = vmatpush.msrb.mxu0 %v5345_v42  ;;  %1028 = vmatpush.msrb.mxu1 %v5361_v43  ;;  %v5353_v42 = vld [vmem:[%s9262_s1 + $0x3b0] sm:$0xff]  ;;  %v5304_v43 = vld [vmem:[%s9262_s1 + $0x328] sm:$0xff] }
  0x3d   : > { %634 = vmatpush.msrb.mxu2 %v5312_v44  ;;  %813 = vmatpush.msrb.mxu3 %v5328_v45  ;;  %v5320_v44 = vld [vmem:[%s9262_s1 + $0xa8] sm:$0xff] }
  0x3e   : > { %921 = vmatpush.msrb.mxu0 %v5344_v46  ;;  %1029 = vmatpush.msrb.mxu1 %v5360_v47  ;;  %v5336_v45 = vld [vmem:[%s9262_s1 + $0x228] sm:$0xff]  ;;  %v5303_v47 = vld [vmem:[%s9262_s1 + $0x320] sm:$0xff] }
  0x3f   : > { %504 = vmatmul.f32.gmra.mxu0 %v6217_v48  ;;  %528 = vmatmul.f32.gmra.mxu2 %v6220_v49  ;;  %v5352_v46 = vld [vmem:[%s9262_s1 + $0x3a8] sm:$0xff] }
  0x40   : > { %569 = vmatmul.f32.gmra.mxu1 %v6223_v50  ;;  %593 = vmatmul.f32.gmra.mxu3 %v6226_v51 }
  0x41   : > { %635 = vmatpush.msrb.mxu2 %v5311_v52  ;;  %814 = vmatpush.msrb.mxu3 %v5327_v53  ;;  %v5319_v52 = vld [vmem:[%s9262_s1 + $0xa0] sm:$0xff] }
  0x42   : > { %922 = vmatpush.msrb.mxu0 %v5343_v54  ;;  %1030 = vmatpush.msrb.mxu1 %v5359_v55  ;;  %v5335_v53 = vld [vmem:[%s9262_s1 + $0x220] sm:$0xff]  ;;  %v6361_v55 = vld [vmem:[%s6141_s11 + $0x48] sm:$0xff] }
  0x43   : > { %636 = vmatpush.msrb.mxu2 %v5310_v56  ;;  %815 = vmatpush.msrb.mxu3 %v5326_v57  ;;  %v5351_v54 = vld [vmem:[%s9262_s1 + $0x3a0] sm:$0xff]  ;;  %v6364_v56 = vld [vmem:[%s6141_s11 + $0xa8] sm:$0xff]  ;;  %v5302_v57 = vld [vmem:[%s9262_s1 + $0x318] sm:$0xff] }
  0x44   : > { %923 = vmatpush.msrb.mxu0 %v5342_v58  ;;  %1031 = vmatpush.msrb.mxu1 %v5358_v59  ;;  %v5318_v58 = vld [vmem:[%s9262_s1 + $0x98] sm:$0xff] }
  0x45   : > { %637 = vmatpush.msrb.mxu2 %v5309_v60  ;;  %816 = vmatpush.msrb.mxu3 %v5325_v61  ;;  %v5334_v59 = vld [vmem:[%s9262_s1 + $0x218] sm:$0xff]  ;;  %v5301_v61 = vld [vmem:[%s9262_s1 + $0x310] sm:$0xff] }
  0x46   : > { %924 = vmatpush.msrb.mxu0 %v5341_v62  ;;  %1032 = vmatpush.msrb.mxu1 %v5357_v63  ;;  %v5350_v60 = vld [vmem:[%s9262_s1 + $0x398] sm:$0xff]  ;;  %v5317_v62 = vld [vmem:[%s9262_s1 + $0x90] sm:$0xff] }
  0x47   : > { %507 = vmatmul.f32.gmra.mxu0 %v6269_v1  ;;  %531 = vmatmul.f32.gmra.mxu2 %v6272_v3  ;;  %v5333_v63 = vld [vmem:[%s9262_s1 + $0x210] sm:$0xff] }
  0x48   : > { %572 = vmatmul.f32.gmra.mxu1 %v6154_v32  ;;  %596 = vmatmul.f32.gmra.mxu3 %v6157_v33 }
  0x49   : > { %638 = vmatpush.msrb.mxu2 %v5308_v5  ;;  %817 = vmatpush.msrb.mxu3 %v5324_v7  ;;  %v5349_v5 = vld [vmem:[%s9262_s1 + $0x390] sm:$0xff]  ;;  %v5300_v7 = vld [vmem:[%s9262_s1 + $0x308] sm:$0xff] }
  0x4a   : > { %925 = vmatpush.msrb.mxu0 %v5340_v9  ;;  %1033 = vmatpush.msrb.mxu1 %v5356_v11  ;;  %v5316_v9 = vld [vmem:[%s9262_s1 + $0x88] sm:$0xff] }
  0x4b   : > { %639 = vmatpush.msrb.mxu2 %v5307_v13  ;;  %818 = vmatpush.msrb.mxu3 %v5323_v15  ;;  %v5332_v11 = vld [vmem:[%s9262_s1 + $0x208] sm:$0xff]  ;;  %v6407_v15 = vld [vmem:[%s6141_s11 + $0x50] sm:$0xff] }
  0x4c   : > { %926 = vmatpush.msrb.mxu0 %v5339_v17  ;;  %1034 = vmatpush.msrb.mxu1 %v5355_v19  ;;  %v5348_v13 = vld [vmem:[%s9262_s1 + $0x388] sm:$0xff]  ;;  %v6410_v17 = vld [vmem:[%s6141_s11 + $0xb0] sm:$0xff]  ;;  %v5299_v19 = vld [vmem:[%s9262_s1 + $0x300] sm:$0xff] }
  0x4d   : > { %640 = vmatpush.msrb.mxu2 %v5306_v21  ;;  %819 = vmatpush.msrb.mxu3 %v5322_v23  ;;  %v5315_v21 = vld [vmem:[%s9262_s1 + $0x80] sm:$0xff] }
  0x4e   : > { %927 = vmatpush.msrb.mxu0 %v5338_v25  ;;  %1035 = vmatpush.msrb.mxu1 %v5354_v27  ;;  %v5331_v23 = vld [vmem:[%s9262_s1 + $0x200] sm:$0xff]  ;;  %v5378_v27 = vld [vmem:[%s9262_s1 + $0x178] sm:$0xff] }
  0x4f   : > { %510 = vmatmul.f32.gmra.mxu0 %v6315_v29  ;;  %534 = vmatmul.f32.gmra.mxu2 %v6318_v31  ;;  %v5347_v25 = vld [vmem:[%s9262_s1 + $0x380] sm:$0xff] }
  0x50   : > { %575 = vmatmul.f32.gmra.mxu1 %v6217_v48  ;;  %599 = vmatmul.f32.gmra.mxu3 %v6220_v49 }
  0x51   : > { %641 = vmatpush.msrb.mxu2 %v5305_v37  ;;  %820 = vmatpush.msrb.mxu3 %v5321_v39  ;;  %v5394_v37 = vld [vmem:[%s9262_s1 + $0x2f8] sm:$0xff] }
  0x52   : > { %928 = vmatpush.msrb.mxu0 %v5337_v41  ;;  %1036 = vmatpush.msrb.mxu1 %v5353_v42  ;;  %v5410_v39 = vld [vmem:[%s9262_s1 + $0x478] sm:$0xff]  ;;  %v5377_v41 = vld [vmem:[%s9262_s1 + $0x170] sm:$0xff] }
  0x53   : > { %642 = vmatpush.msrb.mxu2 %v5304_v43  ;;  %821 = vmatpush.msrb.mxu3 %v5320_v44  ;;  %v5393_v42 = vld [vmem:[%s9262_s1 + $0x2f0] sm:$0xff]  ;;  %v6444_v43 = vld [vmem:[%s6141_s11 + $0xc0] sm:$0xff]  ;;  %v5376_v44 = vld [vmem:[%s9262_s1 + $0x168] sm:$0xff] }
  0x54   : > { %929 = vmatpush.msrb.mxu0 %v5336_v45  ;;  %1037 = vmatpush.msrb.mxu1 %v5352_v46  ;;  %v6463_v45 = vld [vmem:[%s6141_s11 + $0xc8] sm:$0xff]  ;;  %v738_v46 = vrot.slane %v6162_v34, 1 }
  0x55   : > { %643 = vmatpush.msrb.mxu2 %v5303_v47  ;;  %822 = vmatpush.msrb.mxu3 %v5319_v52  ;;  %v743_v47 = vrot.slane %v6154_v32, 1  ;;  %v5408_v52 = vld [vmem:[%s9262_s1 + $0x468] sm:$0xff] }
  0x56   : > { %930 = vmatpush.msrb.mxu0 %v5335_v53  ;;  %1038 = vmatpush.msrb.mxu1 %v5351_v54  ;;  %v739_v53 = vrot.slane %v6223_v50, 1  ;;  %v748_v54 = vrot.slane %v6269_v1, 1 }
  0x57   : > { %513 = vmatmul.f32.gmra.mxu0 %v6361_v55  ;;  %537 = vmatmul.f32.gmra.mxu2 %v6364_v56 }
  0x58   : > { %578 = vmatmul.f32.gmra.mxu1 %v6269_v1  ;;  %602 = vmatmul.f32.gmra.mxu3 %v6272_v3 }
  0x59   : > { %644 = vmatpush.msrb.mxu2 %v5302_v57  ;;  %823 = vmatpush.msrb.mxu3 %v5318_v58  ;;  %v749_v57 = vrot.slane %v6315_v29, 1 }
  0x5a   : > { %931 = vmatpush.msrb.mxu0 %v5334_v59  ;;  %1039 = vmatpush.msrb.mxu1 %v5350_v60  ;;  %v740_v59 = vsel %vm737_vm0, %v738_v46, %v739_v53  ;;  %v5386_v46 = vld [vmem:[%s9262_s1 + $0x2b8] sm:$0xff] }
  0x5b   : > { %645 = vmatpush.msrb.mxu2 %v5301_v61  ;;  %824 = vmatpush.msrb.mxu3 %v5317_v62  ;;  %v6491_v60 = vsel %vm737_vm0, %v748_v54, %v749_v57  ;;  %v6494_v61 = vld [vmem:[%s6141_s11 + $0x28] sm:$0x3]  ;;  %v6497_v62 = vld [vmem:[%s6141_s11 + $0x10] sm:$0x3]  ;;  %v764_v54 = vrot.slane %v6220_v49, 1 }
  0x5c   : > { %932 = vmatpush.msrb.mxu0 %v5333_v63  ;;  %1040 = vmatpush.msrb.mxu1 %v5349_v5  ;;  %v6500_v63 = vld [vmem:[%s6141_s11 + $0x40] sm:$0x3]  ;;  %v5390_v5 = vld [vmem:[%s9262_s1 + $0x2d8] sm:$0xff] }
  0x5d   : > { %646 = vmatpush.msrb.mxu2 %v5300_v7  ;;  %825 = vmatpush.msrb.mxu3 %v5316_v9  ;;  %v741_v7 = vrot.slane %v6497_v62, 1  ;;  %v751_v9 = vrot.slane %v6500_v63, 1 }
  0x5e   : > { %933 = vmatpush.msrb.mxu0 %v5332_v11  ;;  %1041 = vmatpush.msrb.mxu1 %v5348_v13 }
  0x5f   : > { %516 = vmatmul.f32.gmra.mxu0 %v6407_v15  ;;  %540 = vmatmul.f32.gmra.mxu2 %v6410_v17  ;;  %v742_v13 = vsel %vm737_vm0, %v739_v53, %v741_v7  ;;  %v763_v53 = vrot.slane %v6157_v33, 1  ;;  %v768_v7 = vrot.slane %v6272_v3, 1 }
  0x60   : > { %581 = vmatmul.f32.gmra.mxu1 %v6315_v29  ;;  %605 = vmatmul.f32.gmra.mxu3 %v6318_v31 }
  0x61   : > { %647 = vmatpush.msrb.mxu2 %v5299_v19  ;;  %826 = vmatpush.msrb.mxu3 %v5315_v21  ;;  %v752_v19 = vsel %vm737_vm0, %v749_v57, %v751_v9  ;;  %v5406_v21 = vld [vmem:[%s9262_s1 + $0x458] sm:$0xff]  ;;  %v6603_v57 = vld [vmem:[%s6141_s11 + $0x88] sm:$0x3] }
  0x62   : > { %934 = vmatpush.msrb.mxu0 %v5331_v23  ;;  %1042 = vmatpush.msrb.mxu1 %v5347_v25  ;;  %v754_v23 = vrot.slane %v6407_v15, 1 }
  0x63   : > { %1182 = vmatpush.msra.mxu2 %v5378_v27  ;;  %1287 = vmatpush.msra.mxu3 %v5394_v37  ;;  %v6539_v27 = vld [vmem:[%s6141_s11 + $0x58] sm:$0x3]  ;;  %v5372_v37 = vld [vmem:[%s9262_s1 + $0x148] sm:$0xff] }
  0x64   : > { %1392 = vmatpush.msra.mxu0 %v5410_v39  ;;  %1607 = vmatpush.msra.mxu1 %v5991_v0  ;;  %v5392_v0 = vld [vmem:[%s9262_s1 + $0x2e8] sm:$0xff] }
  0x65   : > { %1183 = vmatpush.msra.mxu2 %v5377_v41  ;;  %1288 = vmatpush.msra.mxu3 %v5393_v42  ;;  %v5371_v41 = vld [vmem:[%s9262_s1 + $0x140] sm:$0xff]  ;;  %v758_v42 = vrot.slane %v6165_v35, 1 }
  0x66   : > { %1608 = vmatpush.msra.mxu1 %v5999_v2  ;;  %v5409_v2 = vld [vmem:[%s9262_s1 + $0x470] sm:$0xff] }
  0x67   : > { %519 = vmatmul.f32.gmra.mxu0 %v6165_v35  ;;  %543 = vmatmul.f32.gmra.mxu2 %v6444_v43 }
  0x68   : > { %584 = vmatmul.f32.gmra.mxu1 %v6361_v55  ;;  %608 = vmatmul.f32.gmra.mxu3 %v6364_v56 }
  0x69   : > { %1184 = vmatpush.msra.mxu2 %v5376_v44  ;;  %1289 = vmatpush.msra.mxu3 %v5392_v0  ;;  %v6572_v0 = vld [vmem:[%s6141_s11 + $0x70] sm:$0x3] }
  0x6a   : > { %1393 = vmatpush.msra.mxu0 %v5409_v2  ;;  %1609 = vmatpush.msra.mxu1 %v6009_v4  ;;  %v744_v4 = vrot.slane %v6217_v48, 1  ;;  %v5370_v2 = vld [vmem:[%s9262_s1 + $0x138] sm:$0xff] }
  0x6c   : > { %1610 = vmatpush.msra.mxu1 %v6019_v6  ;;  %v5375_v6 = vld [vmem:[%s9262_s1 + $0x160] sm:$0xff]  ;;  %1394 = vmatpush.msra.mxu0 %v5408_v52  ;;  %v745_v58 = vsel %vm737_vm0, %v743_v47, %v744_v4  ;;  %v5402_v52 = vld [vmem:[%s9262_s1 + $0x438] sm:$0xff] }
  0x6d   : > { %1185 = vmatpush.msra.mxu2 %v5375_v6  ;;  %v5403_v47 = vld [vmem:[%s9262_s1 + $0x440] sm:$0xff]  ;;  %v5369_v6 = vld [vmem:[%s9262_s1 + $0x130] sm:$0xff] }
  0x6e   : > { %1611 = vmatpush.msra.mxu1 %v6029_v8  ;;  %v5391_v8 = vld [vmem:[%s9262_s1 + $0x2e0] sm:$0xff] }
  0x6f   : > { %522 = vmatmul.f32.gmra.mxu0 %v6226_v51  ;;  %546 = vmatmul.f32.gmra.mxu2 %v6463_v45 }
  0x70   : > { %587 = vmatmul.f32.gmra.mxu1 %v6407_v15  ;;  %611 = vmatmul.f32.gmra.mxu3 %v6410_v17 }
  0x71   : > { %1290 = vmatpush.msra.mxu3 %v5391_v8  ;;  %1612 = vmatpush.msra.mxu1 %v6039_v10  ;;  %v746_v10 = vrot.slane %v6494_v61, 1  ;;  %v5385_v8 = vld [vmem:[%s9262_s1 + $0x2b0] sm:$0xff] }
  0x73   : > { %1613 = vmatpush.msra.mxu1 %v6049_v12  ;;  %v5374_v12 = vld [vmem:[%s9262_s1 + $0x158] sm:$0xff]  ;;  %1291 = vmatpush.msra.mxu3 %v5390_v5  ;;  %v747_v11 = vsel %vm737_vm0, %v744_v4, %v746_v10  ;;  %v761_v4 = vrot.slane %v6572_v0, 1  ;;  %v766_v10 = vrot.slane %v6603_v57, 1  ;;  %v5383_v5 = vld [vmem:[%s9262_s1 + $0x2a0] sm:$0xff] }
  0x74   : > { %1186 = vmatpush.msra.mxu2 %v5374_v12  ;;  %v5367_v12 = vld [vmem:[%s9262_s1 + $0x120] sm:$0xff] }
  0x75   : > { %1614 = vmatpush.msra.mxu1 %v6059_v14  ;;  %v5407_v14 = vld [vmem:[%s9262_s1 + $0x460] sm:$0xff] }
  0x76   : > { %1395 = vmatpush.msra.mxu0 %v5407_v14  ;;  %v5400_v14 = vld [vmem:[%s9262_s1 + $0x428] sm:$0xff] }
  0x77   : > { %648 = vmatmul.f32.vlgmr.msrb.gmra.mxu2 %v6269_v1  ;;  %935 = vmatmul.f32.vlgmr.msrb.gmra.mxu0 %v745_v58 }
  0x78   : > { %827 = vmatmul.f32.vlgmr.msrb.gmra.mxu3 %v740_v59  ;;  %1043 = vmatmul.f32.vlgmr.msrb.gmra.mxu1 %v6491_v60  ;;  %v5384_v59 = vld [vmem:[%s9262_s1 + $0x2a8] sm:$0xff] }
  0x79   : > { %1615 = vmatpush.msra.mxu1 %v6069_v16  ;;  %v5373_v16 = vld [vmem:[%s9262_s1 + $0x150] sm:$0xff]  ;;  %1396 = vmatpush.msra.mxu0 %v5406_v21  ;;  %v5399_v21 = vld [vmem:[%s9262_s1 + $0x420] sm:$0xff] }
  0x7a   : > { %1187 = vmatpush.msra.mxu2 %v5373_v16  ;;  %v5366_v16 = vld [vmem:[%s9262_s1 + $0x118] sm:$0xff] }
  0x7b   : > { %1616 = vmatpush.msra.mxu1 %v6080_v18  ;;  %v5389_v18 = vld [vmem:[%s9262_s1 + $0x2d0] sm:$0xff] }
  0x7c   : > { %1292 = vmatpush.msra.mxu3 %v5389_v18  ;;  %1188 = vmatpush.msra.mxu2 %v5372_v37  ;;  %v5382_v18 = vld [vmem:[%s9262_s1 + $0x298] sm:$0xff] }
  0x7d   : > { %1617 = vmatpush.msra.mxu1 %v6090_v20  ;;  %v753_v20 = vrot.slane %v6361_v55, 1 }
  0x7e   : > { %1189 = vmatpush.msra.mxu2 %v5371_v41  ;;  %v5398_v41 = vld [vmem:[%s9262_s1 + $0x418] sm:$0xff] }
  0x7f   : > { %651 = vmatmul.f32.gmra.mxu2 %v6315_v29  ;;  %938 = vmatmul.f32.gmra.mxu0 %v747_v11  ;;  %v755_v25 = vsel %vm737_vm0, %v753_v20, %v754_v23 }
  0x80   : > { %830 = vmatmul.f32.gmra.mxu3 %v742_v13  ;;  %1046 = vmatmul.f32.gmra.mxu1 %v752_v19 }
  0x81   : > { %1618 = vmatpush.msra.mxu1 %v6101_v22  ;;  %v5388_v22 = vld [vmem:[%s9262_s1 + $0x2c8] sm:$0xff]  ;;  %1190 = vmatpush.msra.mxu2 %v5370_v2 }
  0x82   : > { %1293 = vmatpush.msra.mxu3 %v5388_v22 }
  0x83   : > { %1619 = vmatpush.msra.mxu1 %v6109_v24  ;;  %v5405_v24 = vld [vmem:[%s9262_s1 + $0x450] sm:$0xff]  ;;  %1191 = vmatpush.msra.mxu2 %v5369_v6 }
  0x84   : > { %1397 = vmatpush.msra.mxu0 %v5405_v24  ;;  %v5397_v6 = vld [vmem:[%s9262_s1 + $0x410] sm:$0xff] }
  0x85   : > { %1620 = vmatpush.msra.mxu1 %v6121_v26  ;;  %v756_v26 = vrot.slane %v6539_v27, 1 }
  0x87   : > { %654 = vmatmul.f32.gmra.mxu2 %v6361_v55  ;;  %941 = vmatmul.f32.gmra.mxu0 %v6491_v60  ;;  %v757_v39 = vsel %vm737_vm0, %v754_v23, %v756_v26  ;;  %v5365_v26 = vld [vmem:[%s9262_s1 + $0x110] sm:$0xff] }
  0x88   : > { %833 = vmatmul.f32.gmra.mxu3 %v745_v58  ;;  %1049 = vmatmul.f32.gmra.mxu1 %v755_v25  ;;  %v5368_v58 = vld [vmem:[%s9262_s1 + $0x128] sm:$0xff] }
  0x89   : > { %1621 = vmatpush.msra.mxu1 %v6131_v28  ;;  %v5387_v28 = vld [vmem:[%s9262_s1 + $0x2c0] sm:$0xff]  ;;  %1192 = vmatpush.msra.mxu2 %v5368_v58 }
  0x8a   : > { %1294 = vmatpush.msra.mxu3 %v5387_v28  ;;  %v774_v28 = vrot.slane %v6410_v17, 1 }
  0x8b   : > { %1622 = vmatpush.msra.mxu1 %v6146_v30  ;;  %v5404_v30 = vld [vmem:[%s9262_s1 + $0x448] sm:$0xff]  ;;  %1193 = vmatpush.msra.mxu2 %v5367_v12  ;;  %v896_v12 = vrot.slane %v6463_v45, 1 }
  0x8c   : > { %1398 = vmatpush.msra.mxu0 %v5404_v30  ;;  %1295 = vmatpush.msra.mxu3 %v5386_v46 }
  0x8d   : > { %2037 = vmatpush.msrb.mxu1 %v6180_v38  ;;  %v759_v38 = vrot.slane %v6226_v51, 1  ;;  %1194 = vmatpush.msra.mxu2 %v5366_v16 }
  0x8e   : > { %1399 = vmatpush.msra.mxu0 %v5403_v47  ;;  %1296 = vmatpush.msra.mxu3 %v5385_v8  ;;  %v6689_v47 = vld [vmem:[%s6141_s11 + $0xb8] sm:$0x3] }
  0x8f   : > { %657 = vmatmul.f32.gmra.mxu2 %v6407_v15  ;;  %944 = vmatmul.f32.gmra.mxu0 %v752_v19  ;;  %v760_v44 = vsel %vm737_vm0, %v758_v42, %v759_v38 }
  0x90   : > { %836 = vmatmul.f32.gmra.mxu3 %v747_v11  ;;  %1052 = vmatmul.f32.gmra.mxu1 %v757_v39 }
  0x91   : > { %1400 = vmatpush.msra.mxu0 %v5402_v52  ;;  %1297 = vmatpush.msra.mxu3 %v5384_v59  ;;  %v5363_v59 = vld [vmem:[%s9262_s1 + $0x100] sm:$0xff] }
  0x92   : > { %1195 = vmatpush.msra.mxu2 %v5365_v26 }
  0x93   : > { %1298 = vmatpush.msra.mxu3 %v5383_v5  ;;  %v1110_v5 = vrot.slane %v6223_v50, 2  ;;  %v1124_v50 = vrot.slane %v6361_v55, 2 }
  0x95   : > { %1299 = vmatpush.msra.mxu3 %v5382_v18 }
  0x97   : > { %660 = vmatmul.f32.gmra.mxu2 %v6165_v35  ;;  %947 = vmatmul.f32.gmra.mxu0 %v755_v25  ;;  %v762_v35 = vsel %vm737_vm0, %v759_v38, %v761_v4  ;;  %v5364_v4 = vld [vmem:[%s9262_s1 + $0x108] sm:$0xff] }
  0x98   : > { %839 = vmatmul.f32.gmra.mxu3 %v6491_v60  ;;  %1055 = vmatmul.f32.gmra.mxu1 %v760_v44  ;;  %v5401_v60 = vld [vmem:[%s9262_s1 + $0x430] sm:$0xff] }
  0x99   : > { %1401 = vmatpush.msra.mxu0 %v5401_v60  ;;  %1196 = vmatpush.msra.mxu2 %v5364_v4  ;;  %v5379_v60 = vld [vmem:[%s9262_s1 + $0x280] sm:$0xff]  ;;  %v1589_v4 = vld [vmem:[%s9262_s1 + $0x70] sm:$0xff] }
  0x9b   : > { %1402 = vmatpush.msra.mxu0 %v5400_v14  ;;  %1197 = vmatpush.msra.mxu2 %v5363_v59 }
  0x9d   : > { %1403 = vmatpush.msra.mxu0 %v5399_v21 }
  0x9f   : > { %663 = vmatmul.f32.gmra.mxu2 %v6226_v51  ;;  %950 = vmatmul.f32.gmra.mxu0 %v757_v39  ;;  %v6600_v51 = vsel %vm737_vm0, %v763_v53, %v764_v54 }
  0xa0   : > { %842 = vmatmul.f32.gmra.mxu3 %v752_v19  ;;  %1058 = vmatmul.f32.gmra.mxu1 %v762_v35  ;;  %v6641_v19 = vld [vmem:[%s6141_s11 + $0xa0] sm:$0x3] }
  0xa1   : > { %v771_v20 = vrot.slane %v6641_v19, 1  ;;  %1404 = vmatpush.msra.mxu0 %v5398_v41 }
  0xa3   : > { %1405 = vmatpush.msra.mxu0 %v5397_v6 }
  0xa7   : > { %666 = vmatmul.f32.gmra.mxu2 %v6157_v33  ;;  %953 = vmatmul.f32.gmra.mxu0 %v760_v44  ;;  %v6618_v33 = vsel %vm737_vm0, %v764_v54, %v766_v10  ;;  %v5396_v10 = vld [vmem:[%s9262_s1 + $0x408] sm:$0xff] }
  0xa8   : > { %845 = vmatmul.f32.gmra.mxu3 %v755_v25  ;;  %1061 = vmatmul.f32.gmra.mxu1 %v6600_v51 }
  0xa9   : > { %1406 = vmatpush.msra.mxu0 %v5396_v10  ;;  %v6802_v10 = vld [vmem:[%s6141_s11 + $0xe8] sm:$0x3] }
  0xaf   : > { %669 = vmatmul.f32.gmra.mxu2 %v6220_v49  ;;  %956 = vmatmul.f32.gmra.mxu0 %v762_v35  ;;  %v769_v49 = vrot.slane %v6318_v31, 1 }
  0xb0   : > { %848 = vmatmul.f32.gmra.mxu3 %v757_v39  ;;  %1064 = vmatmul.f32.gmra.mxu1 %v6618_v33  ;;  %v5381_v39 = vld [vmem:[%s9262_s1 + $0x290] sm:$0xff] }
  0xb1   : > { %v6638_v13 = vsel %vm737_vm0, %v768_v7, %v769_v49  ;;  %v6663_v24 = vsel %vm737_vm0, %v769_v49, %v771_v20  ;;  %1300 = vmatpush.msra.mxu3 %v5381_v39  ;;  %v1114_v7 = vrot.slane %v6154_v32, 2  ;;  %v1115_v49 = vrot.slane %v6217_v48, 2  ;;  %v1585_v48 = vld [vmem:[%s9262_s1 + $0x50] sm:$0xff] }
  0xb4   : > { %v6633_v9 = vpop.f32.mrf.mxu0 }
  0xb5   : > { %v6635_v11 = vpop.f32.mrf.mxu1 }
  0xb7   : > { %672 = vmatmul.f32.gmra.mxu2 %v6272_v3  ;;  %959 = vmatmul.f32.gmra.mxu0 %v6600_v51 }
  0xb8   : > { %851 = vmatmul.f32.gmra.mxu3 %v760_v44  ;;  %1067 = vmatmul.f32.gmra.mxu1 %v6638_v13 }
  0xba   : > { %v526_v3 = vpop.f32.mrf.mxu2 }
  0xbb   : > { %v591_v23 = vpop.f32.mrf.mxu3 }
  0xbc   : > { %v6656_v25 = vadd.f32 %v591_v23, %v526_v3  ;;  %v6658_v37 = vpop.f32.mrf.mxu0  ;;  %v5395_v3 = vld [vmem:[%s9262_s1 + $0x400] sm:$0xff]  ;;  %v1590_v23 = vld [vmem:[%s9262_s1 + $0x78] sm:$0xff] }
  0xbd   : > { %v6660_v22 = vpop.f32.mrf.mxu1  ;;  %1407 = vmatpush.msra.mxu0 %v5395_v3  ;;  %1672 = vmatpush.msrb.mxu2 %v1590_v23 }
  0xbf   : > { %675 = vmatmul.f32.gmra.mxu2 %v6318_v31  ;;  %962 = vmatmul.f32.gmra.mxu0 %v6618_v33  ;;  %v773_v31 = vrot.slane %v6364_v56, 1 }
  0xc0   : > { %854 = vmatmul.f32.gmra.mxu3 %v762_v35  ;;  %1070 = vmatmul.f32.gmra.mxu1 %v6663_v24  ;;  %v5380_v35 = vld [vmem:[%s9262_s1 + $0x288] sm:$0xff] }
  0xc1   : > { %v6686_v46 = vsel %vm737_vm0, %v773_v31, %v774_v28  ;;  %1301 = vmatpush.msra.mxu3 %v5380_v35  ;;  %v5488_v35 = vld [vmem:[%s9262_s1 + $0xf8] sm:$0xff]  ;;  %1673 = vmatpush.msrb.mxu2 %v1589_v4  ;;  %v1587_v4 = vld [vmem:[%s9262_s1 + $0x60] sm:$0xff] }
  0xc2   : > { %v529_v30 = vpop.f32.mrf.mxu2  ;;  %1930 = vmatpush.msrb.mxu0 %v5488_v35  ;;  %v5469_v35 = vld [vmem:[%s9262_s1 + $0x360] sm:$0xff] }
  0xc3   : > { %v594_v42 = vpop.f32.mrf.mxu3  ;;  %1302 = vmatpush.msra.mxu3 %v5379_v60 }
  0xc4   : > { %v6679_v38 = vadd.f32 %v594_v42, %v529_v30  ;;  %v6681_v44 = vpop.f32.mrf.mxu0  ;;  %v6773_v42 = vld [vmem:[%s6141_s11 + $0xd8] sm:$0xff] }
  0xc5   : > { %v6683_v2 = vpop.f32.mrf.mxu1  ;;  %1753 = vmatpush.msrb.mxu3 %v6170_v36  ;;  %v6746_v36 = vld [vmem:[%s6141_s11 + $0xd0] sm:$0x3]  ;;  %v1003_v6 = vrot.slane %v6773_v42, 1 }
  0xc6   : > { %v898_v26 = vrot.slane %v6746_v36, 1 }
  0xc7   : > { %678 = vmatmul.f32.gmra.mxu2 %v6364_v56  ;;  %965 = vmatmul.f32.gmra.mxu0 %v6638_v13  ;;  %v776_v56 = vrot.slane %v6689_v47, 1 }
  0xc8   : > { %857 = vmatmul.f32.gmra.mxu3 %v6600_v51  ;;  %1073 = vmatmul.f32.gmra.mxu1 %v6686_v46  ;;  %v899_v30 = vsel %vm737_vm0, %v896_v12, %v898_v26  ;;  %v5503_v26 = vld [vmem:[%s9262_s1 + $0x270] sm:$0xff] }
  0xc9   : > { %v6712_v58 = vsel %vm737_vm0, %v774_v28, %v776_v56  ;;  %1754 = vmatpush.msrb.mxu3 %v6190_v40  ;;  %v6758_v40 = vsel %vm1108_vm1, %v1114_v7, %v1115_v49  ;;  %2038 = vmatpush.msrb.mxu1 %v5503_v26 }
  0xca   : > { %v532_v8 = vpop.f32.mrf.mxu2 }
  0xcb   : > { %v597_v52 = vpop.f32.mrf.mxu3 }
  0xcc   : > { %v6705_v53 = vadd.f32 %v597_v52, %v532_v8  ;;  %v6707_v54 = vpop.f32.mrf.mxu0 }
  0xcd   : > { %v6709_v51 = vpop.f32.mrf.mxu1 }
  0xcf   : > { %681 = vmatmul.f32.gmra.mxu2 %v6410_v17  ;;  %968 = vmatmul.f32.gmra.mxu0 %v6663_v24  ;;  %v895_v17 = vrot.slane %v6444_v43, 1 }
  0xd0   : > { %860 = vmatmul.f32.gmra.mxu3 %v6618_v33  ;;  %1076 = vmatmul.f32.gmra.mxu1 %v6712_v58  ;;  %v1109_v33 = vrot.slane %v6162_v34, 2 }
  0xd1   : > { %v897_v34 = vsel %vm737_vm0, %v895_v17, %v896_v12  ;;  %v1588_v17 = vld [vmem:[%s9262_s1 + $0x68] sm:$0xff] }
  0xd2   : > { %v535_v14 = vpop.f32.mrf.mxu2  ;;  %v6751_v32 = vsel %vm1108_vm1, %v1109_v33, %v1110_v5  ;;  %v5470_v12 = vld [vmem:[%s9262_s1 + $0x368] sm:$0xff]  ;;  %v5487_v33 = vld [vmem:[%s9262_s1 + $0xf0] sm:$0xff]  ;;  %1674 = vmatpush.msrb.mxu2 %v1588_v17 }
  0xd3   : > { %v600_v16 = vpop.f32.mrf.mxu3  ;;  %1755 = vmatpush.msrb.mxu3 %v5470_v12  ;;  %1931 = vmatpush.msrb.mxu0 %v5487_v33  ;;  %v5502_v17 = vld [vmem:[%s9262_s1 + $0x268] sm:$0xff]  ;;  %v1112_v12 = vrot.slane %v6497_v62, 2  ;;  %v1122_v33 = vrot.slane %v6500_v63, 2 }
  0xd4   : > { %v6734_v18 = vadd.f32 %v600_v16, %v535_v14  ;;  %v6736_v21 = vpop.f32.mrf.mxu0  ;;  %v1006_v14 = vrot.slane %v6802_v10, 1  ;;  %1675 = vmatpush.msrb.mxu2 %v1587_v4  ;;  %2039 = vmatpush.msrb.mxu1 %v5502_v17 }
  0xd5   : > { %v6739_v20 = vpop.f32.mrf.mxu1  ;;  %1756 = vmatpush.msrb.mxu3 %v5469_v35  ;;  %v1113_v4 = vsel %vm1108_vm1, %v1110_v5, %v1112_v12  ;;  %v1125_v5 = vrot.slane %v6407_v15, 2 }
  0xd7   : > { %684 = vmatmul.f32.gmra.mxu2 %v6444_v43  ;;  %971 = vmatmul.f32.gmra.mxu0 %v6686_v46 }
  0xd8   : > { %863 = vmatmul.f32.gmra.mxu3 %v6638_v13  ;;  %1079 = vmatmul.f32.gmra.mxu1 %v897_v34  ;;  %v6776_v13 = vld [vmem:[%s6141_s11 + $0xe0] sm:$0xff] }
  0xd9   : > { %v6789_v56 = vrot.slane %v6776_v13, 1 }
  0xda   : > { %v538_v39 = vpop.f32.mrf.mxu2 }
  0xdb   : > { %v603_v41 = vpop.f32.mrf.mxu3  ;;  %v6799_v60 = vsel %vm737_vm0, %v1003_v6, %v6789_v56  ;;  %v1007_v23 = vsel %vm737_vm0, %v6789_v56, %v1006_v14  ;;  %v1586_v14 = vld [vmem:[%s9262_s1 + $0x58] sm:$0xff] }
  0xdc   : > { %v6765_v43 = vadd.f32 %v603_v41, %v538_v39  ;;  %v6767_v31 = vpop.f32.mrf.mxu0  ;;  %v1119_v39 = vrot.slane %v6269_v1, 2  ;;  %v1120_v41 = vrot.slane %v6315_v29, 2  ;;  %1676 = vmatpush.msrb.mxu2 %v1586_v14 }
  0xdd   : > { %v6769_v28 = vpop.f32.mrf.mxu1 }
  0xde   : > { %v6871_v35 = vsel %vm1108_vm1, %v1120_v41, %v1122_v33  ;;  %1677 = vmatpush.msrb.mxu2 %v1585_v48  ;;  %v6897_v33 = vsel %vm1108_vm1, %v1124_v50, %v1125_v5  ;;  %v6927_v50 = vld [vmem:[%s6141_s11 + $0xf8] sm:$0xff] }
  0xdf   : > { %687 = vmatmul.f32.gmra.mxu2 %v6463_v45  ;;  %974 = vmatmul.f32.gmra.mxu0 %v6712_v58 }
  0xe0   : > { %866 = vmatmul.f32.gmra.mxu3 %v6663_v24  ;;  %1082 = vmatmul.f32.gmra.mxu1 %v899_v30 }
  0xe2   : > { %v541_v45 = vpop.f32.mrf.mxu2 }
  0xe3   : > { %v606_v8 = vpop.f32.mrf.mxu3 }
  0xe4   : > { %v6791_v52 = vadd.f32 %v606_v8, %v541_v45  ;;  %v6793_v24 = vpop.f32.mrf.mxu0  ;;  %v6844_v45 = vsel %vm1108_vm1, %v1119_v39, %v1120_v41  ;;  %v5484_v41 = vld [vmem:[%s9262_s1 + $0xd8] sm:$0xff] }
  0xe5   : > { %v6795_v59 = vpop.f32.mrf.mxu1 }
  0xe7   : > { %690 = vmatmul.f32.gmra.mxu2 %v6773_v42  ;;  %977 = vmatmul.f32.gmra.mxu0 %v897_v34 }
  0xe8   : > { %869 = vmatmul.f32.gmra.mxu3 %v6686_v46  ;;  %1085 = vmatmul.f32.gmra.mxu1 %v6799_v60 }
  0xea   : > { %v544_v7 = vpop.f32.mrf.mxu2 }
  0xeb   : > { %v609_v46 = vpop.f32.mrf.mxu3 }
  0xec   : > { %v6817_v16 = vadd.f32 %v609_v46, %v544_v7  ;;  %v6819_v34 = vpop.f32.mrf.mxu0  ;;  %v5485_v7 = vld [vmem:[%s9262_s1 + $0xe0] sm:$0xff]  ;;  %v568_v46 = vadd.f32 %v6635_v11, %v6633_v9 }
  0xed   : > { %v6821_v3 = vpop.f32.mrf.mxu1  ;;  %v5501_v11 = vld [vmem:[%s9262_s1 + $0x260] sm:$0xff] }
  0xee   : > { %2040 = vmatpush.msrb.mxu1 %v5501_v11 }
  0xef   : > { %693 = vmatmul.f32.gmra.mxu2 %v6776_v13  ;;  %980 = vmatmul.f32.gmra.mxu0 %v899_v30  ;;  %v5486_v30 = vld [vmem:[%s9262_s1 + $0xe8] sm:$0xff] }
  0xf0   : > { %872 = vmatmul.f32.gmra.mxu3 %v6712_v58  ;;  %1088 = vmatmul.f32.gmra.mxu1 %v1007_v23  ;;  %v1117_v23 = vrot.slane %v6494_v61, 2 }
  0xf1   : > { %1932 = vmatpush.msrb.mxu0 %v5486_v30 }
  0xf2   : > { %v547_v58 = vpop.f32.mrf.mxu2  ;;  %v1118_v61 = vsel %vm1108_vm1, %v1115_v49, %v1117_v23  ;;  %v5467_v49 = vld [vmem:[%s9262_s1 + $0x350] sm:$0xff] }
  0xf3   : > { %v612_v1 = vpop.f32.mrf.mxu3  ;;  %1933 = vmatpush.msrb.mxu0 %v5485_v7  ;;  %v6900_v7 = vld [vmem:[%s6141_s11 + $0xf0] sm:$0xff] }
  0xf4   : > { %v6841_v6 = vadd.f32 %v612_v1, %v547_v58  ;;  %v936_v29 = vpop.f32.mrf.mxu0  ;;  %v571_v1 = vadd.f32 %v6660_v22, %v6658_v37  ;;  %v5500_v37 = vld [vmem:[%s9262_s1 + $0x258] sm:$0xff]  ;;  %v1127_v22 = vrot.slane %v6539_v27, 2  ;;  %v5483_v23 = vld [vmem:[%s9262_s1 + $0xd0] sm:$0xff] }
  0xf5   : > { %v1044_v8 = vpop.f32.mrf.mxu1  ;;  %1934 = vmatpush.msrb.mxu0 %v5484_v41  ;;  %2041 = vmatpush.msrb.mxu1 %v5500_v37  ;;  %v1583_v41 = vld [vmem:[%s9262_s1 + $0x40] sm:$0xff] }
  0xf7   : > { %1198 = vmatmul.f32.vlgmr.msra.gmra.mxu2 %v6751_v32  ;;  %1408 = vmatmul.f32.vlgmr.msra.gmra.mxu0 %v6844_v45  ;;  %v5468_v32 = vld [vmem:[%s9262_s1 + $0x358] sm:$0xff] }
  0xf8   : > { %1303 = vmatmul.f32.vlgmr.msra.gmra.mxu3 %v6758_v40  ;;  %1623 = vmatmul.f32.vlgmr.msra.gmra.mxu1 %v6773_v42 }
  0xf9   : > { %1757 = vmatpush.msrb.mxu3 %v5468_v32  ;;  %1935 = vmatpush.msrb.mxu0 %v5483_v23 }
  0xfa   : > { %v649_v62 = vpop.f32.mrf.mxu2 }
  0xfb   : > { %v697_v63 = vadd.f32 %v649_v62, %v568_v46  ;;  %v828_v26 = vpop.f32.mrf.mxu3  ;;  %1758 = vmatpush.msrb.mxu3 %v5467_v49  ;;  %v574_v62 = vadd.f32 %v6683_v2, %v6681_v44  ;;  %v5499_v2 = vld [vmem:[%s9262_s1 + $0x250] sm:$0xff] }
  0xfc   : > { %v939_v39 = vpop.f32.mrf.mxu0  ;;  %2042 = vmatpush.msrb.mxu1 %v5499_v2 }
  0xfd   : > { %v876_v30 = vadd.f32 %v828_v26, %v697_v63  ;;  %v1047_v58 = vpop.f32.mrf.mxu1 }
  0xff   : > { %v984_v9 = vadd.f32 %v936_v29, %v876_v30  ;;  %1201 = vmatmul.f32.gmra.mxu2 %v1113_v4  ;;  %1411 = vmatmul.f32.gmra.mxu0 %v6871_v35  ;;  %v6924_v30 = vsel %vm1108_vm1, %v1125_v5, %v1127_v22  ;;  %v5720_v5 = vld [vmem:[%s6141_s11 + $0x68] sm:$0xff] }
 0x100   : > { %1306 = vmatmul.f32.gmra.mxu3 %v1118_v61  ;;  %1626 = vmatmul.f32.gmra.mxu1 %v6776_v13  ;;  %v1130_v49 = vrot.slane %v5720_v5, 2 }
 0x101   : > { %v6894_v55 = vadd.f32 %v1044_v8, %v984_v9  ;;  %v1584_v8 = vld [vmem:[%s9262_s1 + $0x48] sm:$0xff] }
 0x102   : > { %v652_v15 = vpop.f32.mrf.mxu2  ;;  %1678 = vmatpush.msrb.mxu2 %v1584_v8 }
 0x103   : > { %v698_v29 = vadd.f32 %v652_v15, %v571_v1  ;;  %v831_v17 = vpop.f32.mrf.mxu3  ;;  %v5482_v1 = vld [vmem:[%s9262_s1 + $0xc8] sm:$0xff]  ;;  %v577_v15 = vadd.f32 %v6709_v51, %v6707_v54  ;;  %v1132_v51 = vrot.slane %v6572_v0, 2 }
 0x104   : > { %v942_v12 = vpop.f32.mrf.mxu0  ;;  %1679 = vmatpush.msrb.mxu2 %v1583_v41  ;;  %1936 = vmatpush.msrb.mxu0 %v5482_v1  ;;  %v5498_v54 = vld [vmem:[%s9262_s1 + $0x248] sm:$0xff]  ;;  %v5480_v1 = vld [vmem:[%s9262_s1 + $0xb8] sm:$0xff] }
 0x105   : > { %v877_v14 = vadd.f32 %v831_v17, %v698_v29  ;;  %v1050_v32 = vpop.f32.mrf.mxu1  ;;  %2043 = vmatpush.msrb.mxu1 %v5498_v54 }
 0x107   : > { %v985_v46 = vadd.f32 %v939_v39, %v877_v14  ;;  %1204 = vmatmul.f32.gmra.mxu2 %v6758_v40  ;;  %1414 = vmatmul.f32.gmra.mxu0 %v6897_v33  ;;  %v5466_v40 = vld [vmem:[%s9262_s1 + $0x348] sm:$0xff] }
 0x108   : > { %1309 = vmatmul.f32.gmra.mxu3 %v6844_v45  ;;  %1629 = vmatmul.f32.gmra.mxu1 %v6900_v7 }
 0x109   : > { %v6921_v63 = vadd.f32 %v1047_v58, %v985_v46  ;;  %1759 = vmatpush.msrb.mxu3 %v5466_v40  ;;  %v5719_v58 = vld [vmem:[%s6141_s11 + $0x60] sm:$0xff]  ;;  %v6954_v40 = vld [vmem:[%s6141_s11 + $0x108] sm:$0xff] }
 0x10a   : > { %v655_v27 = vpop.f32.mrf.mxu2  ;;  %v1129_v48 = vrot.slane %v5719_v58, 2 }
 0x10b   : > { %v699_v26 = vadd.f32 %v655_v27, %v574_v62  ;;  %v834_v39 = vpop.f32.mrf.mxu3  ;;  %v5481_v62 = vld [vmem:[%s9262_s1 + $0xc0] sm:$0xff]  ;;  %v580_v27 = vadd.f32 %v6739_v20, %v6736_v21 }
 0x10c   : > { %v945_v4 = vpop.f32.mrf.mxu0  ;;  %v6951_v37 = vsel %vm1108_vm1, %v1129_v48, %v1130_v49  ;;  %1937 = vmatpush.msrb.mxu0 %v5481_v62  ;;  %v6981_v48 = vld [vmem:[%s6141_s11 + $0x110] sm:$0xff]  ;;  %v5497_v20 = vld [vmem:[%s9262_s1 + $0x240] sm:$0xff] }
 0x10d   : > { %v878_v9 = vadd.f32 %v834_v39, %v699_v26  ;;  %v1053_v11 = vpop.f32.mrf.mxu1  ;;  %2044 = vmatpush.msrb.mxu1 %v5497_v20  ;;  %v5479_v62 = vld [vmem:[%s9262_s1 + $0xb0] sm:$0xff] }
 0x10e   : > { %1938 = vmatpush.msrb.mxu0 %v5480_v1  ;;  %v589_v1 = vadd.f32 %v6821_v3, %v6819_v34  ;;  %v5494_v34 = vld [vmem:[%s9262_s1 + $0x228] sm:$0xff]  ;;  %v1142_v3 = vrot.slane %v6641_v19, 2 }
 0x10f   : > { %v986_v44 = vadd.f32 %v942_v12, %v878_v9  ;;  %1207 = vmatmul.f32.gmra.mxu2 %v1118_v61  ;;  %1417 = vmatmul.f32.gmra.mxu0 %v6924_v30  ;;  %v5465_v61 = vld [vmem:[%s9262_s1 + $0x340] sm:$0xff] }
 0x110   : > { %1312 = vmatmul.f32.gmra.mxu3 %v6871_v35  ;;  %1632 = vmatmul.f32.gmra.mxu1 %v6927_v50 }
 0x111   : > { %v6948_v29 = vadd.f32 %v1050_v32, %v986_v44  ;;  %1760 = vmatpush.msrb.mxu3 %v5465_v61  ;;  %v1582_v32 = vld [vmem:[%s9262_s1 + $0x38] sm:$0xff]  ;;  %v6978_v44 = vsel %vm1108_vm1, %v1130_v49, %v1132_v51  ;;  %v5722_v49 = vld [vmem:[%s6141_s11 + $0x80] sm:$0xff]  ;;  %v1581_v61 = vld [vmem:[%s9262_s1 + $0x30] sm:$0xff]  ;;  %1939 = vmatpush.msrb.mxu0 %v5479_v62 }
 0x112   : > { %v658_v17 = vpop.f32.mrf.mxu2  ;;  %1680 = vmatpush.msrb.mxu2 %v1582_v32  ;;  %v1135_v41 = vrot.slane %v5722_v49, 2  ;;  %v7009_v32 = vld [vmem:[%s6141_s11 + $0x120] sm:$0xff]  ;;  %v5724_v49 = vld [vmem:[%s6141_s11 + $0x98] sm:$0xff] }
 0x113   : > { %v700_v12 = vadd.f32 %v658_v17, %v577_v15  ;;  %v837_v14 = vpop.f32.mrf.mxu3  ;;  %v583_v15 = vadd.f32 %v6769_v28, %v6767_v31  ;;  %v5496_v31 = vld [vmem:[%s9262_s1 + $0x238] sm:$0xff]  ;;  %v1137_v28 = vrot.slane %v6603_v57, 2 }
 0x114   : > { %v948_v46 = vpop.f32.mrf.mxu0  ;;  %1681 = vmatpush.msrb.mxu2 %v1581_v61  ;;  %2045 = vmatpush.msrb.mxu1 %v5496_v31  ;;  %v1579_v61 = vld [vmem:[%s9262_s1 + $0x20] sm:$0xff] }
 0x115   : > { %v879_v22 = vadd.f32 %v837_v14, %v700_v12  ;;  %v1056_v8 = vpop.f32.mrf.mxu1 }
 0x117   : > { %v987_v23 = vadd.f32 %v945_v4, %v879_v22  ;;  %1210 = vmatmul.f32.gmra.mxu2 %v6844_v45  ;;  %1420 = vmatmul.f32.gmra.mxu0 %v6951_v37  ;;  %v5464_v45 = vld [vmem:[%s9262_s1 + $0x338] sm:$0xff] }
 0x118   : > { %1315 = vmatmul.f32.gmra.mxu3 %v6897_v33  ;;  %1635 = vmatmul.f32.gmra.mxu1 %v6954_v40 }
 0x119   : > { %v6975_v26 = vadd.f32 %v1053_v11, %v987_v23  ;;  %1761 = vmatpush.msrb.mxu3 %v5464_v45  ;;  %v5721_v11 = vld [vmem:[%s6141_s11 + $0x78] sm:$0xff] }
 0x11a   : > { %v661_v0 = vpop.f32.mrf.mxu2  ;;  %v1134_v5 = vrot.slane %v5721_v11, 2  ;;  %v7036_v11 = vld [vmem:[%s6141_s11 + $0x128] sm:$0xff] }
 0x11b   : > { %v701_v39 = vadd.f32 %v661_v0, %v580_v27  ;;  %v840_v4 = vpop.f32.mrf.mxu3  ;;  %v586_v27 = vadd.f32 %v6795_v59, %v6793_v24  ;;  %v5495_v59 = vld [vmem:[%s9262_s1 + $0x230] sm:$0xff] }
 0x11c   : > { %v951_v9 = vpop.f32.mrf.mxu0  ;;  %v7006_v23 = vsel %vm1108_vm1, %v1134_v5, %v1135_v41  ;;  %2046 = vmatpush.msrb.mxu1 %v5495_v59 }
 0x11d   : > { %v880_v2 = vadd.f32 %v840_v4, %v701_v39  ;;  %v1059_v58 = vpop.f32.mrf.mxu1 }
 0x11e   : > { %2047 = vmatpush.msrb.mxu1 %v5494_v34 }
 0x11f   : > { %v988_v21 = vadd.f32 %v948_v46, %v880_v2  ;;  %1213 = vmatmul.f32.gmra.mxu2 %v6871_v35  ;;  %1423 = vmatmul.f32.gmra.mxu0 %v6978_v44  ;;  %v5463_v35 = vld [vmem:[%s9262_s1 + $0x330] sm:$0xff]  ;;  %v7033_v2 = vsel %vm1108_vm1, %v1135_v41, %v1137_v28  ;;  %v1140_v41 = vrot.slane %v5724_v49, 2  ;;  %v7064_v28 = vld [vmem:[%s6141_s11 + $0x138] sm:$0xff] }
 0x120   : > { %1318 = vmatmul.f32.gmra.mxu3 %v6924_v30  ;;  %1638 = vmatmul.f32.gmra.mxu1 %v6981_v48 }
 0x121   : > { %v7003_v17 = vadd.f32 %v1056_v8, %v988_v21  ;;  %1762 = vmatpush.msrb.mxu3 %v5463_v35  ;;  %v1580_v8 = vld [vmem:[%s9262_s1 + $0x28] sm:$0xff] }
 0x122   : > { %v664_v12 = vpop.f32.mrf.mxu2  ;;  %1682 = vmatpush.msrb.mxu2 %v1580_v8  ;;  %v5478_v35 = vld [vmem:[%s9262_s1 + $0xa8] sm:$0xff] }
 0x123   : > { %v702_v14 = vadd.f32 %v664_v12, %v583_v15  ;;  %v843_v46 = vpop.f32.mrf.mxu3  ;;  %1940 = vmatpush.msrb.mxu0 %v5478_v35 }
 0x124   : > { %v954_v22 = vpop.f32.mrf.mxu0  ;;  %1683 = vmatpush.msrb.mxu2 %v1579_v61  ;;  %v5476_v61 = vld [vmem:[%s9262_s1 + $0x98] sm:$0xff] }
 0x125   : > { %v881_v54 = vadd.f32 %v843_v46, %v702_v14  ;;  %v1062_v51 = vpop.f32.mrf.mxu1 }
 0x127   : > { %v989_v45 = vadd.f32 %v951_v9, %v881_v54  ;;  %1216 = vmatmul.f32.gmra.mxu2 %v6897_v33  ;;  %1426 = vmatmul.f32.gmra.mxu0 %v7006_v23  ;;  %v5462_v33 = vld [vmem:[%s9262_s1 + $0x328] sm:$0xff] }
 0x128   : > { %1321 = vmatmul.f32.gmra.mxu3 %v6951_v37  ;;  %1641 = vmatmul.f32.gmra.mxu1 %v7009_v32 }
 0x129   : > { %v7030_v0 = vadd.f32 %v1059_v58, %v989_v45  ;;  %1763 = vmatpush.msrb.mxu3 %v5462_v33  ;;  %v5723_v58 = vld [vmem:[%s6141_s11 + $0x90] sm:$0xff]  ;;  %v5477_v33 = vld [vmem:[%s9262_s1 + $0xa0] sm:$0xff] }
 0x12a   : > { %v667_v57 = vpop.f32.mrf.mxu2  ;;  %v1139_v5 = vrot.slane %v5723_v58, 2  ;;  %1941 = vmatpush.msrb.mxu0 %v5477_v33 }
 0x12b   : > { %v703_v39 = vadd.f32 %v667_v57, %v586_v27  ;;  %v846_v4 = vpop.f32.mrf.mxu3 }
 0x12c   : > { %v957_v9 = vpop.f32.mrf.mxu0  ;;  %v7061_v54 = vsel %vm1108_vm1, %v1139_v5, %v1140_v41  ;;  %v5726_v5 = vld [vmem:[%s6141_s11 + $0xb0] sm:$0xff]  ;;  %1942 = vmatpush.msrb.mxu0 %v5476_v61 }
 0x12d   : > { %v882_v21 = vadd.f32 %v846_v4, %v703_v39  ;;  %v1065_v20 = vpop.f32.mrf.mxu1  ;;  %v7087_v4 = vsel %vm1108_vm1, %v1140_v41, %v1142_v3  ;;  %v1145_v49 = vrot.slane %v5726_v5, 2  ;;  %v1577_v41 = vld [vmem:[%s9262_s1 + $0x10] sm:$0xff]  ;;  %v1576_v3 = vld [vmem:[%s9262_s1 + $0x8] sm:$0xff] }
 0x12f   : > { %v990_v24 = vadd.f32 %v954_v22, %v882_v21  ;;  %1219 = vmatmul.f32.gmra.mxu2 %v6924_v30  ;;  %1429 = vmatmul.f32.gmra.mxu0 %v7033_v2  ;;  %v5461_v30 = vld [vmem:[%s9262_s1 + $0x320] sm:$0xff] }
 0x130   : > { %1324 = vmatmul.f32.gmra.mxu3 %v6978_v44  ;;  %1644 = vmatmul.f32.gmra.mxu1 %v7036_v11 }
 0x131   : > { %v7058_v15 = vadd.f32 %v1062_v51, %v990_v24  ;;  %1764 = vmatpush.msrb.mxu3 %v5461_v30  ;;  %v1578_v51 = vld [vmem:[%s9262_s1 + $0x18] sm:$0xff]  ;;  %v7090_v24 = vld [vmem:[%s6141_s11 + $0x140] sm:$0xff] }
 0x132   : > { %v670_v12 = vpop.f32.mrf.mxu2  ;;  %1684 = vmatpush.msrb.mxu2 %v1578_v51  ;;  %v5475_v51 = vld [vmem:[%s9262_s1 + $0x90] sm:$0xff] }
 0x133   : > { %v704_v14 = vadd.f32 %v670_v12, %v589_v1  ;;  %v849_v46 = vpop.f32.mrf.mxu3  ;;  %1943 = vmatpush.msrb.mxu0 %v5475_v51  ;;  %v5520_v51 = vld [vmem:[%s9262_s1 + $0x3f8] sm:$0xff] }
 0x134   : > { %v960_v22 = vpop.f32.mrf.mxu0  ;;  %1685 = vmatpush.msrb.mxu2 %v1577_v41  ;;  %v5474_v41 = vld [vmem:[%s9262_s1 + $0x88] sm:$0xff] }
 0x135   : > { %v883_v45 = vadd.f32 %v849_v46, %v704_v14  ;;  %v1068_v31 = vpop.f32.mrf.mxu1  ;;  %1944 = vmatpush.msrb.mxu0 %v5474_v41 }
 0x136   : > { %1686 = vmatpush.msrb.mxu2 %v1576_v3 }
 0x137   : > { %v991_v8 = vadd.f32 %v957_v9, %v883_v45  ;;  %1222 = vmatmul.f32.gmra.mxu2 %v6951_v37  ;;  %1432 = vmatmul.f32.gmra.mxu0 %v7061_v54  ;;  %v5460_v37 = vld [vmem:[%s9262_s1 + $0x318] sm:$0xff] }
 0x138   : > { %1327 = vmatmul.f32.gmra.mxu3 %v7006_v23  ;;  %1647 = vmatmul.f32.gmra.mxu1 %v7064_v28 }
 0x139   : > { %v7083_v62 = vadd.f32 %v1065_v20, %v991_v8  ;;  %1765 = vmatpush.msrb.mxu3 %v5460_v37  ;;  %v5493_v20 = vld [vmem:[%s9262_s1 + $0x220] sm:$0xff]  ;;  %v7117_v8 = vld [vmem:[%s6141_s11 + $0x150] sm:$0xff] }
 0x13a   : > { %v673_v27 = vpop.f32.mrf.mxu2  ;;  %2048 = vmatpush.msrb.mxu1 %v5493_v20 }
 0x13b   : > { %v705_v19 = vadd.f32 %v673_v27, %v6656_v25  ;;  %v852_v57 = vpop.f32.mrf.mxu3  ;;  %v5725_v25 = vld [vmem:[%s6141_s11 + $0xa8] sm:$0xff] }
 0x13c   : > { %v963_v39 = vpop.f32.mrf.mxu0  ;;  %v1144_v58 = vrot.slane %v5725_v25, 2 }
 0x13d   : > { %v884_v9 = vadd.f32 %v852_v57, %v705_v19  ;;  %v1071_v21 = vpop.f32.mrf.mxu1 }
 0x13e   : > { %v7114_v46 = vsel %vm1108_vm1, %v1144_v58, %v1145_v49  ;;  %v5728_v58 = vld [vmem:[%s6141_s11 + $0xc8] sm:$0xff] }
 0x13f   : > { %v992_v59 = vadd.f32 %v960_v22, %v884_v9  ;;  %1225 = vmatmul.f32.gmra.mxu2 %v6978_v44  ;;  %1435 = vmatmul.f32.gmra.mxu0 %v7087_v4  ;;  %v5459_v44 = vld [vmem:[%s9262_s1 + $0x310] sm:$0xff]  ;;  %v1264_v5 = vrot.slane %v5728_v58, 2  ;;  %v7199_v58 = vrot.slane %v6776_v13, 2 }
 0x140   : > { %1330 = vmatmul.f32.gmra.mxu3 %v7033_v2  ;;  %1650 = vmatmul.f32.gmra.mxu1 %v7090_v24 }
 0x141   : > { %v7110_v30 = vadd.f32 %v1068_v31, %v992_v59  ;;  %1766 = vmatpush.msrb.mxu3 %v5459_v44  ;;  %v5492_v31 = vld [vmem:[%s9262_s1 + $0x218] sm:$0xff] }
 0x142   : > { %v676_v35 = vpop.f32.mrf.mxu2  ;;  %2049 = vmatpush.msrb.mxu1 %v5492_v31  ;;  %v7143_v59 = vld [vmem:[%s6141_s11 + $0x158] sm:$0xff] }
 0x143   : > { %v706_v1 = vadd.f32 %v676_v35, %v6679_v38  ;;  %v855_v12 = vpop.f32.mrf.mxu3  ;;  %v1147_v38 = vrot.slane %v6689_v47, 2 }
 0x144   : > { %v966_v14 = vpop.f32.mrf.mxu0 }
 0x145   : > { %v885_v22 = vadd.f32 %v855_v12, %v706_v1  ;;  %v1074_v45 = vpop.f32.mrf.mxu1  ;;  %v7140_v57 = vsel %vm1108_vm1, %v1145_v49, %v1147_v38  ;;  %v1575_v49 = vld [vmem:[%s9262_s1] sm:$0xff]  ;;  %v7171_v38 = vld [vmem:[%s6141_s11 + $0x168] sm:$0xff] }
 0x146   : > { %1687 = vmatpush.msrb.mxu2 %v1575_v49 }
 0x147   : > { %v993_v34 = vadd.f32 %v963_v39, %v885_v22  ;;  %1228 = vmatmul.f32.gmra.mxu2 %v7006_v23  ;;  %1438 = vmatmul.f32.gmra.mxu0 %v7114_v46  ;;  %v5458_v23 = vld [vmem:[%s9262_s1 + $0x308] sm:$0xff] }
 0x148   : > { %1333 = vmatmul.f32.gmra.mxu3 %v7061_v54  ;;  %1653 = vmatmul.f32.gmra.mxu1 %v7117_v8  ;;  %v5490_v22 = vld [vmem:[%s9262_s1 + $0x208] sm:$0xff] }
 0x149   : > { %v7136_v37 = vadd.f32 %v1071_v21, %v993_v34  ;;  %1767 = vmatpush.msrb.mxu3 %v5458_v23  ;;  %v5491_v21 = vld [vmem:[%s9262_s1 + $0x210] sm:$0xff]  ;;  %v1266_v23 = vrot.slane %v6746_v36, 2  ;;  %2144 = vmatpush.msra.mxu2 %v5520_v51  ;;  %v7237_v51 = vld [vmem:[%s6141_s11 + $0x188] sm:$0xff] }
 0x14a   : > { %v679_v33 = vpop.f32.mrf.mxu2  ;;  %2050 = vmatpush.msrb.mxu1 %v5491_v21 }
 0x14b   : > { %v707_v47 = vadd.f32 %v679_v33, %v6705_v53  ;;  %v858_v27 = vpop.f32.mrf.mxu3  ;;  %v5727_v53 = vld [vmem:[%s6141_s11 + $0xc0] sm:$0xff]  ;;  %v5536_v33 = vld [vmem:[%s9262_s1 + $0x178] sm:$0xff]  ;;  %v1267_v36 = vsel %vm1108_vm1, %v1264_v5, %v1266_v23 }
 0x14c   : > { %v969_v19 = vpop.f32.mrf.mxu0  ;;  %v1263_v25 = vrot.slane %v5727_v53, 2  ;;  %2051 = vmatpush.msrb.mxu1 %v5490_v22  ;;  %v7194_v53 = vld [vmem:[%s6141_s11 + $0x170] sm:$0xff]  ;;  %v1371_v22 = vrot.slane %v6802_v10, 2 }
 0x14d   : > { %v886_v39 = vadd.f32 %v858_v27, %v707_v47  ;;  %v1077_v9 = vpop.f32.mrf.mxu1 }
 0x14f   : > { %v994_v20 = vadd.f32 %v966_v14, %v886_v39  ;;  %1231 = vmatmul.f32.gmra.mxu2 %v7033_v2  ;;  %1441 = vmatmul.f32.gmra.mxu0 %v7140_v57  ;;  %v5457_v2 = vld [vmem:[%s9262_s1 + $0x300] sm:$0xff]  ;;  %v1265_v14 = vsel %vm1108_vm1, %v1263_v25, %v1264_v5 }
 0x150   : > { %1336 = vmatmul.f32.gmra.mxu3 %v7087_v4  ;;  %1656 = vmatmul.f32.gmra.mxu1 %v7143_v59 }
 0x151   : > { %v7163_v44 = vadd.f32 %v1074_v45, %v994_v20  ;;  %1768 = vmatpush.msrb.mxu3 %v5457_v2  ;;  %v5473_v45 = vld [vmem:[%s9262_s1 + $0x80] sm:$0xff] }
 0x152   : > { %v682_v61 = vpop.f32.mrf.mxu2  ;;  %1945 = vmatpush.msrb.mxu0 %v5473_v45 }
 0x153   : > { %v708_v35 = vadd.f32 %v682_v61, %v6734_v18  ;;  %v861_v1 = vpop.f32.mrf.mxu3  ;;  %v5489_v18 = vld [vmem:[%s9262_s1 + $0x200] sm:$0xff]  ;;  %2297 = vmatpush.msra.mxu3 %v5536_v33 }
 0x154   : > { %v972_v12 = vpop.f32.mrf.mxu0  ;;  %2052 = vmatpush.msrb.mxu1 %v5489_v18  ;;  %v1372_v18 = vsel %vm1108_vm1, %v7199_v58, %v1371_v22  ;;  %v7240_v33 = vld [vmem:[%s6141_s11 + $0xc0] sm:$0xff] }
 0x155   : > { %v887_v34 = vadd.f32 %v861_v1, %v708_v35  ;;  %v1080_v31 = vpop.f32.mrf.mxu1  ;;  %v7211_v35 = vld [vmem:[%s6141_s11 + $0x180] sm:$0xff]  ;;  %v5519_v1 = vld [vmem:[%s9262_s1 + $0x3f0] sm:$0xff] }
 0x156   : > { %2145 = vmatpush.msra.mxu2 %v5519_v1  ;;  %v5567_v1 = vld [vmem:[%s9262_s1 + $0x470] sm:$0xff] }
 0x157   : > { %v995_v3 = vadd.f32 %v969_v19, %v887_v34  ;;  %1234 = vmatmul.f32.gmra.mxu2 %v7061_v54  ;;  %1444 = vmatmul.f32.gmra.mxu0 %v1265_v14 }
 0x158   : > { %1339 = vmatmul.f32.gmra.mxu3 %v7114_v46  ;;  %1659 = vmatmul.f32.gmra.mxu1 %v7171_v38 }
 0x159   : > { %v7189_v47 = vadd.f32 %v1077_v9, %v995_v3  ;;  %v1368_v9 = vrot.slane %v6773_v42, 2 }
 0x15a   : > { %v685_v54 = vpop.f32.mrf.mxu2 }
 0x15b   : > { %v709_v27 = vadd.f32 %v685_v54, %v6765_v43  ;;  %v864_v19 = vpop.f32.mrf.mxu3  ;;  %v7243_v54 = vld [vmem:[%s6141_s11 + $0xc8] sm:$0xff] }
 0x15c   : > { %v975_v39 = vpop.f32.mrf.mxu0 }
 0x15d   : > { %v888_v20 = vadd.f32 %v864_v19, %v709_v27  ;;  %v1083_v21 = vpop.f32.mrf.mxu1  ;;  %v5568_v27 = vld [vmem:[%s9262_s1 + $0x478] sm:$0xff]  ;;  %v5518_v19 = vld [vmem:[%s9262_s1 + $0x3e8] sm:$0xff] }
 0x15e   : > { %2505 = vmatpush.msra.mxu1 %v5568_v27  ;;  %2146 = vmatpush.msra.mxu2 %v5518_v19 }
 0x15f   : > { %v996_v25 = vadd.f32 %v972_v12, %v888_v20  ;;  %1237 = vmatmul.f32.gmra.mxu2 %v7087_v4  ;;  %1447 = vmatmul.f32.gmra.mxu0 %v1267_v36  ;;  %v7208_v4 = vsel %vm1108_vm1, %v1368_v9, %v7199_v58  ;;  %v5552_v12 = vld [vmem:[%s9262_s1 + $0x2f8] sm:$0xff]  ;;  %v1859_v20 = vrot.slane %v7243_v54, 1 }
 0x160   : > { %1342 = vmatmul.f32.gmra.mxu3 %v7140_v57  ;;  %1662 = vmatmul.f32.gmra.mxu1 %v7194_v53 }
 0x161   : > { %v7203_v43 = vadd.f32 %v1080_v31, %v996_v25  ;;  %2401 = vmatpush.msra.mxu0 %v5552_v12  ;;  %v5533_v12 = vld [vmem:[%s9262_s1 + $0x160] sm:$0xff]  ;;  %2506 = vmatpush.msra.mxu1 %v5567_v1 }
 0x162   : > { %v688_v5 = vpop.f32.mrf.mxu2 }
 0x163   : > { %v710_v49 = vadd.f32 %v688_v5, %v6791_v52  ;;  %v867_v2 = vpop.f32.mrf.mxu3  ;;  %v5535_v52 = vld [vmem:[%s9262_s1 + $0x170] sm:$0xff] }
 0x164   : > { %v978_v41 = vpop.f32.mrf.mxu0  ;;  %2298 = vmatpush.msra.mxu3 %v5535_v52  ;;  %v5517_v52 = vld [vmem:[%s9262_s1 + $0x3e0] sm:$0xff] }
 0x165   : > { %v889_v61 = vadd.f32 %v867_v2, %v710_v49  ;;  %v1086_v42 = vpop.f32.mrf.mxu1  ;;  %2147 = vmatpush.msra.mxu2 %v5517_v52 }
 0x167   : > { %v997_v13 = vadd.f32 %v975_v39, %v889_v61  ;;  %1240 = vmatmul.f32.gmra.mxu2 %v7114_v46  ;;  %1450 = vmatmul.f32.gmra.mxu0 %v7208_v4  ;;  %v5872_v46 = vmov 0.0   ;;  %v5534_v39 = vld [vmem:[%s9262_s1 + $0x168] sm:$0xff] }
 0x168   : > { %1345 = vmatmul.f32.gmra.mxu3 %v1265_v14  ;;  %1665 = vmatmul.f32.gmra.mxu1 %v7211_v35  ;;  %387 = vst [vmem:[#allocation2 + $0x18] sm:$0x1] %v5872_v46 }
 0x169   : > { %v7227_v34 = vadd.f32 %v1083_v21, %v997_v13  ;;  %379 = vst [vmem:[#allocation2] sm:$0xff] %v5872_v46  ;;  %v5551_v21 = vld [vmem:[%s9262_s1 + $0x2f0] sm:$0xff]  ;;  %2299 = vmatpush.msra.mxu3 %v5534_v39  ;;  %v7279_v13 = vld [vmem:[%s6141_s11 + $0xe8] sm:$0x3] }
 0x16a   : > { %v691_v31 = vpop.f32.mrf.mxu2  ;;  %380 = vst [vmem:[#allocation2 + $0x8] sm:$0xff] %v5872_v46  ;;  %2402 = vmatpush.msra.mxu0 %v5551_v21  ;;  %v5566_v21 = vld [vmem:[%s9262_s1 + $0x468] sm:$0xff] }
 0x16b   : > { %v711_v14 = vadd.f32 %v691_v31, %v6817_v16  ;;  %v870_v45 = vpop.f32.mrf.mxu3  ;;  %381 = vst [vmem:[#allocation2 + $0x10] sm:$0x3] %v5872_v46  ;;  %v5550_v31 = vld [vmem:[%s9262_s1 + $0x2e8] sm:$0xff]  ;;  %2300 = vmatpush.msra.mxu3 %v5533_v12  ;;  %2507 = vmatpush.msra.mxu1 %v5566_v21 }
 0x16c   : > { %v981_v10 = vpop.f32.mrf.mxu0  ;;  %383 = vst [vmem:[#allocation2 + $0x198] sm:$0xff] %v5872_v46  ;;  %2403 = vmatpush.msra.mxu0 %v5550_v31 }
 0x16d   : > { %v890_v3 = vadd.f32 %v870_v45, %v711_v14  ;;  %v1089_v23 = vpop.f32.mrf.mxu1  ;;  %385 = vst [vmem:[#allocation2 + $0x1a8] sm:$0x3] %v5872_v46  ;;  %v1866_v14 = vrot.slane %v7279_v13, 1 }
 0x16e   : > { %388 = vst [vmem:[#allocation2 + $0x30] sm:$0x1] %v5872_v46 }
 0x16f   : > { %v998_v16 = vadd.f32 %v978_v41, %v890_v3  ;;  %1243 = vmatmul.f32.gmra.mxu2 %v7140_v57  ;;  %1453 = vmatmul.f32.gmra.mxu0 %v1372_v18  ;;  %v1858_v57 = vrot.slane %v7240_v33, 1  ;;  %389 = vst [vmem:[#allocation2 + $0x48] sm:$0x1] %v5872_v46 }
 0x170   : > { %1348 = vmatmul.f32.gmra.mxu3 %v1267_v36  ;;  %1668 = vmatmul.f32.gmra.mxu1 %v7237_v51  ;;  %390 = vst [vmem:[#allocation2 + $0x60] sm:$0x1] %v5872_v46 }
 0x171   : > { %v7264_v25 = vadd.f32 %v1086_v42, %v998_v16  ;;  %391 = vst [vmem:[#allocation2 + $0x78] sm:$0x1] %v5872_v46  ;;  %v1860_v2 = vsel %vm737_vm0, %v1858_v57, %v1859_v20  ;;  %v7275_v42 = vld [vmem:[%s6141_s11 + $0xd0] sm:$0x3]  ;;  %v7318_v57 = vsel %vm737_vm0, %v6789_v56, %v1866_v14  ;;  %v5516_v56 = vld [vmem:[%s9262_s1 + $0x3d8] sm:$0xff] }
 0x172   : > { %v694_v36 = vpop.f32.mrf.mxu2  ;;  %392 = vst [vmem:[#allocation2 + $0x90] sm:$0x1] %v5872_v46  ;;  %v1861_v22 = vrot.slane %v7275_v42, 1  ;;  %2148 = vmatpush.msra.mxu2 %v5516_v56 }
 0x173   : > { %v712_v9 = vadd.f32 %v694_v36, %v6841_v6  ;;  %v873_v5 = vpop.f32.mrf.mxu3  ;;  %393 = vst [vmem:[#allocation2 + $0xa8] sm:$0x1] %v5872_v46  ;;  %v5532_v36 = vld [vmem:[%s9262_s1 + $0x158] sm:$0xff] }
 0x174   : > { %v1409_v49 = vpop.f32.mrf.mxu0  ;;  %394 = vst [vmem:[#allocation2 + $0xc0] sm:$0x1] %v5872_v46  ;;  %v1862_v27 = vsel %vm737_vm0, %v1859_v20, %v1861_v22  ;;  %2301 = vmatpush.msra.mxu3 %v5532_v36 }
 0x175   : > { %v891_v41 = vadd.f32 %v873_v5, %v712_v9  ;;  %v7272_v61 = vpop.f32.mrf.mxu1  ;;  %395 = vst [vmem:[#allocation2 + $0xd8] sm:$0x1] %v5872_v46  ;;  %v5549_v9 = vld [vmem:[%s9262_s1 + $0x2e0] sm:$0xff] }
 0x176   : > { %396 = vst [vmem:[#allocation2 + $0xf0] sm:$0x1] %v5872_v46  ;;  %2404 = vmatpush.msra.mxu0 %v5549_v9 }
 0x177   : > { %v999_v6 = vadd.f32 %v981_v10, %v891_v41  ;;  %1688 = vmatmul.f32.vlgmr.msrb.gmra.mxu2 %v7240_v33  ;;  %1946 = vmatmul.f32.vlgmr.msrb.gmra.mxu0 %v1860_v2  ;;  %397 = vst [vmem:[#allocation2 + $0x108] sm:$0x1] %v5872_v46  ;;  %v1869_v2 = vrot.slane %v6927_v50, 1 }
 0x178   : > { %1769 = vmatmul.f32.vlgmr.msrb.gmra.mxu3 %v6900_v7  ;;  %2053 = vmatmul.f32.vlgmr.msrb.gmra.mxu1 %v6799_v60  ;;  %398 = vst [vmem:[#allocation2 + $0x120] sm:$0x1] %v5872_v46 }
 0x179   : > { %v7301_v45 = vadd.f32 %v1089_v23, %v999_v6  ;;  %399 = vst [vmem:[#allocation2 + $0x138] sm:$0x1] %v5872_v46  ;;  %v7312_v23 = vld [vmem:[%s9263_s2] ss:$0 sm:$0xff] }
 0x17a   : > { %v1199_v10 = vpop.f32.mrf.mxu2  ;;  %400 = vst [vmem:[#allocation2 + $0x150] sm:$0x1] %v5872_v46 }
 0x17b   : > { %v1247_v18 = vadd.f32 %v1199_v10, %v6894_v55  ;;  %v1304_v3 = vpop.f32.mrf.mxu3  ;;  %401 = vst [vmem:[#allocation2 + $0x168] sm:$0x1] %v5872_v46  ;;  %v7324_v55 = vld [vmem:[%s9264_s3] ss:$0 sm:$0xff] }
 0x17c   : > { %v1412_v16 = vpop.f32.mrf.mxu0  ;;  %402 = vst [vmem:[#allocation2 + $0x180] sm:$0x1] %v5872_v46 }
 0x17d   : > { %v1352_v19 = vadd.f32 %v1304_v3, %v1247_v18  ;;  %v7314_v39 = vpop.f32.mrf.mxu1  ;;  %405 = vst [vmem:[#allocation2 + $0x29] sm:$0x1] %v5872_v46  ;;  %v7360_v18 = vld [vmem:[%s6141_s11 + $0x100] sm:$0x3]  ;;  %v5729_v3 = vld [vmem:[%s6141_s11 + $0xd8] sm:$0xff] }
 0x17e   : > { %406 = vst [vmem:[#allocation2 + $0x41] sm:$0x1] %v5872_v46  ;;  %v1871_v21 = vrot.slane %v7360_v18, 1 }
 0x17f   : > { %v1457_v20 = vadd.f32 %v1409_v49, %v1352_v19  ;;  %1691 = vmatmul.f32.gmra.mxu2 %v7243_v54  ;;  %1949 = vmatmul.f32.gmra.mxu0 %v1862_v27  ;;  %407 = vst [vmem:[#allocation2 + $0x59] sm:$0x1] %v5872_v46  ;;  %v1868_v49 = vrot.slane %v6900_v7, 1  ;;  %v5565_v27 = vld [vmem:[%s9262_s1 + $0x460] sm:$0xff]  ;;  %v5515_v19 = vld [vmem:[%s9262_s1 + $0x3d0] sm:$0xff] }
 0x180   : > { %1772 = vmatmul.f32.gmra.mxu3 %v6927_v50  ;;  %2056 = vmatmul.f32.gmra.mxu1 %v7318_v57  ;;  %408 = vst [vmem:[#allocation2 + $0x71] sm:$0x1] %v5872_v46 }
 0x181   : > { %v1476_v5 = vmul.f32 %v7312_v23, %v1457_v20  ;;  %409 = vst [vmem:[#allocation2 + $0x89] sm:$0x1] %v5872_v46  ;;  %v7356_v10 = vsel %vm737_vm0, %v1868_v49, %v1869_v2  ;;  %v5531_v20 = vld [vmem:[%s9262_s1 + $0x150] sm:$0xff]  ;;  %2508 = vmatpush.msra.mxu1 %v5565_v27  ;;  %2149 = vmatpush.msra.mxu2 %v5515_v19  ;;  %v1874_v27 = vrot.slane %v6981_v48, 1 }
 0x182   : > { %v1202_v41 = vpop.f32.mrf.mxu2  ;;  %410 = vst [vmem:[#allocation2 + $0xa1] sm:$0x1] %v5872_v46  ;;  %2302 = vmatpush.msra.mxu3 %v5531_v20 }
 0x183   : > { %v1495_v6 = vadd.f32 %v7324_v55, %v1476_v5  ;;  %v1248_v1 = vadd.f32 %v1202_v41, %v6921_v63  ;;  %v1307_v52 = vpop.f32.mrf.mxu3  ;;  %411 = vst [vmem:[#allocation2 + $0xb9] sm:$0x1] %v5872_v46 }
 0x184   : > { %v1415_v12 = vpop.f32.mrf.mxu0  ;;  %412 = vst [vmem:[#allocation2 + $0xd1] sm:$0x1] %v5872_v46 }
 0x185   : > { %v1511_v22 = vmax.f32 %v1495_v6, 0.0  ;;  %v1353_v31 = vadd.f32 %v1307_v52, %v1248_v1  ;;  %v7353_v14 = vpop.f32.mrf.mxu1  ;;  %413 = vst [vmem:[#allocation2 + $0xe9] sm:$0x1] %v5872_v46  ;;  %v7391_v52 = vsel %vm737_vm0, %v1869_v2, %v1871_v21  ;;  %v5530_v2 = vld [vmem:[%s9262_s1 + $0x148] sm:$0xff] }
 0x186   : > { %414 = vst [vmem:[#allocation2 + $0x101] sm:$0x1] %v5872_v46  ;;  %2303 = vmatpush.msra.mxu3 %v5530_v2 }
 0x187   : > { %1528 = vst [vmem:[#allocation2 + $0x19] sm:$0xff] %v1511_v22  ;;  %v1458_v63 = vadd.f32 %v1412_v16, %v1353_v31  ;;  %1694 = vmatmul.f32.gmra.mxu2 %v5729_v3  ;;  %1952 = vmatmul.f32.gmra.mxu0 %v6799_v60  ;;  %v5548_v60 = vld [vmem:[%s9262_s1 + $0x2d8] sm:$0xff]  ;;  %v1873_v3 = vrot.slane %v6954_v40, 1 }
 0x188   : > { %1775 = vmatmul.f32.gmra.mxu3 %v6954_v40  ;;  %2059 = vmatmul.f32.gmra.mxu1 %v7356_v10  ;;  %415 = vst [vmem:[#allocation2 + $0x119] sm:$0x1] %v5872_v46  ;;  %v5564_v31 = vld [vmem:[%s9262_s1 + $0x458] sm:$0xff] }
 0x189   : > { %v1477_v16 = vmul.f32 %v7312_v23, %v1458_v63  ;;  %2405 = vmatpush.msra.mxu0 %v5548_v60  ;;  %416 = vst [vmem:[#allocation2 + $0x131] sm:$0x1] %v5872_v46  ;;  %v5514_v63 = vld [vmem:[%s9262_s1 + $0x3c8] sm:$0xff]  ;;  %2509 = vmatpush.msra.mxu1 %v5564_v31 }
 0x18a   : > { %v1205_v56 = vpop.f32.mrf.mxu2  ;;  %417 = vst [vmem:[#allocation2 + $0x149] sm:$0x1] %v5872_v46  ;;  %2150 = vmatpush.msra.mxu2 %v5514_v63 }
 0x18b   : > { %v1496_v36 = vadd.f32 %v7324_v55, %v1477_v16  ;;  %v1249_v9 = vadd.f32 %v1205_v56, %v6948_v29  ;;  %v1310_v5 = vpop.f32.mrf.mxu3  ;;  %418 = vst [vmem:[#allocation2 + $0x161] sm:$0x1] %v5872_v46  ;;  %v5730_v29 = vld [vmem:[%s6141_s11 + $0xe0] sm:$0xff] }
 0x18c   : > { %v1418_v49 = vpop.f32.mrf.mxu0  ;;  %419 = vst [vmem:[#allocation2 + $0x179] sm:$0x1] %v5872_v46 }
 0x18d   : > { %v1512_v41 = vmax.f32 %v1496_v36, 0.0  ;;  %v1354_v6 = vadd.f32 %v1310_v5, %v1249_v9  ;;  %v7388_v1 = vpop.f32.mrf.mxu1  ;;  %420 = vst [vmem:[#allocation2 + $0x191] sm:$0x1] %v5872_v46  ;;  %v7423_v5 = vsel %vm737_vm0, %v1873_v3, %v1874_v27 }
 0x18e   : > { %386 = vst [vmem:[#allocation2] sm:$0x1] %v5872_v46 }
 0x18f   : > { %1529 = vst [vmem:[#allocation2 + $0x21] sm:$0xff] %v1512_v41  ;;  %v1459_v22 = vadd.f32 %v1415_v12, %v1354_v6  ;;  %1697 = vmatmul.f32.gmra.mxu2 %v5730_v29  ;;  %1955 = vmatmul.f32.gmra.mxu0 %v7318_v57  ;;  %v5547_v57 = vld [vmem:[%s9262_s1 + $0x2d0] sm:$0xff]  ;;  %v7426_v41 = vld [vmem:[%s6141_s11 + $0x118] sm:$0x3] }
 0x190   : > { %1778 = vmatmul.f32.gmra.mxu3 %v6981_v48  ;;  %2062 = vmatmul.f32.gmra.mxu1 %v7391_v52  ;;  %403 = vst [vmem:[#allocation2 + $0x198] sm:$0x1] %v5872_v46  ;;  %v1876_v29 = vrot.slane %v7426_v41, 1 }
 0x191   : > { %v1478_v12 = vmul.f32 %v7312_v23, %v1459_v22  ;;  %2406 = vmatpush.msra.mxu0 %v5547_v57  ;;  %404 = vst [vmem:[#allocation2 + $0x11] sm:$0x1] %v5872_v46  ;;  %v5529_v22 = vld [vmem:[%s9262_s1 + $0x140] sm:$0xff] }
 0x192   : > { %v1208_v19 = vpop.f32.mrf.mxu2  ;;  %421 = vst [vmem:[#allocation2 + $0x1a9] sm:$0x1] %v5872_v46  ;;  %v5513_v46 = vld [vmem:[%s9262_s1 + $0x3c0] sm:$0xff]  ;;  %2304 = vmatpush.msra.mxu3 %v5529_v22 }
 0x193   : > { %v1497_v20 = vadd.f32 %v7324_v55, %v1478_v12  ;;  %v1250_v60 = vadd.f32 %v1208_v19, %v6975_v26  ;;  %v1313_v16 = vpop.f32.mrf.mxu3  ;;  %v5563_v26 = vld [vmem:[%s9262_s1 + $0x450] sm:$0xff]  ;;  %2151 = vmatpush.msra.mxu2 %v5513_v46 }
 0x194   : > { %v1421_v21 = vpop.f32.mrf.mxu0  ;;  %2510 = vmatpush.msra.mxu1 %v5563_v26 }
 0x195   : > { %v1513_v56 = vmax.f32 %v1497_v20, 0.0  ;;  %v1355_v36 = vadd.f32 %v1313_v16, %v1250_v60  ;;  %v7420_v9 = vpop.f32.mrf.mxu1  ;;  %v7451_v60 = vsel %vm737_vm0, %v1874_v27, %v1876_v29 }
 0x197   : > { %1530 = vst [vmem:[#allocation2 + $0x31] sm:$0xff] %v1513_v56  ;;  %v1460_v6 = vadd.f32 %v1418_v49, %v1355_v36  ;;  %1700 = vmatmul.f32.gmra.mxu2 %v6900_v7  ;;  %1958 = vmatmul.f32.gmra.mxu0 %v7356_v10  ;;  %v5546_v7 = vld [vmem:[%s9262_s1 + $0x2c8] sm:$0xff]  ;;  %v5528_v36 = vld [vmem:[%s9262_s1 + $0x138] sm:$0xff] }
 0x198   : > { %1781 = vmatmul.f32.gmra.mxu3 %v7009_v32  ;;  %2065 = vmatmul.f32.gmra.mxu1 %v7423_v5  ;;  %v5562_v56 = vld [vmem:[%s9262_s1 + $0x448] sm:$0xff] }
 0x199   : > { %v1479_v49 = vmul.f32 %v7312_v23, %v1460_v6  ;;  %2407 = vmatpush.msra.mxu0 %v5546_v7  ;;  %v1879_v6 = vrot.slane %v7036_v11, 1  ;;  %2511 = vmatpush.msra.mxu1 %v5562_v56 }
 0x19a   : > { %v1211_v31 = vpop.f32.mrf.mxu2  ;;  %2305 = vmatpush.msra.mxu3 %v5528_v36 }
 0x19b   : > { %v1498_v63 = vadd.f32 %v7324_v55, %v1479_v49  ;;  %v1251_v2 = vadd.f32 %v1211_v31, %v7003_v17  ;;  %v1316_v57 = vpop.f32.mrf.mxu3  ;;  %v5512_v17 = vld [vmem:[%s9262_s1 + $0x3b8] sm:$0xff] }
 0x19c   : > { %v1424_v12 = vpop.f32.mrf.mxu0  ;;  %2152 = vmatpush.msra.mxu2 %v5512_v17 }
 0x19d   : > { %v1514_v3 = vmax.f32 %v1498_v63, 0.0  ;;  %v1356_v19 = vadd.f32 %v1316_v57, %v1251_v2  ;;  %v7448_v20 = vpop.f32.mrf.mxu1  ;;  %v7480_v57 = vld [vmem:[%s6141_s11 + $0x130] sm:$0x3] }
 0x19e   : > { %v1881_v56 = vrot.slane %v7480_v57, 1 }
 0x19f   : > { %1531 = vst [vmem:[#allocation2 + $0x39] sm:$0xff] %v1514_v3  ;;  %v1461_v16 = vadd.f32 %v1421_v21, %v1356_v19  ;;  %1703 = vmatmul.f32.gmra.mxu2 %v6927_v50  ;;  %1961 = vmatmul.f32.gmra.mxu0 %v7391_v52  ;;  %v5545_v50 = vld [vmem:[%s9262_s1 + $0x2c0] sm:$0xff]  ;;  %v1878_v21 = vrot.slane %v7009_v32, 1  ;;  %v5511_v19 = vld [vmem:[%s9262_s1 + $0x3b0] sm:$0xff] }
 0x1a0   : > { %1784 = vmatmul.f32.gmra.mxu3 %v7036_v11  ;;  %2068 = vmatmul.f32.gmra.mxu1 %v7451_v60 }
 0x1a1   : > { %v1480_v27 = vmul.f32 %v7312_v23, %v1461_v16  ;;  %2408 = vmatpush.msra.mxu0 %v5545_v50  ;;  %v7477_v2 = vsel %vm737_vm0, %v1878_v21, %v1879_v6  ;;  %v5527_v16 = vld [vmem:[%s9262_s1 + $0x130] sm:$0xff]  ;;  %2153 = vmatpush.msra.mxu2 %v5511_v19 }
 0x1a2   : > { %v1214_v26 = vpop.f32.mrf.mxu2  ;;  %2306 = vmatpush.msra.mxu3 %v5527_v16 }
 0x1a3   : > { %v1499_v46 = vadd.f32 %v7324_v55, %v1480_v27  ;;  %v1252_v22 = vadd.f32 %v1214_v26, %v7030_v0  ;;  %v1319_v7 = vpop.f32.mrf.mxu3  ;;  %v5561_v0 = vld [vmem:[%s9262_s1 + $0x440] sm:$0xff] }
 0x1a4   : > { %v1427_v49 = vpop.f32.mrf.mxu0  ;;  %2512 = vmatpush.msra.mxu1 %v5561_v0  ;;  %v1884_v0 = vrot.slane %v7090_v24, 1 }
 0x1a5   : > { %v1515_v29 = vmax.f32 %v1499_v46, 0.0  ;;  %v1357_v31 = vadd.f32 %v1319_v7, %v1252_v22  ;;  %v7474_v63 = vpop.f32.mrf.mxu1  ;;  %v7505_v7 = vsel %vm737_vm0, %v1879_v6, %v1881_v56 }
 0x1a7   : > { %1532 = vst [vmem:[#allocation2 + $0x49] sm:$0xff] %v1515_v29  ;;  %v1462_v3 = vadd.f32 %v1424_v12, %v1357_v31  ;;  %1706 = vmatmul.f32.gmra.mxu2 %v6954_v40  ;;  %1964 = vmatmul.f32.gmra.mxu0 %v7423_v5  ;;  %v5544_v40 = vld [vmem:[%s9262_s1 + $0x2b8] sm:$0xff] }
 0x1a8   : > { %1787 = vmatmul.f32.gmra.mxu3 %v7064_v28  ;;  %2071 = vmatmul.f32.gmra.mxu1 %v7477_v2  ;;  %v5560_v31 = vld [vmem:[%s9262_s1 + $0x438] sm:$0xff] }
 0x1a9   : > { %v1481_v12 = vmul.f32 %v7312_v23, %v1462_v3  ;;  %2409 = vmatpush.msra.mxu0 %v5544_v40  ;;  %v5526_v3 = vld [vmem:[%s9262_s1 + $0x128] sm:$0xff]  ;;  %2513 = vmatpush.msra.mxu1 %v5560_v31  ;;  %v5525_v31 = vld [vmem:[%s9262_s1 + $0x120] sm:$0xff] }
 0x1aa   : > { %v1217_v17 = vpop.f32.mrf.mxu2  ;;  %2307 = vmatpush.msra.mxu3 %v5526_v3 }
 0x1ab   : > { %v1500_v36 = vadd.f32 %v7324_v55, %v1481_v12  ;;  %v1253_v50 = vadd.f32 %v1217_v17, %v7058_v15  ;;  %v1322_v27 = vpop.f32.mrf.mxu3  ;;  %v5510_v15 = vld [vmem:[%s9262_s1 + $0x3a8] sm:$0xff] }
 0x1ac   : > { %v1430_v21 = vpop.f32.mrf.mxu0  ;;  %2154 = vmatpush.msra.mxu2 %v5510_v15  ;;  %2308 = vmatpush.msra.mxu3 %v5525_v31 }
 0x1ad   : > { %v1516_v26 = vmax.f32 %v1500_v36, 0.0  ;;  %v1358_v46 = vadd.f32 %v1322_v27, %v1253_v50  ;;  %v7502_v22 = vpop.f32.mrf.mxu1 }
 0x1af   : > { %1533 = vst [vmem:[#allocation2 + $0x51] sm:$0xff] %v1516_v26  ;;  %v1463_v29 = vadd.f32 %v1427_v49, %v1358_v46  ;;  %1709 = vmatmul.f32.gmra.mxu2 %v6981_v48  ;;  %1967 = vmatmul.f32.gmra.mxu0 %v7451_v60  ;;  %v5543_v48 = vld [vmem:[%s9262_s1 + $0x2b0] sm:$0xff]  ;;  %v1883_v49 = vrot.slane %v7064_v28, 1  ;;  %v7534_v26 = vld [vmem:[%s6141_s11 + $0x148] sm:$0x3] }
 0x1b0   : > { %1790 = vmatmul.f32.gmra.mxu3 %v7090_v24  ;;  %2074 = vmatmul.f32.gmra.mxu1 %v7505_v7  ;;  %v1886_v15 = vrot.slane %v7534_v26, 1 }
 0x1b1   : > { %v1482_v6 = vmul.f32 %v7312_v23, %v1463_v29  ;;  %2410 = vmatpush.msra.mxu0 %v5543_v48  ;;  %v7531_v27 = vsel %vm737_vm0, %v1883_v49, %v1884_v0  ;;  %v5509_v29 = vld [vmem:[%s9262_s1 + $0x3a0] sm:$0xff] }
 0x1b2   : > { %v1220_v19 = vpop.f32.mrf.mxu2  ;;  %2155 = vmatpush.msra.mxu2 %v5509_v29  ;;  %v1889_v29 = vrot.slane %v7143_v59, 1 }
 0x1b3   : > { %v1501_v16 = vadd.f32 %v7324_v55, %v1482_v6  ;;  %v1254_v40 = vadd.f32 %v1220_v19, %v7083_v62  ;;  %v1325_v12 = vpop.f32.mrf.mxu3  ;;  %v5559_v62 = vld [vmem:[%s9262_s1 + $0x430] sm:$0xff] }
 0x1b4   : > { %v1433_v56 = vpop.f32.mrf.mxu0  ;;  %2514 = vmatpush.msra.mxu1 %v5559_v62  ;;  %v5524_v62 = vld [vmem:[%s9262_s1 + $0x118] sm:$0xff] }
 0x1b5   : > { %v1517_v17 = vmax.f32 %v1501_v16, 0.0  ;;  %v1359_v36 = vadd.f32 %v1325_v12, %v1254_v40  ;;  %v7528_v50 = vpop.f32.mrf.mxu1  ;;  %2309 = vmatpush.msra.mxu3 %v5524_v62 }
 0x1b7   : > { %1534 = vst [vmem:[#allocation2 + $0x61] sm:$0xff] %v1517_v17  ;;  %v1464_v46 = vadd.f32 %v1430_v21, %v1359_v36  ;;  %1712 = vmatmul.f32.gmra.mxu2 %v7009_v32  ;;  %1970 = vmatmul.f32.gmra.mxu0 %v7477_v2  ;;  %v5542_v32 = vld [vmem:[%s9262_s1 + $0x2a8] sm:$0xff]  ;;  %v7559_v17 = vsel %vm737_vm0, %v1884_v0, %v1886_v15 }
 0x1b8   : > { %1793 = vmatmul.f32.gmra.mxu3 %v7117_v8  ;;  %2077 = vmatmul.f32.gmra.mxu1 %v7531_v27 }
 0x1b9   : > { %v1483_v21 = vmul.f32 %v7312_v23, %v1464_v46  ;;  %2411 = vmatpush.msra.mxu0 %v5542_v32  ;;  %v5558_v46 = vld [vmem:[%s9262_s1 + $0x428] sm:$0xff] }
 0x1ba   : > { %v1223_v3 = vpop.f32.mrf.mxu2  ;;  %2515 = vmatpush.msra.mxu1 %v5558_v46  ;;  %v5507_v46 = vld [vmem:[%s9262_s1 + $0x390] sm:$0xff] }
 0x1bb   : > { %v1502_v48 = vadd.f32 %v7324_v55, %v1483_v21  ;;  %v1255_v6 = vadd.f32 %v1223_v3, %v7110_v30  ;;  %v1328_v49 = vpop.f32.mrf.mxu3  ;;  %v5508_v30 = vld [vmem:[%s9262_s1 + $0x398] sm:$0xff] }
 0x1bc   : > { %v1436_v19 = vpop.f32.mrf.mxu0  ;;  %2156 = vmatpush.msra.mxu2 %v5508_v30  ;;  %v5523_v30 = vld [vmem:[%s9262_s1 + $0x110] sm:$0xff] }
 0x1bd   : > { %v1518_v16 = vmax.f32 %v1502_v48, 0.0  ;;  %v1360_v40 = vadd.f32 %v1328_v49, %v1255_v6  ;;  %v7556_v12 = vpop.f32.mrf.mxu1  ;;  %2310 = vmatpush.msra.mxu3 %v5523_v30  ;;  %v1894_v30 = vrot.slane %v7194_v53, 1 }
 0x1be   : > { %2157 = vmatpush.msra.mxu2 %v5507_v46  ;;  %v5522_v46 = vld [vmem:[%s9262_s1 + $0x108] sm:$0xff] }
 0x1bf   : > { %1535 = vst [vmem:[#allocation2 + $0x69] sm:$0xff] %v1518_v16  ;;  %v1465_v36 = vadd.f32 %v1433_v56, %v1360_v40  ;;  %1715 = vmatmul.f32.gmra.mxu2 %v7036_v11  ;;  %1973 = vmatmul.f32.gmra.mxu0 %v7505_v7  ;;  %v5541_v11 = vld [vmem:[%s9262_s1 + $0x2a0] sm:$0xff]  ;;  %v1888_v56 = vrot.slane %v7117_v8, 1 }
 0x1c0   : > { %1796 = vmatmul.f32.gmra.mxu3 %v7143_v59  ;;  %2080 = vmatmul.f32.gmra.mxu1 %v7559_v17  ;;  %v7588_v40 = vld [vmem:[%s6141_s11 + $0x160] sm:$0x3] }
 0x1c1   : > { %v1484_v0 = vmul.f32 %v7312_v23, %v1465_v36  ;;  %2412 = vmatpush.msra.mxu0 %v5541_v11  ;;  %v7585_v16 = vsel %vm737_vm0, %v1888_v56, %v1889_v29  ;;  %v1891_v62 = vrot.slane %v7588_v40, 1  ;;  %2311 = vmatpush.msra.mxu3 %v5522_v46  ;;  %v5505_v46 = vld [vmem:[%s9262_s1 + $0x380] sm:$0xff] }
 0x1c2   : > { %v1226_v31 = vpop.f32.mrf.mxu2 }
 0x1c3   : > { %v1503_v32 = vadd.f32 %v7324_v55, %v1484_v0  ;;  %v1256_v21 = vadd.f32 %v1226_v31, %v7136_v37  ;;  %v1331_v15 = vpop.f32.mrf.mxu3  ;;  %v5557_v37 = vld [vmem:[%s9262_s1 + $0x420] sm:$0xff] }
 0x1c4   : > { %v1439_v3 = vpop.f32.mrf.mxu0  ;;  %2516 = vmatpush.msra.mxu1 %v5557_v37  ;;  %v5556_v37 = vld [vmem:[%s9262_s1 + $0x418] sm:$0xff] }
 0x1c5   : > { %v1519_v48 = vmax.f32 %v1503_v32, 0.0  ;;  %v1361_v6 = vadd.f32 %v1331_v15, %v1256_v21  ;;  %v7582_v49 = vpop.f32.mrf.mxu1 }
 0x1c6   : > { %2517 = vmatpush.msra.mxu1 %v5556_v37 }
 0x1c7   : > { %1536 = vst [vmem:[#allocation2 + $0x79] sm:$0xff] %v1519_v48  ;;  %v1466_v36 = vadd.f32 %v1436_v19, %v1361_v6  ;;  %1718 = vmatmul.f32.gmra.mxu2 %v7064_v28  ;;  %1976 = vmatmul.f32.gmra.mxu0 %v7531_v27  ;;  %v5540_v28 = vld [vmem:[%s9262_s1 + $0x298] sm:$0xff]  ;;  %v7613_v6 = vsel %vm737_vm0, %v1889_v29, %v1891_v62 }
 0x1c8   : > { %1799 = vmatmul.f32.gmra.mxu3 %v7171_v38  ;;  %2083 = vmatmul.f32.gmra.mxu1 %v7585_v16 }
 0x1c9   : > { %v1485_v19 = vmul.f32 %v7312_v23, %v1466_v36  ;;  %2413 = vmatpush.msra.mxu0 %v5540_v28 }
 0x1ca   : > { %v1229_v11 = vpop.f32.mrf.mxu2 }
 0x1cb   : > { %v1504_v0 = vadd.f32 %v7324_v55, %v1485_v19  ;;  %v1257_v56 = vadd.f32 %v1229_v11, %v7163_v44  ;;  %v1334_v31 = vpop.f32.mrf.mxu3  ;;  %v5506_v44 = vld [vmem:[%s9262_s1 + $0x388] sm:$0xff]  ;;  %v5555_v19 = vld [vmem:[%s9262_s1 + $0x410] sm:$0xff] }
 0x1cc   : > { %v1442_v32 = vpop.f32.mrf.mxu0  ;;  %2158 = vmatpush.msra.mxu2 %v5506_v44  ;;  %2518 = vmatpush.msra.mxu1 %v5555_v19 }
 0x1cd   : > { %v1520_v21 = vmax.f32 %v1504_v0, 0.0  ;;  %v1362_v15 = vadd.f32 %v1334_v31, %v1257_v56  ;;  %v7610_v48 = vpop.f32.mrf.mxu1  ;;  %v5538_v31 = vld [vmem:[%s9262_s1 + $0x288] sm:$0xff] }
 0x1ce   : > { %2159 = vmatpush.msra.mxu2 %v5505_v46  ;;  %v2713_v46 = vld [vmem:[#allocation3 + $0x1f8] sm:$0xff] }
 0x1cf   : > { %1537 = vst [vmem:[#allocation2 + $0x81] sm:$0xff] %v1520_v21  ;;  %v1467_v36 = vadd.f32 %v1439_v3, %v1362_v15  ;;  %1721 = vmatmul.f32.gmra.mxu2 %v7090_v24  ;;  %1979 = vmatmul.f32.gmra.mxu0 %v7559_v17  ;;  %v5539_v24 = vld [vmem:[%s9262_s1 + $0x290] sm:$0xff]  ;;  %v1893_v3 = vrot.slane %v7171_v38, 1  ;;  %v5554_v21 = vld [vmem:[%s9262_s1 + $0x408] sm:$0xff] }
 0x1d0   : > { %1802 = vmatmul.f32.gmra.mxu3 %v7194_v53  ;;  %2086 = vmatmul.f32.gmra.mxu1 %v7613_v6 }
 0x1d1   : > { %v1486_v29 = vmul.f32 %v7312_v23, %v1467_v36  ;;  %2414 = vmatpush.msra.mxu0 %v5539_v24  ;;  %v7648_v44 = vsel %vm737_vm0, %v1893_v3, %v1894_v30  ;;  %2519 = vmatpush.msra.mxu1 %v5554_v21  ;;  %v5521_v24 = vld [vmem:[%s9262_s1 + $0x100] sm:$0xff] }
 0x1d2   : > { %v1232_v28 = vpop.f32.mrf.mxu2  ;;  %v5537_v3 = vld [vmem:[%s9262_s1 + $0x280] sm:$0xff]  ;;  %2312 = vmatpush.msra.mxu3 %v5521_v24  ;;  %v2696_v24 = vld [vmem:[#allocation3 + $0x78] sm:$0xff]  ;;  %2714 = vmatpush.msrb.mxu2 %v2713_v46 }
 0x1d3   : > { %v1505_v62 = vadd.f32 %v7324_v55, %v1486_v29  ;;  %v1258_v11 = vadd.f32 %v1232_v28, %v7189_v47  ;;  %v1337_v0 = vpop.f32.mrf.mxu3  ;;  %2415 = vmatpush.msra.mxu0 %v5538_v31  ;;  %v7651_v47 = vld [vmem:[%s6141_s11 + $0x178] sm:$0x3]  ;;  %v5553_v28 = vld [vmem:[%s9262_s1 + $0x400] sm:$0xff] }
 0x1d4   : > { %v1445_v56 = vpop.f32.mrf.mxu0  ;;  %2520 = vmatpush.msra.mxu1 %v5553_v28  ;;  %v2860_v28 = vld [vmem:[#allocation3 + $0x378] sm:$0xff]  ;;  %2779 = vmatpush.msrb.mxu3 %v2696_v24  ;;  %v2711_v24 = vld [vmem:[#allocation3 + $0x1e8] sm:$0xff] }
 0x1d5   : > { %v1521_v15 = vmax.f32 %v1505_v62, 0.0  ;;  %v1363_v36 = vadd.f32 %v1337_v0, %v1258_v11  ;;  %v7645_v37 = vpop.f32.mrf.mxu1  ;;  %2416 = vmatpush.msra.mxu0 %v5537_v3  ;;  %v2695_v3 = vld [vmem:[#allocation3 + $0x70] sm:$0xff] }
 0x1d6   : > { %9280 = vst [vmem:[#allocation9_spill] sm:$0xff] %v7645_v37  ;;  %2780 = vmatpush.msrb.mxu3 %v2695_v3  ;;  %v2859_v3 = vld [vmem:[#allocation3 + $0x370] sm:$0xff] }
 0x1d7   : > { %1538 = vst [vmem:[#allocation2 + $0x91] sm:$0xff] %v1521_v15  ;;  %v1468_v29 = vadd.f32 %v1442_v32, %v1363_v36  ;;  %1724 = vmatmul.f32.gmra.mxu2 %v7117_v8  ;;  %1982 = vmatmul.f32.gmra.mxu0 %v7585_v16  ;;  %v1896_v32 = vrot.slane %v7651_v47, 1 }
 0x1d8   : > { %1805 = vmatmul.f32.gmra.mxu3 %v7211_v35  ;;  %2089 = vmatmul.f32.gmra.mxu1 %v7648_v44 }
 0x1d9   : > { %v1487_v19 = vmul.f32 %v7312_v23, %v1468_v29  ;;  %v7676_v37 = vsel %vm737_vm0, %v1894_v30, %v1896_v32  ;;  %v2014_v30 = vrot.slane %v7211_v35, 1  ;;  %2861 = vmatpush.msrb.mxu0 %v2860_v28  ;;  %v7690_v35 = vld [vmem:[%s6141_s11 + $0x198] sm:$0xff] }
 0x1da   : > { %v1235_v8 = vpop.f32.mrf.mxu2 }
 0x1db   : > { %v1506_v62 = vadd.f32 %v7324_v55, %v1487_v19  ;;  %v1259_v11 = vadd.f32 %v1235_v8, %v7203_v43  ;;  %v1340_v0 = vpop.f32.mrf.mxu3  ;;  %v2712_v43 = vld [vmem:[#allocation3 + $0x1f0] sm:$0xff]  ;;  %2862 = vmatpush.msrb.mxu0 %v2859_v3  ;;  %v2693_v3 = vld [vmem:[#allocation3 + $0x60] sm:$0xff] }
 0x1dc   : > { %v1448_v31 = vpop.f32.mrf.mxu0  ;;  %2715 = vmatpush.msrb.mxu2 %v2712_v43  ;;  %v2694_v43 = vld [vmem:[#allocation3 + $0x68] sm:$0xff] }
 0x1dd   : > { %v1522_v21 = vmax.f32 %v1506_v62, 0.0  ;;  %v1364_v15 = vadd.f32 %v1340_v0, %v1259_v11  ;;  %v7673_v36 = vpop.f32.mrf.mxu1  ;;  %2781 = vmatpush.msrb.mxu3 %v2694_v43  ;;  %v2710_v43 = vld [vmem:[#allocation3 + $0x1e0] sm:$0xff] }
 0x1de   : > { %2716 = vmatpush.msrb.mxu2 %v2711_v24  ;;  %v2225_v24 = vrot.slane %v7240_v33, 2 }
 0x1df   : > { %1539 = vst [vmem:[#allocation2 + $0x99] sm:$0xff] %v1522_v21  ;;  %v1469_v29 = vadd.f32 %v1445_v56, %v1364_v15  ;;  %1727 = vmatmul.f32.gmra.mxu2 %v7143_v59  ;;  %1985 = vmatmul.f32.gmra.mxu0 %v7613_v6  ;;  %v2015_v56 = vrot.slane %v7237_v51, 1 }
 0x1e0   : > { %1808 = vmatmul.f32.gmra.mxu3 %v7237_v51  ;;  %2092 = vmatmul.f32.gmra.mxu1 %v7676_v37 }
 0x1e1   : > { %v1488_v19 = vmul.f32 %v7312_v23, %v1469_v29  ;;  %v7693_v51 = vsel %vm737_vm0, %v2014_v30, %v2015_v56  ;;  %v7696_v29 = vld [vmem:[%s6141_s11 + $0x190] sm:$0x3]  ;;  %2717 = vmatpush.msrb.mxu2 %v2710_v43  ;;  %2782 = vmatpush.msrb.mxu3 %v2693_v3  ;;  %v3036_v43 = vld [vmem:[#allocation3 + $0xe8] sm:$0xff]  ;;  %v2709_v3 = vld [vmem:[#allocation3 + $0x1d8] sm:$0xff] }
 0x1e2   : > { %v1238_v59 = vpop.f32.mrf.mxu2 }
 0x1e3   : > { %v1507_v32 = vadd.f32 %v7324_v55, %v1488_v19  ;;  %v1260_v8 = vadd.f32 %v1238_v59, %v7227_v34  ;;  %v1343_v62 = vpop.f32.mrf.mxu3  ;;  %v3038_v34 = vld [vmem:[#allocation3 + $0xf8] sm:$0xff]  ;;  %v2017_v19 = vrot.slane %v7696_v29, 1  ;;  %2718 = vmatpush.msrb.mxu2 %v2709_v3 }
 0x1e4   : > { %v1451_v11 = vpop.f32.mrf.mxu0  ;;  %3039 = vmatpush.msrb.mxu1 %v3038_v34 }
 0x1e5   : > { %v1523_v0 = vmax.f32 %v1507_v32, 0.0  ;;  %v1365_v21 = vadd.f32 %v1343_v62, %v1260_v8  ;;  %v7687_v15 = vpop.f32.mrf.mxu1 }
 0x1e6   : > { %9281 = vst [vmem:[#allocation10_spill] sm:$0xff] %v7687_v15 }
 0x1e7   : > { %1540 = vst [vmem:[#allocation2 + $0xa9] sm:$0xff] %v1523_v0  ;;  %v1470_v46 = vadd.f32 %v1448_v31, %v1365_v21  ;;  %1730 = vmatmul.f32.gmra.mxu2 %v7171_v38  ;;  %1988 = vmatmul.f32.gmra.mxu0 %v7648_v44  ;;  %v7709_v21 = vld [vmem:[%s6141_s11 + $0x1a0] sm:$0xff] }
 0x1e8   : > { %1811 = vmatmul.f32.gmra.mxu3 %v7690_v35  ;;  %2095 = vmatmul.f32.gmra.mxu1 %v7693_v51 }
 0x1e9   : > { %v1489_v28 = vmul.f32 %v7312_v23, %v1470_v46  ;;  %v7712_v46 = vsel %vm737_vm0, %v2015_v56, %v2017_v19  ;;  %v2226_v19 = vrot.slane %v7243_v54, 2 }
 0x1ea   : > { %v1241_v31 = vpop.f32.mrf.mxu2 }
 0x1eb   : > { %v1508_v38 = vadd.f32 %v7324_v55, %v1489_v28  ;;  %v1261_v30 = vadd.f32 %v1241_v31, %v7264_v25  ;;  %v1346_v59 = vpop.f32.mrf.mxu3  ;;  %v3037_v25 = vld [vmem:[#allocation3 + $0xf0] sm:$0xff]  ;;  %v2858_v28 = vld [vmem:[#allocation3 + $0x368] sm:$0xff]  ;;  %v5731_v31 = vld [vmem:[%s6141_s11 + $0xf0] sm:$0xff]  ;;  %v2227_v54 = vsel %vm1108_vm1, %v2225_v24, %v2226_v19 }
 0x1ec   : > { %v1454_v32 = vpop.f32.mrf.mxu0  ;;  %3040 = vmatpush.msrb.mxu1 %v3037_v25  ;;  %2863 = vmatpush.msrb.mxu0 %v2858_v28  ;;  %v2692_v28 = vld [vmem:[#allocation3 + $0x58] sm:$0xff] }
 0x1ed   : > { %v1524_v8 = vmax.f32 %v1508_v38, 0.0  ;;  %v1366_v62 = vadd.f32 %v1346_v59, %v1261_v30  ;;  %v7706_v0 = vpop.f32.mrf.mxu1  ;;  %v5732_v38 = vld [vmem:[%s6141_s11 + $0xf8] sm:$0xff]  ;;  %2783 = vmatpush.msrb.mxu3 %v2692_v28 }
 0x1ee   : > { %9282 = vst [vmem:[#allocation11_spill] sm:$0xff] %v7706_v0  ;;  %3041 = vmatpush.msrb.mxu1 %v3036_v43 }
 0x1ef   : > { %1541 = vst [vmem:[#allocation2 + $0xb1] sm:$0xff] %v1524_v8  ;;  %v1471_v34 = vadd.f32 %v1451_v11, %v1366_v62  ;;  %1733 = vmatmul.f32.gmra.mxu2 %v7194_v53  ;;  %1991 = vmatmul.f32.gmra.mxu0 %v7676_v37  ;;  %v2235_v11 = vrot.slane %v5731_v31, 2  ;;  %v2236_v53 = vrot.slane %v5732_v38, 2 }
 0x1f0   : > { %1814 = vmatmul.f32.gmra.mxu3 %v7709_v21  ;;  %2098 = vmatmul.f32.gmra.mxu1 %v7712_v46 }
 0x1f1   : > { %v1490_v56 = vmul.f32 %v7312_v23, %v1471_v34  ;;  %v7727_v31 = vsel %vm1108_vm1, %v2235_v11, %v2236_v53  ;;  %v2228_v11 = vrot.slane %v7275_v42, 2 }
 0x1f2   : > { %v1244_v30 = vpop.f32.mrf.mxu2 }
 0x1f3   : > { %v1509_v33 = vadd.f32 %v7324_v55, %v1490_v56  ;;  %v1262_v59 = vadd.f32 %v1244_v30, %v7301_v45  ;;  %v1349_v8 = vpop.f32.mrf.mxu3  ;;  %v2233_v45 = vrot.slane %v7279_v13, 2  ;;  %v2857_v56 = vld [vmem:[#allocation3 + $0x360] sm:$0xff] }
 0x1f4   : > { %v1947_v62 = vpop.f32.mrf.mxu0  ;;  %2864 = vmatpush.msrb.mxu0 %v2857_v56 }
 0x1f5   : > { %v1525_v0 = vmax.f32 %v1509_v33, 0.0  ;;  %v1367_v15 = vadd.f32 %v1349_v8, %v1262_v59  ;;  %v2054_v34 = vpop.f32.mrf.mxu1  ;;  %v7740_v30 = vsel %vm1108_vm1, %v7199_v58, %v2233_v45  ;;  %v2229_v33 = vsel %vm1108_vm1, %v2226_v19, %v2228_v11  ;;  %v2708_v58 = vld [vmem:[#allocation3 + $0x1d0] sm:$0xff]  ;;  %v5734_v45 = vld [vmem:[%s6141_s11 + $0x110] sm:$0xff] }
 0x1f6   : > { %v2691_v8 = vld [vmem:[#allocation3 + $0x50] sm:$0xff]  ;;  %v2241_v19 = vrot.slane %v5734_v45, 2  ;;  %2719 = vmatpush.msrb.mxu2 %v2708_v58 }
 0x1f7   : > { %1542 = vst [vmem:[#allocation2 + $0xc1] sm:$0xff] %v1525_v0  ;;  %v1472_v25 = vadd.f32 %v1454_v32, %v1367_v15  ;;  %2160 = vmatmul.f32.vlgmr.msra.gmra.mxu2 %v7356_v10  ;;  %2417 = vmatmul.f32.vlgmr.msra.gmra.mxu0 %v7208_v4  ;;  %v2238_v0 = vrot.slane %v7360_v18, 2 }
 0x1f8   : > { %2313 = vmatmul.f32.vlgmr.msra.gmra.mxu3 %v2227_v54  ;;  %2521 = vmatmul.f32.vlgmr.msra.gmra.mxu1 %v7727_v31  ;;  %v2856_v54 = vld [vmem:[#allocation3 + $0x358] sm:$0xff] }
 0x1f9   : > { %v1491_v24 = vmul.f32 %v7312_v23, %v1472_v25  ;;  %v7744_v59 = vsel %vm1108_vm1, %v2236_v53, %v2238_v0  ;;  %v5733_v25 = vld [vmem:[%s6141_s11 + $0x108] sm:$0xff]  ;;  %2784 = vmatpush.msrb.mxu3 %v2691_v8  ;;  %2865 = vmatpush.msrb.mxu0 %v2856_v54 }
 0x1fa   : > { %v1689_v10 = vpop.f32.mrf.mxu2  ;;  %v2240_v43 = vrot.slane %v5733_v25, 2 }
 0x1fb   : > { %v1510_v15 = vadd.f32 %v7324_v55, %v1491_v24  ;;  %v1690_v32 = vadd.f32 %v1689_v10, %v7272_v61  ;;  %v1770_v38 = vpop.f32.mrf.mxu3  ;;  %v3035_v61 = vld [vmem:[#allocation3 + $0xe0] sm:$0xff] }
 0x1fc   : > { %v1950_v13 = vpop.f32.mrf.mxu0  ;;  %3042 = vmatpush.msrb.mxu1 %v3035_v61  ;;  %v7755_v11 = vsel %vm1108_vm1, %v2240_v43, %v2241_v19 }
 0x1fd   : > { %v1526_v23 = vmax.f32 %v1510_v15, 0.0  ;;  %v1818_v42 = vadd.f32 %v1770_v38, %v1690_v32  ;;  %v2057_v18 = vpop.f32.mrf.mxu1  ;;  %v2690_v38 = vld [vmem:[#allocation3 + $0x48] sm:$0xff] }
 0x1fe   : > { %v2675_v0 = vld [vmem:[#allocation2 + $0xc0] sm:$0xff]  ;;  %2785 = vmatpush.msrb.mxu3 %v2690_v38 }
 0x1ff   : > { %1543 = vst [vmem:[#allocation2 + $0xc9] sm:$0xff] %v1526_v23  ;;  %v1995_v55 = vadd.f32 %v1947_v62, %v1818_v42  ;;  %2163 = vmatmul.f32.gmra.mxu2 %v7391_v52  ;;  %2420 = vmatmul.f32.gmra.mxu0 %v7740_v30  ;;  %v2855_v23 = vld [vmem:[#allocation3 + $0x350] sm:$0xff] }
 0x200   : > { %2316 = vmatmul.f32.gmra.mxu3 %v2229_v33  ;;  %2524 = vmatmul.f32.gmra.mxu1 %v7744_v59  ;;  %v2243_v33 = vrot.slane %v7426_v41, 2 }
 0x201   : > { %v7751_v53 = vadd.f32 %v2054_v34, %v1995_v55  ;;  %v3034_v34 = vld [vmem:[#allocation3 + $0xd8] sm:$0xff]  ;;  %2866 = vmatpush.msrb.mxu0 %v2855_v23 }
 0x202   : > { %v1692_v62 = vpop.f32.mrf.mxu2  ;;  %3043 = vmatpush.msrb.mxu1 %v3034_v34  ;;  %v7776_v43 = vsel %vm1108_vm1, %v2241_v19, %v2243_v33  ;;  %v3032_v33 = vld [vmem:[#allocation3 + $0xc8] sm:$0xff] }
 0x203   : > { %v1693_v52 = vadd.f32 %v1692_v62, %v7314_v39  ;;  %v1773_v3 = vpop.f32.mrf.mxu3  ;;  %v2707_v39 = vld [vmem:[#allocation3 + $0x1c8] sm:$0xff]  ;;  %v2706_v62 = vld [vmem:[#allocation3 + $0x1c0] sm:$0xff] }
 0x204   : > { %v1953_v28 = vpop.f32.mrf.mxu0  ;;  %2720 = vmatpush.msrb.mxu2 %v2707_v39 }
 0x205   : > { %v1819_v56 = vadd.f32 %v1773_v3, %v1693_v52  ;;  %v2060_v24 = vpop.f32.mrf.mxu1  ;;  %v2689_v52 = vld [vmem:[#allocation3 + $0x40] sm:$0xff]  ;;  %v2854_v3 = vld [vmem:[#allocation3 + $0x348] sm:$0xff] }
 0x206   : > { %v2676_v10 = vld [vmem:[#allocation2 + $0xc8] sm:$0xff]  ;;  %v3927_v15 = vld [vmem:[#allocation2 + $0xd0] sm:$0x3]  ;;  %2721 = vmatpush.msrb.mxu2 %v2706_v62  ;;  %2786 = vmatpush.msrb.mxu3 %v2689_v52  ;;  %v5737_v52 = vld [vmem:[%s6141_s11 + $0x138] sm:$0xff] }
 0x207   : > { %v1996_v32 = vadd.f32 %v1950_v13, %v1819_v56  ;;  %2166 = vmatmul.f32.gmra.mxu2 %v7423_v5  ;;  %2423 = vmatmul.f32.gmra.mxu0 %v7727_v31  ;;  %v7761_v42 = vrot.slane %v2676_v10, 2  ;;  %v3490_v13 = vrot.slane %v2675_v0, 2  ;;  %v4608_v5 = vrot.slane %v3927_v15, 2  ;;  %v5735_v56 = vld [vmem:[%s6141_s11 + $0x120] sm:$0xff]  ;;  %v5736_v10 = vld [vmem:[%s6141_s11 + $0x128] sm:$0xff] }
 0x208   : > { %2319 = vmatmul.f32.gmra.mxu3 %v7208_v4  ;;  %2527 = vmatmul.f32.gmra.mxu1 %v7755_v11  ;;  %v2245_v0 = vrot.slane %v5735_v56, 2  ;;  %v2246_v15 = vrot.slane %v5736_v10, 2  ;;  %v2852_v62 = vld [vmem:[#allocation3 + $0x338] sm:$0xff]  ;;  %v5738_v56 = vld [vmem:[%s6141_s11 + $0x140] sm:$0xff] }
 0x209   : > { %9283 = vst [vmem:[#allocation12_spill] sm:$0xff] %v7761_v42  ;;  %v7764_v55 = vadd.f32 %v2057_v18, %v1996_v32  ;;  %v7769_v8 = vsel %vm1108_vm1, %v3490_v13, %v7761_v42  ;;  %v7773_v41 = vsel %vm1108_vm1, %v7761_v42, %v4608_v5  ;;  %2867 = vmatpush.msrb.mxu0 %v2854_v3  ;;  %v2688_v13 = vld [vmem:[#allocation3 + $0x38] sm:$0xff]  ;;  %v2248_v5 = vrot.slane %v7480_v57, 2  ;;  %v3031_v57 = vld [vmem:[#allocation3 + $0xc0] sm:$0xff] }
 0x20a   : > { %v1695_v61 = vpop.f32.mrf.mxu2  ;;  %9284 = vst [vmem:[#allocation13_spill] sm:$0xff] %v7769_v8  ;;  %v7788_v38 = vsel %vm1108_vm1, %v2245_v0, %v2246_v15  ;;  %2787 = vmatpush.msrb.mxu3 %v2688_v13  ;;  %v2250_v3 = vrot.slane %v5737_v52, 2  ;;  %v2251_v0 = vrot.slane %v5738_v56, 2 }
 0x20b   : > { %v1696_v4 = vadd.f32 %v1695_v61, %v7353_v14  ;;  %v1776_v58 = vpop.f32.mrf.mxu3  ;;  %9285 = vst [vmem:[#allocation14_spill] sm:$0xff] %v7773_v41  ;;  %v3033_v14 = vld [vmem:[#allocation3 + $0xd0] sm:$0xff] }
 0x20c   : > { %v1956_v18 = vpop.f32.mrf.mxu0  ;;  %3044 = vmatpush.msrb.mxu1 %v3033_v14 }
 0x20d   : > { %v1820_v54 = vadd.f32 %v1776_v58, %v1696_v4  ;;  %v2063_v25 = vpop.f32.mrf.mxu1 }
 0x20e   : > { %3045 = vmatpush.msrb.mxu1 %v3032_v33  ;;  %v2686_v33 = vld [vmem:[#allocation3 + $0x28] sm:$0xff] }
 0x20f   : > { %v1997_v45 = vadd.f32 %v1953_v28, %v1820_v54  ;;  %2169 = vmatmul.f32.gmra.mxu2 %v7451_v60  ;;  %2426 = vmatmul.f32.gmra.mxu0 %v7744_v59 }
 0x210   : > { %2322 = vmatmul.f32.gmra.mxu3 %v7740_v30  ;;  %2530 = vmatmul.f32.gmra.mxu1 %v7776_v43 }
 0x211   : > { %v7784_v19 = vadd.f32 %v2060_v24, %v1997_v45  ;;  %v2705_v24 = vld [vmem:[#allocation3 + $0x1b8] sm:$0xff]  ;;  %v7799_v45 = vsel %vm1108_vm1, %v2246_v15, %v2248_v5  ;;  %3046 = vmatpush.msrb.mxu1 %v3031_v57 }
 0x212   : > { %v1698_v28 = vpop.f32.mrf.mxu2  ;;  %2722 = vmatpush.msrb.mxu2 %v2705_v24  ;;  %v2253_v24 = vrot.slane %v7534_v26, 2  ;;  %v3029_v26 = vld [vmem:[#allocation3 + $0xb0] sm:$0xff] }
 0x213   : > { %v1699_v60 = vadd.f32 %v1698_v28, %v7388_v1  ;;  %v1779_v32 = vpop.f32.mrf.mxu3  ;;  %v2853_v1 = vld [vmem:[#allocation3 + $0x340] sm:$0xff] }
 0x214   : > { %v1959_v30 = vpop.f32.mrf.mxu0  ;;  %2868 = vmatpush.msrb.mxu0 %v2853_v1 }
 0x215   : > { %v1821_v34 = vadd.f32 %v1779_v32, %v1699_v60  ;;  %v2066_v39 = vpop.f32.mrf.mxu1 }
 0x216   : > { %2869 = vmatpush.msrb.mxu0 %v2852_v62 }
 0x217   : > { %v1998_v23 = vadd.f32 %v1956_v18, %v1821_v34  ;;  %2172 = vmatmul.f32.gmra.mxu2 %v7477_v2  ;;  %2429 = vmatmul.f32.gmra.mxu0 %v7755_v11 }
 0x218   : > { %2325 = vmatmul.f32.gmra.mxu3 %v7727_v31  ;;  %2533 = vmatmul.f32.gmra.mxu1 %v7788_v38 }
 0x219   : > { %v7795_v61 = vadd.f32 %v2063_v25, %v1998_v23  ;;  %v2704_v25 = vld [vmem:[#allocation3 + $0x1b0] sm:$0xff]  ;;  %v3030_v23 = vld [vmem:[#allocation3 + $0xb8] sm:$0xff] }
 0x21a   : > { %v1701_v4 = vpop.f32.mrf.mxu2  ;;  %2723 = vmatpush.msrb.mxu2 %v2704_v25  ;;  %3047 = vmatpush.msrb.mxu1 %v3030_v23  ;;  %v5740_v25 = vld [vmem:[%s6141_s11 + $0x158] sm:$0xff] }
 0x21b   : > { %v1702_v2 = vadd.f32 %v1701_v4, %v7420_v9  ;;  %v1782_v58 = vpop.f32.mrf.mxu3  ;;  %v2687_v9 = vld [vmem:[#allocation3 + $0x30] sm:$0xff] }
 0x21c   : > { %v1962_v31 = vpop.f32.mrf.mxu0  ;;  %2788 = vmatpush.msrb.mxu3 %v2687_v9  ;;  %v2256_v9 = vrot.slane %v5740_v25, 2  ;;  %3048 = vmatpush.msrb.mxu1 %v3029_v26 }
 0x21d   : > { %v1822_v18 = vadd.f32 %v1782_v58, %v1702_v2  ;;  %v2069_v54 = vpop.f32.mrf.mxu1  ;;  %v7822_v58 = vsel %vm1108_vm1, %v2251_v0, %v2253_v24 }
 0x21e   : > { %2789 = vmatpush.msrb.mxu3 %v2686_v33 }
 0x21f   : > { %v1999_v14 = vadd.f32 %v1959_v30, %v1822_v18  ;;  %2175 = vmatmul.f32.gmra.mxu2 %v7505_v7  ;;  %2432 = vmatmul.f32.gmra.mxu0 %v7776_v43  ;;  %v7811_v30 = vsel %vm1108_vm1, %v2250_v3, %v2251_v0  ;;  %v2702_v18 = vld [vmem:[#allocation3 + $0x1a0] sm:$0xff] }
 0x220   : > { %2328 = vmatmul.f32.gmra.mxu3 %v7744_v59  ;;  %2536 = vmatmul.f32.gmra.mxu1 %v7799_v45 }
 0x221   : > { %v7807_v10 = vadd.f32 %v2066_v39, %v1999_v14  ;;  %v2703_v39 = vld [vmem:[#allocation3 + $0x1a8] sm:$0xff]  ;;  %v5739_v14 = vld [vmem:[%s6141_s11 + $0x150] sm:$0xff] }
 0x222   : > { %v1704_v15 = vpop.f32.mrf.mxu2  ;;  %2724 = vmatpush.msrb.mxu2 %v2703_v39  ;;  %v2255_v57 = vrot.slane %v5739_v14, 2 }
 0x223   : > { %v1705_v7 = vadd.f32 %v1704_v15, %v7448_v20  ;;  %v1785_v28 = vpop.f32.mrf.mxu3  ;;  %v2851_v20 = vld [vmem:[#allocation3 + $0x330] sm:$0xff] }
 0x224   : > { %v1965_v59 = vpop.f32.mrf.mxu0  ;;  %2870 = vmatpush.msrb.mxu0 %v2851_v20  ;;  %2725 = vmatpush.msrb.mxu2 %v2702_v18  ;;  %v7834_v15 = vsel %vm1108_vm1, %v2255_v57, %v2256_v9 }
 0x225   : > { %v1823_v60 = vadd.f32 %v1785_v28, %v1705_v7  ;;  %v2072_v32 = vpop.f32.mrf.mxu1  ;;  %v3028_v28 = vld [vmem:[#allocation3 + $0xa8] sm:$0xff] }
 0x226   : > { %3049 = vmatpush.msrb.mxu1 %v3028_v28 }
 0x227   : > { %v2000_v34 = vadd.f32 %v1962_v31, %v1823_v60  ;;  %2178 = vmatmul.f32.gmra.mxu2 %v7531_v27  ;;  %2435 = vmatmul.f32.gmra.mxu0 %v7788_v38  ;;  %v2684_v60 = vld [vmem:[#allocation3 + $0x18] sm:$0xff] }
 0x228   : > { %2331 = vmatmul.f32.gmra.mxu3 %v7755_v11  ;;  %2539 = vmatmul.f32.gmra.mxu1 %v7811_v30 }
 0x229   : > { %v7818_v13 = vadd.f32 %v2069_v54, %v2000_v34  ;;  %v2850_v54 = vld [vmem:[#allocation3 + $0x328] sm:$0xff] }
 0x22a   : > { %v1707_v1 = vpop.f32.mrf.mxu2  ;;  %2871 = vmatpush.msrb.mxu0 %v2850_v54  ;;  %v2483_v54 = vrot.slane %v7709_v21, 2 }
 0x22b   : > { %v1708_v27 = vadd.f32 %v1707_v1, %v7474_v63  ;;  %v1788_v5 = vpop.f32.mrf.mxu3  ;;  %v2685_v63 = vld [vmem:[#allocation3 + $0x20] sm:$0xff] }
 0x22c   : > { %v1968_v11 = vpop.f32.mrf.mxu0  ;;  %2790 = vmatpush.msrb.mxu3 %v2685_v63  ;;  %v2122_v63 = vrot.slane %v7709_v21, 1 }
 0x22d   : > { %v1824_v4 = vadd.f32 %v1788_v5, %v1708_v27  ;;  %v2075_v2 = vpop.f32.mrf.mxu1  ;;  %v2700_v27 = vld [vmem:[#allocation3 + $0x190] sm:$0xff]  ;;  %v2848_v5 = vld [vmem:[#allocation3 + $0x318] sm:$0xff] }
 0x22e   : > { %2791 = vmatpush.msrb.mxu3 %v2684_v60 }
 0x22f   : > { %v2001_v31 = vadd.f32 %v1965_v59, %v1824_v4  ;;  %2181 = vmatmul.f32.gmra.mxu2 %v7559_v17  ;;  %2438 = vmatmul.f32.gmra.mxu0 %v7799_v45  ;;  %v2701_v59 = vld [vmem:[#allocation3 + $0x198] sm:$0xff] }
 0x230   : > { %2334 = vmatmul.f32.gmra.mxu3 %v7776_v43  ;;  %2542 = vmatmul.f32.gmra.mxu1 %v7822_v58 }
 0x231   : > { %v7830_v62 = vadd.f32 %v2072_v32, %v2001_v31  ;;  %v2258_v32 = vrot.slane %v7588_v40, 2  ;;  %2726 = vmatpush.msrb.mxu2 %v2701_v59  ;;  %v3027_v40 = vld [vmem:[#allocation3 + $0xa0] sm:$0xff] }
 0x232   : > { %v1710_v52 = vpop.f32.mrf.mxu2  ;;  %3050 = vmatpush.msrb.mxu1 %v3027_v40  ;;  %v5744_v40 = vld [vmem:[%s6141_s11 + $0x188] sm:$0xff] }
 0x233   : > { %v1711_v17 = vadd.f32 %v1710_v52, %v7502_v22  ;;  %v1791_v3 = vpop.f32.mrf.mxu3  ;;  %v2849_v22 = vld [vmem:[#allocation3 + $0x320] sm:$0xff]  ;;  %v7845_v24 = vsel %vm1108_vm1, %v2256_v9, %v2258_v32  ;;  %2727 = vmatpush.msrb.mxu2 %v2700_v27  ;;  %v2379_v27 = vrot.slane %v5744_v40, 2 }
 0x234   : > { %v1971_v43 = vpop.f32.mrf.mxu0  ;;  %2872 = vmatpush.msrb.mxu0 %v2849_v22 }
 0x235   : > { %v1825_v56 = vadd.f32 %v1791_v3, %v1711_v17  ;;  %v2078_v0 = vpop.f32.mrf.mxu1 }
 0x236   : > { %2873 = vmatpush.msrb.mxu0 %v2848_v5 }
 0x237   : > { %v2002_v7 = vadd.f32 %v1968_v11, %v1825_v56  ;;  %2184 = vmatmul.f32.gmra.mxu2 %v7585_v16  ;;  %2441 = vmatmul.f32.gmra.mxu0 %v7811_v30  ;;  %v5741_v11 = vld [vmem:[%s6141_s11 + $0x168] sm:$0xff]  ;;  %v2699_v56 = vld [vmem:[#allocation3 + $0x188] sm:$0xff] }
 0x238   : > { %2337 = vmatmul.f32.gmra.mxu3 %v7788_v38  ;;  %2545 = vmatmul.f32.gmra.mxu1 %v7834_v15  ;;  %v2260_v4 = vrot.slane %v5741_v11, 2 }
 0x239   : > { %v7841_v34 = vadd.f32 %v2075_v2, %v2002_v7  ;;  %v5742_v2 = vld [vmem:[%s6141_s11 + $0x170] sm:$0xff]  ;;  %v2263_v7 = vrot.slane %v7651_v47, 2  ;;  %2728 = vmatpush.msrb.mxu2 %v2699_v56  ;;  %v3025_v47 = vld [vmem:[#allocation3 + $0x90] sm:$0xff] }
 0x23a   : > { %v1713_v23 = vpop.f32.mrf.mxu2  ;;  %v2261_v31 = vrot.slane %v5742_v2, 2 }
 0x23b   : > { %v1714_v16 = vadd.f32 %v1713_v23, %v7528_v50  ;;  %v1794_v39 = vpop.f32.mrf.mxu3  ;;  %v2683_v50 = vld [vmem:[#allocation3 + $0x10] sm:$0xff] }
 0x23c   : > { %v1974_v38 = vpop.f32.mrf.mxu0  ;;  %2792 = vmatpush.msrb.mxu3 %v2683_v50  ;;  %v7861_v17 = vsel %vm1108_vm1, %v2260_v4, %v2261_v31  ;;  %v3024_v4 = vld [vmem:[#allocation3 + $0x88] sm:$0xff] }
 0x23d   : > { %v1826_v33 = vadd.f32 %v1794_v39, %v1714_v16  ;;  %v2081_v20 = vpop.f32.mrf.mxu1  ;;  %v7882_v16 = vsel %vm1108_vm1, %v2261_v31, %v2263_v7 }
 0x23f   : > { %v2003_v1 = vadd.f32 %v1971_v43, %v1826_v33  ;;  %2187 = vmatmul.f32.gmra.mxu2 %v7613_v6  ;;  %2444 = vmatmul.f32.gmra.mxu0 %v7822_v58  ;;  %v2121_v6 = vrot.slane %v7690_v35, 1  ;;  %v3026_v43 = vld [vmem:[#allocation3 + $0x98] sm:$0xff]  ;;  %v2846_v33 = vld [vmem:[#allocation3 + $0x308] sm:$0xff] }
 0x240   : > { %2340 = vmatmul.f32.gmra.mxu3 %v7799_v45  ;;  %2548 = vmatmul.f32.gmra.mxu1 %v7845_v24  ;;  %v2482_v45 = vrot.slane %v7690_v35, 2 }
 0x241   : > { %v7853_v26 = vadd.f32 %v2078_v0, %v2003_v1  ;;  %v7868_v35 = vsel %vm737_vm0, %v2121_v6, %v2122_v63  ;;  %v2682_v0 = vld [vmem:[#allocation3 + $0x8] sm:$0xff]  ;;  %3051 = vmatpush.msrb.mxu1 %v3026_v43 }
 0x242   : > { %v1716_v18 = vpop.f32.mrf.mxu2  ;;  %2793 = vmatpush.msrb.mxu3 %v2682_v0 }
 0x243   : > { %v1717_v14 = vadd.f32 %v1716_v18, %v7556_v12  ;;  %v1797_v57 = vpop.f32.mrf.mxu3  ;;  %v7873_v12 = vsel %vm1108_vm1, %v2482_v45, %v2483_v54  ;;  %3052 = vmatpush.msrb.mxu1 %v3025_v47  ;;  %v2845_v18 = vld [vmem:[#allocation3 + $0x300] sm:$0xff] }
 0x244   : > { %v1977_v25 = vpop.f32.mrf.mxu0  ;;  %v3023_v45 = vld [vmem:[#allocation3 + $0x80] sm:$0xff] }
 0x245   : > { %v1827_v9 = vadd.f32 %v1797_v57, %v1717_v14  ;;  %v2084_v52 = vpop.f32.mrf.mxu1  ;;  %3053 = vmatpush.msrb.mxu1 %v3024_v4  ;;  %v3146_v57 = vld [vmem:[#allocation3 + $0x278] sm:$0xff] }
 0x247   : > { %v2004_v3 = vadd.f32 %v1974_v38, %v1827_v9  ;;  %2190 = vmatmul.f32.gmra.mxu2 %v7648_v44  ;;  %2447 = vmatmul.f32.gmra.mxu0 %v7834_v15  ;;  %v2847_v44 = vld [vmem:[#allocation3 + $0x310] sm:$0xff]  ;;  %v2698_v38 = vld [vmem:[#allocation3 + $0x180] sm:$0xff] }
 0x248   : > { %2343 = vmatmul.f32.gmra.mxu3 %v7811_v30  ;;  %2551 = vmatmul.f32.gmra.mxu1 %v7861_v17 }
 0x249   : > { %v7878_v28 = vadd.f32 %v2081_v20, %v2004_v3  ;;  %2874 = vmatpush.msrb.mxu0 %v2847_v44  ;;  %v5743_v20 = vld [vmem:[%s6141_s11 + $0x180] sm:$0xff]  ;;  %2729 = vmatpush.msrb.mxu2 %v2698_v38  ;;  %v9286_v3 = vld [vmem:[#allocation9_spill] sm:$0xff] }
 0x24a   : > { %v1719_v59 = vpop.f32.mrf.mxu2  ;;  %v2378_v1 = vrot.slane %v5743_v20, 2  ;;  %3054 = vmatpush.msrb.mxu1 %v3023_v45  ;;  %v3145_v38 = vld [vmem:[#allocation3 + $0x270] sm:$0xff] }
 0x24b   : > { %v1720_v60 = vadd.f32 %v1719_v59, %v7582_v49  ;;  %v1800_v22 = vpop.f32.mrf.mxu3  ;;  %v2681_v49 = vld [vmem:[#allocation3] sm:$0xff]  ;;  %2875 = vmatpush.msrb.mxu0 %v2846_v33  ;;  %3147 = vmatpush.msra.mxu2 %v3146_v57  ;;  %v3408_v33 = vld [vmem:[#allocation3 + $0x178] sm:$0xff]  ;;  %v3407_v45 = vld [vmem:[#allocation3 + $0x170] sm:$0xff] }
 0x24c   : > { %v1980_v30 = vpop.f32.mrf.mxu0  ;;  %2794 = vmatpush.msrb.mxu3 %v2681_v49  ;;  %v2380_v6 = vsel %vm1108_vm1, %v2378_v1, %v2379_v27  ;;  %v3253_v49 = vld [vmem:[#allocation3 + $0x3f0] sm:$0xff]  ;;  %v9287_v1 = vld [vmem:[#allocation10_spill] sm:$0xff] }
 0x24d   : > { %v1828_v32 = vadd.f32 %v1800_v22, %v1720_v60  ;;  %v2087_v23 = vpop.f32.mrf.mxu1  ;;  %2876 = vmatpush.msrb.mxu0 %v2845_v18  ;;  %3148 = vmatpush.msra.mxu2 %v3145_v38  ;;  %v3252_v18 = vld [vmem:[#allocation3 + $0x3e8] sm:$0xff]  ;;  %v7946_v38 = vld [vmem:[#allocation2 + $0x20] sm:$0xff] }
 0x24f   : > { %v2005_v39 = vadd.f32 %v1977_v25, %v1828_v32  ;;  %2193 = vmatmul.f32.gmra.mxu2 %v7676_v37  ;;  %2450 = vmatmul.f32.gmra.mxu0 %v7845_v24  ;;  %v2381_v25 = vrot.slane %v7696_v29, 2 }
 0x250   : > { %2346 = vmatmul.f32.gmra.mxu3 %v7822_v58  ;;  %2554 = vmatmul.f32.gmra.mxu1 %v7882_v16 }
 0x251   : > { %v7890_v50 = vadd.f32 %v2084_v52, %v2005_v39  ;;  %v5440_v39 = vld [vmem:[%s6141_s11 + $0x1a8] sm:$0x3]  ;;  %3409 = vmatpush.msra.mxu0 %v3408_v33 }
 0x252   : > { %v1722_v5 = vpop.f32.mrf.mxu2 }
 0x253   : > { %v1723_v37 = vadd.f32 %v1722_v5, %v7610_v48  ;;  %v1803_v11 = vpop.f32.mrf.mxu3  ;;  %v3254_v48 = vld [vmem:[#allocation3 + $0x3f8] sm:$0xff]  ;;  %3410 = vmatpush.msra.mxu0 %v3407_v45 }
 0x254   : > { %v1983_v58 = vpop.f32.mrf.mxu0  ;;  %3255 = vmatpush.msra.mxu3 %v3254_v48  ;;  %v7968_v45 = vld [vmem:[#allocation2 + $0x48] sm:$0xff] }
 0x255   : > { %v1829_v2 = vadd.f32 %v1803_v11, %v1723_v37  ;;  %v2090_v31 = vpop.f32.mrf.mxu1  ;;  %v7921_v11 = vld [vmem:[#allocation2] sm:$0xff] }
 0x256   : > { %3256 = vmatpush.msra.mxu3 %v3253_v49  ;;  %v2966_v4 = vrot.slane %v7921_v11, 1  ;;  %v7948_v49 = vld [vmem:[#allocation2 + $0x38] sm:$0xff] }
 0x257   : > { %v2006_v14 = vadd.f32 %v1980_v30, %v1829_v2  ;;  %2196 = vmatmul.f32.gmra.mxu2 %v7693_v51  ;;  %2453 = vmatmul.f32.gmra.mxu0 %v7861_v17  ;;  %v7925_v2 = vld [vmem:[#allocation2 + $0x8] sm:$0xff] }
 0x258   : > { %2349 = vmatmul.f32.gmra.mxu3 %v7834_v15  ;;  %2557 = vmatmul.f32.gmra.mxu1 %v2380_v6  ;;  %v2382_v15 = vsel %vm1108_vm1, %v2379_v27, %v2381_v25 }
 0x259   : > { %v7898_v9 = vadd.f32 %v2087_v23, %v2006_v14  ;;  %v9288_v14 = vld [vmem:[#allocation11_spill] sm:$0xff]  ;;  %3257 = vmatpush.msra.mxu3 %v3252_v18 }
 0x25a   : > { %v1725_v52 = vpop.f32.mrf.mxu2 }
 0x25b   : > { %v1726_v43 = vadd.f32 %v1725_v52, %v9286_v3  ;;  %v1806_v56 = vpop.f32.mrf.mxu3 }
 0x25c   : > { %v1986_v51 = vpop.f32.mrf.mxu0 }
 0x25d   : > { %v1830_v0 = vadd.f32 %v1806_v56, %v1726_v43  ;;  %v2093_v44 = vpop.f32.mrf.mxu1  ;;  %v7932_v43 = vld [vmem:[#allocation2 + $0x18] sm:$0xff]  ;;  %v7934_v56 = vld [vmem:[#allocation2 + $0x30] sm:$0xff] }
 0x25f   : > { %v2007_v7 = vadd.f32 %v1983_v58, %v1830_v0  ;;  %2199 = vmatmul.f32.gmra.mxu2 %v7712_v46  ;;  %2456 = vmatmul.f32.gmra.mxu0 %v7882_v16  ;;  %v2124_v46 = vrot.slane %v5440_v39, 1 }
 0x260   : > { %2352 = vmatmul.f32.gmra.mxu3 %v7845_v24  ;;  %2560 = vmatmul.f32.gmra.mxu1 %v2382_v15  ;;  %v2485_v24 = vrot.slane %v5440_v39, 2 }
 0x261   : > { %v7905_v29 = vadd.f32 %v2090_v31, %v2007_v7  ;;  %v3513_v31 = vld [vmem:[#allocation3 + $0x2f8] sm:$0xff]  ;;  %v3143_v7 = vld [vmem:[#allocation3 + $0x260] sm:$0xff] }
 0x262   : > { %v1728_v59 = vpop.f32.mrf.mxu2  ;;  %v2486_v37 = vsel %vm1108_vm1, %v2483_v54, %v2485_v24  ;;  %3514 = vmatpush.msra.mxu1 %v3513_v31 }
 0x263   : > { %v1729_v60 = vadd.f32 %v1728_v59, %v7673_v36  ;;  %v1809_v22 = vpop.f32.mrf.mxu3  ;;  %v3251_v59 = vld [vmem:[#allocation3 + $0x3e0] sm:$0xff] }
 0x264   : > { %v1989_v30 = vpop.f32.mrf.mxu0  ;;  %3258 = vmatpush.msra.mxu3 %v3251_v59 }
 0x265   : > { %v1831_v32 = vadd.f32 %v1809_v22, %v1729_v60  ;;  %v2096_v23 = vpop.f32.mrf.mxu1 }
 0x267   : > { %v2008_v47 = vadd.f32 %v1986_v51, %v1831_v32  ;;  %2202 = vmatmul.f32.gmra.mxu2 %v7868_v35  ;;  %2459 = vmatmul.f32.gmra.mxu0 %v2380_v6  ;;  %v3144_v6 = vld [vmem:[#allocation3 + $0x268] sm:$0xff]  ;;  %v7936_v51 = vld [vmem:[#allocation2 + $0x10] sm:$0x3] }
 0x268   : > { %2355 = vmatmul.f32.gmra.mxu3 %v7861_v17  ;;  %2563 = vmatmul.f32.gmra.mxu1 %v7873_v12  ;;  %v2125_v17 = vsel %vm737_vm0, %v2122_v63, %v2124_v46  ;;  %v2967_v63 = vrot.slane %v7925_v2, 1 }
 0x269   : > { %v7912_v20 = vadd.f32 %v2093_v44, %v2008_v47  ;;  %3149 = vmatpush.msra.mxu2 %v3144_v6  ;;  %v2969_v44 = vrot.slane %v7936_v51, 1 }
 0x26a   : > { %v1731_v36 = vpop.f32.mrf.mxu2  ;;  %v2968_v3 = vsel %vm737_vm0, %v2966_v4, %v2967_v63 }
 0x26b   : > { %v1732_v40 = vadd.f32 %v1731_v36, %v9287_v1  ;;  %v1812_v27 = vpop.f32.mrf.mxu3  ;;  %3150 = vmatpush.msra.mxu2 %v3143_v7  ;;  %v2970_v24 = vsel %vm737_vm0, %v2967_v63, %v2969_v44  ;;  %v3511_v36 = vld [vmem:[#allocation3 + $0x2e8] sm:$0xff]  ;;  %v3142_v1 = vld [vmem:[#allocation3 + $0x258] sm:$0xff]  ;;  %v7964_v63 = vld [vmem:[%s9264_s3] ss:$0 sm:$0xff] }
 0x26c   : > { %v1992_v35 = vpop.f32.mrf.mxu0  ;;  %v3404_v44 = vld [vmem:[#allocation3 + $0x158] sm:$0xff] }
 0x26d   : > { %v1832_v12 = vadd.f32 %v1812_v27, %v1732_v40  ;;  %v2099_v5 = vpop.f32.mrf.mxu1  ;;  %v3250_v40 = vld [vmem:[#allocation3 + $0x3d8] sm:$0xff]  ;;  %3151 = vmatpush.msra.mxu2 %v3142_v1  ;;  %v3248_v1 = vld [vmem:[#allocation3 + $0x3c8] sm:$0xff] }
 0x26e   : > { %3259 = vmatpush.msra.mxu3 %v3250_v40 }
 0x26f   : > { %v2009_v58 = vadd.f32 %v1989_v30, %v1832_v12  ;;  %2205 = vmatmul.f32.gmra.mxu2 %v2125_v17  ;;  %2462 = vmatmul.f32.gmra.mxu0 %v2382_v15  ;;  %v3512_v15 = vld [vmem:[#allocation3 + $0x2f0] sm:$0xff]  ;;  %v3406_v30 = vld [vmem:[#allocation3 + $0x168] sm:$0xff] }
 0x270   : > { %2358 = vmatmul.f32.gmra.mxu3 %v7882_v16  ;;  %2566 = vmatmul.f32.gmra.mxu1 %v2486_v37  ;;  %v7956_v17 = vld [vmem:[%s9263_s2] ss:$0 sm:$0xff] }
 0x271   : > { %v7928_v21 = vadd.f32 %v2096_v23, %v2009_v58  ;;  %3515 = vmatpush.msra.mxu1 %v3512_v15  ;;  %3411 = vmatpush.msra.mxu0 %v3406_v30  ;;  %v2972_v58 = vrot.slane %v7946_v38, 1 }
 0x272   : > { %v1734_v54 = vpop.f32.mrf.mxu2 }
 0x273   : > { %v1735_v57 = vadd.f32 %v1734_v54, %v9288_v14  ;;  %v1815_v48 = vpop.f32.mrf.mxu3  ;;  %3516 = vmatpush.msra.mxu1 %v3511_v36  ;;  %v2971_v54 = vrot.slane %v7932_v43, 1  ;;  %v3140_v36 = vld [vmem:[#allocation3 + $0x248] sm:$0xff] }
 0x274   : > { %v2418_v16 = vpop.f32.mrf.mxu0 }
 0x275   : > { %v1833_v25 = vadd.f32 %v1815_v48, %v1735_v57  ;;  %v2522_v52 = vpop.f32.mrf.mxu1  ;;  %v7973_v57 = vsel %vm737_vm0, %v2971_v54, %v2972_v58  ;;  %v7977_v48 = vld [vmem:[#allocation2 + $0x28] sm:$0x3]  ;;  %v7997_v54 = vld [vmem:[#allocation2 + $0x60] sm:$0xff] }
 0x277   : > { %v2010_v0 = vadd.f32 %v1992_v35, %v1833_v25  ;;  %2730 = vmatmul.f32.vlgmr.msrb.gmra.mxu2 %v7932_v43  ;;  %2877 = vmatmul.f32.vlgmr.msrb.gmra.mxu0 %v7934_v56  ;;  %v3405_v35 = vld [vmem:[#allocation3 + $0x160] sm:$0xff] }
 0x278   : > { %2795 = vmatmul.f32.vlgmr.msrb.gmra.mxu3 %v7921_v11  ;;  %3055 = vmatmul.f32.vlgmr.msrb.gmra.mxu1 %v2968_v3  ;;  %v3510_v25 = vld [vmem:[#allocation3 + $0x2e0] sm:$0xff]  ;;  %v3249_v3 = vld [vmem:[#allocation3 + $0x3d0] sm:$0xff] }
 0x279   : > { %v7942_v60 = vadd.f32 %v2099_v5, %v2010_v0  ;;  %3412 = vmatpush.msra.mxu0 %v3405_v35  ;;  %3517 = vmatpush.msra.mxu1 %v3510_v25 }
 0x27a   : > { %v2161_v22 = vpop.f32.mrf.mxu2  ;;  %3260 = vmatpush.msra.mxu3 %v3249_v3 }
 0x27b   : > { %v2209_v32 = vadd.f32 %v2161_v22, %v7751_v53  ;;  %v2314_v23 = vpop.f32.mrf.mxu3  ;;  %v2974_v22 = vrot.slane %v7977_v48, 1  ;;  %3413 = vmatpush.msra.mxu0 %v3404_v44  ;;  %v3508_v44 = vld [vmem:[#allocation3 + $0x2d0] sm:$0xff] }
 0x27c   : > { %v2421_v39 = vpop.f32.mrf.mxu0  ;;  %3261 = vmatpush.msra.mxu3 %v3248_v1 }
 0x27d   : > { %v2362_v47 = vadd.f32 %v2314_v23, %v2209_v32  ;;  %v2525_v46 = vpop.f32.mrf.mxu1 }
 0x27f   : > { %v2466_v33 = vadd.f32 %v2418_v16, %v2362_v47  ;;  %2733 = vmatmul.f32.gmra.mxu2 %v7946_v38  ;;  %2880 = vmatmul.f32.gmra.mxu0 %v7948_v49  ;;  %v7983_v47 = vld [vmem:[#allocation2 + $0x50] sm:$0xff] }
 0x280   : > { %2798 = vmatmul.f32.gmra.mxu3 %v7925_v2  ;;  %3058 = vmatmul.f32.gmra.mxu1 %v2970_v24 }
 0x281   : > { %v2570_v53 = vadd.f32 %v2522_v52, %v2466_v33  ;;  %v3141_v52 = vld [vmem:[#allocation3 + $0x250] sm:$0xff] }
 0x282   : > { %v2164_v27 = vpop.f32.mrf.mxu2  ;;  %3152 = vmatpush.msra.mxu2 %v3141_v52 }
 0x283   : > { %v2586_v12 = vmul.f32 %v7956_v17, %v2570_v53  ;;  %v2210_v5 = vadd.f32 %v2164_v27, %v7764_v55  ;;  %v2317_v37 = vpop.f32.mrf.mxu3  ;;  %v3509_v53 = vld [vmem:[#allocation3 + $0x2d8] sm:$0xff]  ;;  %v3403_v27 = vld [vmem:[#allocation3 + $0x150] sm:$0xff] }
 0x284   : > { %v2424_v4 = vpop.f32.mrf.mxu0  ;;  %3518 = vmatpush.msra.mxu1 %v3509_v53  ;;  %3153 = vmatpush.msra.mxu2 %v3140_v36 }
 0x285   : > { %v2602_v31 = vadd.f32 %v7964_v63, %v2586_v12  ;;  %v2363_v6 = vadd.f32 %v2317_v37, %v2210_v5  ;;  %v2528_v18 = vpop.f32.mrf.mxu1  ;;  %v2977_v37 = vrot.slane %v7948_v49, 1  ;;  %3414 = vmatpush.msra.mxu0 %v3403_v27 }
 0x286   : > { %3519 = vmatpush.msra.mxu1 %v3508_v44 }
 0x287   : > { %v2618_v55 = vmax.f32 %v2602_v31, 0.0  ;;  %v2467_v14 = vadd.f32 %v2421_v39, %v2363_v6  ;;  %2736 = vmatmul.f32.gmra.mxu2 %v7934_v56  ;;  %2883 = vmatmul.f32.gmra.mxu0 %v7968_v45 }
 0x288   : > { %2801 = vmatmul.f32.gmra.mxu3 %v7932_v43  ;;  %3061 = vmatmul.f32.gmra.mxu1 %v7973_v57 }
 0x289   : > { %2635 = vst [vmem:[#allocation2 + $0xd9] sm:$0xff] %v2618_v55  ;;  %v2571_v16 = vadd.f32 %v2525_v46, %v2467_v14 }
 0x28a   : > { %v2167_v0 = vpop.f32.mrf.mxu2 }
 0x28b   : > { %v2587_v15 = vmul.f32 %v7956_v17, %v2571_v16  ;;  %v2211_v7 = vadd.f32 %v2167_v0, %v7784_v19  ;;  %v2320_v59 = vpop.f32.mrf.mxu3  ;;  %v7988_v19 = vsel %vm737_vm0, %v2972_v58, %v2974_v22  ;;  %v8004_v16 = vld [vmem:[#allocation2 + $0x40] sm:$0x3] }
 0x28c   : > { %v2427_v30 = vpop.f32.mrf.mxu0 }
 0x28d   : > { %v2603_v32 = vadd.f32 %v7964_v63, %v2587_v15  ;;  %v2364_v23 = vadd.f32 %v2320_v59, %v2211_v7  ;;  %v2531_v39 = vpop.f32.mrf.mxu1  ;;  %v3139_v15 = vld [vmem:[#allocation3 + $0x240] sm:$0xff] }
 0x28e   : > { %v3247_v7 = vld [vmem:[#allocation3 + $0x3c0] sm:$0xff]  ;;  %3154 = vmatpush.msra.mxu2 %v3139_v15 }
 0x28f   : > { %v2619_v46 = vmax.f32 %v2603_v32, 0.0  ;;  %v2468_v24 = vadd.f32 %v2424_v4, %v2364_v23  ;;  %2739 = vmatmul.f32.gmra.mxu2 %v7948_v49  ;;  %2886 = vmatmul.f32.gmra.mxu0 %v7983_v47 }
 0x290   : > { %2804 = vmatmul.f32.gmra.mxu3 %v7946_v38  ;;  %3064 = vmatmul.f32.gmra.mxu1 %v7988_v19  ;;  %v8008_v25 = vld [vmem:[#allocation2 + $0xd8] sm:$0xff] }
 0x291   : > { %2636 = vst [vmem:[#allocation2 + $0xe1] sm:$0xff] %v2619_v46  ;;  %v2572_v33 = vadd.f32 %v2528_v18, %v2468_v24  ;;  %v2976_v18 = vrot.slane %v7934_v56, 1  ;;  %3262 = vmatpush.msra.mxu3 %v3247_v7 }
 0x292   : > { %v2170_v40 = vpop.f32.mrf.mxu2 }
 0x293   : > { %v2588_v35 = vmul.f32 %v7956_v17, %v2572_v33  ;;  %v2212_v12 = vadd.f32 %v2170_v40, %v7795_v61  ;;  %v2323_v5 = vpop.f32.mrf.mxu3  ;;  %v8002_v61 = vsel %vm737_vm0, %v2976_v18, %v2977_v37  ;;  %v2979_v33 = vrot.slane %v8004_v16, 1  ;;  %v3507_v18 = vld [vmem:[#allocation3 + $0x2c8] sm:$0xff] }
 0x294   : > { %v2430_v58 = vpop.f32.mrf.mxu0  ;;  %3520 = vmatpush.msra.mxu1 %v3507_v18 }
 0x295   : > { %v2604_v4 = vadd.f32 %v7964_v63, %v2588_v35  ;;  %v2365_v31 = vadd.f32 %v2323_v5, %v2212_v12  ;;  %v2534_v6 = vpop.f32.mrf.mxu1 }
 0x297   : > { %v2620_v55 = vmax.f32 %v2604_v4, 0.0  ;;  %v2469_v14 = vadd.f32 %v2427_v30, %v2365_v31  ;;  %2742 = vmatmul.f32.gmra.mxu2 %v7968_v45  ;;  %2889 = vmatmul.f32.gmra.mxu0 %v7997_v54  ;;  %v3402_v30 = vld [vmem:[#allocation3 + $0x148] sm:$0xff]  ;;  %v8033_v4 = vsel %vm737_vm0, %v2977_v37, %v2979_v33  ;;  %v2982_v37 = vrot.slane %v7983_v47, 1 }
 0x298   : > { %2807 = vmatmul.f32.gmra.mxu3 %v7934_v56  ;;  %3067 = vmatmul.f32.gmra.mxu1 %v8002_v61  ;;  %v8010_v52 = vld [vmem:[#allocation2 + $0xe0] sm:$0xff]  ;;  %v3930_v3 = vld [vmem:[#allocation2 + $0xe8] sm:$0x3]  ;;  %v8051_v33 = vld [vmem:[#allocation2 + $0x58] sm:$0x3] }
 0x299   : > { %2637 = vst [vmem:[#allocation2 + $0xf1] sm:$0xff] %v2620_v55  ;;  %v2573_v0 = vadd.f32 %v2531_v39, %v2469_v14  ;;  %v8013_v59 = vrot.slane %v8010_v52, 2  ;;  %v4613_v32 = vrot.slane %v3930_v3, 2  ;;  %3415 = vmatpush.msra.mxu0 %v3402_v30  ;;  %v3595_v39 = vrot.slane %v8008_v25, 2  ;;  %v3138_v55 = vld [vmem:[#allocation3 + $0x238] sm:$0xff] }
 0x29a   : > { %v2173_v22 = vpop.f32.mrf.mxu2  ;;  %v3246_v14 = vld [vmem:[#allocation3 + $0x3b8] sm:$0xff]  ;;  %3155 = vmatpush.msra.mxu2 %v3138_v55 }
 0x29b   : > { %9289 = vst [vmem:[#allocation9_spill] sm:$0xff] %v8013_v59  ;;  %v2589_v23 = vmul.f32 %v7956_v17, %v2573_v0  ;;  %v2213_v46 = vadd.f32 %v2173_v22, %v7807_v10  ;;  %v2326_v24 = vpop.f32.mrf.mxu3  ;;  %v8022_v27 = vsel %vm1108_vm1, %v3595_v39, %v8013_v59  ;;  %v8026_v35 = vsel %vm1108_vm1, %v8013_v59, %v4613_v32  ;;  %v8028_v10 = vld [vmem:[#allocation2 + $0x68] sm:$0xff] }
 0x29c   : > { %v2433_v53 = vpop.f32.mrf.mxu0  ;;  %9290 = vst [vmem:[#allocation10_spill] sm:$0xff] %v8022_v27  ;;  %3263 = vmatpush.msra.mxu3 %v3246_v14  ;;  %v2981_v32 = vrot.slane %v7968_v45, 1  ;;  %v2984_v14 = vrot.slane %v8051_v33, 1 }
 0x29d   : > { %v2605_v36 = vadd.f32 %v7964_v63, %v2589_v23  ;;  %v2366_v1 = vadd.f32 %v2326_v24, %v2213_v46  ;;  %v2537_v40 = vpop.f32.mrf.mxu1  ;;  %9291 = vst [vmem:[#allocation11_spill] sm:$0xff] %v8026_v35  ;;  %v8042_v23 = vld [vmem:[#allocation2 + $0x78] sm:$0xff] }
 0x29f   : > { %v2621_v12 = vmax.f32 %v2605_v36, 0.0  ;;  %v2470_v5 = vadd.f32 %v2430_v58, %v2366_v1  ;;  %2745 = vmatmul.f32.gmra.mxu2 %v7983_v47  ;;  %2892 = vmatmul.f32.gmra.mxu0 %v8028_v10  ;;  %v3401_v58 = vld [vmem:[#allocation3 + $0x140] sm:$0xff]  ;;  %v3137_v1 = vld [vmem:[#allocation3 + $0x230] sm:$0xff] }
 0x2a0   : > { %2810 = vmatmul.f32.gmra.mxu3 %v7948_v49  ;;  %3070 = vmatmul.f32.gmra.mxu1 %v8033_v4  ;;  %v3506_v36 = vld [vmem:[#allocation3 + $0x2c0] sm:$0xff] }
 0x2a1   : > { %2638 = vst [vmem:[#allocation2 + $0xf9] sm:$0xff] %v2621_v12  ;;  %v2574_v31 = vadd.f32 %v2534_v6, %v2470_v5  ;;  %3416 = vmatpush.msra.mxu0 %v3401_v58  ;;  %v3245_v12 = vld [vmem:[#allocation3 + $0x3b0] sm:$0xff]  ;;  %3521 = vmatpush.msra.mxu1 %v3506_v36 }
 0x2a2   : > { %v2176_v3 = vpop.f32.mrf.mxu2  ;;  %3156 = vmatpush.msra.mxu2 %v3137_v1  ;;  %3264 = vmatpush.msra.mxu3 %v3245_v12 }
 0x2a3   : > { %v2590_v0 = vmul.f32 %v7956_v17, %v2574_v31  ;;  %v2214_v44 = vadd.f32 %v2176_v3, %v7818_v13  ;;  %v2329_v15 = vpop.f32.mrf.mxu3  ;;  %v8047_v13 = vsel %vm737_vm0, %v2981_v32, %v2982_v37  ;;  %v3505_v32 = vld [vmem:[#allocation3 + $0x2b8] sm:$0xff] }
 0x2a4   : > { %v2436_v7 = vpop.f32.mrf.mxu0  ;;  %3522 = vmatpush.msra.mxu1 %v3505_v32  ;;  %v3243_v32 = vld [vmem:[#allocation3 + $0x3a0] sm:$0xff] }
 0x2a5   : > { %v2606_v22 = vadd.f32 %v7964_v63, %v2590_v0  ;;  %v2367_v6 = vadd.f32 %v2329_v15, %v2214_v44  ;;  %v2540_v30 = vpop.f32.mrf.mxu1  ;;  %v8057_v44 = vld [vmem:[#allocation2 + $0x80] sm:$0xff] }
 0x2a7   : > { %v2622_v46 = vmax.f32 %v2606_v22, 0.0  ;;  %v2471_v24 = vadd.f32 %v2433_v53, %v2367_v6  ;;  %2748 = vmatmul.f32.gmra.mxu2 %v7997_v54  ;;  %2895 = vmatmul.f32.gmra.mxu0 %v8042_v23  ;;  %v3400_v53 = vld [vmem:[#allocation3 + $0x138] sm:$0xff] }
 0x2a8   : > { %2813 = vmatmul.f32.gmra.mxu3 %v7968_v45  ;;  %3073 = vmatmul.f32.gmra.mxu1 %v8047_v13 }
 0x2a9   : > { %2639 = vst [vmem:[#allocation2 + $0x109] sm:$0xff] %v2622_v46  ;;  %v2575_v39 = vadd.f32 %v2537_v40, %v2471_v24  ;;  %3417 = vmatpush.msra.mxu0 %v3400_v53  ;;  %v3136_v46 = vld [vmem:[#allocation3 + $0x228] sm:$0xff] }
 0x2aa   : > { %v2179_v5 = vpop.f32.mrf.mxu2  ;;  %v3244_v24 = vld [vmem:[#allocation3 + $0x3a8] sm:$0xff]  ;;  %3157 = vmatpush.msra.mxu2 %v3136_v46 }
 0x2ab   : > { %v2591_v31 = vmul.f32 %v7956_v17, %v2575_v39  ;;  %v2215_v18 = vadd.f32 %v2179_v5, %v7830_v62  ;;  %v2332_v55 = vpop.f32.mrf.mxu3  ;;  %v8062_v62 = vsel %vm737_vm0, %v2982_v37, %v2984_v14  ;;  %v2987_v37 = vrot.slane %v8028_v10, 1  ;;  %3265 = vmatpush.msra.mxu3 %v3244_v24 }
 0x2ac   : > { %v2439_v3 = vpop.f32.mrf.mxu0 }
 0x2ad   : > { %v2607_v58 = vadd.f32 %v7964_v63, %v2591_v31  ;;  %v2368_v40 = vadd.f32 %v2332_v55, %v2215_v18  ;;  %v2543_v0 = vpop.f32.mrf.mxu1  ;;  %v2986_v18 = vrot.slane %v7997_v54, 1  ;;  %v8071_v55 = vld [vmem:[#allocation2 + $0x90] sm:$0xff]  ;;  %3266 = vmatpush.msra.mxu3 %v3243_v32 }
 0x2af   : > { %v2623_v15 = vmax.f32 %v2607_v58, 0.0  ;;  %v2472_v22 = vadd.f32 %v2436_v7, %v2368_v40  ;;  %2751 = vmatmul.f32.gmra.mxu2 %v8028_v10  ;;  %2898 = vmatmul.f32.gmra.mxu0 %v8057_v44  ;;  %v3399_v7 = vld [vmem:[#allocation3 + $0x130] sm:$0xff]  ;;  %v8080_v40 = vld [vmem:[#allocation2 + $0x70] sm:$0x3] }
 0x2b0   : > { %2816 = vmatmul.f32.gmra.mxu3 %v7983_v47  ;;  %3076 = vmatmul.f32.gmra.mxu1 %v8062_v62 }
 0x2b1   : > { %2640 = vst [vmem:[#allocation2 + $0x111] sm:$0xff] %v2623_v15  ;;  %v2576_v6 = vadd.f32 %v2540_v30, %v2472_v22  ;;  %3418 = vmatpush.msra.mxu0 %v3399_v7  ;;  %v3504_v22 = vld [vmem:[#allocation3 + $0x2b0] sm:$0xff] }
 0x2b2   : > { %v2182_v39 = vpop.f32.mrf.mxu2  ;;  %3523 = vmatpush.msra.mxu1 %v3504_v22  ;;  %v3134_v22 = vld [vmem:[#allocation3 + $0x218] sm:$0xff] }
 0x2b3   : > { %v2592_v36 = vmul.f32 %v7956_v17, %v2576_v6  ;;  %v2216_v1 = vadd.f32 %v2182_v39, %v7841_v34  ;;  %v2335_v12 = vpop.f32.mrf.mxu3  ;;  %v8076_v34 = vsel %vm737_vm0, %v2986_v18, %v2987_v37  ;;  %v3135_v6 = vld [vmem:[#allocation3 + $0x220] sm:$0xff] }
 0x2b4   : > { %v2442_v5 = vpop.f32.mrf.mxu0  ;;  %3158 = vmatpush.msra.mxu2 %v3135_v6  ;;  %v3242_v6 = vld [vmem:[#allocation3 + $0x398] sm:$0xff] }
 0x2b5   : > { %v2608_v53 = vadd.f32 %v7964_v63, %v2592_v36  ;;  %v2369_v30 = vadd.f32 %v2335_v12, %v2216_v1  ;;  %v2546_v31 = vpop.f32.mrf.mxu1  ;;  %v2989_v36 = vrot.slane %v8080_v40, 1  ;;  %3267 = vmatpush.msra.mxu3 %v3242_v6  ;;  %v3133_v6 = vld [vmem:[#allocation3 + $0x210] sm:$0xff] }
 0x2b6   : > { %3159 = vmatpush.msra.mxu2 %v3134_v22  ;;  %v3502_v22 = vld [vmem:[#allocation3 + $0x2a0] sm:$0xff] }
 0x2b7   : > { %v2624_v14 = vmax.f32 %v2608_v53, 0.0  ;;  %v2473_v58 = vadd.f32 %v2439_v3, %v2369_v30  ;;  %2754 = vmatmul.f32.gmra.mxu2 %v8042_v23  ;;  %2901 = vmatmul.f32.gmra.mxu0 %v8071_v55  ;;  %v3398_v3 = vld [vmem:[#allocation3 + $0x128] sm:$0xff] }
 0x2b8   : > { %2819 = vmatmul.f32.gmra.mxu3 %v7997_v54  ;;  %3079 = vmatmul.f32.gmra.mxu1 %v8076_v34  ;;  %v8086_v30 = vld [vmem:[#allocation2 + $0x98] sm:$0xff] }
 0x2b9   : > { %2641 = vst [vmem:[#allocation2 + $0x121] sm:$0xff] %v2624_v14  ;;  %v2577_v15 = vadd.f32 %v2543_v0, %v2473_v58  ;;  %3419 = vmatpush.msra.mxu0 %v3398_v3  ;;  %3160 = vmatpush.msra.mxu2 %v3133_v6  ;;  %v3501_v6 = vld [vmem:[#allocation3 + $0x298] sm:$0xff] }
 0x2ba   : > { %v2185_v46 = vpop.f32.mrf.mxu2 }
 0x2bb   : > { %v2593_v24 = vmul.f32 %v7956_v17, %v2577_v15  ;;  %v2217_v39 = vadd.f32 %v2185_v46, %v7853_v26  ;;  %v2338_v7 = vpop.f32.mrf.mxu3  ;;  %v8091_v26 = vsel %vm737_vm0, %v2987_v37, %v2989_v36  ;;  %v3503_v15 = vld [vmem:[#allocation3 + $0x2a8] sm:$0xff]  ;;  %v2992_v37 = vrot.slane %v8057_v44, 1 }
 0x2bc   : > { %v2445_v1 = vpop.f32.mrf.mxu0  ;;  %3524 = vmatpush.msra.mxu1 %v3503_v15 }
 0x2bd   : > { %v2609_v12 = vadd.f32 %v7964_v63, %v2593_v24  ;;  %v2370_v0 = vadd.f32 %v2338_v7, %v2217_v39  ;;  %v2549_v53 = vpop.f32.mrf.mxu1 }
 0x2be   : > { %3525 = vmatpush.msra.mxu1 %v3502_v22 }
 0x2bf   : > { %v2625_v18 = vmax.f32 %v2609_v12, 0.0  ;;  %v2474_v14 = vadd.f32 %v2442_v5, %v2370_v0  ;;  %2757 = vmatmul.f32.gmra.mxu2 %v8057_v44  ;;  %2904 = vmatmul.f32.gmra.mxu0 %v8086_v30  ;;  %v3397_v5 = vld [vmem:[#allocation3 + $0x120] sm:$0xff]  ;;  %v2991_v12 = vrot.slane %v8042_v23, 1  ;;  %v8100_v0 = vld [vmem:[#allocation2 + $0xa8] sm:$0xff] }
 0x2c0   : > { %2822 = vmatmul.f32.gmra.mxu3 %v8028_v10  ;;  %3082 = vmatmul.f32.gmra.mxu1 %v8091_v26  ;;  %9292 = vst [vmem:[#allocation15_spill] sm:$0xff] %v8100_v0 }
 0x2c1   : > { %2642 = vst [vmem:[#allocation2 + $0x129] sm:$0xff] %v2625_v18  ;;  %v2578_v58 = vadd.f32 %v2546_v31, %v2474_v14  ;;  %3420 = vmatpush.msra.mxu0 %v3397_v5  ;;  %3526 = vmatpush.msra.mxu1 %v3501_v6  ;;  %v3394_v6 = vld [vmem:[#allocation3 + $0x108] sm:$0xff] }
 0x2c2   : > { %v2188_v32 = vpop.f32.mrf.mxu2 }
 0x2c3   : > { %v2594_v46 = vmul.f32 %v7956_v17, %v2578_v58  ;;  %v2218_v3 = vadd.f32 %v2188_v32, %v7878_v28  ;;  %v2341_v24 = vpop.f32.mrf.mxu3  ;;  %v8105_v28 = vsel %vm737_vm0, %v2991_v12, %v2992_v37  ;;  %v8109_v58 = vld [vmem:[#allocation2 + $0x88] sm:$0x3]  ;;  %v3241_v32 = vld [vmem:[#allocation3 + $0x390] sm:$0xff] }
 0x2c4   : > { %v2448_v39 = vpop.f32.mrf.mxu0  ;;  %3268 = vmatpush.msra.mxu3 %v3241_v32  ;;  %v3132_v32 = vld [vmem:[#allocation3 + $0x208] sm:$0xff] }
 0x2c5   : > { %v2610_v7 = vadd.f32 %v7964_v63, %v2594_v46  ;;  %v2371_v31 = vadd.f32 %v2341_v24, %v2218_v3  ;;  %v2552_v36 = vpop.f32.mrf.mxu1  ;;  %3161 = vmatpush.msra.mxu2 %v3132_v32  ;;  %v3499_v32 = vld [vmem:[#allocation3 + $0x288] sm:$0xff] }
 0x2c7   : > { %v2626_v18 = vmax.f32 %v2610_v7, 0.0  ;;  %v2475_v14 = vadd.f32 %v2445_v1, %v2371_v31  ;;  %2760 = vmatmul.f32.gmra.mxu2 %v8071_v55  ;;  %2907 = vmatmul.f32.gmra.mxu0 %v8100_v0  ;;  %v3396_v1 = vld [vmem:[#allocation3 + $0x118] sm:$0xff]  ;;  %v2994_v7 = vrot.slane %v8109_v58, 1 }
 0x2c8   : > { %2825 = vmatmul.f32.gmra.mxu3 %v8042_v23  ;;  %3085 = vmatmul.f32.gmra.mxu1 %v8105_v28 }
 0x2c9   : > { %2643 = vst [vmem:[#allocation2 + $0x139] sm:$0xff] %v2626_v18  ;;  %v2579_v15 = vadd.f32 %v2549_v53, %v2475_v14  ;;  %3421 = vmatpush.msra.mxu0 %v3396_v1  ;;  %v8115_v14 = vld [vmem:[#allocation2 + $0xb0] sm:$0xff] }
 0x2ca   : > { %v2191_v5 = vpop.f32.mrf.mxu2 }
 0x2cb   : > { %v2595_v46 = vmul.f32 %v7956_v17, %v2579_v15  ;;  %v2219_v3 = vadd.f32 %v2191_v5, %v7890_v50  ;;  %v2344_v24 = vpop.f32.mrf.mxu3  ;;  %v8120_v50 = vsel %vm737_vm0, %v2992_v37, %v2994_v7  ;;  %v3240_v5 = vld [vmem:[#allocation3 + $0x388] sm:$0xff]  ;;  %v2997_v37 = vrot.slane %v8086_v30, 1  ;;  %v3500_v7 = vld [vmem:[#allocation3 + $0x290] sm:$0xff] }
 0x2cc   : > { %v2451_v31 = vpop.f32.mrf.mxu0  ;;  %3269 = vmatpush.msra.mxu3 %v3240_v5  ;;  %3527 = vmatpush.msra.mxu1 %v3500_v7  ;;  %v3498_v7 = vld [vmem:[#allocation3 + $0x280] sm:$0xff] }
 0x2cd   : > { %v2611_v12 = vadd.f32 %v7964_v63, %v2595_v46  ;;  %v2372_v53 = vadd.f32 %v2344_v24, %v2219_v3  ;;  %v2555_v18 = vpop.f32.mrf.mxu1 }
 0x2ce   : > { %3528 = vmatpush.msra.mxu1 %v3499_v32 }
 0x2cf   : > { %v2627_v35 = vmax.f32 %v2611_v12, 0.0  ;;  %v2476_v22 = vadd.f32 %v2448_v39, %v2372_v53  ;;  %2763 = vmatmul.f32.gmra.mxu2 %v8086_v30  ;;  %2910 = vmatmul.f32.gmra.mxu0 %v8115_v14  ;;  %v3395_v39 = vld [vmem:[#allocation3 + $0x110] sm:$0xff] }
 0x2d0   : > { %2828 = vmatmul.f32.gmra.mxu3 %v8057_v44  ;;  %3088 = vmatmul.f32.gmra.mxu1 %v8120_v50 }
 0x2d1   : > { %2644 = vst [vmem:[#allocation2 + $0x141] sm:$0xff] %v2627_v35  ;;  %v2580_v15 = vadd.f32 %v2552_v36, %v2476_v22  ;;  %3422 = vmatpush.msra.mxu0 %v3395_v39  ;;  %v2996_v22 = vrot.slane %v8071_v55, 1  ;;  %v3131_v39 = vld [vmem:[#allocation3 + $0x200] sm:$0xff]  ;;  %3529 = vmatpush.msra.mxu1 %v3498_v7 }
 0x2d2   : > { %v2194_v1 = vpop.f32.mrf.mxu2  ;;  %3162 = vmatpush.msra.mxu2 %v3131_v39  ;;  %v3618_v39 = vld [vmem:[#allocation3 + $0x478] sm:$0xff] }
 0x2d3   : > { %v2596_v46 = vmul.f32 %v7956_v17, %v2580_v15  ;;  %v2220_v3 = vadd.f32 %v2194_v1, %v7898_v9  ;;  %v2347_v24 = vpop.f32.mrf.mxu3  ;;  %3423 = vmatpush.msra.mxu0 %v3394_v6  ;;  %v8130_v1 = vld [vmem:[#allocation2 + $0xc0] sm:$0xff]  ;;  %v8134_v5 = vsel %vm737_vm0, %v2996_v22, %v2997_v37 }
 0x2d4   : > { %v2454_v12 = vpop.f32.mrf.mxu0  ;;  %3619 = vmatpush.msrb.mxu2 %v3618_v39 }
 0x2d5   : > { %v2612_v35 = vadd.f32 %v7964_v63, %v2596_v46  ;;  %v2373_v36 = vadd.f32 %v2347_v24, %v2220_v3  ;;  %v2558_v53 = vpop.f32.mrf.mxu1  ;;  %v3239_v46 = vld [vmem:[#allocation3 + $0x380] sm:$0xff]  ;;  %v8138_v24 = vld [vmem:[#allocation2 + $0xa0] sm:$0x3] }
 0x2d6   : > { %v3393_v3 = vld [vmem:[#allocation3 + $0x100] sm:$0xff]  ;;  %3270 = vmatpush.msra.mxu3 %v3239_v46  ;;  %v2999_v32 = vrot.slane %v8138_v24, 1  ;;  %v3986_v46 = vld [vmem:[#allocation3 + $0x1f8] sm:$0xff] }
 0x2d7   : > { %v2628_v15 = vmax.f32 %v2612_v35, 0.0  ;;  %v2477_v9 = vadd.f32 %v2451_v31, %v2373_v36  ;;  %2766 = vmatmul.f32.gmra.mxu2 %v8100_v0  ;;  %2913 = vmatmul.f32.gmra.mxu0 %v8130_v1 }
 0x2d8   : > { %2831 = vmatmul.f32.gmra.mxu3 %v8071_v55  ;;  %3091 = vmatmul.f32.gmra.mxu1 %v8134_v5 }
 0x2d9   : > { %2645 = vst [vmem:[#allocation2 + $0x151] sm:$0xff] %v2628_v15  ;;  %v2581_v31 = vadd.f32 %v2555_v18, %v2477_v9  ;;  %3424 = vmatpush.msra.mxu0 %v3393_v3  ;;  %v8145_v18 = vld [vmem:[#allocation2 + $0xc8] sm:$0xff]  ;;  %v8149_v9 = vsel %vm737_vm0, %v2997_v37, %v2999_v32  ;;  %v3769_v37 = vld [vmem:[%s9268_s7 + $0x70] sm:$0xff] }
 0x2da   : > { %v2197_v35 = vpop.f32.mrf.mxu2  ;;  %v3970_v32 = vld [vmem:[#allocation3 + $0x78] sm:$0xff] }
 0x2db   : > { %v2597_v36 = vmul.f32 %v7956_v17, %v2581_v31  ;;  %v2221_v22 = vadd.f32 %v2197_v35, %v7905_v29  ;;  %v2350_v6 = vpop.f32.mrf.mxu3  ;;  %3987 = vmatpush.msrb.mxu0 %v3986_v46  ;;  %4052 = vmatpush.msrb.mxu1 %v3970_v32 }
 0x2dc   : > { %v2457_v41 = vpop.f32.mrf.mxu0 }
 0x2dd   : > { %v2613_v59 = vadd.f32 %v7964_v63, %v2597_v36  ;;  %v2374_v27 = vadd.f32 %v2350_v6, %v2221_v22  ;;  %v2561_v42 = vpop.f32.mrf.mxu1  ;;  %v3001_v6 = vrot.slane %v8100_v0, 1 }
 0x2df   : > { %v2629_v8 = vmax.f32 %v2613_v59, 0.0  ;;  %v2478_v15 = vadd.f32 %v2454_v12, %v2374_v27  ;;  %2769 = vmatmul.f32.gmra.mxu2 %v8115_v14  ;;  %2916 = vmatmul.f32.gmra.mxu0 %v8145_v18  ;;  %v3770_v59 = vld [vmem:[%s9268_s7 + $0x78] sm:$0xff]  ;;  %v3617_v27 = vld [vmem:[#allocation3 + $0x470] sm:$0xff] }
 0x2e0   : > { %2834 = vmatmul.f32.gmra.mxu3 %v8086_v30  ;;  %3094 = vmatmul.f32.gmra.mxu1 %v8149_v9 }
 0x2e1   : > { %2646 = vst [vmem:[#allocation2 + $0x159] sm:$0xff] %v2629_v8  ;;  %v2582_v29 = vadd.f32 %v2558_v53, %v2478_v15  ;;  %3771 = vmatpush.msrb.mxu3 %v3770_v59  ;;  %v3002_v53 = vrot.slane %v8115_v14, 1  ;;  %3620 = vmatpush.msrb.mxu2 %v3617_v27  ;;  %v3616_v59 = vld [vmem:[#allocation3 + $0x468] sm:$0xff]  ;;  %v3768_v27 = vld [vmem:[%s9268_s7 + $0x68] sm:$0xff] }
 0x2e2   : > { %v2200_v12 = vpop.f32.mrf.mxu2 }
 0x2e3   : > { %v2598_v3 = vmul.f32 %v7956_v17, %v2582_v29  ;;  %v2222_v7 = vadd.f32 %v2200_v12, %v7912_v20  ;;  %v2353_v8 = vpop.f32.mrf.mxu3  ;;  %3772 = vmatpush.msrb.mxu3 %v3769_v37  ;;  %v8167_v20 = vsel %vm737_vm0, %v3001_v6, %v3002_v53  ;;  %v8169_v29 = vld [vmem:[#allocation2 + $0xb8] sm:$0x3]  ;;  %v3985_v12 = vld [vmem:[#allocation3 + $0x1f0] sm:$0xff]  ;;  %3621 = vmatpush.msrb.mxu2 %v3616_v59  ;;  %v3615_v59 = vld [vmem:[#allocation3 + $0x460] sm:$0xff] }
 0x2e4   : > { %v2460_v31 = vpop.f32.mrf.mxu0  ;;  %3988 = vmatpush.msrb.mxu0 %v3985_v12 }
 0x2e5   : > { %v2614_v35 = vadd.f32 %v7964_v63, %v2598_v3  ;;  %v2375_v36 = vadd.f32 %v2353_v8, %v2222_v7  ;;  %v2564_v22 = vpop.f32.mrf.mxu1  ;;  %3773 = vmatpush.msrb.mxu3 %v3768_v27  ;;  %v3004_v7 = vrot.slane %v8169_v29, 1  ;;  %v3984_v27 = vld [vmem:[#allocation3 + $0x1e8] sm:$0xff]  ;;  %3622 = vmatpush.msrb.mxu2 %v3615_v59 }
 0x2e6   : > { %3989 = vmatpush.msrb.mxu0 %v3984_v27 }
 0x2e7   : > { %v2630_v15 = vmax.f32 %v2614_v35, 0.0  ;;  %v2479_v39 = vadd.f32 %v2457_v41, %v2375_v36  ;;  %2772 = vmatmul.f32.gmra.mxu2 %v8130_v1  ;;  %2919 = vmatmul.f32.gmra.mxu0 %v8008_v25  ;;  %v8183_v32 = vsel %vm737_vm0, %v3002_v53, %v3004_v7  ;;  %v3968_v7 = vld [vmem:[#allocation3 + $0x68] sm:$0xff] }
 0x2e8   : > { %2837 = vmatmul.f32.gmra.mxu3 %v8100_v0  ;;  %3097 = vmatmul.f32.gmra.mxu1 %v8167_v20  ;;  %v3969_v0 = vld [vmem:[#allocation3 + $0x70] sm:$0xff] }
 0x2e9   : > { %2647 = vst [vmem:[#allocation2 + $0x169] sm:$0xff] %v2630_v15  ;;  %v2583_v41 = vadd.f32 %v2561_v42, %v2479_v39  ;;  %v3337_v39 = vrot.slane %v7925_v2, 2  ;;  %4053 = vmatpush.msrb.mxu1 %v3969_v0 }
 0x2ea   : > { %v2203_v25 = vpop.f32.mrf.mxu2 }
 0x2eb   : > { %v2599_v37 = vmul.f32 %v7956_v17, %v2583_v41  ;;  %v2223_v46 = vadd.f32 %v2203_v25, %v7928_v21  ;;  %v2356_v3 = vpop.f32.mrf.mxu3  ;;  %v3336_v21 = vrot.slane %v7921_v11, 2  ;;  %v3342_v11 = vrot.slane %v7946_v38, 2  ;;  %4054 = vmatpush.msrb.mxu1 %v3968_v7 }
 0x2ec   : > { %v2463_v8 = vpop.f32.mrf.mxu0  ;;  %v3346_v7 = vrot.slane %v7934_v56, 2 }
 0x2ed   : > { %v2615_v35 = vadd.f32 %v7964_v63, %v2599_v37  ;;  %v2376_v36 = vadd.f32 %v2356_v3, %v2223_v46  ;;  %v2567_v6 = vpop.f32.mrf.mxu1  ;;  %v3338_v37 = vsel %vm1108_vm1, %v3336_v21, %v3337_v39  ;;  %v3341_v46 = vrot.slane %v7932_v43, 2  ;;  %v3766_v43 = vld [vmem:[%s9268_s7 + $0x58] sm:$0xff] }
 0x2ef   : > { %v2631_v15 = vmax.f32 %v2615_v35, 0.0  ;;  %v2480_v42 = vadd.f32 %v2460_v31, %v2376_v36  ;;  %2775 = vmatmul.f32.gmra.mxu2 %v8145_v18  ;;  %2922 = vmatmul.f32.gmra.mxu0 %v8010_v52  ;;  %v3767_v31 = vld [vmem:[%s9268_s7 + $0x60] sm:$0xff]  ;;  %v3343_v38 = vsel %vm1108_vm1, %v3341_v46, %v3342_v11 }
 0x2f0   : > { %2840 = vmatmul.f32.gmra.mxu3 %v8115_v14  ;;  %3100 = vmatmul.f32.gmra.mxu1 %v8183_v32 }
 0x2f1   : > { %2648 = vst [vmem:[#allocation2 + $0x171] sm:$0xff] %v2631_v15  ;;  %v2584_v12 = vadd.f32 %v2564_v22, %v2480_v42  ;;  %3774 = vmatpush.msrb.mxu3 %v3767_v31  ;;  %v3614_v15 = vld [vmem:[#allocation3 + $0x458] sm:$0xff]  ;;  %v3983_v42 = vld [vmem:[#allocation3 + $0x1e0] sm:$0xff]  ;;  %v3344_v31 = vrot.slane %v7977_v48, 2 }
 0x2f2   : > { %v2206_v52 = vpop.f32.mrf.mxu2  ;;  %3623 = vmatpush.msrb.mxu2 %v3614_v15  ;;  %3990 = vmatpush.msrb.mxu0 %v3983_v42  ;;  %v3765_v48 = vld [vmem:[%s9268_s7 + $0x50] sm:$0xff]  ;;  %v3981_v15 = vld [vmem:[#allocation3 + $0x1d0] sm:$0xff] }
 0x2f3   : > { %v2600_v53 = vmul.f32 %v7956_v17, %v2584_v12  ;;  %v2224_v41 = vadd.f32 %v2206_v52, %v7942_v60  ;;  %v2359_v2 = vpop.f32.mrf.mxu3  ;;  %v3339_v60 = vrot.slane %v7936_v51, 2  ;;  %3775 = vmatpush.msrb.mxu3 %v3766_v43 }
 0x2f4   : > { %v2878_v25 = vpop.f32.mrf.mxu0 }
 0x2f5   : > { %v2616_v3 = vadd.f32 %v7964_v63, %v2600_v53  ;;  %v2377_v22 = vadd.f32 %v2359_v2, %v2224_v41  ;;  %v3056_v0 = vpop.f32.mrf.mxu1  ;;  %v3340_v12 = vsel %vm1108_vm1, %v3337_v39, %v3339_v60  ;;  %v3967_v2 = vld [vmem:[#allocation3 + $0x60] sm:$0xff]  ;;  %v3982_v39 = vld [vmem:[#allocation3 + $0x1d8] sm:$0xff]  ;;  %3776 = vmatpush.msrb.mxu3 %v3765_v48  ;;  %v3612_v60 = vld [vmem:[#allocation3 + $0x448] sm:$0xff] }
 0x2f6   : > { %4055 = vmatpush.msrb.mxu1 %v3967_v2  ;;  %3991 = vmatpush.msrb.mxu0 %v3982_v39  ;;  %v3964_v48 = vld [vmem:[#allocation3 + $0x48] sm:$0xff] }
 0x2f7   : > { %v2632_v35 = vmax.f32 %v2616_v3, 0.0  ;;  %v2481_v36 = vadd.f32 %v2463_v8, %v2377_v22  ;;  %3163 = vmatmul.f32.vlgmr.msra.gmra.mxu2 %v7973_v57  ;;  %3425 = vmatmul.f32.vlgmr.msra.gmra.mxu0 %v3338_v37  ;;  %v3345_v37 = vsel %vm1108_vm1, %v3342_v11, %v3344_v31  ;;  %v3347_v11 = vrot.slane %v7948_v49, 2  ;;  %v3764_v49 = vld [vmem:[%s9268_s7 + $0x48] sm:$0xff] }
 0x2f8   : > { %3271 = vmatmul.f32.vlgmr.msra.gmra.mxu3 %v8002_v61  ;;  %3530 = vmatmul.f32.vlgmr.msra.gmra.mxu1 %v3343_v38 }
 0x2f9   : > { %2649 = vst [vmem:[#allocation2 + $0x181] sm:$0xff] %v2632_v35  ;;  %v2585_v21 = vadd.f32 %v2567_v6, %v2481_v36  ;;  %v3966_v36 = vld [vmem:[#allocation3 + $0x58] sm:$0xff]  ;;  %3777 = vmatpush.msrb.mxu3 %v3764_v49  ;;  %3992 = vmatpush.msrb.mxu0 %v3981_v15  ;;  %v3609_v49 = vld [vmem:[#allocation3 + $0x430] sm:$0xff] }
 0x2fa   : > { %v2731_v8 = vpop.f32.mrf.mxu2  ;;  %4056 = vmatpush.msrb.mxu1 %v3966_v36  ;;  %v3963_v36 = vld [vmem:[#allocation3 + $0x40] sm:$0xff]  ;;  %v3978_v15 = vld [vmem:[#allocation3 + $0x1b8] sm:$0xff] }
 0x2fb   : > { %v2601_v57 = vmul.f32 %v7956_v17, %v2585_v21  ;;  %v2796_v59 = vpop.f32.mrf.mxu3  ;;  %v3613_v17 = vld [vmem:[#allocation3 + $0x450] sm:$0xff] }
 0x2fc   : > { %v2797_v27 = vadd.f32 %v2796_v59, %v2731_v8  ;;  %v2881_v51 = vpop.f32.mrf.mxu0  ;;  %3624 = vmatpush.msrb.mxu2 %v3613_v17  ;;  %v3965_v59 = vld [vmem:[#allocation3 + $0x50] sm:$0xff] }
 0x2fd   : > { %v2617_v52 = vadd.f32 %v7964_v63, %v2601_v57  ;;  %v3059_v53 = vpop.f32.mrf.mxu1  ;;  %4057 = vmatpush.msrb.mxu1 %v3965_v59 }
 0x2fe   : > { %v2926_v41 = vadd.f32 %v2878_v25, %v2797_v27  ;;  %3625 = vmatpush.msrb.mxu2 %v3612_v60  ;;  %v3611_v27 = vld [vmem:[#allocation3 + $0x440] sm:$0xff] }
 0x2ff   : > { %v2633_v6 = vmax.f32 %v2617_v52, 0.0  ;;  %3166 = vmatmul.f32.gmra.mxu2 %v7988_v19  ;;  %3428 = vmatmul.f32.gmra.mxu0 %v3340_v12 }
 0x300   : > { %3274 = vmatmul.f32.gmra.mxu3 %v8033_v4  ;;  %3533 = vmatmul.f32.gmra.mxu1 %v3345_v37  ;;  %v8215_v46 = vadd.f32 %v3056_v0, %v2926_v41  ;;  %v8221_v0 = vsel %vm1108_vm1, %v3346_v7, %v3347_v11 }
 0x301   : > { %2650 = vst [vmem:[#allocation2 + $0x189] sm:$0xff] %v2633_v6  ;;  %3626 = vmatpush.msrb.mxu2 %v3611_v27  ;;  %4058 = vmatpush.msrb.mxu1 %v3964_v48  ;;  %v3962_v27 = vld [vmem:[#allocation3 + $0x38] sm:$0xff] }
 0x302   : > { %v2734_v63 = vpop.f32.mrf.mxu2 }
 0x303   : > { %v2799_v19 = vpop.f32.mrf.mxu3  ;;  %4059 = vmatpush.msrb.mxu1 %v3963_v36  ;;  %v3960_v36 = vld [vmem:[#allocation3 + $0x28] sm:$0xff] }
 0x304   : > { %v2800_v25 = vadd.f32 %v2799_v19, %v2734_v63  ;;  %v2884_v3 = vpop.f32.mrf.mxu0  ;;  %v3610_v63 = vld [vmem:[#allocation3 + $0x438] sm:$0xff]  ;;  %v3979_v19 = vld [vmem:[#allocation3 + $0x1c0] sm:$0xff] }
 0x305   : > { %v3062_v22 = vpop.f32.mrf.mxu1  ;;  %3627 = vmatpush.msrb.mxu2 %v3610_v63  ;;  %4060 = vmatpush.msrb.mxu1 %v3962_v27  ;;  %v3607_v63 = vld [vmem:[#allocation3 + $0x420] sm:$0xff]  ;;  %v3605_v27 = vld [vmem:[#allocation3 + $0x410] sm:$0xff] }
 0x306   : > { %v2927_v35 = vadd.f32 %v2881_v51, %v2800_v25  ;;  %v3980_v51 = vld [vmem:[#allocation3 + $0x1c8] sm:$0xff]  ;;  %v3354_v25 = vrot.slane %v8051_v33, 2  ;;  %v3761_v33 = vld [vmem:[%s9268_s7 + $0x30] sm:$0xff] }
 0x307   : > { %3169 = vmatmul.f32.gmra.mxu2 %v8002_v61  ;;  %3431 = vmatmul.f32.gmra.mxu0 %v3343_v38  ;;  %v3349_v38 = vrot.slane %v8004_v16, 2  ;;  %v3763_v16 = vld [vmem:[%s9268_s7 + $0x40] sm:$0xff] }
 0x308   : > { %3277 = vmatmul.f32.gmra.mxu3 %v8047_v13  ;;  %3536 = vmatmul.f32.gmra.mxu1 %v8221_v0  ;;  %v8228_v43 = vadd.f32 %v3059_v53, %v2927_v35  ;;  %v3352_v53 = vrot.slane %v7983_v47, 2  ;;  %v3762_v47 = vld [vmem:[%s9268_s7 + $0x38] sm:$0xff] }
 0x309   : > { %v8233_v31 = vsel %vm1108_vm1, %v3347_v11, %v3349_v38  ;;  %3778 = vmatpush.msrb.mxu3 %v3763_v16  ;;  %3993 = vmatpush.msrb.mxu0 %v3980_v51  ;;  %v3357_v38 = vrot.slane %v8028_v10, 2  ;;  %v3608_v51 = vld [vmem:[#allocation3 + $0x428] sm:$0xff]  ;;  %v3760_v10 = vld [vmem:[%s9268_s7 + $0x28] sm:$0xff] }
 0x30a   : > { %v2737_v56 = vpop.f32.mrf.mxu2  ;;  %v8260_v60 = vsel %vm1108_vm1, %v3352_v53, %v3354_v25  ;;  %3628 = vmatpush.msrb.mxu2 %v3609_v49 }
 0x30b   : > { %v2802_v61 = vpop.f32.mrf.mxu3  ;;  %3779 = vmatpush.msrb.mxu3 %v3762_v47  ;;  %3994 = vmatpush.msrb.mxu0 %v3979_v19  ;;  %v3976_v47 = vld [vmem:[#allocation3 + $0x1a8] sm:$0xff] }
 0x30c   : > { %v2803_v42 = vadd.f32 %v2802_v61, %v2737_v56  ;;  %v2887_v21 = vpop.f32.mrf.mxu0  ;;  %3629 = vmatpush.msrb.mxu2 %v3608_v51  ;;  %v3974_v51 = vld [vmem:[#allocation3 + $0x198] sm:$0xff] }
 0x30d   : > { %v3065_v8 = vpop.f32.mrf.mxu1  ;;  %3780 = vmatpush.msrb.mxu3 %v3761_v33  ;;  %3995 = vmatpush.msrb.mxu0 %v3978_v15  ;;  %v3606_v33 = vld [vmem:[#allocation3 + $0x418] sm:$0xff]  ;;  %v3975_v15 = vld [vmem:[#allocation3 + $0x1a0] sm:$0xff] }
 0x30e   : > { %v2928_v57 = vadd.f32 %v2884_v3, %v2803_v42  ;;  %3630 = vmatpush.msrb.mxu2 %v3607_v63  ;;  %v3604_v63 = vld [vmem:[#allocation3 + $0x408] sm:$0xff] }
 0x30f   : > { %3172 = vmatmul.f32.gmra.mxu2 %v8033_v4  ;;  %3434 = vmatmul.f32.gmra.mxu0 %v3345_v37  ;;  %v3351_v37 = vrot.slane %v7968_v45, 2 }
 0x310   : > { %3280 = vmatmul.f32.gmra.mxu3 %v8062_v62  ;;  %3539 = vmatmul.f32.gmra.mxu1 %v8233_v31  ;;  %v8240_v12 = vadd.f32 %v3062_v22, %v2928_v57  ;;  %v3356_v57 = vrot.slane %v7997_v54, 2 }
 0x311   : > { %v8247_v39 = vsel %vm1108_vm1, %v3351_v37, %v3352_v53  ;;  %3781 = vmatpush.msrb.mxu3 %v3760_v10  ;;  %v3359_v53 = vrot.slane %v8080_v40, 2  ;;  %v3759_v40 = vld [vmem:[%s9268_s7 + $0x20] sm:$0xff]  ;;  %3631 = vmatpush.msrb.mxu2 %v3606_v33 }
 0x312   : > { %v2740_v52 = vpop.f32.mrf.mxu2  ;;  %v8274_v16 = vsel %vm1108_vm1, %v3356_v57, %v3357_v38  ;;  %v3959_v57 = vld [vmem:[#allocation3 + $0x20] sm:$0xff] }
 0x313   : > { %v2805_v4 = vpop.f32.mrf.mxu3  ;;  %v8287_v48 = vsel %vm1108_vm1, %v3357_v38, %v3359_v53  ;;  %3782 = vmatpush.msrb.mxu3 %v3759_v40  ;;  %3632 = vmatpush.msrb.mxu2 %v3605_v27  ;;  %v3973_v40 = vld [vmem:[#allocation3 + $0x190] sm:$0xff] }
 0x314   : > { %v2806_v41 = vadd.f32 %v2805_v4, %v2740_v52  ;;  %v2890_v2 = vpop.f32.mrf.mxu0  ;;  %v3977_v52 = vld [vmem:[#allocation3 + $0x1b0] sm:$0xff] }
 0x315   : > { %v3068_v6 = vpop.f32.mrf.mxu1  ;;  %3996 = vmatpush.msrb.mxu0 %v3977_v52  ;;  %3633 = vmatpush.msrb.mxu2 %v3604_v63 }
 0x316   : > { %v2929_v17 = vadd.f32 %v2887_v21, %v2806_v41 }
 0x317   : > { %3175 = vmatmul.f32.gmra.mxu2 %v8047_v13  ;;  %3437 = vmatmul.f32.gmra.mxu0 %v8221_v0 }
 0x318   : > { %3283 = vmatmul.f32.gmra.mxu3 %v8076_v34  ;;  %3542 = vmatmul.f32.gmra.mxu1 %v8247_v39  ;;  %v8254_v45 = vadd.f32 %v3065_v8, %v2929_v17  ;;  %v3961_v17 = vld [vmem:[#allocation3 + $0x30] sm:$0xff] }
 0x319   : > { %4061 = vmatpush.msrb.mxu1 %v3961_v17  ;;  %3997 = vmatpush.msrb.mxu0 %v3976_v47 }
 0x31a   : > { %v2743_v13 = vpop.f32.mrf.mxu2 }
 0x31b   : > { %v2808_v11 = vpop.f32.mrf.mxu3  ;;  %4062 = vmatpush.msrb.mxu1 %v3960_v36  ;;  %3998 = vmatpush.msrb.mxu0 %v3975_v15  ;;  %v3972_v36 = vld [vmem:[#allocation3 + $0x188] sm:$0xff]  ;;  %v8351_v15 = vrot.slane %v8145_v18, 1 }
 0x31c   : > { %v2809_v3 = vadd.f32 %v2808_v11, %v2743_v13  ;;  %v2893_v22 = vpop.f32.mrf.mxu0  ;;  %v3362_v11 = vrot.slane %v8057_v44, 2  ;;  %v3758_v44 = vld [vmem:[%s9268_s7 + $0x18] sm:$0xff] }
 0x31d   : > { %v3071_v7 = vpop.f32.mrf.mxu1  ;;  %3783 = vmatpush.msrb.mxu3 %v3758_v44  ;;  %4063 = vmatpush.msrb.mxu1 %v3959_v57  ;;  %v3956_v57 = vld [vmem:[#allocation3 + $0x8] sm:$0xff] }
 0x31e   : > { %v2930_v35 = vadd.f32 %v2890_v2, %v2809_v3  ;;  %3999 = vmatpush.msrb.mxu0 %v3974_v51  ;;  %v3955_v51 = vld [vmem:[#allocation3] sm:$0xff] }
 0x31f   : > { %3178 = vmatmul.f32.gmra.mxu2 %v8062_v62  ;;  %3440 = vmatmul.f32.gmra.mxu0 %v8233_v31 }
 0x320   : > { %3286 = vmatmul.f32.gmra.mxu3 %v8091_v26  ;;  %3545 = vmatmul.f32.gmra.mxu1 %v8260_v60  ;;  %v8267_v56 = vadd.f32 %v3068_v6, %v2930_v35 }
 0x321   : > { %4000 = vmatpush.msrb.mxu0 %v3973_v40 }
 0x322   : > { %v2746_v62 = vpop.f32.mrf.mxu2 }
 0x323   : > { %v2811_v61 = vpop.f32.mrf.mxu3  ;;  %4001 = vmatpush.msrb.mxu0 %v3972_v36  ;;  %v8388_v36 = vld [vmem:[#allocation2 + $0xd8] sm:$0xff] }
 0x324   : > { %v2812_v42 = vadd.f32 %v2811_v61, %v2746_v62  ;;  %v2896_v21 = vpop.f32.mrf.mxu0  ;;  %v3364_v61 = vrot.slane %v8109_v58, 2  ;;  %v3757_v58 = vld [vmem:[%s9268_s7 + $0x10] sm:$0xff] }
 0x325   : > { %v3074_v8 = vpop.f32.mrf.mxu1  ;;  %3784 = vmatpush.msrb.mxu3 %v3757_v58  ;;  %v3971_v58 = vld [vmem:[#allocation3 + $0x180] sm:$0xff] }
 0x326   : > { %v2931_v59 = vadd.f32 %v2893_v22, %v2812_v42  ;;  %4002 = vmatpush.msrb.mxu0 %v3971_v58 }
 0x327   : > { %3181 = vmatmul.f32.gmra.mxu2 %v8076_v34  ;;  %3443 = vmatmul.f32.gmra.mxu0 %v8247_v39 }
 0x328   : > { %3289 = vmatmul.f32.gmra.mxu3 %v8105_v28  ;;  %3548 = vmatmul.f32.gmra.mxu1 %v8274_v16  ;;  %v8281_v54 = vadd.f32 %v3071_v7, %v2931_v59  ;;  %v3361_v7 = vrot.slane %v8042_v23, 2  ;;  %v8314_v59 = vsel %vm1108_vm1, %v3362_v11, %v3364_v61 }
 0x32a   : > { %v2749_v34 = vpop.f32.mrf.mxu2  ;;  %v8301_v49 = vsel %vm1108_vm1, %v3361_v7, %v3362_v11 }
 0x32b   : > { %v2814_v4 = vpop.f32.mrf.mxu3 }
 0x32c   : > { %v2815_v41 = vadd.f32 %v2814_v4, %v2749_v34  ;;  %v2899_v2 = vpop.f32.mrf.mxu0  ;;  %v3367_v34 = vrot.slane %v8086_v30, 2  ;;  %v3756_v30 = vld [vmem:[%s9268_s7 + $0x8] sm:$0xff] }
 0x32d   : > { %v3077_v6 = vpop.f32.mrf.mxu1  ;;  %3785 = vmatpush.msrb.mxu3 %v3756_v30 }
 0x32e   : > { %v2932_v37 = vadd.f32 %v2896_v21, %v2815_v41 }
 0x32f   : > { %3184 = vmatmul.f32.gmra.mxu2 %v8091_v26  ;;  %3446 = vmatmul.f32.gmra.mxu0 %v8260_v60 }
 0x330   : > { %3292 = vmatmul.f32.gmra.mxu3 %v8120_v50  ;;  %3551 = vmatmul.f32.gmra.mxu1 %v8287_v48  ;;  %v8294_v19 = vadd.f32 %v3074_v8, %v2932_v37  ;;  %v3958_v37 = vld [vmem:[#allocation3 + $0x18] sm:$0xff] }
 0x331   : > { %4064 = vmatpush.msrb.mxu1 %v3958_v37 }
 0x332   : > { %v2752_v26 = vpop.f32.mrf.mxu2 }
 0x333   : > { %v2817_v13 = vpop.f32.mrf.mxu3 }
 0x334   : > { %v2818_v25 = vadd.f32 %v2817_v13, %v2752_v26  ;;  %v2902_v3 = vpop.f32.mrf.mxu0  ;;  %v3369_v26 = vrot.slane %v8138_v24, 2  ;;  %v3755_v24 = vld [vmem:[%s9268_s7] sm:$0xff] }
 0x335   : > { %v3080_v22 = vpop.f32.mrf.mxu1  ;;  %3786 = vmatpush.msrb.mxu3 %v3755_v24 }
 0x336   : > { %v2933_v35 = vadd.f32 %v2899_v2, %v2818_v25  ;;  %v3366_v2 = vrot.slane %v8071_v55, 2  ;;  %v8341_v7 = vsel %vm1108_vm1, %v3367_v34, %v3369_v26  ;;  %v4131_v26 = vld [vmem:[#allocation3 + $0x370] sm:$0xff] }
 0x337   : > { %3187 = vmatmul.f32.gmra.mxu2 %v8105_v28  ;;  %3449 = vmatmul.f32.gmra.mxu0 %v8274_v16 }
 0x338   : > { %3295 = vmatmul.f32.gmra.mxu3 %v8134_v5  ;;  %3554 = vmatmul.f32.gmra.mxu1 %v8301_v49  ;;  %v8308_v23 = vadd.f32 %v3077_v6, %v2933_v35  ;;  %v8328_v17 = vsel %vm1108_vm1, %v3366_v2, %v3367_v34  ;;  %v3603_v35 = vld [vmem:[#allocation3 + $0x400] sm:$0xff]  ;;  %v4132_v34 = vld [vmem:[#allocation3 + $0x378] sm:$0xff] }
 0x339   : > { %3634 = vmatpush.msrb.mxu2 %v3603_v35 }
 0x33a   : > { %v2755_v28 = vpop.f32.mrf.mxu2 }
 0x33b   : > { %v2820_v62 = vpop.f32.mrf.mxu3  ;;  %4133 = vmatpush.msra.mxu2 %v4132_v34 }
 0x33c   : > { %v2821_v38 = vadd.f32 %v2820_v62, %v2755_v28  ;;  %v2905_v42 = vpop.f32.mrf.mxu0  ;;  %v3372_v28 = vrot.slane %v8115_v14, 2 }
 0x33d   : > { %v3083_v21 = vpop.f32.mrf.mxu1  ;;  %4134 = vmatpush.msra.mxu2 %v4131_v26  ;;  %v4306_v26 = vld [vmem:[#allocation3 + $0xe0] sm:$0xff] }
 0x33e   : > { %v2934_v8 = vadd.f32 %v2902_v3, %v2821_v38 }
 0x33f   : > { %3190 = vmatmul.f32.gmra.mxu2 %v8120_v50  ;;  %3452 = vmatmul.f32.gmra.mxu0 %v8287_v48 }
 0x340   : > { %3298 = vmatmul.f32.gmra.mxu3 %v8149_v9  ;;  %3557 = vmatmul.f32.gmra.mxu1 %v8314_v59  ;;  %v8321_v10 = vadd.f32 %v3080_v22, %v2934_v8  ;;  %v3957_v22 = vld [vmem:[#allocation3 + $0x10] sm:$0xff] }
 0x341   : > { %4065 = vmatpush.msrb.mxu1 %v3957_v22 }
 0x342   : > { %v2758_v50 = vpop.f32.mrf.mxu2 }
 0x343   : > { %v2823_v52 = vpop.f32.mrf.mxu3  ;;  %4066 = vmatpush.msrb.mxu1 %v3956_v57  ;;  %v4415_v57 = vld [vmem:[#allocation3 + $0x270] sm:$0xff] }
 0x344   : > { %v2824_v4 = vadd.f32 %v2823_v52, %v2758_v50  ;;  %v2908_v53 = vpop.f32.mrf.mxu0  ;;  %v8367_v52 = vld [vmem:[#allocation2 + $0xd0] sm:$0x3] }
 0x345   : > { %v3086_v41 = vpop.f32.mrf.mxu1  ;;  %4067 = vmatpush.msrb.mxu1 %v3955_v51  ;;  %v3126_v2 = vrot.slane %v8367_v52, 1 }
 0x346   : > { %v2935_v6 = vadd.f32 %v2905_v42, %v2824_v4  ;;  %v3123_v42 = vrot.slane %v8130_v1, 1  ;;  %v4309_v4 = vld [vmem:[#allocation3 + $0xf8] sm:$0xff] }
 0x347   : > { %3193 = vmatmul.f32.gmra.mxu2 %v8134_v5  ;;  %3455 = vmatmul.f32.gmra.mxu0 %v8301_v49 }
 0x348   : > { %3301 = vmatmul.f32.gmra.mxu3 %v8167_v20  ;;  %3560 = vmatmul.f32.gmra.mxu1 %v8328_v17  ;;  %v8335_v55 = vadd.f32 %v3083_v21, %v2935_v6  ;;  %v9293_v21 = vld [vmem:[#allocation15_spill] sm:$0xff]  ;;  %v8359_v50 = vsel %vm737_vm0, %v3123_v42, %v8351_v15  ;;  %v3374_v6 = vrot.slane %v8169_v29, 2  ;;  %v4416_v29 = vld [vmem:[#allocation3 + $0x278] sm:$0xff]  ;;  %v9294_v42 = vld [vmem:[#allocation13_spill] sm:$0xff] }
 0x349   : > { %v3371_v8 = vrot.slane %v9293_v21, 2  ;;  %4310 = vmatpush.msra.mxu3 %v4309_v4  ;;  %4417 = vmatpush.msra.mxu0 %v4416_v29  ;;  %v4130_v21 = vld [vmem:[#allocation3 + $0x368] sm:$0xff]  ;;  %v3493_v4 = vrot.slane %v8367_v52, 2  ;;  %v4129_v52 = vld [vmem:[#allocation3 + $0x360] sm:$0xff] }
 0x34a   : > { %v2761_v5 = vpop.f32.mrf.mxu2  ;;  %4135 = vmatpush.msra.mxu2 %v4130_v21  ;;  %v4305_v21 = vld [vmem:[#allocation3 + $0xd8] sm:$0xff] }
 0x34b   : > { %v2826_v47 = vpop.f32.mrf.mxu3  ;;  %v8363_v14 = vsel %vm1108_vm1, %v3371_v8, %v3372_v28  ;;  %v4307_v8 = vld [vmem:[#allocation3 + $0xe8] sm:$0xff]  ;;  %4418 = vmatpush.msra.mxu0 %v4415_v57 }
 0x34c   : > { %v2827_v13 = vadd.f32 %v2826_v47, %v2761_v5  ;;  %v2911_v11 = vpop.f32.mrf.mxu0  ;;  %v3127_v5 = vsel %vm737_vm0, %v8351_v15, %v3126_v2  ;;  %v8378_v47 = vsel %vm1108_vm1, %v3372_v28, %v3374_v6  ;;  %4136 = vmatpush.msra.mxu2 %v4129_v52 }
 0x34d   : > { %v3089_v25 = vpop.f32.mrf.mxu1 }
 0x34e   : > { %v2936_v3 = vadd.f32 %v2908_v53, %v2827_v13  ;;  %v4308_v13 = vld [vmem:[#allocation3 + $0xf0] sm:$0xff] }
 0x34f   : > { %3196 = vmatmul.f32.gmra.mxu2 %v8149_v9  ;;  %3458 = vmatmul.f32.gmra.mxu0 %v8314_v59 }
 0x350   : > { %3304 = vmatmul.f32.gmra.mxu3 %v8183_v32  ;;  %3563 = vmatmul.f32.gmra.mxu1 %v8341_v7  ;;  %v8348_v33 = vadd.f32 %v3086_v41, %v2936_v3 }
 0x351   : > { %4311 = vmatpush.msra.mxu3 %v4308_v13  ;;  %v4414_v13 = vld [vmem:[#allocation3 + $0x268] sm:$0xff] }
 0x352   : > { %v2764_v9 = vpop.f32.mrf.mxu2  ;;  %4419 = vmatpush.msra.mxu0 %v4414_v13 }
 0x353   : > { %v2829_v44 = vpop.f32.mrf.mxu3  ;;  %4312 = vmatpush.msra.mxu3 %v4307_v8  ;;  %v4413_v8 = vld [vmem:[#allocation3 + $0x260] sm:$0xff] }
 0x354   : > { %v2830_v62 = vadd.f32 %v2829_v44, %v2764_v9  ;;  %v2914_v61 = vpop.f32.mrf.mxu0  ;;  %v3231_v9 = vrot.slane %v8388_v36, 1  ;;  %4420 = vmatpush.msra.mxu0 %v4413_v8 }
 0x355   : > { %v3092_v38 = vpop.f32.mrf.mxu1  ;;  %4313 = vmatpush.msra.mxu3 %v4306_v26 }
 0x356   : > { %v2937_v27 = vadd.f32 %v2911_v11, %v2830_v62 }
 0x357   : > { %3199 = vmatmul.f32.gmra.mxu2 %v8167_v20  ;;  %3461 = vmatmul.f32.gmra.mxu0 %v8328_v17 }
 0x358   : > { %3307 = vmatmul.f32.gmra.mxu3 %v8359_v50  ;;  %3566 = vmatmul.f32.gmra.mxu1 %v8363_v14  ;;  %v8369_v53 = vadd.f32 %v3089_v25, %v2937_v27 }
 0x359   : > { %4314 = vmatpush.msra.mxu3 %v4305_v21 }
 0x35a   : > { %v2767_v20 = vpop.f32.mrf.mxu2 }
 0x35b   : > { %v2832_v41 = vpop.f32.mrf.mxu3 }
 0x35c   : > { %v2833_v37 = vadd.f32 %v2832_v41, %v2767_v20  ;;  %v2917_v63 = vpop.f32.mrf.mxu0 }
 0x35d   : > { %v3095_v30 = vpop.f32.mrf.mxu1 }
 0x35e   : > { %v2938_v40 = vadd.f32 %v2914_v61, %v2833_v37  ;;  %v8397_v61 = vld [vmem:[#allocation2 + $0xe8] sm:$0x3] }
 0x35f   : > { %3202 = vmatmul.f32.gmra.mxu2 %v8183_v32  ;;  %3464 = vmatmul.f32.gmra.mxu0 %v8341_v7  ;;  %v8383_v32 = vld [vmem:[#allocation2 + $0xe0] sm:$0xff]  ;;  %v3234_v34 = vrot.slane %v8397_v61, 1 }
 0x360   : > { %3310 = vmatmul.f32.gmra.mxu3 %v3127_v5  ;;  %3569 = vmatmul.f32.gmra.mxu1 %v8378_v47  ;;  %v8381_v11 = vadd.f32 %v3092_v38, %v2938_v40  ;;  %v8386_v3 = vrot.slane %v8383_v32, 1  ;;  %v4523_v38 = vld [vmem:[#allocation3 + $0x3f8] sm:$0xff]  ;;  %v4522_v40 = vld [vmem:[#allocation3 + $0x3f0] sm:$0xff] }
 0x361   : > { %4524 = vmatpush.msra.mxu1 %v4523_v38  ;;  %v4521_v38 = vld [vmem:[#allocation3 + $0x3e8] sm:$0xff] }
 0x362   : > { %v2770_v25 = vpop.f32.mrf.mxu2  ;;  %v8394_v62 = vsel %vm737_vm0, %v3231_v9, %v8386_v3  ;;  %v3235_v37 = vsel %vm737_vm0, %v8386_v3, %v3234_v34  ;;  %v5569_v9 = vld [vmem:[%s6141_s11 + $0x19] sm:$0xff] }
 0x363   : > { %v2835_v22 = vpop.f32.mrf.mxu3  ;;  %4525 = vmatpush.msra.mxu1 %v4522_v40 }
 0x364   : > { %v2836_v35 = vadd.f32 %v2835_v22, %v2770_v25  ;;  %v2920_v24 = vpop.f32.mrf.mxu0 }
 0x365   : > { %v3098_v44 = vpop.f32.mrf.mxu1  ;;  %4526 = vmatpush.msra.mxu1 %v4521_v38 }
 0x366   : > { %v2939_v28 = vadd.f32 %v2917_v63, %v2836_v35  ;;  %v9295_v63 = vld [vmem:[#allocation12_spill] sm:$0xff] }
 0x367   : > { %3205 = vmatmul.f32.gmra.mxu2 %v8359_v50  ;;  %3467 = vmatmul.f32.gmra.mxu0 %v8363_v14 }
 0x368   : > { %3313 = vmatmul.f32.gmra.mxu3 %v8394_v62  ;;  %3572 = vmatmul.f32.gmra.mxu1 %v9294_v42  ;;  %v8401_v27 = vadd.f32 %v3095_v30, %v2939_v28  ;;  %v8410_v30 = vsel %vm1108_vm1, %v9295_v63, %v3493_v4  ;;  %v4412_v63 = vld [vmem:[#allocation3 + $0x258] sm:$0xff] }
 0x369   : > { %4421 = vmatpush.msra.mxu0 %v4412_v63 }
 0x36a   : > { %v2773_v58 = vpop.f32.mrf.mxu2 }
 0x36b   : > { %v2838_v51 = vpop.f32.mrf.mxu3 }
 0x36c   : > { %v2839_v20 = vadd.f32 %v2838_v51, %v2773_v58  ;;  %v2923_v41 = vpop.f32.mrf.mxu0 }
 0x36d   : > { %v3101_v2 = vpop.f32.mrf.mxu1 }
 0x36e   : > { %v2940_v6 = vadd.f32 %v2920_v24, %v2839_v20 }
 0x36f   : > { %3208 = vmatmul.f32.gmra.mxu2 %v3127_v5  ;;  %3470 = vmatmul.f32.gmra.mxu0 %v8378_v47 }
 0x370   : > { %3316 = vmatmul.f32.gmra.mxu3 %v3235_v37  ;;  %3575 = vmatmul.f32.gmra.mxu1 %v8410_v30  ;;  %v8413_v29 = vadd.f32 %v3098_v44, %v2940_v6  ;;  %v4128_v44 = vld [vmem:[#allocation3 + $0x358] sm:$0xff]  ;;  %v4304_v37 = vld [vmem:[#allocation3 + $0xd0] sm:$0xff] }
 0x371   : > { %4137 = vmatpush.msra.mxu2 %v4128_v44  ;;  %4315 = vmatpush.msra.mxu3 %v4304_v37 }
 0x372   : > { %v2776_v5 = vpop.f32.mrf.mxu2 }
 0x373   : > { %v2841_v25 = vpop.f32.mrf.mxu3 }
 0x374   : > { %v2842_v22 = vadd.f32 %v2841_v25, %v2776_v5  ;;  %v3426_v35 = vpop.f32.mrf.mxu0  ;;  %v5571_v25 = vld [vmem:[%s6141_s11 + $0x31] sm:$0xff] }
 0x375   : > { %v3531_v24 = vpop.f32.mrf.mxu1 }
 0x376   : > { %v2941_v28 = vadd.f32 %v2923_v41, %v2842_v22  ;;  %v5570_v41 = vld [vmem:[%s6141_s11 + $0x21] sm:$0xff]  ;;  %v8430_v22 = vld [vmem:[#allocation2 + $0xf0] sm:$0xff] }
 0x377   : > { %3635 = vmatmul.f32.vlgmr.msrb.gmra.mxu2 %v8221_v0  ;;  %4003 = vmatmul.f32.vlgmr.msrb.gmra.mxu0 %v8388_v36 }
 0x378   : > { %3787 = vmatmul.f32.vlgmr.msrb.gmra.mxu3 %v5569_v9  ;;  %4068 = vmatmul.f32.vlgmr.msrb.gmra.mxu1 %v8130_v1  ;;  %v8419_v57 = vadd.f32 %v3101_v2, %v2941_v28  ;;  %v4520_v1 = vld [vmem:[#allocation3 + $0x3e0] sm:$0xff]  ;;  %v4127_v2 = vld [vmem:[#allocation3 + $0x350] sm:$0xff]  ;;  %v4303_v9 = vld [vmem:[#allocation3 + $0xc8] sm:$0xff] }
 0x379   : > { %4527 = vmatpush.msra.mxu1 %v4520_v1  ;;  %4138 = vmatpush.msra.mxu2 %v4127_v2 }
 0x37a   : > { %v3164_v58 = vpop.f32.mrf.mxu2  ;;  %4316 = vmatpush.msra.mxu3 %v4303_v9 }
 0x37b   : > { %v3212_v51 = vadd.f32 %v3164_v58, %v8215_v46  ;;  %v3272_v0 = vpop.f32.mrf.mxu3 }
 0x37c   : > { %v3429_v34 = vpop.f32.mrf.mxu0 }
 0x37d   : > { %v3320_v4 = vadd.f32 %v3272_v0, %v3212_v51  ;;  %v3534_v20 = vpop.f32.mrf.mxu1  ;;  %v5572_v51 = vld [vmem:[%s6141_s11 + $0x39] sm:$0xff] }
 0x37e   : > { %v8439_v0 = vld [vmem:[#allocation2 + $0xf8] sm:$0xff] }
 0x37f   : > { %v3474_v6 = vadd.f32 %v3426_v35, %v3320_v4  ;;  %3638 = vmatmul.f32.gmra.mxu2 %v8233_v31  ;;  %4006 = vmatmul.f32.gmra.mxu0 %v8383_v32  ;;  %v4519_v35 = vld [vmem:[#allocation3 + $0x3d8] sm:$0xff]  ;;  %v4125_v4 = vld [vmem:[#allocation3 + $0x340] sm:$0xff] }
 0x380   : > { %3790 = vmatmul.f32.gmra.mxu3 %v5570_v41  ;;  %4071 = vmatmul.f32.gmra.mxu1 %v8145_v18 }
 0x381   : > { %v8426_v46 = vadd.f32 %v3531_v24, %v3474_v6  ;;  %v4126_v24 = vld [vmem:[#allocation3 + $0x348] sm:$0xff]  ;;  %4528 = vmatpush.msra.mxu1 %v4519_v35 }
 0x382   : > { %v3167_v40 = vpop.f32.mrf.mxu2  ;;  %4139 = vmatpush.msra.mxu2 %v4126_v24 }
 0x383   : > { %v3213_v52 = vadd.f32 %v3167_v40, %v8228_v43  ;;  %v3275_v31 = vpop.f32.mrf.mxu3  ;;  %v4411_v43 = vld [vmem:[#allocation3 + $0x250] sm:$0xff]  ;;  %v5573_v40 = vld [vmem:[%s6141_s11 + $0x49] sm:$0xff] }
 0x384   : > { %v3432_v26 = vpop.f32.mrf.mxu0  ;;  %4422 = vmatpush.msra.mxu0 %v4411_v43  ;;  %4140 = vmatpush.msra.mxu2 %v4125_v4  ;;  %v5574_v43 = vld [vmem:[%s6141_s11 + $0x51] sm:$0xff] }
 0x385   : > { %v3321_v13 = vadd.f32 %v3275_v31, %v3213_v52  ;;  %v3537_v5 = vpop.f32.mrf.mxu1  ;;  %v8448_v52 = vld [vmem:[#allocation2 + $0x108] sm:$0xff]  ;;  %v4517_v31 = vld [vmem:[#allocation3 + $0x3c8] sm:$0xff] }
 0x387   : > { %v3475_v18 = vadd.f32 %v3429_v34, %v3321_v13  ;;  %3641 = vmatmul.f32.gmra.mxu2 %v8247_v39  ;;  %4009 = vmatmul.f32.gmra.mxu0 %v8430_v22  ;;  %v4518_v34 = vld [vmem:[#allocation3 + $0x3d0] sm:$0xff]  ;;  %v4301_v13 = vld [vmem:[#allocation3 + $0xb8] sm:$0xff] }
 0x388   : > { %3793 = vmatmul.f32.gmra.mxu3 %v5571_v25  ;;  %4074 = vmatmul.f32.gmra.mxu1 %v8388_v36 }
 0x389   : > { %v8435_v28 = vadd.f32 %v3534_v20, %v3475_v18  ;;  %v4302_v20 = vld [vmem:[#allocation3 + $0xc0] sm:$0xff]  ;;  %4529 = vmatpush.msra.mxu1 %v4518_v34 }
 0x38a   : > { %v3170_v38 = vpop.f32.mrf.mxu2  ;;  %4317 = vmatpush.msra.mxu3 %v4302_v20 }
 0x38b   : > { %v3214_v44 = vadd.f32 %v3170_v38, %v8240_v12  ;;  %v3278_v39 = vpop.f32.mrf.mxu3  ;;  %v4410_v12 = vld [vmem:[#allocation3 + $0x248] sm:$0xff]  ;;  %4530 = vmatpush.msra.mxu1 %v4517_v31  ;;  %v8457_v38 = vld [vmem:[#allocation2 + $0x110] sm:$0xff] }
 0x38c   : > { %v3435_v21 = vpop.f32.mrf.mxu0  ;;  %4423 = vmatpush.msra.mxu0 %v4410_v12  ;;  %4318 = vmatpush.msra.mxu3 %v4301_v13  ;;  %v5575_v12 = vld [vmem:[%s6141_s11 + $0x61] sm:$0xff] }
 0x38d   : > { %v3322_v8 = vadd.f32 %v3278_v39, %v3214_v44  ;;  %v3540_v58 = vpop.f32.mrf.mxu1  ;;  %v4516_v39 = vld [vmem:[#allocation3 + $0x3c0] sm:$0xff] }
 0x38e   : > { %4531 = vmatpush.msra.mxu1 %v4516_v39 }
 0x38f   : > { %v3476_v36 = vadd.f32 %v3432_v26, %v3322_v8  ;;  %3644 = vmatmul.f32.gmra.mxu2 %v8260_v60  ;;  %4012 = vmatmul.f32.gmra.mxu0 %v8439_v0  ;;  %v4124_v26 = vld [vmem:[#allocation3 + $0x338] sm:$0xff]  ;;  %v4300_v8 = vld [vmem:[#allocation3 + $0xb0] sm:$0xff] }
 0x390   : > { %3796 = vmatmul.f32.gmra.mxu3 %v5572_v51  ;;  %4077 = vmatmul.f32.gmra.mxu1 %v8383_v32 }
 0x391   : > { %v8444_v41 = vadd.f32 %v3537_v5, %v3476_v36  ;;  %4141 = vmatpush.msra.mxu2 %v4124_v26  ;;  %4319 = vmatpush.msra.mxu3 %v4300_v8 }
 0x392   : > { %v3173_v6 = vpop.f32.mrf.mxu2 }
 0x393   : > { %v3215_v1 = vadd.f32 %v3173_v6, %v8254_v45  ;;  %v3281_v60 = vpop.f32.mrf.mxu3  ;;  %v4409_v45 = vld [vmem:[#allocation3 + $0x240] sm:$0xff]  ;;  %v8466_v6 = vld [vmem:[#allocation2 + $0x120] sm:$0xff] }
 0x394   : > { %v3438_v2 = vpop.f32.mrf.mxu0  ;;  %4424 = vmatpush.msra.mxu0 %v4409_v45  ;;  %v5576_v45 = vld [vmem:[%s6141_s11 + $0x69] sm:$0xff] }
 0x395   : > { %v3323_v37 = vadd.f32 %v3281_v60, %v3215_v1  ;;  %v3543_v63 = vpop.f32.mrf.mxu1  ;;  %v4515_v60 = vld [vmem:[#allocation3 + $0x3b8] sm:$0xff] }
 0x396   : > { %4532 = vmatpush.msra.mxu1 %v4515_v60 }
 0x397   : > { %v3477_v32 = vadd.f32 %v3435_v21, %v3323_v37  ;;  %3647 = vmatmul.f32.gmra.mxu2 %v8274_v16  ;;  %4015 = vmatmul.f32.gmra.mxu0 %v8448_v52  ;;  %v4123_v21 = vld [vmem:[#allocation3 + $0x330] sm:$0xff]  ;;  %v4299_v37 = vld [vmem:[#allocation3 + $0xa8] sm:$0xff] }
 0x398   : > { %3799 = vmatmul.f32.gmra.mxu3 %v5573_v40  ;;  %4080 = vmatmul.f32.gmra.mxu1 %v8430_v22 }
 0x399   : > { %v8453_v5 = vadd.f32 %v3540_v58, %v3477_v32  ;;  %4142 = vmatpush.msra.mxu2 %v4123_v21  ;;  %4320 = vmatpush.msra.mxu3 %v4299_v37 }
 0x39a   : > { %v3176_v25 = vpop.f32.mrf.mxu2 }
 0x39b   : > { %v3216_v18 = vadd.f32 %v3176_v25, %v8267_v56  ;;  %v3284_v16 = vpop.f32.mrf.mxu3  ;;  %v4408_v56 = vld [vmem:[#allocation3 + $0x238] sm:$0xff] }
 0x39c   : > { %v3441_v35 = vpop.f32.mrf.mxu0  ;;  %4425 = vmatpush.msra.mxu0 %v4408_v56  ;;  %v8475_v25 = vld [vmem:[#allocation2 + $0x128] sm:$0xff]  ;;  %v5577_v56 = vld [vmem:[%s6141_s11 + $0x79] sm:$0xff] }
 0x39d   : > { %v3324_v24 = vadd.f32 %v3284_v16, %v3216_v18  ;;  %v3546_v9 = vpop.f32.mrf.mxu1  ;;  %v4514_v16 = vld [vmem:[#allocation3 + $0x3b0] sm:$0xff] }
 0x39e   : > { %4533 = vmatpush.msra.mxu1 %v4514_v16 }
 0x39f   : > { %v3478_v44 = vadd.f32 %v3438_v2, %v3324_v24  ;;  %3650 = vmatmul.f32.gmra.mxu2 %v8287_v48  ;;  %4018 = vmatmul.f32.gmra.mxu0 %v8457_v38  ;;  %v4122_v2 = vld [vmem:[#allocation3 + $0x328] sm:$0xff]  ;;  %v4298_v24 = vld [vmem:[#allocation3 + $0xa0] sm:$0xff] }
 0x3a0   : > { %3802 = vmatmul.f32.gmra.mxu3 %v5574_v43  ;;  %4083 = vmatmul.f32.gmra.mxu1 %v8439_v0 }
 0x3a1   : > { %v8462_v58 = vadd.f32 %v3543_v63, %v3478_v44  ;;  %4143 = vmatpush.msra.mxu2 %v4122_v2  ;;  %4321 = vmatpush.msra.mxu3 %v4298_v24 }
 0x3a2   : > { %v3179_v51 = vpop.f32.mrf.mxu2 }
 0x3a3   : > { %v3217_v36 = vadd.f32 %v3179_v51, %v8281_v54  ;;  %v3287_v48 = vpop.f32.mrf.mxu3  ;;  %v4407_v54 = vld [vmem:[#allocation3 + $0x230] sm:$0xff]  ;;  %v8484_v51 = vld [vmem:[#allocation2 + $0x138] sm:$0xff] }
 0x3a4   : > { %v3444_v34 = vpop.f32.mrf.mxu0  ;;  %4426 = vmatpush.msra.mxu0 %v4407_v54  ;;  %v5578_v54 = vld [vmem:[%s6141_s11 + $0x81] sm:$0xff] }
 0x3a5   : > { %v3325_v4 = vadd.f32 %v3287_v48, %v3217_v36  ;;  %v3549_v20 = vpop.f32.mrf.mxu1  ;;  %v4513_v48 = vld [vmem:[#allocation3 + $0x3a8] sm:$0xff] }
 0x3a6   : > { %4534 = vmatpush.msra.mxu1 %v4513_v48 }
 0x3a7   : > { %v3479_v1 = vadd.f32 %v3441_v35, %v3325_v4  ;;  %3653 = vmatmul.f32.gmra.mxu2 %v8301_v49  ;;  %4021 = vmatmul.f32.gmra.mxu0 %v8466_v6  ;;  %v4121_v35 = vld [vmem:[#allocation3 + $0x320] sm:$0xff]  ;;  %v4297_v4 = vld [vmem:[#allocation3 + $0x98] sm:$0xff] }
 0x3a8   : > { %3805 = vmatmul.f32.gmra.mxu3 %v5575_v12  ;;  %4086 = vmatmul.f32.gmra.mxu1 %v8448_v52 }
 0x3a9   : > { %v8471_v63 = vadd.f32 %v3546_v9, %v3479_v1  ;;  %4144 = vmatpush.msra.mxu2 %v4121_v35  ;;  %4322 = vmatpush.msra.mxu3 %v4297_v4 }
 0x3aa   : > { %v3182_v40 = vpop.f32.mrf.mxu2 }
 0x3ab   : > { %v3218_v32 = vadd.f32 %v3182_v40, %v8294_v19  ;;  %v3290_v49 = vpop.f32.mrf.mxu3  ;;  %v4406_v19 = vld [vmem:[#allocation3 + $0x228] sm:$0xff]  ;;  %v8493_v40 = vld [vmem:[#allocation2 + $0x140] sm:$0xff] }
 0x3ac   : > { %v3447_v31 = vpop.f32.mrf.mxu0  ;;  %4427 = vmatpush.msra.mxu0 %v4406_v19  ;;  %v5579_v19 = vld [vmem:[%s6141_s11 + $0x91] sm:$0xff] }
 0x3ad   : > { %v3326_v26 = vadd.f32 %v3290_v49, %v3218_v32  ;;  %v3552_v13 = vpop.f32.mrf.mxu1  ;;  %v4512_v49 = vld [vmem:[#allocation3 + $0x3a0] sm:$0xff] }
 0x3ae   : > { %4535 = vmatpush.msra.mxu1 %v4512_v49 }
 0x3af   : > { %v3480_v18 = vadd.f32 %v3444_v34, %v3326_v26  ;;  %3656 = vmatmul.f32.gmra.mxu2 %v8314_v59  ;;  %4024 = vmatmul.f32.gmra.mxu0 %v8475_v25  ;;  %v4120_v34 = vld [vmem:[#allocation3 + $0x318] sm:$0xff]  ;;  %v4296_v26 = vld [vmem:[#allocation3 + $0x90] sm:$0xff] }
 0x3b0   : > { %3808 = vmatmul.f32.gmra.mxu3 %v5576_v45  ;;  %4089 = vmatmul.f32.gmra.mxu1 %v8457_v38 }
 0x3b1   : > { %v8480_v9 = vadd.f32 %v3549_v20, %v3480_v18  ;;  %4145 = vmatpush.msra.mxu2 %v4120_v34  ;;  %4323 = vmatpush.msra.mxu3 %v4296_v26 }
 0x3b2   : > { %v3185_v43 = vpop.f32.mrf.mxu2 }
 0x3b3   : > { %v3219_v44 = vadd.f32 %v3185_v43, %v8308_v23  ;;  %v3293_v59 = vpop.f32.mrf.mxu3  ;;  %v4405_v23 = vld [vmem:[#allocation3 + $0x220] sm:$0xff] }
 0x3b4   : > { %v3450_v39 = vpop.f32.mrf.mxu0  ;;  %4428 = vmatpush.msra.mxu0 %v4405_v23  ;;  %v8502_v43 = vld [vmem:[#allocation2 + $0x150] sm:$0xff]  ;;  %v5580_v23 = vld [vmem:[%s6141_s11 + $0x99] sm:$0xff] }
 0x3b5   : > { %v3327_v21 = vadd.f32 %v3293_v59, %v3219_v44  ;;  %v3555_v8 = vpop.f32.mrf.mxu1  ;;  %v4511_v59 = vld [vmem:[#allocation3 + $0x398] sm:$0xff] }
 0x3b6   : > { %4536 = vmatpush.msra.mxu1 %v4511_v59 }
 0x3b7   : > { %v3481_v36 = vadd.f32 %v3447_v31, %v3327_v21  ;;  %3659 = vmatmul.f32.gmra.mxu2 %v8328_v17  ;;  %4027 = vmatmul.f32.gmra.mxu0 %v8484_v51  ;;  %v4119_v31 = vld [vmem:[#allocation3 + $0x310] sm:$0xff]  ;;  %v4295_v21 = vld [vmem:[#allocation3 + $0x88] sm:$0xff] }
 0x3b8   : > { %3811 = vmatmul.f32.gmra.mxu3 %v5577_v56  ;;  %4092 = vmatmul.f32.gmra.mxu1 %v8466_v6 }
 0x3b9   : > { %v8489_v20 = vadd.f32 %v3552_v13, %v3481_v36  ;;  %4146 = vmatpush.msra.mxu2 %v4119_v31  ;;  %4324 = vmatpush.msra.mxu3 %v4295_v21 }
 0x3ba   : > { %v3188_v12 = vpop.f32.mrf.mxu2 }
 0x3bb   : > { %v3220_v1 = vadd.f32 %v3188_v12, %v8321_v10  ;;  %v3296_v17 = vpop.f32.mrf.mxu3  ;;  %v4404_v10 = vld [vmem:[#allocation3 + $0x218] sm:$0xff]  ;;  %v8511_v12 = vld [vmem:[#allocation2 + $0x158] sm:$0xff] }
 0x3bc   : > { %v3453_v60 = vpop.f32.mrf.mxu0  ;;  %4429 = vmatpush.msra.mxu0 %v4404_v10  ;;  %v5581_v10 = vld [vmem:[%s6141_s11 + $0xa9] sm:$0xff] }
 0x3bd   : > { %v3328_v2 = vadd.f32 %v3296_v17, %v3220_v1  ;;  %v3558_v37 = vpop.f32.mrf.mxu1  ;;  %v4510_v17 = vld [vmem:[#allocation3 + $0x390] sm:$0xff] }
 0x3be   : > { %4537 = vmatpush.msra.mxu1 %v4510_v17 }
 0x3bf   : > { %v3482_v32 = vadd.f32 %v3450_v39, %v3328_v2  ;;  %3662 = vmatmul.f32.gmra.mxu2 %v8341_v7  ;;  %4030 = vmatmul.f32.gmra.mxu0 %v8493_v40  ;;  %v4118_v39 = vld [vmem:[#allocation3 + $0x308] sm:$0xff]  ;;  %v4294_v2 = vld [vmem:[#allocation3 + $0x80] sm:$0xff] }
 0x3c0   : > { %3814 = vmatmul.f32.gmra.mxu3 %v5578_v54  ;;  %4095 = vmatmul.f32.gmra.mxu1 %v8475_v25 }
 0x3c1   : > { %v8498_v13 = vadd.f32 %v3555_v8, %v3482_v32  ;;  %4147 = vmatpush.msra.mxu2 %v4118_v39  ;;  %4325 = vmatpush.msra.mxu3 %v4294_v2  ;;  %v5583_v2 = vld [vmem:[%s6141_s11 + $0xc1] sm:$0xff] }
 0x3c2   : > { %v3191_v45 = vpop.f32.mrf.mxu2 }
 0x3c3   : > { %v3221_v18 = vadd.f32 %v3191_v45, %v8335_v55  ;;  %v3299_v7 = vpop.f32.mrf.mxu3  ;;  %v4403_v55 = vld [vmem:[#allocation3 + $0x210] sm:$0xff]  ;;  %v4509_v45 = vld [vmem:[#allocation3 + $0x388] sm:$0xff] }
 0x3c4   : > { %v3456_v16 = vpop.f32.mrf.mxu0  ;;  %4430 = vmatpush.msra.mxu0 %v4403_v55  ;;  %4538 = vmatpush.msra.mxu1 %v4509_v45 }
 0x3c5   : > { %v3329_v35 = vadd.f32 %v3299_v7, %v3221_v18  ;;  %v3561_v24 = vpop.f32.mrf.mxu1  ;;  %v8520_v18 = vld [vmem:[#allocation2 + $0x168] sm:$0xff] }
 0x3c7   : > { %v3483_v44 = vadd.f32 %v3453_v60, %v3329_v35  ;;  %3665 = vmatmul.f32.gmra.mxu2 %v8363_v14  ;;  %4033 = vmatmul.f32.gmra.mxu0 %v8502_v43  ;;  %v4117_v60 = vld [vmem:[#allocation3 + $0x300] sm:$0xff] }
 0x3c8   : > { %3817 = vmatmul.f32.gmra.mxu3 %v5579_v19  ;;  %4098 = vmatmul.f32.gmra.mxu1 %v8484_v51  ;;  %v4508_v35 = vld [vmem:[#allocation3 + $0x380] sm:$0xff] }
 0x3c9   : > { %v8507_v8 = vadd.f32 %v3558_v37, %v3483_v44  ;;  %4148 = vmatpush.msra.mxu2 %v4117_v60  ;;  %4539 = vmatpush.msra.mxu1 %v4508_v35 }
 0x3ca   : > { %v3194_v56 = vpop.f32.mrf.mxu2 }
 0x3cb   : > { %v3222_v36 = vadd.f32 %v3194_v56, %v8348_v33  ;;  %v3302_v14 = vpop.f32.mrf.mxu3  ;;  %v4402_v33 = vld [vmem:[#allocation3 + $0x208] sm:$0xff] }
 0x3cc   : > { %v3459_v48 = vpop.f32.mrf.mxu0  ;;  %4431 = vmatpush.msra.mxu0 %v4402_v33  ;;  %v4675_v33 = vld [vmem:[#allocation3 + $0x170] sm:$0xff] }
 0x3cd   : > { %v3330_v34 = vadd.f32 %v3302_v14, %v3222_v36  ;;  %v3564_v4 = vpop.f32.mrf.mxu1  ;;  %v5582_v36 = vld [vmem:[%s6141_s11 + $0xb1] sm:$0xff] }
 0x3ce   : > { %v8529_v14 = vld [vmem:[#allocation2 + $0x170] sm:$0xff] }
 0x3cf   : > { %v3484_v1 = vadd.f32 %v3456_v16, %v3330_v34  ;;  %3668 = vmatmul.f32.gmra.mxu2 %v8378_v47  ;;  %4036 = vmatmul.f32.gmra.mxu0 %v8511_v12  ;;  %v4401_v16 = vld [vmem:[#allocation3 + $0x200] sm:$0xff] }
 0x3d0   : > { %3820 = vmatmul.f32.gmra.mxu3 %v5580_v23  ;;  %4101 = vmatmul.f32.gmra.mxu1 %v8493_v40 }
 0x3d1   : > { %v8516_v37 = vadd.f32 %v3561_v24, %v3484_v1  ;;  %v4780_v24 = vld [vmem:[#allocation3 + $0x2f8] sm:$0xff]  ;;  %4432 = vmatpush.msra.mxu0 %v4401_v16 }
 0x3d2   : > { %v3197_v54 = vpop.f32.mrf.mxu2  ;;  %4781 = vmatpush.msrb.mxu3 %v4780_v24  ;;  %v5030_v24 = vld [vmem:[%s9268_s7 + $0x78] sm:$0xff] }
 0x3d3   : > { %v3223_v32 = vadd.f32 %v3197_v54, %v8369_v53  ;;  %v3305_v47 = vpop.f32.mrf.mxu3  ;;  %v4676_v53 = vld [vmem:[#allocation3 + $0x178] sm:$0xff]  ;;  %v4779_v54 = vld [vmem:[#allocation3 + $0x2f0] sm:$0xff]  ;;  %5031 = vmatpush.msrb.mxu1 %v5030_v24 }
 0x3d4   : > { %v3462_v49 = vpop.f32.mrf.mxu0  ;;  %4677 = vmatpush.msrb.mxu2 %v4676_v53  ;;  %4782 = vmatpush.msrb.mxu3 %v4779_v54  ;;  %v5584_v53 = vld [vmem:[%s6141_s11 + $0xc9] sm:$0xff]  ;;  %v8599_v24 = vld [vmem:[%s9267_s6] ss:$0 sm:$0xff] }
 0x3d5   : > { %v3331_v31 = vadd.f32 %v3305_v47, %v3223_v32  ;;  %v3567_v26 = vpop.f32.mrf.mxu1  ;;  %v8538_v32 = vld [vmem:[#allocation2 + $0x180] sm:$0xff]  ;;  %v4673_v54 = vld [vmem:[#allocation3 + $0x160] sm:$0xff] }
 0x3d6   : > { %4678 = vmatpush.msrb.mxu2 %v4675_v33  ;;  %v5029_v33 = vld [vmem:[%s9268_s7 + $0x70] sm:$0xff] }
 0x3d7   : > { %v3485_v7 = vadd.f32 %v3459_v48, %v3331_v31  ;;  %3671 = vmatmul.f32.gmra.mxu2 %v9294_v42  ;;  %4039 = vmatmul.f32.gmra.mxu0 %v8520_v18 }
 0x3d8   : > { %3823 = vmatmul.f32.gmra.mxu3 %v5581_v10  ;;  %4104 = vmatmul.f32.gmra.mxu1 %v8502_v43 }
 0x3d9   : > { %v8525_v19 = vadd.f32 %v3564_v4, %v3485_v7  ;;  %5032 = vmatpush.msrb.mxu1 %v5029_v33  ;;  %v4881_v33 = vld [vmem:[#allocation3 + $0x460] sm:$0xff] }
 0x3da   : > { %v3200_v44 = vpop.f32.mrf.mxu2 }
 0x3db   : > { %v3224_v59 = vadd.f32 %v3200_v44, %v8381_v11  ;;  %v3308_v39 = vpop.f32.mrf.mxu3  ;;  %v4674_v44 = vld [vmem:[#allocation3 + $0x168] sm:$0xff] }
 0x3dc   : > { %v3465_v21 = vpop.f32.mrf.mxu0  ;;  %4679 = vmatpush.msrb.mxu2 %v4674_v44 }
 0x3dd   : > { %v3332_v55 = vadd.f32 %v3308_v39, %v3224_v59  ;;  %v3570_v56 = vpop.f32.mrf.mxu1  ;;  %v9297_v59 = vld [vmem:[#allocation9_spill] sm:$0xff] }
 0x3de   : > { %4680 = vmatpush.msrb.mxu2 %v4673_v54 }
 0x3df   : > { %v3486_v48 = vadd.f32 %v3462_v49, %v3332_v55  ;;  %3674 = vmatmul.f32.gmra.mxu2 %v8410_v30  ;;  %4042 = vmatmul.f32.gmra.mxu0 %v8529_v14  ;;  %v4884_v30 = vld [vmem:[#allocation3 + $0x478] sm:$0xff]  ;;  %v9296_v49 = vld [vmem:[#allocation10_spill] sm:$0xff]  ;;  %v4883_v55 = vld [vmem:[#allocation3 + $0x470] sm:$0xff] }
 0x3e0   : > { %3826 = vmatmul.f32.gmra.mxu3 %v5582_v36  ;;  %4107 = vmatmul.f32.gmra.mxu1 %v8511_v12 }
 0x3e1   : > { %v8534_v34 = vadd.f32 %v3567_v26, %v3486_v48  ;;  %4885 = vmatpush.msrb.mxu0 %v4884_v30  ;;  %v3598_v26 = vrot.slane %v8397_v61, 2  ;;  %v4778_v61 = vld [vmem:[#allocation3 + $0x2e8] sm:$0xff] }
 0x3e2   : > { %v3203_v4 = vpop.f32.mrf.mxu2  ;;  %4783 = vmatpush.msrb.mxu3 %v4778_v61  ;;  %v4882_v30 = vld [vmem:[#allocation3 + $0x468] sm:$0xff] }
 0x3e3   : > { %v3225_v11 = vadd.f32 %v3203_v4, %v8401_v27  ;;  %v3311_v23 = vpop.f32.mrf.mxu3  ;;  %v3599_v39 = vsel %vm1108_vm1, %v9297_v59, %v3598_v26  ;;  %4886 = vmatpush.msrb.mxu0 %v4883_v55  ;;  %v8581_v26 = vld [vmem:[#allocation2 + $0x100] sm:$0x3]  ;;  %v5753_v59 = vld [vmem:[#allocation2 + $0xd0] sm:$0x3] }
 0x3e4   : > { %v3468_v1 = vpop.f32.mrf.mxu0 }
 0x3e5   : > { %v3333_v17 = vadd.f32 %v3311_v23, %v3225_v11  ;;  %v3573_v60 = vpop.f32.mrf.mxu1  ;;  %v4249_v11 = vrot.slane %v8439_v0, 1  ;;  %4887 = vmatpush.msrb.mxu0 %v4882_v30 }
 0x3e7   : > { %v3487_v47 = vadd.f32 %v3465_v21, %v3333_v17  ;;  %3677 = vmatmul.f32.gmra.mxu2 %v9296_v49  ;;  %4045 = vmatmul.f32.gmra.mxu0 %v8538_v32  ;;  %v8553_v21 = vld [vmem:[#allocation2 + $0x188] sm:$0xff] }
 0x3e8   : > { %3829 = vmatmul.f32.gmra.mxu3 %v5583_v2  ;;  %4110 = vmatmul.f32.gmra.mxu1 %v8520_v18  ;;  %v4248_v2 = vrot.slane %v8430_v22, 1 }
 0x3e9   : > { %v8543_v27 = vadd.f32 %v3570_v56, %v3487_v47  ;;  %4888 = vmatpush.msrb.mxu0 %v4881_v33 }
 0x3ea   : > { %v3206_v31 = vpop.f32.mrf.mxu2  ;;  %v8572_v47 = vsel %vm737_vm0, %v4248_v2, %v4249_v11  ;;  %v4776_v2 = vld [vmem:[#allocation3 + $0x2d8] sm:$0xff] }
 0x3eb   : > { %v3226_v10 = vadd.f32 %v3206_v31, %v8413_v29  ;;  %v3314_v45 = vpop.f32.mrf.mxu3  ;;  %v8579_v31 = vld [vmem:[%s9269_s8] ss:$0 sm:$0xff] }
 0x3ec   : > { %v3471_v7 = vpop.f32.mrf.mxu0 }
 0x3ed   : > { %v3334_v16 = vadd.f32 %v3314_v45, %v3226_v10  ;;  %v3576_v35 = vpop.f32.mrf.mxu1  ;;  %v8593_v45 = vld [vmem:[%s9270_s9] ss:$0 sm:$0xff] }
 0x3ef   : > { %v3488_v29 = vadd.f32 %v3468_v1, %v3334_v16  ;;  %3680 = vmatmul.f32.gmra.mxu2 %v3599_v39  ;;  %4048 = vmatmul.f32.gmra.mxu0 %v8553_v21  ;;  %v4241_v39 = vrot.slane %v5753_v59, 1  ;;  %v4253_v59 = vrot.slane %v8448_v52, 1 }
 0x3f0   : > { %3832 = vmatmul.f32.gmra.mxu3 %v5584_v53  ;;  %4113 = vmatmul.f32.gmra.mxu1 %v8529_v14 }
 0x3f1   : > { %v8557_v56 = vadd.f32 %v3573_v60, %v3488_v29  ;;  %v4777_v60 = vld [vmem:[#allocation3 + $0x2e0] sm:$0xff] }
 0x3f2   : > { %v3209_v36 = vpop.f32.mrf.mxu2  ;;  %4784 = vmatpush.msrb.mxu3 %v4777_v60  ;;  %v4242_v60 = vsel %vm737_vm0, %v8351_v15, %v4241_v39  ;;  %v4671_v39 = vld [vmem:[#allocation3 + $0x150] sm:$0xff] }
 0x3f3   : > { %v3227_v48 = vadd.f32 %v3209_v36, %v8419_v57  ;;  %v3317_v4 = vpop.f32.mrf.mxu3 }
 0x3f4   : > { %v8561_v23 = vpop.f32.mrf.mxu0  ;;  %4785 = vmatpush.msrb.mxu3 %v4776_v2 }
 0x3f5   : > { %v3335_v17 = vadd.f32 %v3317_v4, %v3227_v48  ;;  %v8563_v1 = vpop.f32.mrf.mxu1  ;;  %v4672_v48 = vld [vmem:[#allocation3 + $0x158] sm:$0xff] }
 0x3f6   : > { %4681 = vmatpush.msrb.mxu2 %v4672_v48 }
 0x3f7   : > { %v3489_v57 = vadd.f32 %v3471_v7, %v3335_v17  ;;  %4149 = vmatmul.f32.vlgmr.msra.gmra.mxu2 %v8430_v22  ;;  %4433 = vmatmul.f32.vlgmr.msra.gmra.mxu0 %v8394_v62  ;;  %v8586_v22 = vld [vmem:[%s9266_s5] ss:$0 sm:$0xff]  ;;  %v5752_v7 = vld [vmem:[#allocation2 + $0xe8] sm:$0x3] }
 0x3f8   : > { %4326 = vmatmul.f32.vlgmr.msra.gmra.mxu3 %v8359_v50  ;;  %4540 = vmatmul.f32.vlgmr.msra.gmra.mxu1 %v8572_v47  ;;  %v4246_v16 = vrot.slane %v5752_v7, 1 }
 0x3f9   : > { %v8588_v10 = vadd.f32 %v3576_v35, %v3489_v57  ;;  %v4251_v35 = vrot.slane %v8581_v26, 1  ;;  %4682 = vmatpush.msrb.mxu2 %v4671_v39 }
 0x3fa   : > { %v3636_v50 = vpop.f32.mrf.mxu2  ;;  %v8615_v17 = vsel %vm737_vm0, %v8386_v3, %v4246_v16 }
 0x3fb   : > { %v3684_v53 = vadd.f32 %v3636_v50, %v8426_v46  ;;  %v3788_v44 = vpop.f32.mrf.mxu3  ;;  %v5028_v46 = vld [vmem:[%s9268_s7 + $0x68] sm:$0xff]  ;;  %v8625_v30 = vsel %vm737_vm0, %v4249_v11, %v4251_v35 }
 0x3fc   : > { %v3840_v61 = vmul.f32 %v8579_v31, %v3788_v44  ;;  %v8604_v55 = vpop.f32.mrf.mxu0  ;;  %5033 = vmatpush.msrb.mxu1 %v5028_v46 }
 0x3fd   : > { %v3703_v29 = vmul.f32 %v8586_v22, %v3684_v53  ;;  %v8607_v36 = vpop.f32.mrf.mxu1 }
 0x3fe   : > { %v3860_v4 = vadd.f32 %v8593_v45, %v3840_v61  ;;  %v4775_v61 = vld [vmem:[#allocation3 + $0x2d0] sm:$0xff] }
 0x3ff   : > { %v3722_v54 = vadd.f32 %v8599_v24, %v3703_v29  ;;  %4152 = vmatmul.f32.gmra.mxu2 %v8439_v0  ;;  %4436 = vmatmul.f32.gmra.mxu0 %v8615_v17  ;;  %v4254_v0 = vrot.slane %v8457_v38, 1  ;;  %v4880_v29 = vld [vmem:[#allocation3 + $0x458] sm:$0xff] }
 0x400   : > { %4329 = vmatmul.f32.gmra.mxu3 %v4242_v60  ;;  %4543 = vmatmul.f32.gmra.mxu1 %v8625_v30 }
 0x401   : > { %v3876_v3 = vadd.f32 %v3860_v4, %v3722_v54  ;;  %v8648_v48 = vsel %vm737_vm0, %v4253_v59, %v4254_v0  ;;  %v8652_v4 = vld [vmem:[#allocation2 + $0x118] sm:$0x3]  ;;  %4786 = vmatpush.msrb.mxu3 %v4775_v61  ;;  %4889 = vmatpush.msrb.mxu0 %v4880_v29  ;;  %v4879_v59 = vld [vmem:[#allocation3 + $0x450] sm:$0xff] }
 0x402   : > { %v3639_v57 = vpop.f32.mrf.mxu2 }
 0x403   : > { %v3892_v50 = vmax.f32 %v3876_v3, 0.0  ;;  %v3685_v7 = vadd.f32 %v3639_v57, %v8435_v28  ;;  %v3791_v16 = vpop.f32.mrf.mxu3  ;;  %v5027_v28 = vld [vmem:[%s9268_s7 + $0x60] sm:$0xff]  ;;  %v4256_v3 = vrot.slane %v8652_v4, 1  ;;  %4890 = vmatpush.msrb.mxu0 %v4879_v59 }
 0x404   : > { %v3841_v15 = vmul.f32 %v8579_v31, %v3791_v16  ;;  %v8631_v53 = vpop.f32.mrf.mxu0  ;;  %5034 = vmatpush.msrb.mxu1 %v5027_v28  ;;  %v5026_v16 = vld [vmem:[%s9268_s7 + $0x58] sm:$0xff] }
 0x405   : > { %3908 = vst [vmem:[%s8633_s30] sm:$0xff] %v3892_v50  ;;  %v3704_v11 = vmul.f32 %v8586_v22, %v3685_v7  ;;  %v8637_v44 = vpop.f32.mrf.mxu1  ;;  %v8671_v39 = vsel %vm737_vm0, %v4254_v0, %v4256_v3  ;;  %v4669_v3 = vld [vmem:[#allocation3 + $0x140] sm:$0xff] }
 0x406   : > { %v3861_v35 = vadd.f32 %v8593_v45, %v3841_v15  ;;  %v4670_v15 = vld [vmem:[#allocation3 + $0x148] sm:$0xff]  ;;  %5035 = vmatpush.msrb.mxu1 %v5026_v16 }
 0x407   : > { %v3723_v46 = vadd.f32 %v8599_v24, %v3704_v11  ;;  %4155 = vmatmul.f32.gmra.mxu2 %v8448_v52  ;;  %4439 = vmatmul.f32.gmra.mxu0 %v8572_v47 }
 0x408   : > { %4332 = vmatmul.f32.gmra.mxu3 %v8394_v62  ;;  %4546 = vmatmul.f32.gmra.mxu1 %v8648_v48 }
 0x409   : > { %v3877_v2 = vadd.f32 %v3861_v35, %v3723_v46  ;;  %4683 = vmatpush.msrb.mxu2 %v4670_v15 }
 0x40a   : > { %v3642_v33 = vpop.f32.mrf.mxu2 }
 0x40b   : > { %v3893_v54 = vmax.f32 %v3877_v2, 0.0  ;;  %v3686_v60 = vadd.f32 %v3642_v33, %v8444_v41  ;;  %v3794_v52 = vpop.f32.mrf.mxu3  ;;  %v4774_v41 = vld [vmem:[#allocation3 + $0x2c8] sm:$0xff]  ;;  %v4259_v33 = vrot.slane %v8475_v25, 1  ;;  %4684 = vmatpush.msrb.mxu2 %v4669_v3 }
 0x40c   : > { %v3842_v57 = vmul.f32 %v8579_v31, %v3794_v52  ;;  %v8657_v50 = vpop.f32.mrf.mxu0  ;;  %4787 = vmatpush.msrb.mxu3 %v4774_v41  ;;  %v5025_v52 = vld [vmem:[%s9268_s7 + $0x50] sm:$0xff] }
 0x40d   : > { %3909 = vst [vmem:[%s8633_s30 + $0x8] sm:$0xff] %v3893_v54  ;;  %v3705_v62 = vmul.f32 %v8586_v22, %v3686_v60  ;;  %v8661_v7 = vpop.f32.mrf.mxu1  ;;  %v4258_v60 = vrot.slane %v8466_v6, 1  ;;  %5036 = vmatpush.msrb.mxu1 %v5025_v52  ;;  %v4877_v52 = vld [vmem:[#allocation3 + $0x440] sm:$0xff] }
 0x40e   : > { %v3862_v11 = vadd.f32 %v8593_v45, %v3842_v57  ;;  %v4773_v57 = vld [vmem:[#allocation3 + $0x2c0] sm:$0xff] }
 0x40f   : > { %v3724_v28 = vadd.f32 %v8599_v24, %v3705_v62  ;;  %4158 = vmatmul.f32.gmra.mxu2 %v8457_v38  ;;  %4442 = vmatmul.f32.gmra.mxu0 %v8625_v30  ;;  %v4878_v62 = vld [vmem:[#allocation3 + $0x448] sm:$0xff]  ;;  %v8693_v15 = vsel %vm737_vm0, %v4258_v60, %v4259_v33 }
 0x410   : > { %4335 = vmatmul.f32.gmra.mxu3 %v8615_v17  ;;  %4549 = vmatmul.f32.gmra.mxu1 %v8671_v39 }
 0x411   : > { %v3878_v35 = vadd.f32 %v3862_v11, %v3724_v28  ;;  %v8697_v11 = vld [vmem:[#allocation2 + $0x130] sm:$0x3]  ;;  %4788 = vmatpush.msrb.mxu3 %v4773_v57  ;;  %4891 = vmatpush.msrb.mxu0 %v4878_v62 }
 0x412   : > { %v3645_v61 = vpop.f32.mrf.mxu2 }
 0x413   : > { %v3894_v29 = vmax.f32 %v3878_v35, 0.0  ;;  %v3687_v46 = vadd.f32 %v3645_v61, %v8453_v5  ;;  %v3797_v2 = vpop.f32.mrf.mxu3  ;;  %v4261_v61 = vrot.slane %v8697_v11, 1  ;;  %4892 = vmatpush.msrb.mxu0 %v4877_v52 }
 0x414   : > { %v3843_v38 = vmul.f32 %v8579_v31, %v3797_v2  ;;  %v8678_v54 = vpop.f32.mrf.mxu0 }
 0x415   : > { %3910 = vst [vmem:[%s8633_s30 + $0x10] sm:$0xff] %v3894_v29  ;;  %v3706_v0 = vmul.f32 %v8586_v22, %v3687_v46  ;;  %v8682_v17 = vpop.f32.mrf.mxu1 }
 0x416   : > { %v3863_v5 = vadd.f32 %v8593_v45, %v3843_v38  ;;  %v5024_v38 = vld [vmem:[%s9268_s7 + $0x48] sm:$0xff] }
 0x417   : > { %v3725_v16 = vadd.f32 %v8599_v24, %v3706_v0  ;;  %4161 = vmatmul.f32.gmra.mxu2 %v8466_v6  ;;  %4445 = vmatmul.f32.gmra.mxu0 %v8648_v48  ;;  %v4668_v0 = vld [vmem:[#allocation3 + $0x138] sm:$0xff] }
 0x418   : > { %4338 = vmatmul.f32.gmra.mxu3 %v8572_v47  ;;  %4552 = vmatmul.f32.gmra.mxu1 %v8693_v15 }
 0x419   : > { %v3879_v41 = vadd.f32 %v3863_v5, %v3725_v16  ;;  %5037 = vmatpush.msrb.mxu1 %v5024_v38  ;;  %4685 = vmatpush.msrb.mxu2 %v4668_v0  ;;  %v8716_v5 = vsel %vm737_vm0, %v4259_v33, %v4261_v61  ;;  %v5023_v61 = vld [vmem:[%s9268_s7 + $0x40] sm:$0xff]  ;;  %v4876_v38 = vld [vmem:[#allocation3 + $0x438] sm:$0xff] }
 0x41a   : > { %v3648_v59 = vpop.f32.mrf.mxu2  ;;  %4893 = vmatpush.msrb.mxu0 %v4876_v38 }
 0x41b   : > { %v3895_v28 = vmax.f32 %v3879_v41, 0.0  ;;  %v3688_v35 = vadd.f32 %v3648_v59, %v8462_v58  ;;  %v3800_v6 = vpop.f32.mrf.mxu3  ;;  %v4772_v58 = vld [vmem:[#allocation3 + $0x2b8] sm:$0xff]  ;;  %5038 = vmatpush.msrb.mxu1 %v5023_v61 }
 0x41c   : > { %v3844_v29 = vmul.f32 %v8579_v31, %v3800_v6  ;;  %v8702_v46 = vpop.f32.mrf.mxu0  ;;  %4789 = vmatpush.msrb.mxu3 %v4772_v58  ;;  %v4263_v6 = vrot.slane %v8484_v51, 1  ;;  %v8742_v58 = vld [vmem:[#allocation2 + $0x148] sm:$0x3] }
 0x41d   : > { %3911 = vst [vmem:[%s8633_s30 + $0x18] sm:$0xff] %v3895_v28  ;;  %v3707_v47 = vmul.f32 %v8586_v22, %v3688_v35  ;;  %v8706_v2 = vpop.f32.mrf.mxu1  ;;  %v4264_v28 = vrot.slane %v8493_v40, 1 }
 0x41e   : > { %v3864_v60 = vadd.f32 %v8593_v45, %v3844_v29  ;;  %v4667_v29 = vld [vmem:[#allocation3 + $0x130] sm:$0xff] }
 0x41f   : > { %v3726_v3 = vadd.f32 %v8599_v24, %v3707_v47  ;;  %4164 = vmatmul.f32.gmra.mxu2 %v8475_v25  ;;  %4448 = vmatmul.f32.gmra.mxu0 %v8671_v39  ;;  %v4771_v47 = vld [vmem:[#allocation3 + $0x2b0] sm:$0xff] }
 0x420   : > { %4341 = vmatmul.f32.gmra.mxu3 %v8625_v30  ;;  %4555 = vmatmul.f32.gmra.mxu1 %v8716_v5 }
 0x421   : > { %v3880_v57 = vadd.f32 %v3864_v60, %v3726_v3  ;;  %4686 = vmatpush.msrb.mxu2 %v4667_v29  ;;  %v8738_v60 = vsel %vm737_vm0, %v4263_v6, %v4264_v28  ;;  %4790 = vmatpush.msrb.mxu3 %v4771_v47  ;;  %v4666_v6 = vld [vmem:[#allocation3 + $0x128] sm:$0xff]  ;;  %v4875_v29 = vld [vmem:[#allocation3 + $0x430] sm:$0xff] }
 0x422   : > { %v3651_v62 = vpop.f32.mrf.mxu2  ;;  %4894 = vmatpush.msrb.mxu0 %v4875_v29  ;;  %v8787_v29 = vld [vmem:[#allocation2 + $0x160] sm:$0x3] }
 0x423   : > { %v3896_v16 = vmax.f32 %v3880_v57, 0.0  ;;  %v3689_v41 = vadd.f32 %v3651_v62, %v8471_v63  ;;  %v3803_v59 = vpop.f32.mrf.mxu3  ;;  %4687 = vmatpush.msrb.mxu2 %v4666_v6  ;;  %v4874_v6 = vld [vmem:[#allocation3 + $0x428] sm:$0xff] }
 0x424   : > { %v3845_v25 = vmul.f32 %v8579_v31, %v3803_v59  ;;  %v8723_v35 = vpop.f32.mrf.mxu0  ;;  %4895 = vmatpush.msrb.mxu0 %v4874_v6 }
 0x425   : > { %3912 = vst [vmem:[%s8633_s30 + $0x20] sm:$0xff] %v3896_v16  ;;  %v3708_v33 = vmul.f32 %v8586_v22, %v3689_v41  ;;  %v8727_v30 = vpop.f32.mrf.mxu1  ;;  %v4266_v16 = vrot.slane %v8742_v58, 1 }
 0x426   : > { %v3865_v63 = vadd.f32 %v8593_v45, %v3845_v25 }
 0x427   : > { %v3727_v0 = vadd.f32 %v8599_v24, %v3708_v33  ;;  %4167 = vmatmul.f32.gmra.mxu2 %v8484_v51  ;;  %4451 = vmatmul.f32.gmra.mxu0 %v8693_v15  ;;  %v5022_v33 = vld [vmem:[%s9268_s7 + $0x38] sm:$0xff]  ;;  %v8761_v47 = vsel %vm737_vm0, %v4264_v28, %v4266_v16  ;;  %v4268_v16 = vrot.slane %v8502_v43, 1 }
 0x428   : > { %4344 = vmatmul.f32.gmra.mxu3 %v8648_v48  ;;  %4558 = vmatmul.f32.gmra.mxu1 %v8738_v60 }
 0x429   : > { %v3881_v52 = vadd.f32 %v3865_v63, %v3727_v0  ;;  %5039 = vmatpush.msrb.mxu1 %v5022_v33  ;;  %v4769_v33 = vld [vmem:[#allocation3 + $0x2a0] sm:$0xff] }
 0x42a   : > { %v3654_v3 = vpop.f32.mrf.mxu2 }
 0x42b   : > { %v3897_v57 = vmax.f32 %v3881_v52, 0.0  ;;  %v3690_v62 = vadd.f32 %v3654_v3, %v8480_v9  ;;  %v3806_v51 = vpop.f32.mrf.mxu3  ;;  %v4770_v9 = vld [vmem:[#allocation3 + $0x2a8] sm:$0xff] }
 0x42c   : > { %v3846_v41 = vmul.f32 %v8579_v31, %v3806_v51  ;;  %v8747_v59 = vpop.f32.mrf.mxu0  ;;  %4791 = vmatpush.msrb.mxu3 %v4770_v9 }
 0x42d   : > { %3913 = vst [vmem:[%s8633_s30 + $0x28] sm:$0xff] %v3897_v57  ;;  %v3709_v48 = vmul.f32 %v8586_v22, %v3690_v62  ;;  %v8751_v25 = vpop.f32.mrf.mxu1  ;;  %v4269_v62 = vrot.slane %v8511_v12, 1 }
 0x42e   : > { %v3866_v61 = vadd.f32 %v8593_v45, %v3846_v41  ;;  %v5021_v41 = vld [vmem:[%s9268_s7 + $0x30] sm:$0xff]  ;;  %4792 = vmatpush.msrb.mxu3 %v4769_v33 }
 0x42f   : > { %v3728_v63 = vadd.f32 %v8599_v24, %v3709_v48  ;;  %4170 = vmatmul.f32.gmra.mxu2 %v8493_v40  ;;  %4454 = vmatmul.f32.gmra.mxu0 %v8716_v5  ;;  %v4665_v48 = vld [vmem:[#allocation3 + $0x120] sm:$0xff]  ;;  %v8783_v9 = vsel %vm737_vm0, %v4268_v16, %v4269_v62  ;;  %v5020_v16 = vld [vmem:[%s9268_s7 + $0x28] sm:$0xff] }
 0x430   : > { %4347 = vmatmul.f32.gmra.mxu3 %v8671_v39  ;;  %4561 = vmatmul.f32.gmra.mxu1 %v8761_v47 }
 0x431   : > { %v3882_v38 = vadd.f32 %v3866_v61, %v3728_v63  ;;  %5040 = vmatpush.msrb.mxu1 %v5021_v41  ;;  %4688 = vmatpush.msrb.mxu2 %v4665_v48  ;;  %v4664_v41 = vld [vmem:[#allocation3 + $0x118] sm:$0xff] }
 0x432   : > { %v3657_v0 = vpop.f32.mrf.mxu2 }
 0x433   : > { %v3898_v52 = vmax.f32 %v3882_v38, 0.0  ;;  %v3691_v3 = vadd.f32 %v3657_v0, %v8489_v20  ;;  %v3809_v57 = vpop.f32.mrf.mxu3  ;;  %5041 = vmatpush.msrb.mxu1 %v5020_v16  ;;  %4689 = vmatpush.msrb.mxu2 %v4664_v41  ;;  %v4663_v16 = vld [vmem:[#allocation3 + $0x110] sm:$0xff] }
 0x434   : > { %v3847_v40 = vmul.f32 %v8579_v31, %v3809_v57  ;;  %v8768_v51 = vpop.f32.mrf.mxu0  ;;  %v4767_v41 = vld [vmem:[#allocation3 + $0x290] sm:$0xff] }
 0x435   : > { %3914 = vst [vmem:[%s8633_s30 + $0x30] sm:$0xff] %v3898_v52  ;;  %v3710_v28 = vmul.f32 %v8586_v22, %v3691_v3  ;;  %v8772_v39 = vpop.f32.mrf.mxu1  ;;  %v4271_v3 = vrot.slane %v8787_v29, 1  ;;  %4690 = vmatpush.msrb.mxu2 %v4663_v16  ;;  %v4662_v16 = vld [vmem:[#allocation3 + $0x108] sm:$0xff] }
 0x436   : > { %v3867_v20 = vadd.f32 %v8593_v45, %v3847_v40 }
 0x437   : > { %v3729_v61 = vadd.f32 %v8599_v24, %v3710_v28  ;;  %4173 = vmatmul.f32.gmra.mxu2 %v8502_v43  ;;  %4457 = vmatmul.f32.gmra.mxu0 %v8738_v60  ;;  %v8806_v6 = vsel %vm737_vm0, %v4269_v62, %v4271_v3  ;;  %v4273_v3 = vrot.slane %v8520_v18, 1 }
 0x438   : > { %4350 = vmatmul.f32.gmra.mxu3 %v8693_v15  ;;  %4564 = vmatmul.f32.gmra.mxu1 %v8783_v9 }
 0x439   : > { %v3883_v63 = vadd.f32 %v3867_v20, %v3729_v61  ;;  %v4873_v20 = vld [vmem:[#allocation3 + $0x420] sm:$0xff]  ;;  %4691 = vmatpush.msrb.mxu2 %v4662_v16 }
 0x43a   : > { %v3660_v38 = vpop.f32.mrf.mxu2  ;;  %4896 = vmatpush.msrb.mxu0 %v4873_v20  ;;  %v4661_v16 = vld [vmem:[#allocation3 + $0x100] sm:$0xff] }
 0x43b   : > { %v3899_v0 = vmax.f32 %v3883_v63, 0.0  ;;  %v3692_v52 = vadd.f32 %v3660_v38, %v8498_v13  ;;  %v3812_v43 = vpop.f32.mrf.mxu3  ;;  %v4768_v13 = vld [vmem:[#allocation3 + $0x298] sm:$0xff]  ;;  %4692 = vmatpush.msrb.mxu2 %v4661_v16 }
 0x43c   : > { %v3848_v57 = vmul.f32 %v8579_v31, %v3812_v43  ;;  %v8792_v40 = vpop.f32.mrf.mxu0  ;;  %4793 = vmatpush.msrb.mxu3 %v4768_v13  ;;  %v4274_v43 = vrot.slane %v8529_v14, 1 }
 0x43d   : > { %3915 = vst [vmem:[%s8633_s30 + $0x38] sm:$0xff] %v3899_v0  ;;  %v3711_v15 = vmul.f32 %v8586_v22, %v3692_v52  ;;  %v8796_v28 = vpop.f32.mrf.mxu1 }
 0x43e   : > { %v3868_v48 = vadd.f32 %v8593_v45, %v3848_v57  ;;  %v8828_v20 = vsel %vm737_vm0, %v4273_v3, %v4274_v43  ;;  %4794 = vmatpush.msrb.mxu3 %v4767_v41  ;;  %v4871_v41 = vld [vmem:[#allocation3 + $0x410] sm:$0xff] }
 0x43f   : > { %v3730_v33 = vadd.f32 %v8599_v24, %v3711_v15  ;;  %4176 = vmatmul.f32.gmra.mxu2 %v8511_v12  ;;  %4460 = vmatmul.f32.gmra.mxu0 %v8761_v47  ;;  %v5019_v15 = vld [vmem:[%s9268_s7 + $0x20] sm:$0xff] }
 0x440   : > { %4353 = vmatmul.f32.gmra.mxu3 %v8716_v5  ;;  %4567 = vmatmul.f32.gmra.mxu1 %v8806_v6 }
 0x441   : > { %v3884_v61 = vadd.f32 %v3868_v48, %v3730_v33  ;;  %5042 = vmatpush.msrb.mxu1 %v5019_v15  ;;  %v4872_v48 = vld [vmem:[#allocation3 + $0x418] sm:$0xff]  ;;  %v8832_v33 = vld [vmem:[#allocation2 + $0x178] sm:$0x3] }
 0x442   : > { %v3663_v63 = vpop.f32.mrf.mxu2  ;;  %4897 = vmatpush.msrb.mxu0 %v4872_v48  ;;  %v5018_v15 = vld [vmem:[%s9268_s7 + $0x18] sm:$0xff] }
 0x443   : > { %v3900_v38 = vmax.f32 %v3884_v61, 0.0  ;;  %v3693_v0 = vadd.f32 %v3663_v63, %v8507_v8  ;;  %v3815_v52 = vpop.f32.mrf.mxu3  ;;  %5043 = vmatpush.msrb.mxu1 %v5018_v15  ;;  %v5017_v15 = vld [vmem:[%s9268_s7 + $0x10] sm:$0xff] }
 0x444   : > { %v3849_v12 = vmul.f32 %v8579_v31, %v3815_v52  ;;  %v8813_v57 = vpop.f32.mrf.mxu0  ;;  %v4276_v52 = vrot.slane %v8832_v33, 1  ;;  %4898 = vmatpush.msrb.mxu0 %v4871_v41 }
 0x445   : > { %3916 = vst [vmem:[%s8633_s30 + $0x40] sm:$0xff] %v3900_v38  ;;  %v3712_v62 = vmul.f32 %v8586_v22, %v3693_v0  ;;  %v8817_v5 = vpop.f32.mrf.mxu1  ;;  %5044 = vmatpush.msrb.mxu1 %v5017_v15 }
 0x446   : > { %v3869_v8 = vadd.f32 %v8593_v45, %v3849_v12 }
 0x447   : > { %v3731_v13 = vadd.f32 %v8599_v24, %v3712_v62  ;;  %4179 = vmatmul.f32.gmra.mxu2 %v8520_v18  ;;  %4463 = vmatmul.f32.gmra.mxu0 %v8783_v9 }
 0x448   : > { %4356 = vmatmul.f32.gmra.mxu3 %v8738_v60  ;;  %4570 = vmatmul.f32.gmra.mxu1 %v8828_v20 }
 0x449   : > { %v3885_v61 = vadd.f32 %v3869_v8, %v3731_v13  ;;  %v8851_v13 = vsel %vm737_vm0, %v4274_v43, %v4276_v52  ;;  %v4394_v52 = vrot.slane %v8538_v32, 1 }
 0x44a   : > { %v3666_v63 = vpop.f32.mrf.mxu2 }
 0x44b   : > { %v3901_v38 = vmax.f32 %v3885_v61, 0.0  ;;  %v3694_v0 = vadd.f32 %v3666_v63, %v8516_v37  ;;  %v3818_v18 = vpop.f32.mrf.mxu3  ;;  %v4766_v37 = vld [vmem:[#allocation3 + $0x288] sm:$0xff] }
 0x44c   : > { %v3850_v12 = vmul.f32 %v8579_v31, %v3818_v18  ;;  %v8837_v62 = vpop.f32.mrf.mxu0  ;;  %4795 = vmatpush.msrb.mxu3 %v4766_v37  ;;  %v4870_v37 = vld [vmem:[#allocation3 + $0x408] sm:$0xff] }
 0x44d   : > { %3917 = vst [vmem:[%s8633_s30 + $0x48] sm:$0xff] %v3901_v38  ;;  %v3713_v60 = vmul.f32 %v8586_v22, %v3694_v0  ;;  %v8841_v3 = vpop.f32.mrf.mxu1  ;;  %4899 = vmatpush.msrb.mxu0 %v4870_v37 }
 0x44e   : > { %v3870_v8 = vadd.f32 %v8593_v45, %v3850_v12  ;;  %v4395_v12 = vrot.slane %v8553_v21, 1 }
 0x44f   : > { %v3732_v48 = vadd.f32 %v8599_v24, %v3713_v60  ;;  %4182 = vmatmul.f32.gmra.mxu2 %v8529_v14  ;;  %4466 = vmatmul.f32.gmra.mxu0 %v8806_v6 }
 0x450   : > { %4359 = vmatmul.f32.gmra.mxu3 %v8761_v47  ;;  %4573 = vmatmul.f32.gmra.mxu1 %v8851_v13 }
 0x451   : > { %v3886_v61 = vadd.f32 %v3870_v8, %v3732_v48  ;;  %v4765_v8 = vld [vmem:[#allocation3 + $0x280] sm:$0xff]  ;;  %v4396_v48 = vsel %vm737_vm0, %v4394_v52, %v4395_v12 }
 0x452   : > { %v3669_v63 = vpop.f32.mrf.mxu2  ;;  %4796 = vmatpush.msrb.mxu3 %v4765_v8 }
 0x453   : > { %v3902_v38 = vmax.f32 %v3886_v61, 0.0  ;;  %v3695_v0 = vadd.f32 %v3669_v63, %v8525_v19  ;;  %v3821_v18 = vpop.f32.mrf.mxu3  ;;  %v8874_v61 = vld [vmem:[#allocation2 + $0x190] sm:$0x3] }
 0x454   : > { %v3851_v14 = vmul.f32 %v8579_v31, %v3821_v18  ;;  %v8858_v60 = vpop.f32.mrf.mxu0  ;;  %v4869_v63 = vld [vmem:[#allocation3 + $0x400] sm:$0xff] }
 0x455   : > { %3918 = vst [vmem:[%s8633_s30 + $0x50] sm:$0xff] %v3902_v38  ;;  %v3714_v43 = vmul.f32 %v8586_v22, %v3695_v0  ;;  %v8862_v47 = vpop.f32.mrf.mxu1  ;;  %4900 = vmatpush.msrb.mxu0 %v4869_v63  ;;  %v8897_v63 = vld [vmem:[#allocation2 + $0x198] sm:$0xff] }
 0x456   : > { %v3871_v19 = vadd.f32 %v8593_v45, %v3851_v14 }
 0x457   : > { %v3733_v41 = vadd.f32 %v8599_v24, %v3714_v43  ;;  %4185 = vmatmul.f32.gmra.mxu2 %v8538_v32  ;;  %4469 = vmatmul.f32.gmra.mxu0 %v8828_v20  ;;  %v4397_v32 = vrot.slane %v8874_v61, 1 }
 0x458   : > { %4362 = vmatmul.f32.gmra.mxu3 %v8783_v9  ;;  %4576 = vmatmul.f32.gmra.mxu1 %v4396_v48 }
 0x459   : > { %v3887_v38 = vadd.f32 %v3871_v19, %v3733_v41  ;;  %v5016_v19 = vld [vmem:[%s9268_s7 + $0x8] sm:$0xff]  ;;  %v4398_v37 = vsel %vm737_vm0, %v4395_v12, %v4397_v32  ;;  %v5015_v41 = vld [vmem:[%s9268_s7] sm:$0xff] }
 0x45a   : > { %v3672_v0 = vpop.f32.mrf.mxu2  ;;  %5045 = vmatpush.msrb.mxu1 %v5016_v19 }
 0x45b   : > { %v3903_v18 = vmax.f32 %v3887_v38, 0.0  ;;  %v3696_v14 = vadd.f32 %v3672_v0, %v8534_v34  ;;  %v3824_v43 = vpop.f32.mrf.mxu3  ;;  %v4501_v0 = vrot.slane %v8897_v63, 1 }
 0x45c   : > { %v3852_v52 = vmul.f32 %v8579_v31, %v3824_v43  ;;  %v8879_v15 = vpop.f32.mrf.mxu0  ;;  %5046 = vmatpush.msrb.mxu1 %v5015_v41  ;;  %v8913_v41 = vld [vmem:[#allocation2 + $0x1a8] sm:$0x3] }
 0x45d   : > { %3919 = vst [vmem:[%s8633_s30 + $0x58] sm:$0xff] %v3903_v18  ;;  %v3715_v9 = vmul.f32 %v8586_v22, %v3696_v14  ;;  %v8883_v16 = vpop.f32.mrf.mxu1  ;;  %v8900_v18 = vld [vmem:[#allocation2 + $0x8] sm:$0xff] }
 0x45e   : > { %v3872_v8 = vadd.f32 %v8593_v45, %v3852_v52 }
 0x45f   : > { %v3734_v34 = vadd.f32 %v8599_v24, %v3715_v9  ;;  %4188 = vmatmul.f32.gmra.mxu2 %v8553_v21  ;;  %4472 = vmatmul.f32.gmra.mxu0 %v8851_v13  ;;  %v4502_v21 = vrot.slane %v8900_v18, 1 }
 0x460   : > { %4365 = vmatmul.f32.gmra.mxu3 %v8806_v6  ;;  %4579 = vmatmul.f32.gmra.mxu1 %v4398_v37 }
 0x461   : > { %v3888_v38 = vadd.f32 %v3872_v8, %v3734_v34  ;;  %v4503_v8 = vsel %vm737_vm0, %v4501_v0, %v4502_v21 }
 0x462   : > { %v3675_v14 = vpop.f32.mrf.mxu2 }
 0x463   : > { %v3904_v12 = vmax.f32 %v3888_v38, 0.0  ;;  %v3697_v43 = vadd.f32 %v3675_v14, %v8543_v27  ;;  %v3827_v32 = vpop.f32.mrf.mxu3  ;;  %v4504_v14 = vrot.slane %v8913_v41, 1 }
 0x464   : > { %v3853_v52 = vmul.f32 %v8579_v31, %v3827_v32  ;;  %v8905_v9 = vpop.f32.mrf.mxu0 }
 0x465   : > { %9298 = vst [vmem:[#allocation15_spill] sm:$0xff] %v8905_v9  ;;  %v3716_v6 = vmul.f32 %v8586_v22, %v3697_v43  ;;  %v8909_v19 = vpop.f32.mrf.mxu1 }
 0x466   : > { %3920 = vst [vmem:[%s8633_s30 + $0x60] sm:$0xff] %v3904_v12  ;;  %v3873_v34 = vadd.f32 %v8593_v45, %v3853_v52 }
 0x467   : > { %9299 = vst [vmem:[#allocation13_spill] sm:$0xff] %v8909_v19  ;;  %v3735_v38 = vadd.f32 %v8599_v24, %v3716_v6  ;;  %4191 = vmatmul.f32.gmra.mxu2 %v8897_v63  ;;  %4475 = vmatmul.f32.gmra.mxu0 %v4396_v48 }
 0x468   : > { %4368 = vmatmul.f32.gmra.mxu3 %v8828_v20  ;;  %4582 = vmatmul.f32.gmra.mxu1 %v4503_v8  ;;  %v4505_v20 = vsel %vm737_vm0, %v4502_v21, %v4504_v14 }
 0x469   : > { %v3889_v27 = vadd.f32 %v3873_v34, %v3735_v38  ;;  %v5755_v38 = vld [vmem:[#allocation2 + $0xf8] sm:$0xff] }
 0x46a   : > { %v3678_v12 = vpop.f32.mrf.mxu2 }
 0x46b   : > { %v3905_v43 = vmax.f32 %v3889_v27, 0.0  ;;  %v3698_v0 = vadd.f32 %v3678_v12, %v8557_v56  ;;  %v3830_v32 = vpop.f32.mrf.mxu3  ;;  %v4616_v27 = vrot.slane %v5755_v38, 2 }
 0x46c   : > { %v3854_v52 = vmul.f32 %v8579_v31, %v3830_v32  ;;  %v8921_v19 = vpop.f32.mrf.mxu0  ;;  %v5756_v32 = vld [vmem:[#allocation2 + $0xf0] sm:$0xff] }
 0x46d   : > { %3921 = vst [vmem:[%s8633_s30 + $0x68] sm:$0xff] %v3905_v43  ;;  %v3717_v6 = vmul.f32 %v8586_v22, %v3698_v0  ;;  %v8925_v9 = vpop.f32.mrf.mxu1 }
 0x46e   : > { %v3874_v48 = vadd.f32 %v8593_v45, %v3854_v52  ;;  %v4615_v52 = vrot.slane %v5756_v32, 2  ;;  %v9300_v32 = vld [vmem:[#allocation14_spill] sm:$0xff] }
 0x46f   : > { %v3736_v8 = vadd.f32 %v8599_v24, %v3717_v6  ;;  %4194 = vmatmul.f32.gmra.mxu2 %v8900_v18  ;;  %4478 = vmatmul.f32.gmra.mxu0 %v4398_v37 }
 0x470   : > { %4371 = vmatmul.f32.gmra.mxu3 %v8851_v13  ;;  %4585 = vmatmul.f32.gmra.mxu1 %v4505_v20  ;;  %v5585_v13 = vld [vmem:[%s6141_s11 + $0xd9] sm:$0xff] }
 0x471   : > { %v3890_v56 = vadd.f32 %v3874_v48, %v3736_v8  ;;  %v8939_v48 = vsel %vm1108_vm1, %v4615_v52, %v4616_v27 }
 0x472   : > { %v3681_v34 = vpop.f32.mrf.mxu2 }
 0x473   : > { %v3906_v12 = vmax.f32 %v3890_v56, 0.0  ;;  %v3699_v43 = vadd.f32 %v3681_v34, %v8588_v10  ;;  %v3833_v21 = vpop.f32.mrf.mxu3 }
 0x474   : > { %v3855_v14 = vmul.f32 %v8579_v31, %v3833_v21  ;;  %v4434_v0 = vpop.f32.mrf.mxu0  ;;  %v4070_v31 = vadd.f32 %v8563_v1, %v8561_v23  ;;  %v9301_v23 = vld [vmem:[#allocation11_spill] sm:$0xff]  ;;  %v4073_v1 = vadd.f32 %v8607_v36, %v8604_v55  ;;  %v4076_v55 = vadd.f32 %v8637_v44, %v8631_v53 }
 0x475   : > { %3922 = vst [vmem:[%s8633_s30 + $0x70] sm:$0xff] %v3906_v12  ;;  %v3718_v37 = vmul.f32 %v8586_v22, %v3699_v43  ;;  %v4541_v6 = vpop.f32.mrf.mxu1  ;;  %v4079_v53 = vadd.f32 %v8661_v7, %v8657_v50  ;;  %v4082_v50 = vadd.f32 %v8682_v17, %v8678_v54  ;;  %v4085_v54 = vadd.f32 %v8706_v2, %v8702_v46 }
 0x476   : > { %v3875_v20 = vadd.f32 %v8593_v45, %v3855_v14  ;;  %v4618_v45 = vrot.slane %v8581_v26, 2  ;;  %v4088_v46 = vadd.f32 %v8727_v30, %v8723_v35  ;;  %v4091_v35 = vadd.f32 %v8751_v25, %v8747_v59 }
 0x477   : > { %v3737_v8 = vadd.f32 %v8599_v24, %v3718_v37  ;;  %4693 = vmatmul.f32.vlgmr.msrb.gmra.mxu2 %v9294_v42  ;;  %4901 = vmatmul.f32.vlgmr.msrb.gmra.mxu0 %v8939_v48  ;;  %v5586_v42 = vld [vmem:[%s6141_s11 + $0xe1] sm:$0xff]  ;;  %v5757_v37 = vld [vmem:[#allocation2 + $0x110] sm:$0xff]  ;;  %v4094_v59 = vadd.f32 %v8772_v39, %v8768_v51  ;;  %v4097_v51 = vadd.f32 %v8796_v28, %v8792_v40 }
 0x478   : > { %4797 = vmatmul.f32.vlgmr.msrb.gmra.mxu3 %v9296_v49  ;;  %5047 = vmatmul.f32.vlgmr.msrb.gmra.mxu1 %v5585_v13  ;;  %v8951_v21 = vsel %vm1108_vm1, %v4616_v27, %v4618_v45  ;;  %v4621_v13 = vrot.slane %v5757_v37, 2  ;;  %v5587_v45 = vld [vmem:[%s6141_s11 + $0xf1] sm:$0xff]  ;;  %v4100_v40 = vadd.f32 %v8817_v5, %v8813_v57  ;;  %v4103_v57 = vadd.f32 %v8841_v3, %v8837_v62 }
 0x479   : > { %v3891_v22 = vadd.f32 %v3875_v20, %v3737_v8  ;;  %v4106_v62 = vadd.f32 %v8862_v47, %v8858_v60  ;;  %v4862_v60 = vrot.slane %v8897_v63, 2  ;;  %v4863_v47 = vrot.slane %v8900_v18, 2  ;;  %v9303_v18 = vld [vmem:[#allocation13_spill] sm:$0xff] }
 0x47a   : > { %v4150_v10 = vpop.f32.mrf.mxu2 }
 0x47b   : > { %v3907_v56 = vmax.f32 %v3891_v22, 0.0  ;;  %v4198_v34 = vadd.f32 %v4150_v10, %v4070_v31  ;;  %v4327_v38 = vpop.f32.mrf.mxu3 }
 0x47c   : > { %v4437_v12 = vpop.f32.mrf.mxu0 }
 0x47d   : > { %3923 = vst [vmem:[%s8633_s30 + $0x78] sm:$0xff] %v3907_v56  ;;  %v4375_v24 = vadd.f32 %v4327_v38, %v4198_v34  ;;  %v4544_v43 = vpop.f32.mrf.mxu1  ;;  %v4623_v38 = vrot.slane %v8652_v4, 2 }
 0x47f   : > { %v4482_v14 = vadd.f32 %v4434_v0, %v4375_v24  ;;  %4696 = vmatmul.f32.gmra.mxu2 %v9300_v32  ;;  %4904 = vmatmul.f32.gmra.mxu0 %v8951_v21  ;;  %v5758_v0 = vld [vmem:[#allocation2 + $0x108] sm:$0xff] }
 0x480   : > { %4800 = vmatmul.f32.gmra.mxu3 %v9301_v23  ;;  %5050 = vmatmul.f32.gmra.mxu1 %v5586_v42  ;;  %v4620_v31 = vrot.slane %v5758_v0, 2 }
 0x481   : > { %v8958_v26 = vadd.f32 %v4541_v6, %v4482_v14 }
 0x482   : > { %v4153_v52 = vpop.f32.mrf.mxu2  ;;  %v8962_v56 = vsel %vm1108_vm1, %v4620_v31, %v4621_v13 }
 0x483   : > { %v4199_v20 = vadd.f32 %v4153_v52, %v4073_v1  ;;  %v4330_v27 = vpop.f32.mrf.mxu3  ;;  %v5588_v1 = vld [vmem:[%s6141_s11 + $0xf9] sm:$0xff] }
 0x484   : > { %v4440_v8 = vpop.f32.mrf.mxu0 }
 0x485   : > { %v4376_v22 = vadd.f32 %v4330_v27, %v4199_v20  ;;  %v4547_v10 = vpop.f32.mrf.mxu1 }
 0x487   : > { %v4483_v34 = vadd.f32 %v4437_v12, %v4376_v22  ;;  %4699 = vmatmul.f32.gmra.mxu2 %v9296_v49  ;;  %4907 = vmatmul.f32.gmra.mxu0 %v8962_v56  ;;  %v8974_v49 = vsel %vm1108_vm1, %v4621_v13, %v4623_v38  ;;  %v5589_v22 = vld [vmem:[%s6141_s11 + $0x109] sm:$0xff] }
 0x488   : > { %4803 = vmatmul.f32.gmra.mxu3 %v8939_v48  ;;  %5053 = vmatmul.f32.gmra.mxu1 %v5587_v45 }
 0x489   : > { %v8969_v36 = vadd.f32 %v4544_v43, %v4483_v34  ;;  %v5759_v43 = vld [vmem:[#allocation2 + $0x128] sm:$0xff] }
 0x48a   : > { %v4156_v6 = vpop.f32.mrf.mxu2  ;;  %v4626_v37 = vrot.slane %v5759_v43, 2 }
 0x48b   : > { %v4200_v24 = vadd.f32 %v4156_v6, %v4076_v55  ;;  %v4333_v42 = vpop.f32.mrf.mxu3  ;;  %v4628_v55 = vrot.slane %v8697_v11, 2 }
 0x48c   : > { %v4443_v14 = vpop.f32.mrf.mxu0 }
 0x48d   : > { %v4377_v32 = vadd.f32 %v4333_v42, %v4200_v24  ;;  %v4550_v12 = vpop.f32.mrf.mxu1 }
 0x48f   : > { %v4484_v52 = vadd.f32 %v4440_v8, %v4377_v32  ;;  %4702 = vmatmul.f32.gmra.mxu2 %v9301_v23  ;;  %4910 = vmatmul.f32.gmra.mxu0 %v8974_v49  ;;  %v5760_v8 = vld [vmem:[#allocation2 + $0x120] sm:$0xff]  ;;  %v5590_v32 = vld [vmem:[%s6141_s11 + $0x111] sm:$0xff] }
 0x490   : > { %4806 = vmatmul.f32.gmra.mxu3 %v8951_v21  ;;  %5056 = vmatmul.f32.gmra.mxu1 %v5588_v1  ;;  %v4625_v0 = vrot.slane %v5760_v8, 2 }
 0x491   : > { %v8981_v44 = vadd.f32 %v4547_v10, %v4484_v52 }
 0x492   : > { %v4159_v4 = vpop.f32.mrf.mxu2  ;;  %v8985_v45 = vsel %vm1108_vm1, %v4625_v0, %v4626_v37 }
 0x493   : > { %v4201_v20 = vadd.f32 %v4159_v4, %v4079_v53  ;;  %v4336_v13 = vpop.f32.mrf.mxu3 }
 0x494   : > { %v4446_v27 = vpop.f32.mrf.mxu0 }
 0x495   : > { %v4378_v23 = vadd.f32 %v4336_v13, %v4201_v20  ;;  %v4553_v31 = vpop.f32.mrf.mxu1 }
 0x497   : > { %v4485_v34 = vadd.f32 %v4443_v14, %v4378_v23  ;;  %4705 = vmatmul.f32.gmra.mxu2 %v8939_v48  ;;  %4913 = vmatmul.f32.gmra.mxu0 %v8985_v45  ;;  %v8997_v48 = vsel %vm1108_vm1, %v4626_v37, %v4628_v55  ;;  %v5762_v37 = vld [vmem:[#allocation2 + $0x138] sm:$0xff] }
 0x498   : > { %4809 = vmatmul.f32.gmra.mxu3 %v8962_v56  ;;  %5059 = vmatmul.f32.gmra.mxu1 %v5589_v22  ;;  %v4630_v20 = vrot.slane %v5762_v37, 2  ;;  %v4638_v37 = vrot.slane %v8787_v29, 2 }
 0x499   : > { %v8992_v7 = vadd.f32 %v4550_v12, %v4485_v34  ;;  %v5761_v12 = vld [vmem:[#allocation2 + $0x140] sm:$0xff] }
 0x49a   : > { %v4162_v10 = vpop.f32.mrf.mxu2  ;;  %v4631_v52 = vrot.slane %v5761_v12, 2 }
 0x49b   : > { %v4202_v6 = vadd.f32 %v4162_v10, %v4082_v50  ;;  %v4339_v38 = vpop.f32.mrf.mxu3 }
 0x49c   : > { %v4449_v24 = vpop.f32.mrf.mxu0  ;;  %v9008_v8 = vsel %vm1108_vm1, %v4630_v20, %v4631_v52 }
 0x49d   : > { %v4379_v42 = vadd.f32 %v4339_v38, %v4202_v6  ;;  %v4556_v14 = vpop.f32.mrf.mxu1  ;;  %v5592_v6 = vld [vmem:[%s6141_s11 + $0x129] sm:$0xff] }
 0x49f   : > { %v4486_v1 = vadd.f32 %v4446_v27, %v4379_v42  ;;  %4708 = vmatmul.f32.gmra.mxu2 %v8951_v21  ;;  %4916 = vmatmul.f32.gmra.mxu0 %v8997_v48  ;;  %v5591_v27 = vld [vmem:[%s6141_s11 + $0x121] sm:$0xff] }
 0x4a0   : > { %4812 = vmatmul.f32.gmra.mxu3 %v8974_v49  ;;  %5062 = vmatmul.f32.gmra.mxu1 %v5590_v32 }
 0x4a1   : > { %v9004_v17 = vadd.f32 %v4553_v31, %v4486_v1  ;;  %v4633_v31 = vrot.slane %v8742_v58, 2 }
 0x4a2   : > { %v4165_v11 = vpop.f32.mrf.mxu2 }
 0x4a3   : > { %v4203_v53 = vadd.f32 %v4165_v11, %v4085_v54  ;;  %v4342_v4 = vpop.f32.mrf.mxu3  ;;  %v5764_v54 = vld [vmem:[#allocation2 + $0x150] sm:$0xff] }
 0x4a4   : > { %v4452_v43 = vpop.f32.mrf.mxu0  ;;  %v4635_v11 = vrot.slane %v5764_v54, 2 }
 0x4a5   : > { %v4380_v21 = vadd.f32 %v4342_v4, %v4203_v53  ;;  %v4559_v13 = vpop.f32.mrf.mxu1 }
 0x4a7   : > { %v4487_v0 = vadd.f32 %v4449_v24, %v4380_v21  ;;  %4711 = vmatmul.f32.gmra.mxu2 %v8962_v56  ;;  %4919 = vmatmul.f32.gmra.mxu0 %v9008_v8  ;;  %v9020_v56 = vsel %vm1108_vm1, %v4631_v52, %v4633_v31  ;;  %v5763_v24 = vld [vmem:[#allocation2 + $0x158] sm:$0xff]  ;;  %v5765_v31 = vld [vmem:[#allocation2 + $0x170] sm:$0xff] }
 0x4a8   : > { %4815 = vmatmul.f32.gmra.mxu3 %v8985_v45  ;;  %5065 = vmatmul.f32.gmra.mxu1 %v5591_v27  ;;  %v4636_v42 = vrot.slane %v5763_v24, 2  ;;  %v5593_v52 = vld [vmem:[%s6141_s11 + $0x139] sm:$0xff] }
 0x4a9   : > { %v9015_v2 = vadd.f32 %v4556_v14, %v4487_v0 }
 0x4aa   : > { %v4168_v23 = vpop.f32.mrf.mxu2  ;;  %v9031_v53 = vsel %vm1108_vm1, %v4635_v11, %v4636_v42 }
 0x4ab   : > { %v4204_v22 = vadd.f32 %v4168_v23, %v4088_v46  ;;  %v4345_v34 = vpop.f32.mrf.mxu3  ;;  %v5594_v46 = vld [vmem:[%s6141_s11 + $0x141] sm:$0xff] }
 0x4ac   : > { %v4455_v50 = vpop.f32.mrf.mxu0 }
 0x4ad   : > { %v4381_v10 = vadd.f32 %v4345_v34, %v4204_v22  ;;  %v4562_v55 = vpop.f32.mrf.mxu1  ;;  %v4641_v22 = vrot.slane %v5765_v31, 2 }
 0x4af   : > { %v4488_v38 = vadd.f32 %v4452_v43, %v4381_v10  ;;  %4714 = vmatmul.f32.gmra.mxu2 %v8974_v49  ;;  %4922 = vmatmul.f32.gmra.mxu0 %v9020_v56 }
 0x4b0   : > { %4818 = vmatmul.f32.gmra.mxu3 %v8997_v48  ;;  %5068 = vmatmul.f32.gmra.mxu1 %v5592_v6 }
 0x4b1   : > { %v9027_v30 = vadd.f32 %v4559_v13, %v4488_v38 }
 0x4b2   : > { %v4171_v58 = vpop.f32.mrf.mxu2 }
 0x4b3   : > { %v4205_v14 = vadd.f32 %v4171_v58, %v4091_v35  ;;  %v4348_v32 = vpop.f32.mrf.mxu3  ;;  %v5595_v35 = vld [vmem:[%s6141_s11 + $0x151] sm:$0xff] }
 0x4b4   : > { %v4458_v1 = vpop.f32.mrf.mxu0 }
 0x4b5   : > { %v4382_v49 = vadd.f32 %v4348_v32, %v4205_v14  ;;  %v4565_v12 = vpop.f32.mrf.mxu1  ;;  %v4643_v14 = vrot.slane %v8832_v33, 2 }
 0x4b7   : > { %v4489_v4 = vadd.f32 %v4455_v50, %v4382_v49  ;;  %4717 = vmatmul.f32.gmra.mxu2 %v8985_v45  ;;  %4925 = vmatmul.f32.gmra.mxu0 %v9031_v53  ;;  %v9043_v45 = vsel %vm1108_vm1, %v4636_v42, %v4638_v37 }
 0x4b8   : > { %4821 = vmatmul.f32.gmra.mxu3 %v9008_v8  ;;  %5071 = vmatmul.f32.gmra.mxu1 %v5593_v52 }
 0x4b9   : > { %v9038_v25 = vadd.f32 %v4562_v55, %v4489_v4  ;;  %v5766_v55 = vld [vmem:[#allocation2 + $0x168] sm:$0xff] }
 0x4ba   : > { %v4174_v43 = vpop.f32.mrf.mxu2  ;;  %v4640_v6 = vrot.slane %v5766_v55, 2  ;;  %v5767_v4 = vld [vmem:[#allocation2 + $0x188] sm:$0xff]  ;;  %v5598_v55 = vld [vmem:[%s6141_s11 + $0x171] sm:$0xff] }
 0x4bb   : > { %v4206_v20 = vadd.f32 %v4174_v43, %v4094_v59  ;;  %v4351_v21 = vpop.f32.mrf.mxu3  ;;  %v4759_v59 = vrot.slane %v5767_v4, 2 }
 0x4bc   : > { %v4461_v13 = vpop.f32.mrf.mxu0  ;;  %v9054_v58 = vsel %vm1108_vm1, %v4640_v6, %v4641_v22 }
 0x4bd   : > { %v4383_v27 = vadd.f32 %v4351_v21, %v4206_v20  ;;  %v4568_v0 = vpop.f32.mrf.mxu1  ;;  %v5768_v21 = vld [vmem:[#allocation2 + $0x180] sm:$0xff] }
 0x4bf   : > { %v4490_v23 = vadd.f32 %v4458_v1, %v4383_v27  ;;  %4720 = vmatmul.f32.gmra.mxu2 %v8997_v48  ;;  %4928 = vmatmul.f32.gmra.mxu0 %v9043_v45 }
 0x4c0   : > { %4824 = vmatmul.f32.gmra.mxu3 %v9020_v56  ;;  %5074 = vmatmul.f32.gmra.mxu1 %v5594_v46 }
 0x4c1   : > { %v9050_v39 = vadd.f32 %v4565_v12, %v4490_v23  ;;  %v5596_v12 = vld [vmem:[%s6141_s11 + $0x159] sm:$0xff] }
 0x4c2   : > { %v4177_v29 = vpop.f32.mrf.mxu2 }
 0x4c3   : > { %v4207_v34 = vadd.f32 %v4177_v29, %v4097_v51  ;;  %v4354_v50 = vpop.f32.mrf.mxu3  ;;  %v4761_v29 = vrot.slane %v8874_v61, 2  ;;  %v4109_v61 = vadd.f32 %v8883_v16, %v8879_v15  ;;  %v4865_v15 = vrot.slane %v8913_v41, 2  ;;  %v9302_v16 = vld [vmem:[#allocation15_spill] sm:$0xff] }
 0x4c4   : > { %v4464_v10 = vpop.f32.mrf.mxu0  ;;  %v4115_v41 = vadd.f32 %v8925_v9, %v8921_v19 }
 0x4c5   : > { %v4384_v48 = vadd.f32 %v4354_v50, %v4207_v34  ;;  %v4571_v38 = vpop.f32.mrf.mxu1 }
 0x4c7   : > { %v4491_v24 = vadd.f32 %v4461_v13, %v4384_v48  ;;  %4723 = vmatmul.f32.gmra.mxu2 %v9008_v8  ;;  %4931 = vmatmul.f32.gmra.mxu0 %v9054_v58  ;;  %v9066_v8 = vsel %vm1108_vm1, %v4641_v22, %v4643_v14  ;;  %v4758_v13 = vrot.slane %v5768_v21, 2 }
 0x4c8   : > { %4827 = vmatmul.f32.gmra.mxu3 %v9031_v53  ;;  %5077 = vmatmul.f32.gmra.mxu1 %v5595_v35 }
 0x4c9   : > { %v9061_v28 = vadd.f32 %v4568_v0, %v4491_v24  ;;  %v5597_v0 = vld [vmem:[%s6141_s11 + $0x169] sm:$0xff]  ;;  %v4760_v46 = vsel %vm1108_vm1, %v4758_v13, %v4759_v59 }
 0x4ca   : > { %v4180_v42 = vpop.f32.mrf.mxu2 }
 0x4cb   : > { %v4208_v32 = vadd.f32 %v4180_v42, %v4100_v40  ;;  %v4357_v1 = vpop.f32.mrf.mxu3  ;;  %v4864_v42 = vsel %vm1108_vm1, %v4862_v60, %v4863_v47 }
 0x4cc   : > { %v4467_v54 = vpop.f32.mrf.mxu0 }
 0x4cd   : > { %v4385_v11 = vadd.f32 %v4357_v1, %v4208_v32  ;;  %v4574_v49 = vpop.f32.mrf.mxu1  ;;  %v5599_v32 = vld [vmem:[%s6141_s11 + $0x181] sm:$0xff]  ;;  %v4112_v1 = vadd.f32 %v9303_v18, %v9302_v16 }
 0x4cf   : > { %v4492_v52 = vadd.f32 %v4464_v10, %v4385_v11  ;;  %4726 = vmatmul.f32.gmra.mxu2 %v9020_v56  ;;  %4934 = vmatmul.f32.gmra.mxu0 %v9066_v8 }
 0x4d0   : > { %4830 = vmatmul.f32.gmra.mxu3 %v9043_v45  ;;  %5080 = vmatmul.f32.gmra.mxu1 %v5596_v12 }
 0x4d1   : > { %v9073_v5 = vadd.f32 %v4571_v38, %v4492_v52 }
 0x4d2   : > { %v4183_v33 = vpop.f32.mrf.mxu2 }
 0x4d3   : > { %v4209_v43 = vadd.f32 %v4183_v33, %v4103_v57  ;;  %v4360_v37 = vpop.f32.mrf.mxu3  ;;  %v4866_v57 = vsel %vm1108_vm1, %v4863_v47, %v4865_v15 }
 0x4d4   : > { %v4470_v20 = vpop.f32.mrf.mxu0 }
 0x4d5   : > { %v4386_v56 = vadd.f32 %v4360_v37, %v4209_v43  ;;  %v4577_v27 = vpop.f32.mrf.mxu1 }
 0x4d7   : > { %v4493_v23 = vadd.f32 %v4467_v54, %v4386_v56  ;;  %4729 = vmatmul.f32.gmra.mxu2 %v9031_v53  ;;  %4937 = vmatmul.f32.gmra.mxu0 %v4760_v46  ;;  %v4762_v53 = vsel %vm1108_vm1, %v4759_v59, %v4761_v29  ;;  %v5600_v59 = vld [vmem:[%s6141_s11 + $0x189] sm:$0xff]  ;;  %s5821_s11 = scalar_lea.hbm %s9271_s10, 512 }
 0x4d8   : > { %4833 = vmatmul.f32.gmra.mxu3 %v9054_v58  ;;  %5083 = vmatmul.f32.gmra.mxu1 %v5597_v0  ;;  %p5823_p4 = scmp.lt.s32.totalorder %s5821_s11, %s5817_s25 }
 0x4d9   : > { %v9081_v3 = vadd.f32 %v4574_v49, %v4493_v23 }
 0x4da   : > { %v4186_v51 = vpop.f32.mrf.mxu2  ;;  %p5824_p7 = por %p5823_p4, %p5822_p3 }
 0x4db   : > { %v4210_v31 = vadd.f32 %v4186_v51, %v4106_v62  ;;  %v4363_v22 = vpop.f32.mrf.mxu3 }
 0x4dc   : > { %v4473_v34 = vpop.f32.mrf.mxu0  ;;  %p5825_p8 = pnand %p5824_p7, %p5820_p2 }
 0x4dd   : > { %v4387_v50 = vadd.f32 %v4363_v22, %v4210_v31  ;;  %v4580_v10 = vpop.f32.mrf.mxu1  ;;  %v9121_v31 = vld [vmem:[%s9270_s9] ss:$0 sm:$0xff] }
 0x4df   : > { %v4494_v6 = vadd.f32 %v4470_v20, %v4387_v50  ;;  %4732 = vmatmul.f32.gmra.mxu2 %v9043_v45  ;;  %4940 = vmatmul.f32.gmra.mxu0 %v4762_v53  ;;  %v9126_v50 = vld [vmem:[%s9266_s5] ss:$0 sm:$0xff] }
 0x4e0   : > { %4836 = vmatmul.f32.gmra.mxu3 %v9066_v8  ;;  %5086 = vmatmul.f32.gmra.mxu1 %v5598_v55 }
 0x4e1   : > { %v9092_v48 = vadd.f32 %v4577_v27, %v4494_v6 }
 0x4e2   : > { %v4189_v38 = vpop.f32.mrf.mxu2 }
 0x4e3   : > { %v4211_v35 = vadd.f32 %v4189_v38, %v4109_v61  ;;  %v4366_v24 = vpop.f32.mrf.mxu3 }
 0x4e4   : > { %v4476_v40 = vpop.f32.mrf.mxu0 }
 0x4e5   : > { %v4388_v45 = vadd.f32 %v4366_v24, %v4211_v35  ;;  %v4583_v14 = vpop.f32.mrf.mxu1 }
 0x4e7   : > { %v4495_v63 = vadd.f32 %v4473_v34, %v4388_v45  ;;  %4735 = vmatmul.f32.gmra.mxu2 %v9054_v58  ;;  %4943 = vmatmul.f32.gmra.mxu0 %v4864_v42 }
 0x4e8   : > { %4839 = vmatmul.f32.gmra.mxu3 %v4760_v46  ;;  %5089 = vmatmul.f32.gmra.mxu1 %v5599_v32 }
 0x4e9   : > { %v9100_v54 = vadd.f32 %v4580_v10, %v4495_v63 }
 0x4ea   : > { %v4192_v11 = vpop.f32.mrf.mxu2 }
 0x4eb   : > { %v4212_v49 = vadd.f32 %v4192_v11, %v4112_v1  ;;  %v4369_v12 = vpop.f32.mrf.mxu3 }
 0x4ec   : > { %v4479_v52 = vpop.f32.mrf.mxu0 }
 0x4ed   : > { %v4389_v33 = vadd.f32 %v4369_v12, %v4212_v49  ;;  %v4586_v4 = vpop.f32.mrf.mxu1 }
 0x4ef   : > { %4738 = vmatmul.f32.gmra.mxu2 %v9066_v8  ;;  %v4496_v58 = vadd.f32 %v4476_v40, %v4389_v33  ;;  %4946 = vmatmul.f32.gmra.mxu0 %v4866_v57  ;;  %v9114_v8 = vld [vmem:[%s9269_s8] ss:$0 sm:$0xff] }
 0x4f0   : > { %4842 = vmatmul.f32.gmra.mxu3 %v4762_v53  ;;  %5092 = vmatmul.f32.gmra.mxu1 %v5600_v59  ;;  %v9133_v53 = vld [vmem:[%s9267_s6] ss:$0 sm:$0xff] }
 0x4f1   : > { %v9107_v43 = vadd.f32 %v4583_v14, %v4496_v58 }
 0x4f2   : > { %v4195_v37 = vpop.f32.mrf.mxu2 }
 0x4f3   : > { %v4213_v20 = vadd.f32 %v4195_v37, %v4115_v41  ;;  %v4372_v21 = vpop.f32.mrf.mxu3 }
 0x4f4   : > { %v4902_v13 = vpop.f32.mrf.mxu0 }
 0x4f5   : > { %v4390_v56 = vadd.f32 %v4372_v21, %v4213_v20  ;;  %v5048_v27 = vpop.f32.mrf.mxu1 }
 0x4f6   : > { %v5100_v29 = vmul.f32 %v9114_v8, %v5048_v27 }
 0x4f7   : > { %v4497_v0 = vadd.f32 %v4479_v52, %v4390_v56 }
 0x4f8   : > { %v5120_v10 = vadd.f32 %v9121_v31, %v5100_v29 }
 0x4f9   : > { %v9109_v46 = vadd.f32 %v4586_v4, %v4497_v0 }
 0x4fa   : > { %v4694_v23 = vpop.f32.mrf.mxu2 }
 0x4fb   : > { %v4742_v62 = vadd.f32 %v4694_v23, %v8958_v26  ;;  %v4798_v9 = vpop.f32.mrf.mxu3 }
 0x4fc   : > { %v4905_v19 = vpop.f32.mrf.mxu0 }
 0x4fd   : > { %v4846_v51 = vadd.f32 %v4798_v9, %v4742_v62  ;;  %v5051_v22 = vpop.f32.mrf.mxu1 }
 0x4fe   : > { %v5101_v24 = vmul.f32 %v9114_v8, %v5051_v22 }
 0x4ff   : > { %v4950_v34 = vadd.f32 %v4902_v13, %v4846_v51 }
 0x500   : > { %v5121_v32 = vadd.f32 %v9121_v31, %v5101_v24 }
 0x501   : > { %v4966_v26 = vmul.f32 %v9126_v50, %v4950_v34 }
 0x502   : > { %v4697_v55 = vpop.f32.mrf.mxu2 }
 0x503   : > { %v4982_v6 = vadd.f32 %v9133_v53, %v4966_v26  ;;  %v4743_v60 = vadd.f32 %v4697_v55, %v8969_v36  ;;  %v4801_v47 = vpop.f32.mrf.mxu3 }
 0x504   : > { %v4908_v61 = vpop.f32.mrf.mxu0 }
 0x505   : > { %v5136_v38 = vadd.f32 %v5120_v10, %v4982_v6  ;;  %v4847_v35 = vadd.f32 %v4801_v47, %v4743_v60  ;;  %v5054_v40 = vpop.f32.mrf.mxu1 }
 0x506   : > { %v5102_v49 = vmul.f32 %v9114_v8, %v5054_v40 }
 0x507   : > { %v5152_v42 = vmax.f32 %v5136_v38, 0.0  ;;  %v4951_v45 = vadd.f32 %v4905_v19, %v4847_v35 }
 0x508   : > { %v5122_v4 = vadd.f32 %v9121_v31, %v5102_v49 }
 0x509   : > { %5601 = vst [vmem:[%s8633_s30 + $0x80] sm:$0xff] %v5152_v42  ;;  %v4967_v14 = vmul.f32 %v9126_v50, %v4951_v45 }
 0x50a   : > { %v4700_v63 = vpop.f32.mrf.mxu2 }
 0x50b   : > { %v4983_v15 = vadd.f32 %v9133_v53, %v4967_v14  ;;  %v4744_v36 = vadd.f32 %v4700_v63, %v8981_v44  ;;  %v4804_v16 = vpop.f32.mrf.mxu3 }
 0x50c   : > { %v4911_v18 = vpop.f32.mrf.mxu0 }
 0x50d   : > { %v5137_v1 = vadd.f32 %v5121_v32, %v4983_v15  ;;  %v4848_v11 = vadd.f32 %v4804_v16, %v4744_v36  ;;  %v5057_v12 = vpop.f32.mrf.mxu1 }
 0x50e   : > { %v5103_v13 = vmul.f32 %v9114_v8, %v5057_v12 }
 0x50f   : > { %v5153_v52 = vmax.f32 %v5137_v1, 0.0  ;;  %v4952_v57 = vadd.f32 %v4908_v61, %v4848_v11 }
 0x510   : > { %v5123_v62 = vadd.f32 %v9121_v31, %v5103_v13 }
 0x511   : > { %5602 = vst [vmem:[%s8633_s30 + $0x88] sm:$0xff] %v5153_v52  ;;  %v4968_v33 = vmul.f32 %v9126_v50, %v4952_v57 }
 0x512   : > { %v4703_v59 = vpop.f32.mrf.mxu2 }
 0x513   : > { %v4984_v58 = vadd.f32 %v9133_v53, %v4968_v33  ;;  %v4745_v44 = vadd.f32 %v4703_v59, %v8992_v7  ;;  %v4807_v41 = vpop.f32.mrf.mxu3 }
 0x514   : > { %v4914_v37 = vpop.f32.mrf.mxu0 }
 0x515   : > { %v5138_v20 = vadd.f32 %v5122_v4, %v4984_v58  ;;  %v4849_v21 = vadd.f32 %v4807_v41, %v4745_v44  ;;  %v5060_v56 = vpop.f32.mrf.mxu1 }
 0x516   : > { %v5104_v26 = vmul.f32 %v9114_v8, %v5060_v56 }
 0x517   : > { %v5154_v27 = vmax.f32 %v5138_v20, 0.0  ;;  %v4953_v0 = vadd.f32 %v4911_v18, %v4849_v21 }
 0x518   : > { %v5124_v47 = vadd.f32 %v9121_v31, %v5104_v26 }
 0x519   : > { %5603 = vst [vmem:[%s8633_s30 + $0x90] sm:$0xff] %v5154_v27  ;;  %v4969_v23 = vmul.f32 %v9126_v50, %v4953_v0 }
 0x51a   : > { %v4706_v9 = vpop.f32.mrf.mxu2 }
 0x51b   : > { %v4985_v19 = vadd.f32 %v9133_v53, %v4969_v23  ;;  %v4746_v7 = vadd.f32 %v4706_v9, %v9004_v17  ;;  %v4810_v51 = vpop.f32.mrf.mxu3 }
 0x51c   : > { %v4917_v29 = vpop.f32.mrf.mxu0 }
 0x51d   : > { %v5139_v22 = vadd.f32 %v5123_v62, %v4985_v19  ;;  %v4850_v34 = vadd.f32 %v4810_v51, %v4746_v7  ;;  %v5063_v10 = vpop.f32.mrf.mxu1 }
 0x51e   : > { %v5105_v45 = vmul.f32 %v9114_v8, %v5063_v10 }
 0x51f   : > { %v5155_v55 = vmax.f32 %v5139_v22, 0.0  ;;  %v4954_v6 = vadd.f32 %v4914_v37, %v4850_v34 }
 0x520   : > { %v5125_v36 = vadd.f32 %v9121_v31, %v5105_v45 }
 0x521   : > { %5604 = vst [vmem:[%s8633_s30 + $0x98] sm:$0xff] %v5155_v55  ;;  %v4970_v60 = vmul.f32 %v9126_v50, %v4954_v6 }
 0x522   : > { %v4709_v61 = vpop.f32.mrf.mxu2 }
 0x523   : > { %v4986_v38 = vadd.f32 %v9133_v53, %v4970_v60  ;;  %v4747_v17 = vadd.f32 %v4709_v61, %v9015_v2  ;;  %v4813_v35 = vpop.f32.mrf.mxu3 }
 0x524   : > { %v4920_v24 = vpop.f32.mrf.mxu0 }
 0x525   : > { %v5140_v40 = vadd.f32 %v5124_v47, %v4986_v38  ;;  %v4851_v42 = vadd.f32 %v4813_v35, %v4747_v17  ;;  %v5066_v14 = vpop.f32.mrf.mxu1 }
 0x526   : > { %v5106_v52 = vmul.f32 %v9114_v8, %v5066_v14 }
 0x527   : > { %v5156_v32 = vmax.f32 %v5140_v40, 0.0  ;;  %v4955_v63 = vadd.f32 %v4917_v29, %v4851_v42 }
 0x528   : > { %v5126_v58 = vadd.f32 %v9121_v31, %v5106_v52 }
 0x529   : > { %5605 = vst [vmem:[%s8633_s30 + $0xa0] sm:$0xff] %v5156_v32  ;;  %v4971_v15 = vmul.f32 %v9126_v50, %v4955_v63 }
 0x52a   : > { %v4712_v16 = vpop.f32.mrf.mxu2 }
 0x52b   : > { %v4987_v18 = vadd.f32 %v9133_v53, %v4971_v15  ;;  %v4748_v2 = vadd.f32 %v4712_v16, %v9027_v30  ;;  %v4816_v1 = vpop.f32.mrf.mxu3 }
 0x52c   : > { %v4923_v11 = vpop.f32.mrf.mxu0 }
 0x52d   : > { %v5141_v49 = vadd.f32 %v5125_v36, %v4987_v18  ;;  %v4852_v12 = vadd.f32 %v4816_v1, %v4748_v2  ;;  %v5069_v57 = vpop.f32.mrf.mxu1 }
 0x52e   : > { %v5107_v56 = vmul.f32 %v9114_v8, %v5069_v57 }
 0x52f   : > { %v5157_v33 = vmax.f32 %v5141_v49, 0.0  ;;  %v4956_v4 = vadd.f32 %v4920_v24, %v4852_v12 }
 0x530   : > { %v5127_v9 = vadd.f32 %v9121_v31, %v5107_v56 }
 0x531   : > { %5606 = vst [vmem:[%s8633_s30 + $0xa8] sm:$0xff] %v5157_v33  ;;  %v4972_v59 = vmul.f32 %v9126_v50, %v4956_v4 }
 0x532   : > { %v4715_v44 = vpop.f32.mrf.mxu2 }
 0x533   : > { %v4988_v41 = vadd.f32 %v9133_v53, %v4972_v59  ;;  %v4749_v30 = vadd.f32 %v4715_v44, %v9038_v25  ;;  %v4819_v37 = vpop.f32.mrf.mxu3 }
 0x534   : > { %v4926_v20 = vpop.f32.mrf.mxu0 }
 0x535   : > { %v5142_v21 = vadd.f32 %v5126_v58, %v4988_v41  ;;  %v4853_v13 = vadd.f32 %v4819_v37, %v4749_v30  ;;  %v5072_v27 = vpop.f32.mrf.mxu1 }
 0x536   : > { %v5108_v26 = vmul.f32 %v9114_v8, %v5072_v27 }
 0x537   : > { %v5158_v0 = vmax.f32 %v5142_v21, 0.0  ;;  %v4957_v23 = vadd.f32 %v4923_v11, %v4853_v13 }
 0x538   : > { %v5128_v47 = vadd.f32 %v9121_v31, %v5108_v26 }
 0x539   : > { %5607 = vst [vmem:[%s8633_s30 + $0xb0] sm:$0xff] %v5158_v0  ;;  %v4973_v62 = vmul.f32 %v9126_v50, %v4957_v23 }
 0x53a   : > { %v4718_v19 = vpop.f32.mrf.mxu2 }
 0x53b   : > { %v4989_v7 = vadd.f32 %v9133_v53, %v4973_v62  ;;  %v4750_v25 = vadd.f32 %v4718_v19, %v9050_v39  ;;  %v4822_v51 = vpop.f32.mrf.mxu3 }
 0x53c   : > { %v4929_v29 = vpop.f32.mrf.mxu0 }
 0x53d   : > { %v5143_v22 = vadd.f32 %v5127_v9, %v4989_v7  ;;  %v4854_v34 = vadd.f32 %v4822_v51, %v4750_v25  ;;  %v5075_v10 = vpop.f32.mrf.mxu1 }
 0x53e   : > { %v5109_v42 = vmul.f32 %v9114_v8, %v5075_v10 }
 0x53f   : > { %v5159_v55 = vmax.f32 %v5143_v22, 0.0  ;;  %v4958_v6 = vadd.f32 %v4926_v20, %v4854_v34 }
 0x540   : > { %v5129_v15 = vadd.f32 %v9121_v31, %v5109_v42 }
 0x541   : > { %5608 = vst [vmem:[%s8633_s30 + $0xb8] sm:$0xff] %v5159_v55  ;;  %v4974_v60 = vmul.f32 %v9126_v50, %v4958_v6 }
 0x542   : > { %v4721_v61 = vpop.f32.mrf.mxu2 }
 0x543   : > { %v4990_v38 = vadd.f32 %v9133_v53, %v4974_v60  ;;  %v4751_v39 = vadd.f32 %v4721_v61, %v9061_v28  ;;  %v4825_v17 = vpop.f32.mrf.mxu3 }
 0x544   : > { %v4932_v35 = vpop.f32.mrf.mxu0 }
 0x545   : > { %v5144_v24 = vadd.f32 %v5128_v47, %v4990_v38  ;;  %v4855_v40 = vadd.f32 %v4825_v17, %v4751_v39  ;;  %v5078_v45 = vpop.f32.mrf.mxu1 }
 0x546   : > { %v5110_v11 = vmul.f32 %v9114_v8, %v5078_v45 }
 0x547   : > { %v5160_v14 = vmax.f32 %v5144_v24, 0.0  ;;  %v4959_v32 = vadd.f32 %v4929_v29, %v4855_v40 }
 0x548   : > { %v5130_v4 = vadd.f32 %v9121_v31, %v5110_v11 }
 0x549   : > { %5609 = vst [vmem:[%s8633_s30 + $0xc0] sm:$0xff] %v5160_v14  ;;  %v4975_v63 = vmul.f32 %v9126_v50, %v4959_v32 }
 0x54a   : > { %v4724_v36 = vpop.f32.mrf.mxu2 }
 0x54b   : > { %v4991_v16 = vadd.f32 %v9133_v53, %v4975_v63  ;;  %v4752_v28 = vadd.f32 %v4724_v36, %v9073_v5  ;;  %v4828_v18 = vpop.f32.mrf.mxu3 }
 0x54c   : > { %v4935_v12 = vpop.f32.mrf.mxu0 }
 0x54d   : > { %v5145_v2 = vadd.f32 %v5129_v15, %v4991_v16  ;;  %v4856_v1 = vadd.f32 %v4828_v18, %v4752_v28  ;;  %v5081_v49 = vpop.f32.mrf.mxu1 }
 0x54e   : > { %v5111_v37 = vmul.f32 %v9114_v8, %v5081_v49 }
 0x54f   : > { %v5161_v52 = vmax.f32 %v5145_v2, 0.0  ;;  %v4960_v57 = vadd.f32 %v4932_v35, %v4856_v1 }
 0x550   : > { %v5131_v0 = vadd.f32 %v9121_v31, %v5111_v37 }
 0x551   : > { %5610 = vst [vmem:[%s8633_s30 + $0xc8] sm:$0xff] %v5161_v52  ;;  %v4976_v33 = vmul.f32 %v9126_v50, %v4960_v57 }
 0x552   : > { %v4727_v59 = vpop.f32.mrf.mxu2 }
 0x553   : > { %v4992_v58 = vadd.f32 %v9133_v53, %v4976_v33  ;;  %v4753_v5 = vadd.f32 %v4727_v59, %v9081_v3  ;;  %v4831_v44 = vpop.f32.mrf.mxu3 }
 0x554   : > { %v4938_v56 = vpop.f32.mrf.mxu0 }
 0x555   : > { %v5146_v41 = vadd.f32 %v5130_v4, %v4992_v58  ;;  %v4857_v30 = vadd.f32 %v4831_v44, %v4753_v5  ;;  %v5084_v20 = vpop.f32.mrf.mxu1 }
 0x556   : > { %v5112_v25 = vmul.f32 %v9114_v8, %v5084_v20 }
 0x557   : > { %v5162_v21 = vmax.f32 %v5146_v41, 0.0  ;;  %v4961_v13 = vadd.f32 %v4935_v12, %v4857_v30 }
 0x558   : > { %v5132_v26 = vadd.f32 %v9121_v31, %v5112_v25 }
 0x559   : > { %5611 = vst [vmem:[%s8633_s30 + $0xd0] sm:$0xff] %v5162_v21  ;;  %v4977_v27 = vmul.f32 %v9126_v50, %v4961_v13 }
 0x55a   : > { %v4730_v23 = vpop.f32.mrf.mxu2 }
 0x55b   : > { %v4993_v62 = vadd.f32 %v9133_v53, %v4977_v27  ;;  %v4754_v3 = vadd.f32 %v4730_v23, %v9092_v48  ;;  %v4834_v9 = vpop.f32.mrf.mxu3 }
 0x55c   : > { %v4941_v10 = vpop.f32.mrf.mxu0 }
 0x55d   : > { %v5147_v19 = vadd.f32 %v5131_v0, %v4993_v62  ;;  %v4858_v7 = vadd.f32 %v4834_v9, %v4754_v3  ;;  %v5087_v51 = vpop.f32.mrf.mxu1 }
 0x55e   : > { %v5113_v38 = vmul.f32 %v9114_v8, %v5087_v51 }
 0x55f   : > { %v5163_v29 = vmax.f32 %v5147_v19, 0.0  ;;  %v4962_v22 = vadd.f32 %v4938_v56, %v4858_v7 }
 0x560   : > { %v5133_v40 = vadd.f32 %v9121_v31, %v5113_v38 }
 0x561   : > { %5612 = vst [vmem:[%s8633_s30 + $0xd8] sm:$0xff] %v5163_v29  ;;  %v4978_v34 = vmul.f32 %v9126_v50, %v4962_v22 }
 0x562   : > { %v4733_v55 = vpop.f32.mrf.mxu2 }
 0x563   : > { %v4994_v6 = vadd.f32 %v9133_v53, %v4978_v34  ;;  %v4755_v48 = vadd.f32 %v4733_v55, %v9100_v54  ;;  %v4837_v60 = vpop.f32.mrf.mxu3 }
 0x564   : > { %v4944_v45 = vpop.f32.mrf.mxu0 }
 0x565   : > { %v5148_v47 = vadd.f32 %v5132_v26, %v4994_v6  ;;  %v4859_v61 = vadd.f32 %v4837_v60, %v4755_v48  ;;  %v5090_v35 = vpop.f32.mrf.mxu1 }
 0x566   : > { %v5114_v36 = vmul.f32 %v9114_v8, %v5090_v35 }
 0x567   : > { %v5164_v39 = vmax.f32 %v5148_v47, 0.0  ;;  %v4963_v17 = vadd.f32 %v4941_v10, %v4859_v61 }
 0x568   : > { %v5134_v2 = vadd.f32 %v9121_v31, %v5114_v36 }
 0x569   : > { %5613 = vst [vmem:[%s8633_s30 + $0xe0] sm:$0xff] %v5164_v39  ;;  %v4979_v24 = vmul.f32 %v9126_v50, %v4963_v17 }
 0x56a   : > { %v4736_v42 = vpop.f32.mrf.mxu2 }
 0x56b   : > { %v4995_v14 = vadd.f32 %v9133_v53, %v4979_v24  ;;  %v4756_v54 = vadd.f32 %v4736_v42, %v9107_v43  ;;  %v4840_v32 = vpop.f32.mrf.mxu3 }
 0x56c   : > { %v4947_v52 = vpop.f32.mrf.mxu0 }
 0x56d   : > { %v5149_v63 = vadd.f32 %v5133_v40, %v4995_v14  ;;  %v4860_v15 = vadd.f32 %v4840_v32, %v4756_v54  ;;  %v5093_v11 = vpop.f32.mrf.mxu1 }
 0x56e   : > { %v5115_v4 = vmul.f32 %v9114_v8, %v5093_v11 }
 0x56f   : > { %v5165_v16 = vmax.f32 %v5149_v63, 0.0  ;;  %v4964_v28 = vadd.f32 %v4944_v45, %v4860_v15 }
 0x571   : > { %5614 = vst [vmem:[%s8633_s30 + $0xe8] sm:$0xff] %v5165_v16  ;;  %v4980_v18 = vmul.f32 %v9126_v50, %v4964_v28 }
 0x572   : > { %v4739_v1 = vpop.f32.mrf.mxu2 }
 0x573   : > { %v4996_v49 = vadd.f32 %v9133_v53, %v4980_v18  ;;  %v4757_v43 = vadd.f32 %v4739_v1, %v9109_v46  ;;  %v4843_v12 = vpop.f32.mrf.mxu3  ;;  %v5135_v46 = vadd.f32 %v9121_v31, %v5115_v4 }
 0x575   : > { %v5150_v57 = vadd.f32 %v5134_v2, %v4996_v49  ;;  %v4861_v33 = vadd.f32 %v4843_v12, %v4757_v43 }
 0x577   : > { %v5166_v59 = vmax.f32 %v5150_v57, 0.0  ;;  %v4965_v58 = vadd.f32 %v4947_v52, %v4861_v33 }
 0x579   : > { %5615 = vst [vmem:[%s8633_s30 + $0xf0] sm:$0xff] %v5166_v59  ;;  %v4981_v5 = vmul.f32 %v9126_v50, %v4965_v58 }
 0x57b   : > { %v4997_v44 = vadd.f32 %v9133_v53, %v4981_v5 }
 0x57d   : > { %v5151_v41 = vadd.f32 %v5135_v46, %v4997_v44 }
 0x57f   : > { %v5167_v8 = vmax.f32 %v5151_v41, 0.0 }
 0x581   : > { %5616 = vst [vmem:[%s8633_s30 + $0xf8] sm:$0xff] %v5167_v8 }
 0x582   : > { %5828 = shalt.err (!%p5825_p8)
}
 0x583   : > { %s5873_s18 = smov 128   ;;  %s5874_s30 = smov 8  }
 0x584   : > { %5660 = dma.vmem_to_hbm [thread:$0]  (%p5968_p5), %s5199_s29, 4096, %s5201_s20, %s5186_s17, %s5873_s18, %s5873_s18, %s5874_s30  }
 0x585 PF: > { %p5672_p9 = scmp.ge.s32.totalorder %s5867_s16, 2  ;;  %s5215_s26 = sand.u32 1, %s5855_s13  }
 0x586   : > { %s5216_s12 = scalar_lea.sflag [#allocation5], %s5215_s26 }
 0x587   : > { %p5667_p10 = pnand %p5672_p9, %p5972_p6 }
 0x589   : > { %p5668_p11 = pneg %p5667_p10 }
 0x58b   : > { %5850 = dma.done.wait (%p5668_p11), %s5216_s12, 4096  }
 0x58c   : > { %5852 = vsyncadd (%p5668_p11), %s5216_s12, 4294963200  ;;  %p21_p12 = scmp.ge.s32.totalorder %s5955_s19, 4   ;;  %s9304_s13 = smov %s5859_s14 }
 0x58d   : > { %s9305_s14 = smov %s5863_s15  ;;  %s9306_s15 = smov %s5966_s22 }
 0x58e   : > { %s9307_s16 = smov %s5955_s19  ;;  %23 = sbr.rel (!%p21_p12) target bundleno = 4 (0x4), region = 124 }
 0x593   :  { %5222 = vsyncpa [#allocation4], 1 }
 0x594   :  { %5224 = vsyncpa [#allocation4 + $0x1], 1 }
 0x595   :  { %5225 = vsyncpa [#allocation5], 1 }
 0x596   :  { %5227 = vsyncpa [#allocation5 + $0x1], 1 }

</bundles_post_ra>
